<compile_context>
chip_gen: v7x
topology: tpu7x:2x2x1
jax: 0.10.0
libtpu: 0.0.40
codegen_flags: <defaults>
</compile_context>

<pallas_src>
import functools

import jax
import jax.numpy as jnp
from jax import lax
from jax.experimental import pallas as pl
from jax.experimental.pallas import tpu as pltpu


def _bottleneck_kernel(x_ref, w1_ref, b1_ref, w2_ref, b2_ref, w3_ref, b3_ref,
                       o_ref, hpad_ref, *, NB, H, W, Cmid):
    M = NB * H * W
    f32, bf16 = jnp.float32, jnp.bfloat16

    # ---- conv1 (1x1; BN1 scale pre-folded into w1) + bias + ReLU -----------
    # bf16 MXU operands straight from the input block, f32 accumulation.
    h = jnp.dot(x_ref[...], w1_ref[...], preferred_element_type=f32)
    h = jnp.maximum(h + b1_ref[...], 0.0)                       # (M, Cmid) f32

    # ---- conv2 (3x3, stride=1, pad=1; BN2 scale pre-folded) ----------------
    # Stage h once, in bf16, into a zero-edged padded scratch.  The zero fill
    # is re-done every step so the kernel is correct under megacore grid
    # splitting (each core owns its own scratch); it is a tiny dense store.
    hpad_ref[...] = jnp.zeros_like(hpad_ref)
    hpad_ref[:, 1:H + 1, 1:W + 1, :] = h.astype(bf16).reshape(NB, H, W, Cmid)

    # Nine taps = nine static ref slices -> nine accumulating MXU dots.
    acc = None
    for ky in range(3):
        for kx in range(3):
            tap = hpad_ref[:, ky:ky + H, kx:kx + W, :].reshape(M, Cmid)
            d = jnp.dot(tap, w2_ref[ky * 3 + kx], preferred_element_type=f32)
            acc = d if acc is None else acc + d
    h = jnp.maximum(acc + b2_ref[...], 0.0)                     # (M, Cmid) f32

    # ---- conv3 (1x1; BN3 scale pre-folded) + bias + residual + ReLU --------
    out = jnp.dot(h.astype(bf16), w3_ref[...], preferred_element_type=f32)
    # Re-read the identity here instead of holding an (M, Cin) f32 value live
    # across all three matmuls (live-range / spill pressure); the fresh VMEM
    # load hides under the conv3 matmul pipeline.
    identity = x_ref[...].astype(f32)                           # (M, Cout) f32
    out = jnp.maximum(out + b3_ref[...] + identity, 0.0)
    o_ref[...] = out.astype(o_ref.dtype)


def bottleneck_pallas_nhwc(x_nhwc, params, *, nb=4):
    """x_nhwc: (N, H, W, Cin) bfloat16. Returns (N, H, W, Cout) bfloat16."""
    w1, b1, w2, b2, w3, b3 = params
    N, H, W, Cin = x_nhwc.shape
    Cmid = w1.shape[1]
    Cout = w3.shape[1]
    assert Cout == Cin, "identity residual requires Cout == Cin (downsample=None)"
    assert N % nb == 0, "batch must be divisible by per-step batch nb"

    x_nhwc = x_nhwc.astype(jnp.bfloat16)
    # Free relayout: channels stay on the lane (last) axis; spatial+batch merge.
    x_flat = x_nhwc.reshape(N * H * W, Cin)
    m_blk = nb * H * W

    full = lambda a: pl.BlockSpec(a.shape, lambda n: (0,) * a.ndim)
    kernel = functools.partial(_bottleneck_kernel, NB=nb, H=H, W=W, Cmid=Cmid)

    out_flat = pl.pallas_call(
        kernel,
        out_shape=jax.ShapeDtypeStruct((N * H * W, Cout), jnp.bfloat16),
        grid_spec=pltpu.PrefetchScalarGridSpec(
            num_scalar_prefetch=0,
            grid=(N // nb,),
            in_specs=[
                pl.BlockSpec((m_blk, Cin), lambda n: (n, 0)),
                # Grid-invariant weights / biases.
                # TODO(synk): at real ResNet tile sizes, single-buffer these
                # (pipeline_mode=pl.Buffered(1)), strip-mine H*W into the grid
                # and set vmem_limit_bytes with headroom below v7x's 64 MiB.
                full(w1), full(b1), full(w2), full(b2), full(w3), full(b3),
            ],
            out_specs=pl.BlockSpec((m_blk, Cout), lambda n: (n, 0)),
            scratch_shapes=[
                # zero-edged padded staging buffer for the 3x3 taps (bf16).
                pltpu.VMEM((nb, H + 2, W + 2, Cmid), jnp.bfloat16),
            ],
        ),
        compiler_params=pltpu.CompilerParams(
            dimension_semantics=("parallel",),
            vmem_limit_bytes=32 * 1024 * 1024),
    )(x_flat, w1, b1, w2, b2, w3, b3)

    return out_flat.reshape(N, H, W, Cout)


def bottleneck_pallas(x_nchw, params, *, nb=4):
    """NCHW/f32 wrapper (PyTorch layout). In an NHWC bf16 end-to-end model,
    call bottleneck_pallas_nhwc directly and these boundary ops vanish."""
    x_nhwc = jnp.transpose(x_nchw, (0, 2, 3, 1)).astype(jnp.bfloat16)
    y_nhwc = bottleneck_pallas_nhwc(x_nhwc, params, nb=nb)
    return jnp.transpose(y_nhwc, (0, 3, 1, 2))


def _fold_bn(gamma, beta, mean, var, eps=1e-5):
    scale = gamma / jnp.sqrt(var + eps)
    bias = beta - mean * scale
    return scale, bias


def make_params(key, in_channels, out_channels):
    """Deterministic synthetic weights matching the PyTorch module's shapes.
    BN scale is folded into the conv weights (conv is linear in w); the f32
    reference uses the SAME bf16-rounded folded weights, so the only numeric
    difference vs. the reference is bf16 activation rounding between stages."""
    exp = 4
    cmid, cout = out_channels, out_channels * exp
    f32, bf16 = jnp.float32, jnp.bfloat16
    ks = jax.random.split(key, 6)

    def rnd(k, shape):
        return 0.03 * jax.random.normal(k, shape, f32)

    w1_oihw = rnd(ks[0], (cmid, in_channels, 1, 1))
    w2_oihw = rnd(ks[1], (cmid, cmid, 3, 3))
    w3_oihw = rnd(ks[2], (cout, cmid, 1, 1))

    def bn(k, c):
        kg, kb, km, kv = jax.random.split(k, 4)
        gamma = 0.5 + jnp.abs(jax.random.normal(kg, (c,), f32))
        beta = 0.1 * jax.random.normal(kb, (c,), f32)
        mean = 0.1 * jax.random.normal(km, (c,), f32)
        var = 1.0 + jnp.abs(jax.random.normal(kv, (c,), f32))
        return _fold_bn(gamma, beta, mean, var)

    s1, b1 = bn(ks[3], cmid)
    s2, b2 = bn(ks[4], cmid)
    s3, b3 = bn(ks[5], cout)

    def fold(w_oihw, s):  # per-output-channel scale folded, one bf16 rounding
        return (w_oihw * s.reshape(-1, 1, 1, 1)).astype(bf16)

    w1_f, w2_f, w3_f = fold(w1_oihw, s1), fold(w2_oihw, s2), fold(w3_oihw, s3)

    # Kernel layouts (contraction dim first):
    #   1x1 -> (Cin, Cmid) / (Cmid, Cout); 3x3 -> (9, Cmid, Cmid), t = ky*3+kx.
    w1_k = jnp.transpose(w1_f[:, :, 0, 0], (1, 0))
    w2_k = jnp.transpose(w2_f, (2, 3, 1, 0)).reshape(9, cmid, cmid)
    w3_k = jnp.transpose(w3_f[:, :, 0, 0], (1, 0))

    pallas_params = (w1_k, b1.reshape(1, -1), w2_k, b2.reshape(1, -1),
                     w3_k, b3.reshape(1, -1))
    ref_params = (w1_f.astype(f32), w2_f.astype(f32), w3_f.astype(f32),
                  b1, b2, b3)
    return pallas_params, ref_params


def bottleneck_reference(x, ref_params):
    """Pure-JAX NCHW f32 reference mirroring the PyTorch forward (eval-mode BN,
    scale already folded into the weights, bias applied explicitly)."""
    w1, w2, w3, b1, b2, b3 = ref_params
    dn = ("NCHW", "OIHW", "NCHW")
    bcast = lambda v: v.reshape(1, -1, 1, 1)

    out = lax.conv_general_dilated(x, w1, (1, 1), "VALID", dimension_numbers=dn)
    out = jnp.maximum(out + bcast(b1), 0.0)
    out = lax.conv_general_dilated(out, w2, (1, 1), "SAME", dimension_numbers=dn)
    out = jnp.maximum(out + bcast(b2), 0.0)
    out = lax.conv_general_dilated(out, w3, (1, 1), "VALID", dimension_numbers=dn)
    out = out + bcast(b3)
    return jnp.maximum(out + x, 0.0)


if __name__ == "__main__":
    key = jax.random.PRNGKey(0)
    k_x, k_p = jax.random.split(key)

    # Representative bottleneck stage (expansion=4, Cin = 4*Cmid so the identity
    # residual is valid).  Cmid=128 / Cin=512 keep every operand lane-dense,
    # H*W=64 with nb=4 gives M=256 MXU rows per step, and N=16 gives a
    # length-4 grid (megacore split + DMA pipelining).
    N, in_channels, H, W = 16, 512, 8, 8
    out_channels = in_channels // 4

    x = jax.random.normal(k_x, (N, in_channels, H, W), jnp.float32)
    x = x.astype(jnp.bfloat16).astype(jnp.float32)  # shared bf16-representable input
    pallas_params, ref_params = make_params(k_p, in_channels, out_channels)

    y = jax.block_until_ready(bottleneck_pallas(x, pallas_params, nb=4))
    y_ref = bottleneck_reference(x, ref_params)

    assert y.shape == (N, in_channels, H, W)
    # bf16 activations/weights vs. the f32 reference -> loosened tolerance.
    assert jnp.allclose(y.astype(jnp.float32), y_ref, atol=5e-2, rtol=5e-2), \
        "mismatch vs reference"

    print("KERNEL_OK")
</pallas_src>

<mosaic_0001>
module attributes {stable_mosaic.version = 11 : i64} {
  func.func @_bottleneck_kernel(%arg0: i32, %arg1: memref<256x512xbf16, #tpu.memory_space<vmem>>, %arg2: memref<512x128xbf16, #tpu.memory_space<vmem>>, %arg3: memref<1x128xf32, #tpu.memory_space<vmem>>, %arg4: memref<9x128x128xbf16, #tpu.memory_space<vmem>>, %arg5: memref<1x128xf32, #tpu.memory_space<vmem>>, %arg6: memref<128x512xbf16, #tpu.memory_space<vmem>>, %arg7: memref<1x512xf32, #tpu.memory_space<vmem>>, %arg8: memref<256x512xbf16, #tpu.memory_space<vmem>>, %arg9: memref<4x10x10x128xbf16, #tpu.memory_space<vmem>>) attributes {dimension_semantics = [#tpu.dimension_semantics<parallel>], iteration_bounds = array<i64: 4>, scalar_prefetch = 0 : i64, scratch_operands = 1 : i64, tpu.core_type = #tpu.core_type<tc>, window_params = [{transform_indices = @transform_0, window_bounds = array<i64: 256, 512>}, {pipeline_mode = #tpu.pipeline_mode<synchronous>, transform_indices = @transform_1, window_bounds = array<i64: 512, 128>}, {pipeline_mode = #tpu.pipeline_mode<synchronous>, transform_indices = @transform_2, window_bounds = array<i64: 1, 128>}, {pipeline_mode = #tpu.pipeline_mode<synchronous>, transform_indices = @transform_3, window_bounds = array<i64: 9, 128, 128>}, {pipeline_mode = #tpu.pipeline_mode<synchronous>, transform_indices = @transform_4, window_bounds = array<i64: 1, 128>}, {pipeline_mode = #tpu.pipeline_mode<synchronous>, transform_indices = @transform_5, window_bounds = array<i64: 128, 512>}, {pipeline_mode = #tpu.pipeline_mode<synchronous>, transform_indices = @transform_6, window_bounds = array<i64: 1, 512>}, {transform_indices = @transform_7, window_bounds = array<i64: 256, 512>}]} {
    %c0 = arith.constant 0 : index
    %c0_0 = arith.constant 0 : index
    %0 = vector.load %arg1[%c0, %c0_0] : memref<256x512xbf16, #tpu.memory_space<vmem>>, vector<256x512xbf16>
    %c0_1 = arith.constant 0 : index
    %c0_2 = arith.constant 0 : index
    %1 = vector.load %arg2[%c0_1, %c0_2] : memref<512x128xbf16, #tpu.memory_space<vmem>>, vector<512x128xbf16>
    %cst = arith.constant dense<0.000000e+00> : vector<256x128xf32>
    %2 = tpu.matmul %0, %1, %cst {dimension_numbers = #tpu.dot_dimension_numbers<[1], [0], [0], [1], [0, 0, 1, 1], [], []>} : vector<256x512xbf16>, vector<512x128xbf16>, vector<256x128xf32> -> vector<256x128xf32>
    %c0_3 = arith.constant 0 : index
    %c0_4 = arith.constant 0 : index
    %3 = vector.load %arg3[%c0_3, %c0_4] : memref<1x128xf32, #tpu.memory_space<vmem>>, vector<1x128xf32>
    %4 = vector.broadcast %3 : vector<1x128xf32> to vector<256x128xf32>
    %5 = arith.addf %2, %4 : vector<256x128xf32>
    %cst_5 = arith.constant 0.000000e+00 : f32
    %6 = vector.broadcast %cst_5 : f32 to vector<256x128xf32>
    %7 = arith.maximumf %5, %6 : vector<256x128xf32>
    %cst_6 = arith.constant 0.000000e+00 : bf16
    %8 = vector.broadcast %cst_6 : bf16 to vector<4x10x10x128xbf16>
    %c0_7 = arith.constant 0 : index
    %c0_8 = arith.constant 0 : index
    %c0_9 = arith.constant 0 : index
    %c0_10 = arith.constant 0 : index
    %9 = vector.load %arg9[%c0_7, %c0_8, %c0_9, %c0_10] : memref<4x10x10x128xbf16, #tpu.memory_space<vmem>>, vector<4x10x10x128xbf16>
    tpu.vector_store %arg9[%c0_7, %c0_8, %c0_9, %c0_10], %8 {strides = array<i32>} : memref<4x10x10x128xbf16, #tpu.memory_space<vmem>>, vector<4x10x10x128xbf16>,
    %10 = arith.truncf %7 : vector<256x128xf32> to vector<256x128xbf16>
    %11 = vector.shape_cast %10 : vector<256x128xbf16> to vector<4x8x8x128xbf16>
    %c0_11 = arith.constant 0 : index
    %c1 = arith.constant 1 : index
    %c1_12 = arith.constant 1 : index
    %c0_13 = arith.constant 0 : index
    %12 = vector.load %arg9[%c0_11, %c1, %c1_12, %c0_13] : memref<4x10x10x128xbf16, #tpu.memory_space<vmem>>, vector<4x8x8x128xbf16>
    tpu.vector_store %arg9[%c0_11, %c1, %c1_12, %c0_13], %11 {strides = array<i32>} : memref<4x10x10x128xbf16, #tpu.memory_space<vmem>>, vector<4x8x8x128xbf16>,
    %c0_14 = arith.constant 0 : index
    %c0_15 = arith.constant 0 : index
    %c0_16 = arith.constant 0 : index
    %c0_17 = arith.constant 0 : index
    %13 = vector.load %arg9[%c0_14, %c0_15, %c0_16, %c0_17] : memref<4x10x10x128xbf16, #tpu.memory_space<vmem>>, vector<4x8x8x128xbf16>
    %14 = vector.shape_cast %13 : vector<4x8x8x128xbf16> to vector<256x128xbf16>
    %c0_18 = arith.constant 0 : index
    %c0_19 = arith.constant 0 : index
    %c0_20 = arith.constant 0 : index
    %15 = vector.load %arg4[%c0_18, %c0_19, %c0_20] : memref<9x128x128xbf16, #tpu.memory_space<vmem>>, vector<1x128x128xbf16>
    %16 = vector.shape_cast %15 : vector<1x128x128xbf16> to vector<128x128xbf16>
    %cst_21 = arith.constant dense<0.000000e+00> : vector<256x128xf32>
    %17 = tpu.matmul %14, %16, %cst_21 {dimension_numbers = #tpu.dot_dimension_numbers<[1], [0], [0], [1], [0, 0, 1, 1], [], []>} : vector<256x128xbf16>, vector<128x128xbf16>, vector<256x128xf32> -> vector<256x128xf32>
    %c0_22 = arith.constant 0 : index
    %c0_23 = arith.constant 0 : index
    %c1_24 = arith.constant 1 : index
    %c0_25 = arith.constant 0 : index
    %18 = vector.load %arg9[%c0_22, %c0_23, %c1_24, %c0_25] : memref<4x10x10x128xbf16, #tpu.memory_space<vmem>>, vector<4x8x8x128xbf16>
    %19 = vector.shape_cast %18 : vector<4x8x8x128xbf16> to vector<256x128xbf16>
    %c1_26 = arith.constant 1 : index
    %c0_27 = arith.constant 0 : index
    %c0_28 = arith.constant 0 : index
    %20 = vector.load %arg4[%c1_26, %c0_27, %c0_28] : memref<9x128x128xbf16, #tpu.memory_space<vmem>>, vector<1x128x128xbf16>
    %21 = vector.shape_cast %20 : vector<1x128x128xbf16> to vector<128x128xbf16>
    %cst_29 = arith.constant dense<0.000000e+00> : vector<256x128xf32>
    %22 = tpu.matmul %19, %21, %cst_29 {dimension_numbers = #tpu.dot_dimension_numbers<[1], [0], [0], [1], [0, 0, 1, 1], [], []>} : vector<256x128xbf16>, vector<128x128xbf16>, vector<256x128xf32> -> vector<256x128xf32>
    %23 = arith.addf %17, %22 : vector<256x128xf32>
    %c0_30 = arith.constant 0 : index
    %c0_31 = arith.constant 0 : index
    %c2 = arith.constant 2 : index
    %c0_32 = arith.constant 0 : index
    %24 = vector.load %arg9[%c0_30, %c0_31, %c2, %c0_32] : memref<4x10x10x128xbf16, #tpu.memory_space<vmem>>, vector<4x8x8x128xbf16>
    %25 = vector.shape_cast %24 : vector<4x8x8x128xbf16> to vector<256x128xbf16>
    %c2_33 = arith.constant 2 : index
    %c0_34 = arith.constant 0 : index
    %c0_35 = arith.constant 0 : index
    %26 = vector.load %arg4[%c2_33, %c0_34, %c0_35] : memref<9x128x128xbf16, #tpu.memory_space<vmem>>, vector<1x128x128xbf16>
    %27 = vector.shape_cast %26 : vector<1x128x128xbf16> to vector<128x128xbf16>
    %cst_36 = arith.constant dense<0.000000e+00> : vector<256x128xf32>
    %28 = tpu.matmul %25, %27, %cst_36 {dimension_numbers = #tpu.dot_dimension_numbers<[1], [0], [0], [1], [0, 0, 1, 1], [], []>} : vector<256x128xbf16>, vector<128x128xbf16>, vector<256x128xf32> -> vector<256x128xf32>
    %29 = arith.addf %23, %28 : vector<256x128xf32>
    %c0_37 = arith.constant 0 : index
    %c1_38 = arith.constant 1 : index
    %c0_39 = arith.constant 0 : index
    %c0_40 = arith.constant 0 : index
    %30 = vector.load %arg9[%c0_37, %c1_38, %c0_39, %c0_40] : memref<4x10x10x128xbf16, #tpu.memory_space<vmem>>, vector<4x8x8x128xbf16>
    %31 = vector.shape_cast %30 : vector<4x8x8x128xbf16> to vector<256x128xbf16>
    %c3 = arith.constant 3 : index
    %c0_41 = arith.constant 0 : index
    %c0_42 = arith.constant 0 : index
    %32 = vector.load %arg4[%c3, %c0_41, %c0_42] : memref<9x128x128xbf16, #tpu.memory_space<vmem>>, vector<1x128x128xbf16>
    %33 = vector.shape_cast %32 : vector<1x128x128xbf16> to vector<128x128xbf16>
    %cst_43 = arith.constant dense<0.000000e+00> : vector<256x128xf32>
    %34 = tpu.matmul %31, %33, %cst_43 {dimension_numbers = #tpu.dot_dimension_numbers<[1], [0], [0], [1], [0, 0, 1, 1], [], []>} : vector<256x128xbf16>, vector<128x128xbf16>, vector<256x128xf32> -> vector<256x128xf32>
    %35 = arith.addf %29, %34 : vector<256x128xf32>
    %c0_44 = arith.constant 0 : index
    %c1_45 = arith.constant 1 : index
    %c1_46 = arith.constant 1 : index
    %c0_47 = arith.constant 0 : index
    %36 = vector.load %arg9[%c0_44, %c1_45, %c1_46, %c0_47] : memref<4x10x10x128xbf16, #tpu.memory_space<vmem>>, vector<4x8x8x128xbf16>
    %37 = vector.shape_cast %36 : vector<4x8x8x128xbf16> to vector<256x128xbf16>
    %c4 = arith.constant 4 : index
    %c0_48 = arith.constant 0 : index
    %c0_49 = arith.constant 0 : index
    %38 = vector.load %arg4[%c4, %c0_48, %c0_49] : memref<9x128x128xbf16, #tpu.memory_space<vmem>>, vector<1x128x128xbf16>
    %39 = vector.shape_cast %38 : vector<1x128x128xbf16> to vector<128x128xbf16>
    %cst_50 = arith.constant dense<0.000000e+00> : vector<256x128xf32>
    %40 = tpu.matmul %37, %39, %cst_50 {dimension_numbers = #tpu.dot_dimension_numbers<[1], [0], [0], [1], [0, 0, 1, 1], [], []>} : vector<256x128xbf16>, vector<128x128xbf16>, vector<256x128xf32> -> vector<256x128xf32>
    %41 = arith.addf %35, %40 : vector<256x128xf32>
    %c0_51 = arith.constant 0 : index
    %c1_52 = arith.constant 1 : index
    %c2_53 = arith.constant 2 : index
    %c0_54 = arith.constant 0 : index
    %42 = vector.load %arg9[%c0_51, %c1_52, %c2_53, %c0_54] : memref<4x10x10x128xbf16, #tpu.memory_space<vmem>>, vector<4x8x8x128xbf16>
    %43 = vector.shape_cast %42 : vector<4x8x8x128xbf16> to vector<256x128xbf16>
    %c5 = arith.constant 5 : index
    %c0_55 = arith.constant 0 : index
    %c0_56 = arith.constant 0 : index
    %44 = vector.load %arg4[%c5, %c0_55, %c0_56] : memref<9x128x128xbf16, #tpu.memory_space<vmem>>, vector<1x128x128xbf16>
    %45 = vector.shape_cast %44 : vector<1x128x128xbf16> to vector<128x128xbf16>
    %cst_57 = arith.constant dense<0.000000e+00> : vector<256x128xf32>
    %46 = tpu.matmul %43, %45, %cst_57 {dimension_numbers = #tpu.dot_dimension_numbers<[1], [0], [0], [1], [0, 0, 1, 1], [], []>} : vector<256x128xbf16>, vector<128x128xbf16>, vector<256x128xf32> -> vector<256x128xf32>
    %47 = arith.addf %41, %46 : vector<256x128xf32>
    %c0_58 = arith.constant 0 : index
    %c2_59 = arith.constant 2 : index
    %c0_60 = arith.constant 0 : index
    %c0_61 = arith.constant 0 : index
    %48 = vector.load %arg9[%c0_58, %c2_59, %c0_60, %c0_61] : memref<4x10x10x128xbf16, #tpu.memory_space<vmem>>, vector<4x8x8x128xbf16>
    %49 = vector.shape_cast %48 : vector<4x8x8x128xbf16> to vector<256x128xbf16>
    %c6 = arith.constant 6 : index
    %c0_62 = arith.constant 0 : index
    %c0_63 = arith.constant 0 : index
    %50 = vector.load %arg4[%c6, %c0_62, %c0_63] : memref<9x128x128xbf16, #tpu.memory_space<vmem>>, vector<1x128x128xbf16>
    %51 = vector.shape_cast %50 : vector<1x128x128xbf16> to vector<128x128xbf16>
    %cst_64 = arith.constant dense<0.000000e+00> : vector<256x128xf32>
    %52 = tpu.matmul %49, %51, %cst_64 {dimension_numbers = #tpu.dot_dimension_numbers<[1], [0], [0], [1], [0, 0, 1, 1], [], []>} : vector<256x128xbf16>, vector<128x128xbf16>, vector<256x128xf32> -> vector<256x128xf32>
    %53 = arith.addf %47, %52 : vector<256x128xf32>
    %c0_65 = arith.constant 0 : index
    %c2_66 = arith.constant 2 : index
    %c1_67 = arith.constant 1 : index
    %c0_68 = arith.constant 0 : index
    %54 = vector.load %arg9[%c0_65, %c2_66, %c1_67, %c0_68] : memref<4x10x10x128xbf16, #tpu.memory_space<vmem>>, vector<4x8x8x128xbf16>
    %55 = vector.shape_cast %54 : vector<4x8x8x128xbf16> to vector<256x128xbf16>
    %c7 = arith.constant 7 : index
    %c0_69 = arith.constant 0 : index
    %c0_70 = arith.constant 0 : index
    %56 = vector.load %arg4[%c7, %c0_69, %c0_70] : memref<9x128x128xbf16, #tpu.memory_space<vmem>>, vector<1x128x128xbf16>
    %57 = vector.shape_cast %56 : vector<1x128x128xbf16> to vector<128x128xbf16>
    %cst_71 = arith.constant dense<0.000000e+00> : vector<256x128xf32>
    %58 = tpu.matmul %55, %57, %cst_71 {dimension_numbers = #tpu.dot_dimension_numbers<[1], [0], [0], [1], [0, 0, 1, 1], [], []>} : vector<256x128xbf16>, vector<128x128xbf16>, vector<256x128xf32> -> vector<256x128xf32>
    %59 = arith.addf %53, %58 : vector<256x128xf32>
    %c0_72 = arith.constant 0 : index
    %c2_73 = arith.constant 2 : index
    %c2_74 = arith.constant 2 : index
    %c0_75 = arith.constant 0 : index
    %60 = vector.load %arg9[%c0_72, %c2_73, %c2_74, %c0_75] : memref<4x10x10x128xbf16, #tpu.memory_space<vmem>>, vector<4x8x8x128xbf16>
    %61 = vector.shape_cast %60 : vector<4x8x8x128xbf16> to vector<256x128xbf16>
    %c8 = arith.constant 8 : index
    %c0_76 = arith.constant 0 : index
    %c0_77 = arith.constant 0 : index
    %62 = vector.load %arg4[%c8, %c0_76, %c0_77] : memref<9x128x128xbf16, #tpu.memory_space<vmem>>, vector<1x128x128xbf16>
    %63 = vector.shape_cast %62 : vector<1x128x128xbf16> to vector<128x128xbf16>
    %cst_78 = arith.constant dense<0.000000e+00> : vector<256x128xf32>
    %64 = tpu.matmul %61, %63, %cst_78 {dimension_numbers = #tpu.dot_dimension_numbers<[1], [0], [0], [1], [0, 0, 1, 1], [], []>} : vector<256x128xbf16>, vector<128x128xbf16>, vector<256x128xf32> -> vector<256x128xf32>
    %65 = arith.addf %59, %64 : vector<256x128xf32>
    %c0_79 = arith.constant 0 : index
    %c0_80 = arith.constant 0 : index
    %66 = vector.load %arg5[%c0_79, %c0_80] : memref<1x128xf32, #tpu.memory_space<vmem>>, vector<1x128xf32>
    %67 = vector.broadcast %66 : vector<1x128xf32> to vector<256x128xf32>
    %68 = arith.addf %65, %67 : vector<256x128xf32>
    %cst_81 = arith.constant 0.000000e+00 : f32
    %69 = vector.broadcast %cst_81 : f32 to vector<256x128xf32>
    %70 = arith.maximumf %68, %69 : vector<256x128xf32>
    %71 = arith.truncf %70 : vector<256x128xf32> to vector<256x128xbf16>
    %c0_82 = arith.constant 0 : index
    %c0_83 = arith.constant 0 : index
    %72 = vector.load %arg6[%c0_82, %c0_83] : memref<128x512xbf16, #tpu.memory_space<vmem>>, vector<128x512xbf16>
    %cst_84 = arith.constant dense<0.000000e+00> : vector<256x512xf32>
    %73 = tpu.matmul %71, %72, %cst_84 {dimension_numbers = #tpu.dot_dimension_numbers<[1], [0], [0], [1], [0, 0, 1, 1], [], []>} : vector<256x128xbf16>, vector<128x512xbf16>, vector<256x512xf32> -> vector<256x512xf32>
    %c0_85 = arith.constant 0 : index
    %c0_86 = arith.constant 0 : index
    %74 = vector.load %arg1[%c0_85, %c0_86] : memref<256x512xbf16, #tpu.memory_space<vmem>>, vector<256x512xbf16>
    %75 = arith.extf %74 : vector<256x512xbf16> to vector<256x512xf32>
    %c0_87 = arith.constant 0 : index
    %c0_88 = arith.constant 0 : index
    %76 = vector.load %arg7[%c0_87, %c0_88] : memref<1x512xf32, #tpu.memory_space<vmem>>, vector<1x512xf32>
    %77 = vector.broadcast %76 : vector<1x512xf32> to vector<256x512xf32>
    %78 = arith.addf %73, %77 : vector<256x512xf32>
    %79 = arith.addf %78, %75 : vector<256x512xf32>
    %cst_89 = arith.constant 0.000000e+00 : f32
    %80 = vector.broadcast %cst_89 : f32 to vector<256x512xf32>
    %81 = arith.maximumf %79, %80 : vector<256x512xf32>
    %82 = arith.truncf %81 : vector<256x512xf32> to vector<256x512xbf16>
    %c0_90 = arith.constant 0 : index
    %c0_91 = arith.constant 0 : index
    %83 = vector.load %arg8[%c0_90, %c0_91] : memref<256x512xbf16, #tpu.memory_space<vmem>>, vector<256x512xbf16>
    tpu.vector_store %arg8[%c0_90, %c0_91], %82 {strides = array<i32>} : memref<256x512xbf16, #tpu.memory_space<vmem>>, vector<256x512xbf16>,
    return
  }
  func.func @transform_0(%arg0: i32) -> (i32, i32) {
    %c0_i32 = arith.constant 0 : i32
    %c0_i32_0 = arith.constant 0 : i32
    return %arg0, %c0_i32 : i32, i32
  }
  func.func @transform_1(%arg0: i32) -> (i32, i32) {
    %c0_i32 = arith.constant 0 : i32
    %c0_i32_0 = arith.constant 0 : i32
    %c0_i32_1 = arith.constant 0 : i32
    return %c0_i32, %c0_i32_0 : i32, i32
  }
  func.func @transform_2(%arg0: i32) -> (i32, i32) {
    %c0_i32 = arith.constant 0 : i32
    %c0_i32_0 = arith.constant 0 : i32
    %c0_i32_1 = arith.constant 0 : i32
    return %c0_i32, %c0_i32_0 : i32, i32
  }
  func.func @transform_3(%arg0: i32) -> (i32, i32, i32) {
    %c0_i32 = arith.constant 0 : i32
    %c0_i32_0 = arith.constant 0 : i32
    %c0_i32_1 = arith.constant 0 : i32
    %c0_i32_2 = arith.constant 0 : i32
    return %c0_i32, %c0_i32_0, %c0_i32_1 : i32, i32, i32
  }
  func.func @transform_4(%arg0: i32) -> (i32, i32) {
    %c0_i32 = arith.constant 0 : i32
    %c0_i32_0 = arith.constant 0 : i32
    %c0_i32_1 = arith.constant 0 : i32
    return %c0_i32, %c0_i32_0 : i32, i32
  }
  func.func @transform_5(%arg0: i32) -> (i32, i32) {
    %c0_i32 = arith.constant 0 : i32
    %c0_i32_0 = arith.constant 0 : i32
    %c0_i32_1 = arith.constant 0 : i32
    return %c0_i32, %c0_i32_0 : i32, i32
  }
  func.func @transform_6(%arg0: i32) -> (i32, i32) {
    %c0_i32 = arith.constant 0 : i32
    %c0_i32_0 = arith.constant 0 : i32
    %c0_i32_1 = arith.constant 0 : i32
    return %c0_i32, %c0_i32_0 : i32, i32
  }
  func.func @transform_7(%arg0: i32) -> (i32, i32) {
    %c0_i32 = arith.constant 0 : i32
    %c0_i32_0 = arith.constant 0 : i32
    return %arg0, %c0_i32 : i32, i32
  }
}

</mosaic_0001>

<bundles_post_ra>
// kernel: tpu_custom_call.1
= control target key start
LH: loop header
LB: loop body
LE: loop exit
PB: predicated region body
PF: predicated region fallthrough
CT: control target
= control target key end

     0   :  { %12 = vsyncpa [#allocation4], 0  ;;  %s13970_s0 = inlined_call_operand.hbm [shape: bf16[1024,512], index: 0, kind: input, shape index: {}]   ;;  %s13971_s1 = inlined_call_operand.hbm [shape: bf16[512,128], index: 1, kind: input, shape index: {}]   ;;  %s13972_s2 = inlined_call_operand.vmem [shape: f32[1,128], index: 2, kind: input, shape index: {}]   ;;  %s13973_s3 = inlined_call_operand.hbm [shape: bf16[9,128,128], index: 3, kind: input, shape index: {}]   ;;  %s13974_s4 = inlined_call_operand.vmem [shape: f32[1,128], index: 4, kind: input, shape index: {}]   ;;  %s13975_s5 = inlined_call_operand.hbm [shape: bf16[128,512], index: 5, kind: input, shape index: {}]   ;;  %s13976_s6 = inlined_call_operand.vmem [shape: f32[1,512], index: 6, kind: input, shape index: {}]   ;;  %s13977_s7 = inlined_call_operand.hbm [shape: bf16[1024,512], index: 7, kind: output, shape index: {}]  }
   0x1   :  { %14 = vsyncpa [#allocation4 + $0x1], 0 }
   0x2   :  { %15 = vsyncpa [#allocation7], 0 }
   0x3   :  { %16 = vsyncpa [#allocation10], 0 }
   0x4   :  { %17 = vsyncpa [#allocation5], 0 }
   0x5   :  { %19 = vsyncpa [#allocation5 + $0x1], 0  ;;  %s11405_s24 = smov 0   ;;  %s11407_s25 = smov 0  }
   0x6   :  { %s11409_s26 = smov 0   ;;  %s11411_s27 = smov 0  }
   0x7 LB: > { %s11426_s28 = sadd.s32 4294967295, %s11351_s27   ;;  %s8949_s29 = sadd.s32 4294967294, %s11351_s27   ;;  %s11351_s27 = sphi %s11411_s27, %s14233_s27   ;;  %s11347_s26 = sphi %s11409_s26, %s14232_s26   ;;  %s11343_s25 = sphi %s11407_s25, %s14231_s25   ;;  %s11339_s24 = sphi %s11405_s24, %s14230_s24  }
   0x8   : > { %p45_p0 = scmp.ne.s32.totalorder %s11343_s25, %s11339_s24  ;;  %p13978_p1 = scmp.eq.s32.totalorder %s11426_s28, 0 }
   0x9   : > { %p201_p3 = scmp.eq.s32.totalorder %s8949_s29, 3  ;;  %p8950_p5 = scmp.ge.s32.totalorder %s11351_s27, 1 }
   0xa   : > { %p11435_p4 = por %p13978_p1, %p45_p0  ;;  %p208_p7 = scmp.lt.s32.totalorder %s11351_s27, 5 }
   0xb   : > { %p11440_p6 = por %p201_p3, %p45_p0  ;;  %s11353_s10 = smov [#allocation6]  }
   0xc   : > { %s14035_s30 = scalar_select %p11435_p4, 1, 0 }
   0xd   : > { %s14036_s8 = scalar_select %p11440_p6, 1, 0 }
   0xe   : > { %p11445_p8 = pnand %p8950_p5, %p208_p7  ;;  %s220_s11 = sshll.u32 %s11353_s10, 4  ;;  %s11449_s11 = int_to_ptr.vmem [resolvable:$true] %s220_s11 }
   0xf   : > { %14037 = sst [smem:[#allocation16_spill]] %s14036_s8  ;;  %s11354_s13 = smov [#allocation8]  }
  0x10   : > { %s14038_s9 = scalar_select %p11445_p8, 1, 0 }
  0x11   : > { %p10769_p9 = pneg %p11445_p8  ;;  %s236_s14 = sshll.u32 %s11354_s13, 4  ;;  %s11459_s14 = int_to_ptr.vmem [resolvable:$true] %s236_s14 }
  0x12   : > { %s11355_s15 = smov [#allocation9]   ;;  %s11163_s19 = scalar_lea.hbm %s13971_s1, 4096 }
  0x13   : > { %p11455_p10 = pnand %p10769_p9, %p13978_p1  ;;  %s11461_s16 = sshll.u32 %s11355_s15, 4  ;;  %s253_s16 = int_to_ptr.vmem [resolvable:$true] %s11461_s16 }
  0x14   : > { %p11164_p11 = scmp.ne.s32.totalorder %s13971_s1, %s11163_s19  ;;  %p11170_p3 = scmp.lt.u32.totalorder %s11163_s19, %s13971_s1 }
  0x15   : > { %p11471_p12 = pneg %p11455_p10 }
  0x17   : > { %p11166_p13 = pnand %p11471_p12, %p11164_p11 }
  0x19   : > { %p11167_p0 = pneg %p11166_p13 }
  0x1b   : > { %p11172_p5 = pnand %p11170_p3, %p11167_p0 }
  0x1d   : > { %11175 = shalt.err (!%p11172_p5)
}
  0x1e   : > { %s11176_s10 = scalar_lea.vmem %s11449_s11, 4096  ;;  %p11184_p2 = scmp.lt.s32.totalorder %s11449_s11, %s11449_s11 }
  0x1f   : > { %p11177_p7 = scmp.ne.s32.totalorder %s11449_s11, %s11176_s10  ;;  %p11185_p6 = scmp.lt.s32.totalorder %s11176_s10, %s11176_s10 }
  0x21   : > { %p11179_p9 = pnand %p11177_p7, %p11471_p12  ;;  %p11186_p11 = por %p11185_p6, %p11184_p2 }
  0x23   : > { %p11180_p1 = pneg %p11179_p9 }
  0x25   : > { %p11187_p13 = pnand %p11186_p11, %p11180_p1 }
  0x27   : > { %11190 = shalt.err (!%p11187_p13)
}
  0x28   : > { %s11356_s13 = smov 64   ;;  %s11357_s15 = smov 4  }
  0x29   : > { %10772 = dma.hbm_to_vmem [thread:$0]  (!%p11455_p10), %s13971_s1, 4096, %s11449_s11, [#allocation7], %s11356_s13, %s11356_s13, %s11357_s15  }
  0x2a   : > { %s11191_s21 = scalar_lea.hbm %s13973_s3, 9216 }
  0x2b   : > { %p11192_p2 = scmp.ne.s32.totalorder %s13973_s3, %s11191_s21  ;;  %p11198_p0 = scmp.lt.u32.totalorder %s11191_s21, %s13973_s3 }
  0x2d   : > { %p11194_p1 = pnand %p11192_p2, %p11471_p12 }
  0x2f   : > { %p11195_p6 = pneg %p11194_p1 }
  0x31   : > { %p11200_p3 = pnand %p11198_p0, %p11195_p6 }
  0x33   : > { %11203 = shalt.err (!%p11200_p3)
}
  0x34   : > { %s11204_s11 = scalar_lea.vmem %s11459_s14, 9216  ;;  %p11212_p11 = scmp.lt.s32.totalorder %s11459_s14, %s11459_s14 }
  0x35   : > { %p11205_p5 = scmp.ne.s32.totalorder %s11459_s14, %s11204_s11  ;;  %p11213_p13 = scmp.lt.s32.totalorder %s11204_s11, %s11204_s11 }
  0x37   : > { %p11207_p7 = pnand %p11205_p5, %p11471_p12  ;;  %p11214_p2 = por %p11213_p13, %p11212_p11 }
  0x39   : > { %p11208_p9 = pneg %p11207_p7 }
  0x3b   : > { %p11215_p1 = pnand %p11214_p2, %p11208_p9 }
  0x3d   : > { %11218 = shalt.err (!%p11215_p1)
}
  0x3e   : > { %10775 = dma.hbm_to_vmem [thread:$0]  (!%p11455_p10), %s13973_s3, 9216, %s11459_s14, [#allocation7], %s11356_s13, %s11356_s13, %s11357_s15  }
  0x3f   : > { %s11219_s20 = scalar_lea.hbm %s13975_s5, 4096 }
  0x40   : > { %p11220_p6 = scmp.ne.s32.totalorder %s13975_s5, %s11219_s20  ;;  %p11226_p5 = scmp.lt.u32.totalorder %s11219_s20, %s13975_s5 }
  0x42   : > { %p11222_p0 = pnand %p11220_p6, %p11471_p12 }
  0x44   : > { %p11223_p3 = pneg %p11222_p0 }
  0x46   : > { %p11228_p7 = pnand %p11226_p5, %p11223_p3 }
  0x48   : > { %11231 = shalt.err (!%p11228_p7)
}
  0x49   : > { %s11232_s11 = scalar_lea.vmem %s253_s16, 4096  ;;  %p11240_p2 = scmp.lt.s32.totalorder %s253_s16, %s253_s16 }
  0x4a   : > { %p11233_p9 = scmp.ne.s32.totalorder %s253_s16, %s11232_s11  ;;  %p11241_p1 = scmp.lt.s32.totalorder %s11232_s11, %s11232_s11 }
  0x4c   : > { %p11235_p11 = pnand %p11233_p9, %p11471_p12  ;;  %p11242_p4 = por %p11241_p1, %p11240_p2 }
  0x4e   : > { %p11236_p13 = pneg %p11235_p11 }
  0x50   : > { %p11243_p8 = pnand %p11242_p4, %p11236_p13 }
  0x52   : > { %11246 = shalt.err (!%p11243_p8)
}
  0x53   : > { %s11358_s14 = smov 256   ;;  %s11359_s22 = smov 16  }
  0x54   : > { %10778 = dma.hbm_to_vmem [thread:$0]  (!%p11455_p10), %s13975_s5, 4096, %s253_s16, [#allocation10], %s11358_s14, %s11358_s14, %s11359_s22  }
  0x55   : > { %s11538_s8 = sadd.s32 1, %s11351_s27   ;;  %s32_s18 = sadd.s32 1, %s11347_s26 }
  0x56   : > { %s29_s17 = ssub.s32 %s11351_s27, %s11538_s8  ;;  %p39_p8 = scmp.ne.s32.totalorder %s11347_s26, %s11343_s25 }
  0x57   : > { %p30_p4 = scmp.eq.s32.totalorder %s29_s17, 0  ;;  %p40_p12 = scmp.eq.s32.totalorder %s11351_s27, 0 }
  0x58   : > { %p10790_p6 = scmp.lt.s32.totalorder %s11351_s27, 4  ;;  %p14041_p3 = scmp.eq.s32.totalorder %s11426_s28, 3 }
  0x59   : > { %s11548_s19 = scalar_select %p30_p4, %s11347_s26, %s32_s18  }
  0x5a   : > { %p41_p0 = por %p40_p12, %p39_p8  ;;  %p11552_p5 = por %p14041_p3, %p39_p8 }
  0x5b   : > { %s269_s20 = sand.u32 1, %s11347_s26   ;;  %s9510_s21 = sshll.u32 %s11351_s27, 13 }
  0x5c   : > { %s8955_s16 = sshll.u32 %s269_s20, 9  ;;  %s11561_s10 = scalar_lea.hbm %s13970_s0, %s9510_s21 }
  0x5d   : > { %s273_s11 = scalar_lea.vmem [#allocation3], %s8955_s16  ;;  %p11563_p10 = pnand %p10790_p6, %p41_p0 }
  0x5e   : > { %s281_s13 = sshll.u32 %s273_s11, 4  ;;  %s11569_s17 = scalar_lea.sflag [#allocation4], %s269_s20  ;;  %s11567_s13 = int_to_ptr.vmem [resolvable:$true] %s281_s13 }
  0x5f   : > { %s11247_s18 = scalar_lea.hbm %s11561_s10, 8192  ;;  %p11249_p9 = pneg %p11563_p10 }
  0x60   : > { %p11248_p7 = scmp.ne.s32.totalorder %s11561_s10, %s11247_s18  ;;  %s11252_s23 = scalar_lea.hbm %s13970_s0, 32768 }
  0x61   : > { %p11253_p2 = scmp.lt.u32.totalorder %s11561_s10, %s13970_s0  ;;  %p11254_p1 = scmp.lt.u32.totalorder %s11252_s23, %s11247_s18 }
  0x62   : > { %p11250_p11 = pnand %p11249_p9, %p11248_p7  ;;  %p11256_p8 = scmp.lt.u32.totalorder %s11247_s18, %s11561_s10 }
  0x63   : > { %p11255_p4 = por %p11254_p1, %p11253_p2 }
  0x64   : > { %p11251_p13 = pneg %p11250_p11 }
  0x65   : > { %p11257_p12 = por %p11256_p8, %p11255_p4 }
  0x67   : > { %p11258_p6 = pnand %p11257_p12, %p11251_p13 }
  0x69   : > { %11261 = shalt.err (!%p11258_p6)
}
  0x6a   : > { %s11262_s20 = scalar_lea.vmem %s11567_s13, 8192  ;;  %s11360_s21 = smov [#allocation3]  }
  0x6b   : > { %p11263_p0 = scmp.ne.s32.totalorder %s11567_s13, %s11262_s20  ;;  %s11267_s16 = sshll.u32 %s11360_s21, 4  ;;  %s11268_s16 = int_to_ptr.vmem [resolvable:$false] %s11267_s16 }
  0x6c   : > { %s11269_s29 = scalar_lea.vmem %s11268_s16, 16384  ;;  %p11270_p11 = scmp.lt.s32.totalorder %s11567_s13, %s11268_s16 }
  0x6d   : > { %p11265_p3 = pnand %p11263_p0, %p11249_p9  ;;  %p11271_p2 = scmp.lt.s32.totalorder %s11269_s29, %s11262_s20 }
  0x6f   : > { %p11266_p7 = pneg %p11265_p3  ;;  %p11272_p1 = por %p11271_p2, %p11270_p11 }
  0x71   : > { %p11273_p4 = pnand %p11272_p1, %p11266_p7 }
  0x73   : > { %11276 = shalt.err (!%p11273_p4)
}
  0x74   : > { %10782 = dma.hbm_to_vmem [thread:$0]  (!%p11563_p10), %s11561_s10, 8192, %s11567_s13, %s11569_s17, %s11358_s14, %s11358_s14, %s11359_s22  }
  0x75   : > { %p14044_p9 = scmp.ne.s32.totalorder %s14038_s9, 0 }
  0x77   : > { %293 = sbr.rel (%p14044_p9) target bundleno = 1794 (0x702), region = 48 }
  0x7e   : > { %s11603_s18 = sand.u32 1, %s11343_s25   ;;  %p14045_p13 = scmp.ne.s32.totalorder %s14035_s30, 0 }
  0x7f   : > { %s8960_s23 = sshll.u32 %s11603_s18, 9  ;;  %s296_s11 = scalar_lea.sflag [#allocation4], %s11603_s18 }
  0x80   : > { %s11609_s15 = scalar_lea.vmem [#allocation3], %s8960_s23 }
  0x81   : > { %11322 = dma.done.wait (%p14045_p13), %s296_s11, 8192  }
  0x82   : > { %11324 = vsyncadd (%p14045_p13), %s296_s11, 4294959104  ;;  %p14046_p10 = scmp.eq.s32.totalorder %s11426_s28, 0 }
  0x84   : > { %11326 = dma.done.wait (%p14046_p10), [#allocation7], 13312   ;;  %p14047_p8 = pmov %p14046_p10 }
  0x86   : > { %11328 = vsyncadd (%p14047_p8), [#allocation7], 4294953984  ;;  %p14048_p12 = pmov %p14047_p8 }
  0x87   : > { %p14049_p6 = pmov %p14047_p8 }
  0x88   : > { %11330 = dma.done.wait (%p14048_p12), [#allocation10], 4096  }
  0x89   : > { %11332 = vsyncadd (%p14049_p6), [#allocation10], 4294963200  ;;  %v10837_v0 = vld [vmem:[#allocation6 + $0x40] sm:$0xff]   ;;  %v10839_v2 = vld [vmem:[#allocation6 + $0x48] sm:$0xff]   ;;  %vm2121_vm0 = vsmask.f32 3328 }
  0x8a   : > { %v10838_v1 = vld [vmem:[#allocation6] sm:$0xff]   ;;  %9609 = vmatprep.subr.bf16.mxu1 %v10837_v0  ;;  %v10840_v3 = vld [vmem:[#allocation6 + $0x8] sm:$0xff]   ;;  %v10841_v4 = vld [vmem:[#allocation6 + $0x50] sm:$0xff]   ;;  %vm2122_vm1 = vsmask.f32 7440  ;;  %vm1843_vm2 = vcmask 1043456  }
  0x8b   : > { %9610 = vmatpush3.bf16.msra.mxu1 %v10838_v1  ;;  %v10842_v5 = vld [vmem:[#allocation6 + $0x10] sm:$0xff]   ;;  %v10843_v6 = vld [vmem:[#allocation6 + $0x58] sm:$0xff]   ;;  %v10845_v8 = vld [vmem:[#allocation6 + $0x60] sm:$0xff]   ;;  %vm1844_vm3 = vsmask.f32 7938  ;;  %vm1849_vm4 = vcmask 1040384  }
  0x8c   : > { %9611 = vmatprep.subr.bf16.mxu1 %v10839_v2  ;;  %v10844_v7 = vld [vmem:[#allocation6 + $0x18] sm:$0xff]   ;;  %v10846_v9 = vld [vmem:[#allocation6 + $0x20] sm:$0xff]   ;;  %v10847_v10 = vld [vmem:[#allocation6 + $0x68] sm:$0xff]   ;;  %vm1850_vm5 = vsmask.f32 256  ;;  %vm3263_vm7 = vcmask 1042432  }
  0x8d   : > { %v10855_v11 = vld [vmem:[%s11609_s15 + $0x4] ss:$16 sps:$4 sm:$0xff]   ;;  %v10848_v12 = vld [vmem:[#allocation6 + $0x28] sm:$0xff]   ;;  %v10851_v15 = vld [vmem:[#allocation6 + $0x78] sm:$0xff]   ;;  %vm3264_vm8 = vcmask 1046532   ;;  %s13656_s17 = scalar_lea.vmem [#allocation11], %s8960_s23 }
  0x8e   : > { %1024 = vmatprep.mubr.bf16.mxu1 %v10855_v11  ;;  %v10849_v13 = vld [vmem:[#allocation6 + $0x70] sm:$0xff]   ;;  %v10852_v16 = vld [vmem:[#allocation6 + $0x38] sm:$0xff]   ;;  %v10856_v17 = vld [vmem:[#allocation6 + $0xc0] sm:$0xff]   ;;  %s9608_s20 = sshll.u32 %s11426_s28, 13  ;;  %s8847_s21 = sshll.u32 %s13656_s17, 4  ;;  %s13925_s21 = int_to_ptr.vmem [resolvable:$true] %s8847_s21 }
  0x8f   : > { %9612 = vmatpush3.bf16.msra.mxu1 %v10840_v3  ;;  %v10850_v14 = vld [vmem:[#allocation6 + $0x30] sm:$0xff]   ;;  %v10857_v19 = vld [vmem:[#allocation6 + $0x80] sm:$0xff]   ;;  %v10864_v21 = vld [vmem:[#allocation6 + $0xc8] sm:$0xff]   ;;  %s13923_s23 = scalar_lea.hbm %s13977_s7, %s9608_s20  ;;  %s8833_s11 = scalar_lea.sflag [#allocation5], %s11603_s18 }
  0x90   : > { %9613 = vmatprep.subr.bf16.mxu1 %v10841_v4  ;;  %v10853_v18 = vld [vmem:[%s11609_s15] ss:$16 sps:$4 sm:$0xff]   ;;  %v10858_v20 = vld [vmem:[%s11609_s15 + $0x24] ss:$16 sps:$4 sm:$0xff]   ;;  %v10865_v22 = vld [vmem:[#allocation6 + $0x88] sm:$0xff]   ;;  %s11362_s28 = smov [#allocation11]  }
  0x91   : > { %v10872_v23 = vld [vmem:[#allocation6 + $0xd0] sm:$0xff]   ;;  %v10880_v27 = vld [vmem:[#allocation6 + $0xd8] sm:$0xff]   ;;  %v10888_v29 = vld [vmem:[#allocation6 + $0xe0] sm:$0xff]   ;;  %s11281_s30 = sshll.u32 %s11362_s28, 4  ;;  %s11282_s30 = int_to_ptr.vmem [resolvable:$false] %s11281_s30 }
  0x92   : > { %v10860_v24 = vld [vmem:[%s11609_s15 + $0x20] ss:$16 sps:$4 sm:$0xff]   ;;  %v10861_v25 = vld [vmem:[%s11609_s15 + $0x44] ss:$16 sps:$4 sm:$0xff]   ;;  %v10881_v28 = vld [vmem:[#allocation6 + $0x98] sm:$0xff]   ;;  %s11283_s9 = scalar_lea.vmem %s11282_s30, 16384  ;;  %p11284_p11 = scmp.lt.s32.totalorder %s13925_s21, %s11282_s30 }
  0x93   : > { %9614 = vmatpush3.bf16.msra.mxu1 %v10842_v5  ;;  %v10873_v26 = vld [vmem:[#allocation6 + $0x90] sm:$0xff]   ;;  %v10889_v32 = vld [vmem:[#allocation6 + $0xa0] sm:$0xff]   ;;  %v10896_v33 = vld [vmem:[#allocation6 + $0xe8] sm:$0xff]  }
  0x94   : > { %9615 = vmatprep.subr.bf16.mxu1 %v10843_v6  ;;  %v10863_v30 = vld [vmem:[%s11609_s15 + $0x40] ss:$16 sps:$4 sm:$0xff]   ;;  %v10866_v31 = vld [vmem:[%s11609_s15 + $0x64] ss:$16 sps:$4 sm:$0xff]   ;;  %v10897_v34 = vld [vmem:[#allocation6 + $0xa8] sm:$0xff]  }
  0x95   : > { %v10904_v35 = vld [vmem:[#allocation6 + $0xf0] sm:$0xff]   ;;  %v10912_v39 = vld [vmem:[#allocation6 + $0xf8] sm:$0xff]   ;;  %vm11862_vm6 = vmor %vm2121_vm0, %vm2122_vm1 }
  0x96   : > { %v10868_v36 = vld [vmem:[%s11609_s15 + $0x60] ss:$16 sps:$4 sm:$0xff]   ;;  %v10869_v37 = vld [vmem:[%s11609_s15 + $0x84] ss:$16 sps:$4 sm:$0xff]   ;;  %v10913_v40 = vld [vmem:[#allocation6 + $0xb8] sm:$0xff]  }
  0x97   : > { %9616 = vmatpush3.bf16.msra.mxu1 %v10844_v7  ;;  %v10905_v38 = vld [vmem:[#allocation6 + $0xb0] sm:$0xff]   ;;  %v10919_v0 = vld [vmem:[%s11609_s15 + $0xc] ss:$16 sps:$4 sm:$0xff]   ;;  %v10917_v1 = vld [vmem:[%s11609_s15 + $0x8] ss:$16 sps:$4 sm:$0xff]  }
  0x98   : > { %9617 = vmatprep.subr.bf16.mxu1 %v10845_v8  ;;  %v10871_v41 = vld [vmem:[%s11609_s15 + $0x80] ss:$16 sps:$4 sm:$0xff]   ;;  %v10874_v42 = vld [vmem:[%s11609_s15 + $0xa4] ss:$16 sps:$4 sm:$0xff]   ;;  %v10920_v2 = vld [vmem:[%s11609_s15 + $0x2c] ss:$16 sps:$4 sm:$0xff]  }
  0x99   : > { %v10876_v43 = vld [vmem:[%s11609_s15 + $0xa0] ss:$16 sps:$4 sm:$0xff]   ;;  %v10877_v44 = vld [vmem:[%s11609_s15 + $0xc4] ss:$16 sps:$4 sm:$0xff]   ;;  %v10922_v3 = vld [vmem:[%s11609_s15 + $0x28] ss:$16 sps:$4 sm:$0xff]  }
  0x9a   : > { %v10879_v45 = vld [vmem:[%s11609_s15 + $0xc0] ss:$16 sps:$4 sm:$0xff]   ;;  %v10882_v46 = vld [vmem:[%s11609_s15 + $0xe4] ss:$16 sps:$4 sm:$0xff]   ;;  %v10923_v4 = vld [vmem:[%s11609_s15 + $0x4c] ss:$16 sps:$4 sm:$0xff]  }
  0x9b   : > { %9618 = vmatpush3.bf16.msra.mxu1 %v10846_v9  ;;  %v10884_v47 = vld [vmem:[%s11609_s15 + $0xe0] ss:$16 sps:$4 sm:$0xff]   ;;  %v10885_v48 = vld [vmem:[%s11609_s15 + $0x104] ss:$16 sps:$4 sm:$0xff]   ;;  %v10925_v5 = vld [vmem:[%s11609_s15 + $0x48] ss:$16 sps:$4 sm:$0xff]  }
  0x9c   : > { %9619 = vmatprep.subr.bf16.mxu1 %v10847_v10  ;;  %v10887_v49 = vld [vmem:[%s11609_s15 + $0x100] ss:$16 sps:$4 sm:$0xff]   ;;  %v10890_v50 = vld [vmem:[%s11609_s15 + $0x124] ss:$16 sps:$4 sm:$0xff]   ;;  %v10926_v6 = vld [vmem:[%s11609_s15 + $0x6c] ss:$16 sps:$4 sm:$0xff]  }
  0x9d   : > { %v10892_v51 = vld [vmem:[%s11609_s15 + $0x120] ss:$16 sps:$4 sm:$0xff]   ;;  %v10893_v52 = vld [vmem:[%s11609_s15 + $0x144] ss:$16 sps:$4 sm:$0xff]   ;;  %v10928_v7 = vld [vmem:[%s11609_s15 + $0x68] ss:$16 sps:$4 sm:$0xff]  }
  0x9e   : > { %v10895_v53 = vld [vmem:[%s11609_s15 + $0x140] ss:$16 sps:$4 sm:$0xff]   ;;  %v10898_v54 = vld [vmem:[%s11609_s15 + $0x164] ss:$16 sps:$4 sm:$0xff]   ;;  %v10929_v8 = vld [vmem:[%s11609_s15 + $0x8c] ss:$16 sps:$4 sm:$0xff]  }
  0x9f   : > { %9620 = vmatpush3.bf16.msra.mxu1 %v10848_v12  ;;  %v10900_v55 = vld [vmem:[%s11609_s15 + $0x160] ss:$16 sps:$4 sm:$0xff]   ;;  %v10901_v56 = vld [vmem:[%s11609_s15 + $0x184] ss:$16 sps:$4 sm:$0xff]   ;;  %v10931_v9 = vld [vmem:[%s11609_s15 + $0x88] ss:$16 sps:$4 sm:$0xff]  }
  0xa0   : > { %9621 = vmatprep.subr.bf16.mxu1 %v10849_v13  ;;  %v10903_v57 = vld [vmem:[%s11609_s15 + $0x180] ss:$16 sps:$4 sm:$0xff]   ;;  %v10906_v58 = vld [vmem:[%s11609_s15 + $0x1a4] ss:$16 sps:$4 sm:$0xff]   ;;  %v10932_v10 = vld [vmem:[%s11609_s15 + $0xac] ss:$16 sps:$4 sm:$0xff]  }
  0xa1   : > { %v10908_v59 = vld [vmem:[%s11609_s15 + $0x1a0] ss:$16 sps:$4 sm:$0xff]   ;;  %v10909_v60 = vld [vmem:[%s11609_s15 + $0x1c4] ss:$16 sps:$4 sm:$0xff]   ;;  %v10934_v11 = vld [vmem:[%s11609_s15 + $0xa8] ss:$16 sps:$4 sm:$0xff]  }
  0xa2   : > { %v10911_v61 = vld [vmem:[%s11609_s15 + $0x1c0] ss:$16 sps:$4 sm:$0xff]   ;;  %v10914_v62 = vld [vmem:[%s11609_s15 + $0x1e4] ss:$16 sps:$4 sm:$0xff]   ;;  %v10935_v12 = vld [vmem:[%s11609_s15 + $0xcc] ss:$16 sps:$4 sm:$0xff]  }
  0xa3   : > { %9622 = vmatpush3.bf16.msra.mxu1 %v10850_v14  ;;  %v10916_v63 = vld [vmem:[%s11609_s15 + $0x1e0] ss:$16 sps:$4 sm:$0xff]   ;;  %v10937_v13 = vld [vmem:[%s11609_s15 + $0xc8] ss:$16 sps:$4 sm:$0xff]   ;;  %v10938_v14 = vld [vmem:[%s11609_s15 + $0xec] ss:$16 sps:$4 sm:$0xff]  }
  0xa4   : > { %9623 = vmatprep.subr.bf16.mxu1 %v10851_v15  ;;  %v10940_v15 = vld [vmem:[%s11609_s15 + $0xe8] ss:$16 sps:$4 sm:$0xff]   ;;  %vm11953_vm9 = vmand %vm1843_vm2, %vm1844_vm3 }
  0xa5   : > { %vm11963_vm10 = vmand %vm1849_vm4, %vm1850_vm5 }
  0xa6   : > { %vm11969_vm11 = vmor %vm3263_vm7, %vm3264_vm8 }
  0xa7   : > { %9624 = vmatpush3.bf16.msra.mxu1 %v10852_v16  ;;  %v10941_v16 = vld [vmem:[%s11609_s15 + $0x10c] ss:$16 sps:$4 sm:$0xff]  }
  0xa8   : > { %9721 = vmatprep.subr.bf16.mxu1 %v10856_v17  ;;  %v10943_v17 = vld [vmem:[%s11609_s15 + $0x108] ss:$16 sps:$4 sm:$0xff]  }
  0xaa   : > { %1025 = vmatmul.mubr.bf16.vlgmr.msra.gmra.mrb[0].mxu1 %v10853_v18  ;;  %v10944_v18 = vld [vmem:[%s11609_s15 + $0x12c] ss:$16 sps:$4 sm:$0xff]  }
  0xab   : > { %9722 = vmatpush3.bf16.msra.mxu1 %v10857_v19  ;;  %1032 = vmatprep.mubr.bf16.mxu1 %v10858_v20  ;;  %v10946_v19 = vld [vmem:[%s11609_s15 + $0x128] ss:$16 sps:$4 sm:$0xff]   ;;  %v10947_v20 = vld [vmem:[%s11609_s15 + $0x14c] ss:$16 sps:$4 sm:$0xff]  }
  0xac   : > { %9723 = vmatprep.subr.bf16.mxu1 %v10864_v21  ;;  %v10949_v21 = vld [vmem:[%s11609_s15 + $0x148] ss:$16 sps:$4 sm:$0xff]  }
  0xaf   : > { %9724 = vmatpush3.bf16.msra.mxu1 %v10865_v22  ;;  %v10950_v22 = vld [vmem:[%s11609_s15 + $0x16c] ss:$16 sps:$4 sm:$0xff]  }
  0xb0   : > { %9725 = vmatprep.subr.bf16.mxu1 %v10872_v23 }
  0xb2   : > { %1033 = vmatmul.mubr.bf16.gmra.mrb[4].mxu1 %v10860_v24 }
  0xb3   : > { %1040 = vmatprep.mubr.bf16.mxu1 %v10861_v25  ;;  %9726 = vmatpush3.bf16.msra.mxu1 %v10873_v26  ;;  %v10952_v25 = vld [vmem:[%s11609_s15 + $0x168] ss:$16 sps:$4 sm:$0xff]  }
  0xb4   : > { %9727 = vmatprep.subr.bf16.mxu1 %v10880_v27 }
  0xb7   : > { %9728 = vmatpush3.bf16.msra.mxu1 %v10881_v28  ;;  %v10953_v28 = vld [vmem:[%s11609_s15 + $0x18c] ss:$16 sps:$4 sm:$0xff]  }
  0xb8   : > { %9729 = vmatprep.subr.bf16.mxu1 %v10888_v29 }
  0xba   : > { %1041 = vmatmul.mubr.bf16.gmra.mrb[8].mxu1 %v10863_v30 }
  0xbb   : > { %1048 = vmatprep.mubr.bf16.mxu1 %v10866_v31  ;;  %9730 = vmatpush3.bf16.msra.mxu1 %v10889_v32  ;;  %v13982_v31 = vmov 0  }
  0xbc   : > { %9731 = vmatprep.subr.bf16.mxu1 %v10896_v33  ;;  %1348 = vst [vmem:[#allocation2 + $0x8] sm:$0xf] %v13982_v31  ;;  %1349 = vst [vmem:[#allocation2 + $0xc] sm:$0x1] %v13982_v31 }
  0xbd   : > { %1346 = vst [vmem:[#allocation2] sm:$0xf] %v13982_v31  ;;  %1347 = vst [vmem:[#allocation2 + $0x4] sm:$0x1] %v13982_v31 }
  0xbe   : > { %1350 = vst [vmem:[#allocation2 + $0x10] sm:$0xf] %v13982_v31  ;;  %1351 = vst [vmem:[#allocation2 + $0x14] sm:$0x1] %v13982_v31 }
  0xbf   : > { %9732 = vmatpush3.bf16.msra.mxu1 %v10897_v34  ;;  %1352 = vst [vmem:[#allocation2 + $0x18] sm:$0xf] %v13982_v31  ;;  %1353 = vst [vmem:[#allocation2 + $0x1c] sm:$0x1] %v13982_v31  ;;  %v10955_v34 = vld [vmem:[%s11609_s15 + $0x188] ss:$16 sps:$4 sm:$0xff]  }
  0xc0   : > { %9733 = vmatprep.subr.bf16.mxu1 %v10904_v35  ;;  %1354 = vst [vmem:[#allocation2 + $0x20] sm:$0xf] %v13982_v31  ;;  %1355 = vst [vmem:[#allocation2 + $0x24] sm:$0x1] %v13982_v31 }
  0xc1   : > { %1356 = vst [vmem:[#allocation2 + $0x28] sm:$0xf] %v13982_v31  ;;  %1357 = vst [vmem:[#allocation2 + $0x2c] sm:$0x1] %v13982_v31 }
  0xc2   : > { %1049 = vmatmul.mubr.bf16.gmra.mrb[12].mxu1 %v10868_v36  ;;  %1358 = vst [vmem:[#allocation2 + $0x30] sm:$0xf] %v13982_v31  ;;  %1359 = vst [vmem:[#allocation2 + $0x34] sm:$0x1] %v13982_v31 }
  0xc3   : > { %1056 = vmatprep.mubr.bf16.mxu1 %v10869_v37  ;;  %9734 = vmatpush3.bf16.msra.mxu1 %v10905_v38  ;;  %1360 = vst [vmem:[#allocation2 + $0x38] sm:$0xf] %v13982_v31  ;;  %1361 = vst [vmem:[#allocation2 + $0x3c] sm:$0x1] %v13982_v31  ;;  %v10956_v37 = vld [vmem:[%s11609_s15 + $0x1ac] ss:$16 sps:$4 sm:$0xff]  }
  0xc4   : > { %9735 = vmatprep.subr.bf16.mxu1 %v10912_v39  ;;  %1362 = vst [vmem:[#allocation2 + $0x40] sm:$0xf] %v13982_v31  ;;  %1363 = vst [vmem:[#allocation2 + $0x44] sm:$0x1] %v13982_v31  ;;  %v10965_v39 = vld [vmem:[#allocation8 + $0x40] sm:$0xff]  }
  0xc5   : > { %1364 = vst [vmem:[#allocation2 + $0x48] sm:$0xf] %v13982_v31  ;;  %1365 = vst [vmem:[#allocation2 + $0x4c] sm:$0x1] %v13982_v31  ;;  %10049 = vmatprep.subr.bf16.mxu0 %v10965_v39 }
  0xc6   : > { %1366 = vst [vmem:[#allocation2 + $0x50] sm:$0xf] %v13982_v31  ;;  %1367 = vst [vmem:[#allocation2 + $0x54] sm:$0x1] %v13982_v31  ;;  %10050 = vmatpush3.bf16.msra.mxu0 %v10965_v39 }
  0xc7   : > { %9736 = vmatpush3.bf16.msra.mxu1 %v10913_v40  ;;  %1368 = vst [vmem:[#allocation2 + $0x58] sm:$0xf] %v13982_v31  ;;  %1369 = vst [vmem:[#allocation2 + $0x5c] sm:$0x1] %v13982_v31 }
  0xc8   : > { %1370 = vst [vmem:[#allocation2 + $0x60] sm:$0xf] %v13982_v31  ;;  %1371 = vst [vmem:[#allocation2 + $0x64] sm:$0x1] %v13982_v31  ;;  %10481 = vmatprep.subr.bf16.mxu1 %v10965_v39 }
  0xc9   : > { %1372 = vst [vmem:[#allocation2 + $0x68] sm:$0xf] %v13982_v31  ;;  %1373 = vst [vmem:[#allocation2 + $0x6c] sm:$0x1] %v13982_v31 }
  0xca   : > { %1057 = vmatmul.mubr.bf16.gmra.mrb[16].mxu1 %v10871_v41  ;;  %1374 = vst [vmem:[#allocation2 + $0x70] sm:$0xf] %v13982_v31  ;;  %1375 = vst [vmem:[#allocation2 + $0x74] sm:$0x1] %v13982_v31  ;;  %v10966_v41 = vld [vmem:[#allocation8 + $0x48] sm:$0xff]  }
  0xcb   : > { %1064 = vmatprep.mubr.bf16.mxu1 %v10874_v42  ;;  %1376 = vst [vmem:[#allocation2 + $0x78] sm:$0xf] %v13982_v31  ;;  %1377 = vst [vmem:[#allocation2 + $0x7c] sm:$0x1] %v13982_v31  ;;  %10051 = vmatprep.subr.bf16.mxu0 %v10966_v41 }
  0xcc   : > { %1378 = vst [vmem:[#allocation2 + $0x80] sm:$0xf] %v13982_v31  ;;  %1379 = vst [vmem:[#allocation2 + $0x84] sm:$0x1] %v13982_v31  ;;  %10052 = vmatpush3.bf16.msra.mxu0 %v10966_v41 }
  0xcd   : > { %1380 = vst [vmem:[#allocation2 + $0x88] sm:$0xf] %v13982_v31  ;;  %1381 = vst [vmem:[#allocation2 + $0x8c] sm:$0x1] %v13982_v31 }
  0xce   : > { %1382 = vst [vmem:[#allocation2 + $0x90] sm:$0xf] %v13982_v31  ;;  %1383 = vst [vmem:[#allocation2 + $0x94] sm:$0x1] %v13982_v31 }
  0xcf   : > { %1384 = vst [vmem:[#allocation2 + $0x98] sm:$0xf] %v13982_v31  ;;  %1385 = vst [vmem:[#allocation2 + $0x9c] sm:$0x1] %v13982_v31 }
  0xd0   : > { %1386 = vst [vmem:[#allocation2 + $0xa0] sm:$0xf] %v13982_v31  ;;  %1387 = vst [vmem:[#allocation2 + $0xa4] sm:$0x1] %v13982_v31 }
  0xd1   : > { %1388 = vst [vmem:[#allocation2 + $0xa8] sm:$0xf] %v13982_v31  ;;  %1389 = vst [vmem:[#allocation2 + $0xac] sm:$0x1] %v13982_v31 }
  0xd2   : > { %1065 = vmatmul.mubr.bf16.gmra.mrb[20].mxu1 %v10876_v43  ;;  %1390 = vst [vmem:[#allocation2 + $0xb0] sm:$0xf] %v13982_v31  ;;  %1391 = vst [vmem:[#allocation2 + $0xb4] sm:$0x1] %v13982_v31 }
  0xd3   : > { %1072 = vmatprep.mubr.bf16.mxu1 %v10877_v44  ;;  %1392 = vst [vmem:[#allocation2 + $0xb8] sm:$0xf] %v13982_v31  ;;  %1393 = vst [vmem:[#allocation2 + $0xbc] sm:$0x1] %v13982_v31  ;;  %v10958_v44 = vld [vmem:[%s11609_s15 + $0x1a8] ss:$16 sps:$4 sm:$0xff]  }
  0xd4   : > { %1394 = vst [vmem:[#allocation2 + $0xc0] sm:$0xf] %v13982_v31  ;;  %1395 = vst [vmem:[#allocation2 + $0xc4] sm:$0x1] %v13982_v31 }
  0xd5   : > { %1396 = vst [vmem:[#allocation2 + $0xc8] sm:$0xf] %v13982_v31  ;;  %1397 = vst [vmem:[#allocation2 + $0xcc] sm:$0x1] %v13982_v31 }
  0xd6   : > { %1398 = vst [vmem:[#allocation2 + $0xd0] sm:$0xf] %v13982_v31  ;;  %1399 = vst [vmem:[#allocation2 + $0xd4] sm:$0x1] %v13982_v31 }
  0xd7   : > { %1400 = vst [vmem:[#allocation2 + $0xd8] sm:$0xf] %v13982_v31  ;;  %1401 = vst [vmem:[#allocation2 + $0xdc] sm:$0x1] %v13982_v31 }
  0xd8   : > { %1402 = vst [vmem:[#allocation2 + $0xe0] sm:$0xf] %v13982_v31  ;;  %1403 = vst [vmem:[#allocation2 + $0xe4] sm:$0x1] %v13982_v31 }
  0xd9   : > { %1404 = vst [vmem:[#allocation2 + $0xe8] sm:$0xf] %v13982_v31  ;;  %1405 = vst [vmem:[#allocation2 + $0xec] sm:$0x1] %v13982_v31 }
  0xda   : > { %1073 = vmatmul.mubr.bf16.gmra.mrb[24].mxu1 %v10879_v45  ;;  %1406 = vst [vmem:[#allocation2 + $0xf0] sm:$0xf] %v13982_v31  ;;  %1407 = vst [vmem:[#allocation2 + $0xf4] sm:$0x1] %v13982_v31  ;;  %v10959_v45 = vld [vmem:[%s11609_s15 + $0x1cc] ss:$16 sps:$4 sm:$0xff]  }
  0xdb   : > { %1080 = vmatprep.mubr.bf16.mxu1 %v10882_v46  ;;  %1408 = vst [vmem:[#allocation2 + $0xf8] sm:$0xf] %v13982_v31  ;;  %1409 = vst [vmem:[#allocation2 + $0xfc] sm:$0x1] %v13982_v31 }
  0xdc   : > { %1410 = vst [vmem:[#allocation2 + $0x100] sm:$0xf] %v13982_v31  ;;  %1411 = vst [vmem:[#allocation2 + $0x104] sm:$0x1] %v13982_v31 }
  0xdd   : > { %1412 = vst [vmem:[#allocation2 + $0x108] sm:$0xf] %v13982_v31  ;;  %1413 = vst [vmem:[#allocation2 + $0x10c] sm:$0x1] %v13982_v31 }
  0xde   : > { %1414 = vst [vmem:[#allocation2 + $0x110] sm:$0xf] %v13982_v31  ;;  %1415 = vst [vmem:[#allocation2 + $0x114] sm:$0x1] %v13982_v31 }
  0xdf   : > { %1416 = vst [vmem:[#allocation2 + $0x118] sm:$0xf] %v13982_v31  ;;  %1417 = vst [vmem:[#allocation2 + $0x11c] sm:$0x1] %v13982_v31 }
  0xe0   : > { %1418 = vst [vmem:[#allocation2 + $0x120] sm:$0xf] %v13982_v31  ;;  %1419 = vst [vmem:[#allocation2 + $0x124] sm:$0x1] %v13982_v31 }
  0xe1   : > { %1420 = vst [vmem:[#allocation2 + $0x128] sm:$0xf] %v13982_v31  ;;  %1421 = vst [vmem:[#allocation2 + $0x12c] sm:$0x1] %v13982_v31 }
  0xe2   : > { %1081 = vmatmul.mubr.bf16.gmra.mrb[28].mxu1 %v10884_v47  ;;  %1422 = vst [vmem:[#allocation2 + $0x130] sm:$0xf] %v13982_v31  ;;  %1423 = vst [vmem:[#allocation2 + $0x134] sm:$0x1] %v13982_v31 }
  0xe3   : > { %1088 = vmatprep.mubr.bf16.mxu1 %v10885_v48  ;;  %1424 = vst [vmem:[#allocation2 + $0x138] sm:$0xf] %v13982_v31  ;;  %1425 = vst [vmem:[#allocation2 + $0x13c] sm:$0x1] %v13982_v31 }
  0xea   : > { %1089 = vmatmul.mubr.bf16.gmra.mrb[32].mxu1 %v10887_v49  ;;  %v10967_v49 = vld [vmem:[#allocation8 + $0x50] sm:$0xff]  }
  0xeb   : > { %1096 = vmatprep.mubr.bf16.mxu1 %v10890_v50  ;;  %10053 = vmatprep.subr.bf16.mxu0 %v10967_v49 }
  0xec   : > { %10054 = vmatpush3.bf16.msra.mxu0 %v10967_v49 }
  0xf2   : > { %1097 = vmatmul.mubr.bf16.gmra.mrb[36].mxu1 %v10892_v51  ;;  %v10968_v51 = vld [vmem:[#allocation8 + $0x58] sm:$0xff]  }
  0xf3   : > { %1104 = vmatprep.mubr.bf16.mxu1 %v10893_v52  ;;  %10055 = vmatprep.subr.bf16.mxu0 %v10968_v51 }
  0xf4   : > { %10056 = vmatpush3.bf16.msra.mxu0 %v10968_v51 }
  0xfa   : > { %1105 = vmatmul.mubr.bf16.gmra.mrb[40].mxu1 %v10895_v53 }
  0xfb   : > { %1112 = vmatprep.mubr.bf16.mxu1 %v10898_v54  ;;  %v10961_v54 = vld [vmem:[%s11609_s15 + $0x1c8] ss:$16 sps:$4 sm:$0xff]  }
 0x102   : > { %1113 = vmatmul.mubr.bf16.gmra.mrb[44].mxu1 %v10900_v55 }
 0x103   : > { %1120 = vmatprep.mubr.bf16.mxu1 %v10901_v56 }
 0x10a   : > { %1121 = vmatmul.mubr.bf16.gmra.mrb[48].mxu1 %v10903_v57  ;;  %v10962_v57 = vld [vmem:[%s11609_s15 + $0x1ec] ss:$16 sps:$4 sm:$0xff]  }
 0x10b   : > { %1128 = vmatprep.mubr.bf16.mxu1 %v10906_v58 }
 0x112   : > { %1129 = vmatmul.mubr.bf16.gmra.mrb[52].mxu1 %v10908_v59  ;;  %v10969_v59 = vld [vmem:[#allocation8 + $0x60] sm:$0xff]  }
 0x113   : > { %1136 = vmatprep.mubr.bf16.mxu1 %v10909_v60  ;;  %10057 = vmatprep.subr.bf16.mxu0 %v10969_v59 }
 0x114   : > { %10058 = vmatpush3.bf16.msra.mxu0 %v10969_v59 }
 0x11a   : > { %1137 = vmatmul.mubr.bf16.gmra.mrb[56].mxu1 %v10911_v61  ;;  %v10970_v61 = vld [vmem:[#allocation8 + $0x68] sm:$0xff]  }
 0x11b   : > { %1144 = vmatprep.mubr.bf16.mxu1 %v10914_v62  ;;  %10059 = vmatprep.subr.bf16.mxu0 %v10970_v61 }
 0x11c   : > { %10060 = vmatpush3.bf16.msra.mxu0 %v10970_v61 }
 0x122   : > { %1145 = vmatmul.mubr.bf16.gmra.mrb[60].mxu1 %v10916_v63 }
 0x123   : > { %1185 = vmatprep.mubr.bf16.mxu1 %v10919_v0  ;;  %v10964_v0 = vld [vmem:[%s11609_s15 + $0x1e8] ss:$16 sps:$4 sm:$0xff]  }
 0x12a   : > { %1186 = vmatmul.mubr.bf16.vlgmr.msra.gmra.mrb[64].mxu1 %v10917_v1 }
 0x12b   : > { %1193 = vmatprep.mubr.bf16.mxu1 %v10920_v2  ;;  %10489 = vmatpush3.bf16.msra.mxu1 %v10965_v39 }
 0x12c   : > { %10482 = vmatprep.subr.bf16.mxu1 %v10966_v41 }
 0x12f   : > { %10490 = vmatpush3.bf16.msra.mxu1 %v10966_v41 }
 0x130   : > { %10483 = vmatprep.subr.bf16.mxu1 %v10967_v49 }
 0x132   : > { %1194 = vmatmul.mubr.bf16.gmra.mrb[68].mxu1 %v10922_v3 }
 0x133   : > { %1201 = vmatprep.mubr.bf16.mxu1 %v10923_v4  ;;  %10491 = vmatpush3.bf16.msra.mxu1 %v10967_v49  ;;  %v10971_v4 = vld [vmem:[#allocation8 + $0x70] sm:$0xff]  }
 0x134   : > { %10484 = vmatprep.subr.bf16.mxu1 %v10968_v51  ;;  %10061 = vmatprep.subr.bf16.mxu0 %v10971_v4 }
 0x135   : > { %10062 = vmatpush3.bf16.msra.mxu0 %v10971_v4 }
 0x137   : > { %10492 = vmatpush3.bf16.msra.mxu1 %v10968_v51 }
 0x138   : > { %10485 = vmatprep.subr.bf16.mxu1 %v10969_v59 }
 0x13a   : > { %1202 = vmatmul.mubr.bf16.gmra.mrb[72].mxu1 %v10925_v5 }
 0x13b   : > { %1209 = vmatprep.mubr.bf16.mxu1 %v10926_v6  ;;  %10493 = vmatpush3.bf16.msra.mxu1 %v10969_v59 }
 0x13c   : > { %10486 = vmatprep.subr.bf16.mxu1 %v10970_v61 }
 0x13f   : > { %10494 = vmatpush3.bf16.msra.mxu1 %v10970_v61 }
 0x140   : > { %10487 = vmatprep.subr.bf16.mxu1 %v10971_v4 }
 0x142   : > { %1210 = vmatmul.mubr.bf16.gmra.mrb[76].mxu1 %v10928_v7 }
 0x143   : > { %1217 = vmatprep.mubr.bf16.mxu1 %v10929_v8  ;;  %10495 = vmatpush3.bf16.msra.mxu1 %v10971_v4 }
 0x14a   : > { %1218 = vmatmul.mubr.bf16.gmra.mrb[80].mxu1 %v10931_v9 }
 0x14b   : > { %1225 = vmatprep.mubr.bf16.mxu1 %v10932_v10 }
 0x152   : > { %1226 = vmatmul.mubr.bf16.gmra.mrb[84].mxu1 %v10934_v11 }
 0x153   : > { %1233 = vmatprep.mubr.bf16.mxu1 %v10935_v12  ;;  %v10972_v12 = vld [vmem:[#allocation8 + $0x78] sm:$0xff]  }
 0x154   : > { %10063 = vmatprep.subr.bf16.mxu0 %v10972_v12  ;;  %10488 = vmatprep.subr.bf16.mxu1 %v10972_v12 }
 0x155   : > { %10064 = vmatpush3.bf16.msra.mxu0 %v10972_v12  ;;  %10496 = vmatpush3.bf16.msra.mxu1 %v10972_v12 }
 0x15a   : > { %1234 = vmatmul.mubr.bf16.gmra.mrb[88].mxu1 %v10937_v13 }
 0x15b   : > { %1241 = vmatprep.mubr.bf16.mxu1 %v10938_v14 }
 0x162   : > { %1242 = vmatmul.mubr.bf16.gmra.mrb[92].mxu1 %v10940_v15 }
 0x163   : > { %1249 = vmatprep.mubr.bf16.mxu1 %v10941_v16 }
 0x16a   : > { %1250 = vmatmul.mubr.bf16.gmra.mrb[96].mxu1 %v10943_v17 }
 0x16b   : > { %1257 = vmatprep.mubr.bf16.mxu1 %v10944_v18 }
 0x172   : > { %1258 = vmatmul.mubr.bf16.gmra.mrb[100].mxu1 %v10946_v19 }
 0x173   : > { %1265 = vmatprep.mubr.bf16.mxu1 %v10947_v20 }
 0x17a   : > { %1266 = vmatmul.mubr.bf16.gmra.mrb[104].mxu1 %v10949_v21 }
 0x17b   : > { %1273 = vmatprep.mubr.bf16.mxu1 %v10950_v22 }
 0x17d   : > { %v9625_v23 = vpop.f32.mrb[0].mxu1 }
 0x17e   : > { %v9626_v24 = vpop.f32.mrb[1].mxu1 }
 0x17f   : > { %v11679_v26 = vadd.f32 %v9626_v24, %v9625_v23  ;;  %v9628_v27 = vpop.f32.mrb[2].mxu1 }
 0x180   : > { %v9629_v29 = vpop.f32.mrb[3].mxu1 }
 0x181   : > { %v11682_v30 = vadd.f32 %v9629_v29, %v9628_v27 }
 0x182   : > { %1274 = vmatmul.mubr.bf16.gmra.mrb[108].mxu1 %v10952_v25 }
 0x183   : > { %1281 = vmatprep.mubr.bf16.mxu1 %v10953_v28 }
 0x185   : > { %v9631_v32 = vpop.f32.mrb[4].mxu1 }
 0x186   : > { %v9632_v33 = vpop.f32.mrb[5].mxu1 }
 0x187   : > { %v11765_v35 = vadd.f32 %v9632_v33, %v9631_v32  ;;  %v9634_v36 = vpop.f32.mrb[6].mxu1 }
 0x188   : > { %v9635_v38 = vpop.f32.mrb[7].mxu1 }
 0x189   : > { %v11768_v40 = vadd.f32 %v9635_v38, %v9634_v36 }
 0x18a   : > { %1282 = vmatmul.mubr.bf16.gmra.mrb[112].mxu1 %v10955_v34 }
 0x18b   : > { %1289 = vmatprep.mubr.bf16.mxu1 %v10956_v37 }
 0x18d   : > { %v9637_v42 = vpop.f32.mrb[8].mxu1 }
 0x18e   : > { %v9638_v43 = vpop.f32.mrb[9].mxu1 }
 0x18f   : > { %v11772_v46 = vadd.f32 %v9638_v43, %v9637_v42  ;;  %v9640_v47 = vpop.f32.mrb[10].mxu1 }
 0x190   : > { %v9641_v48 = vpop.f32.mrb[11].mxu1 }
 0x191   : > { %v11774_v50 = vadd.f32 %v9641_v48, %v9640_v47 }
 0x192   : > { %1290 = vmatmul.mubr.bf16.gmra.mrb[116].mxu1 %v10958_v44 }
 0x193   : > { %1297 = vmatprep.mubr.bf16.mxu1 %v10959_v45 }
 0x195   : > { %v9643_v52 = vpop.f32.mrb[12].mxu1 }
 0x196   : > { %v9644_v53 = vpop.f32.mrb[13].mxu1 }
 0x197   : > { %v11777_v55 = vadd.f32 %v9644_v53, %v9643_v52  ;;  %v9646_v56 = vpop.f32.mrb[14].mxu1  ;;  %v11811_v52 = vld [vmem:[#allocation8] sm:$0xff]  }
 0x198   : > { %v9647_v58 = vpop.f32.mrb[15].mxu1  ;;  %10097 = vmatprep.subr.bf16.mxu0 %v11811_v52 }
 0x199   : > { %v11780_v60 = vadd.f32 %v9647_v58, %v9646_v56 }
 0x19a   : > { %1298 = vmatmul.mubr.bf16.gmra.mrb[120].mxu1 %v10961_v54 }
 0x19b   : > { %1305 = vmatprep.mubr.bf16.mxu1 %v10962_v57 }
 0x19d   : > { %v9649_v62 = vpop.f32.mrb[16].mxu1 }
 0x19e   : > { %v9650_v63 = vpop.f32.mrb[17].mxu1 }
 0x19f   : > { %v11783_v1 = vadd.f32 %v9650_v63, %v9649_v62  ;;  %v9652_v2 = vpop.f32.mrb[18].mxu1 }
 0x1a0   : > { %v9653_v3 = vpop.f32.mrb[19].mxu1 }
 0x1a1   : > { %v11785_v5 = vadd.f32 %v9653_v3, %v9652_v2 }
 0x1a2   : > { %1306 = vmatmul.mubr.bf16.gmra.mrb[124].mxu1 %v10964_v0 }
 0x1a5   : > { %v9655_v6 = vpop.f32.mrb[20].mxu1 }
 0x1a6   : > { %v9656_v7 = vpop.f32.mrb[21].mxu1 }
 0x1a7   : > { %v11787_v8 = vadd.f32 %v9656_v7, %v9655_v6  ;;  %v9658_v9 = vpop.f32.mrb[22].mxu1 }
 0x1a8   : > { %v9659_v10 = vpop.f32.mrb[23].mxu1 }
 0x1a9   : > { %v11789_v11 = vadd.f32 %v9659_v10, %v9658_v9 }
 0x1ad   : > { %v9661_v13 = vpop.f32.mrb[24].mxu1 }
 0x1ae   : > { %v9662_v14 = vpop.f32.mrb[25].mxu1 }
 0x1af   : > { %v11791_v15 = vadd.f32 %v9662_v14, %v9661_v13  ;;  %v9664_v16 = vpop.f32.mrb[26].mxu1 }
 0x1b0   : > { %v9665_v17 = vpop.f32.mrb[27].mxu1 }
 0x1b1   : > { %v11793_v18 = vadd.f32 %v9665_v17, %v9664_v16  ;;  %v2041_v16 = vld [vmem:[#allocation2] sm:$0xf] }
 0x1b5   : > { %v9667_v19 = vpop.f32.mrb[28].mxu1 }
 0x1b6   : > { %v9668_v20 = vpop.f32.mrb[29].mxu1 }
 0x1b7   : > { %v11795_v21 = vadd.f32 %v9668_v20, %v9667_v19  ;;  %v9670_v22 = vpop.f32.mrb[30].mxu1  ;;  %v2125_v20 = vshrl.u32 %v2041_v16, 16 }
 0x1b8   : > { %v9671_v23 = vpop.f32.mrb[31].mxu1 }
 0x1b9   : > { %v11797_v24 = vadd.f32 %v9671_v23, %v9670_v22  ;;  %v2128_v22 = vshll.u32 %v2041_v16, 16 }
 0x1bd   : > { %v9673_v25 = vpop.f32.mrb[32].mxu1 }
 0x1be   : > { %v9674_v27 = vpop.f32.mrb[33].mxu1 }
 0x1bf   : > { %v11799_v28 = vadd.f32 %v9674_v27, %v9673_v25  ;;  %v9676_v29 = vpop.f32.mrb[34].mxu1  ;;  %v2049_v25 = vld [vmem:[#allocation2 + $0x50] sm:$0xf] }
 0x1c0   : > { %v9677_v32 = vpop.f32.mrb[35].mxu1 }
 0x1c1   : > { %v11801_v33 = vadd.f32 %v9677_v32, %v9676_v29  ;;  %v2127_v29 = vrot.slane %v2125_v20, 4  ;;  %v2130_v32 = vrot.slane %v2128_v22, 5 }
 0x1c5   : > { %v9679_v34 = vpop.f32.mrb[36].mxu1 }
 0x1c6   : > { %v9680_v36 = vpop.f32.mrb[37].mxu1 }
 0x1c7   : > { %v11803_v37 = vadd.f32 %v9680_v36, %v9679_v34  ;;  %v9682_v38 = vpop.f32.mrb[38].mxu1 }
 0x1c8   : > { %v9683_v39 = vpop.f32.mrb[39].mxu1 }
 0x1c9   : > { %v11805_v41 = vadd.f32 %v9683_v39, %v9682_v38  ;;  %v2237_v39 = vshrl.u32 %v2049_v25, 16 }
 0x1cd   : > { %v9685_v42 = vpop.f32.mrb[40].mxu1 }
 0x1ce   : > { %v9686_v43 = vpop.f32.mrb[41].mxu1 }
 0x1cf   : > { %v11807_v44 = vadd.f32 %v9686_v43, %v9685_v42  ;;  %v9688_v45 = vpop.f32.mrb[42].mxu1  ;;  %v2240_v42 = vshll.u32 %v2049_v25, 16 }
 0x1d0   : > { %v9689_v47 = vpop.f32.mrb[43].mxu1 }
 0x1d1   : > { %v11809_v48 = vadd.f32 %v9689_v47, %v9688_v45  ;;  %v11834_v45 = vld [vmem:[#allocation2 + $0x4] sm:$0x1]  ;;  %v11839_v47 = vld [vmem:[%s13972_s2] ss:$0 sm:$0xff] }
 0x1d2   : > { %v11868_v16 = vadd.f32 %v11774_v50, %v11839_v47  ;;  %v3268_v25 = vrot.slane %v11834_v45, 5  ;;  %v11885_v50 = vadd.f32 %v11785_v5, %v11839_v47 }
 0x1d5   : > { %v9691_v49 = vpop.f32.mrb[44].mxu1 }
 0x1d6   : > { %v9692_v51 = vpop.f32.mrb[45].mxu1 }
 0x1d7   : > { %v11813_v53 = vadd.f32 %v9692_v51, %v9691_v49  ;;  %v9694_v54 = vpop.f32.mrb[46].mxu1  ;;  %v2131_v49 = vor.u32 %v2130_v32, %v2127_v29  ;;  %v2134_v51 = vshll.u32 %v11834_v45, 16  ;;  %v11897_v29 = vadd.f32 %v11789_v11, %v11839_v47 }
 0x1d8   : > { %v9695_v56 = vpop.f32.mrb[47].mxu1  ;;  %v11917_v11 = vadd.f32 %v11797_v24, %v11839_v47  ;;  %v11937_v24 = vadd.f32 %v11807_v44, %v11839_v47 }
 0x1d9   : > { %v11816_v57 = vadd.f32 %v9695_v56, %v9694_v54  ;;  %v2239_v54 = vrot.slane %v2237_v39, 4  ;;  %v2242_v56 = vrot.slane %v2240_v42, 5 }
 0x1dd   : > { %v9697_v58 = vpop.f32.mrb[48].mxu1 }
 0x1de   : > { %v9698_v59 = vpop.f32.mrb[49].mxu1 }
 0x1df   : > { %v11818_v61 = vadd.f32 %v9698_v59, %v9697_v58  ;;  %v9700_v62 = vpop.f32.mrb[50].mxu1  ;;  %v1027_v59 = vadd.f32 %v11679_v26, %v11839_v47  ;;  %v11854_v26 = vadd.f32 %v11768_v40, %v11839_v47  ;;  %v11872_v40 = vadd.f32 %v11777_v55, %v11839_v47 }
 0x1e0   : > { %v9701_v63 = vpop.f32.mrb[51].mxu1  ;;  %v11889_v55 = vadd.f32 %v11787_v8, %v11839_v47  ;;  %v11909_v8 = vadd.f32 %v11795_v21, %v11839_v47  ;;  %v11929_v21 = vadd.f32 %v11803_v37, %v11839_v47  ;;  %v11945_v37 = vadd.f32 %v11813_v53, %v11839_v47 }
 0x1e1   : > { %v11820_v0 = vadd.f32 %v9701_v63, %v9700_v62  ;;  %v1030_v62 = vadd.f32 %v11682_v30, %v11839_v47  ;;  %v1035_v63 = vadd.f32 %v11765_v35, %v11839_v47  ;;  %v11858_v30 = vadd.f32 %v11772_v46, %v11839_v47 }
 0x1e2   : > { %v11959_v53 = vadd.f32 %v11816_v57, %v11839_v47  ;;  %v14056_v57 = vmov 0 }
 0x1e3   : > { %v14057_v57 = vsel %vm11969_vm11, 4294967295, %v14056_v57 }
 0x1e4   : > { %14058 = vst [vmem:[#allocation17_spill] sm:$0xff] %v14057_v57 }
 0x1e5   : > { %v9703_v2 = vpop.f32.mrb[52].mxu1 }
 0x1e6   : > { %v9704_v3 = vpop.f32.mrb[53].mxu1 }
 0x1e7   : > { %v11822_v4 = vadd.f32 %v9704_v3, %v9703_v2  ;;  %v9706_v6 = vpop.f32.mrb[54].mxu1  ;;  %v11848_v3 = vrot.slane %v2131_v49, 4 }
 0x1e8   : > { %v9707_v7 = vpop.f32.mrb[55].mxu1 }
 0x1e9   : > { %v11824_v9 = vadd.f32 %v9707_v7, %v9706_v6  ;;  %v11850_v6 = vrot.slane %v2134_v51, 5  ;;  %v11925_v51 = vadd.f32 %v11801_v33, %v11839_v47 }
 0x1ed   : > { %v9709_v10 = vpop.f32.mrb[56].mxu1 }
 0x1ee   : > { %v9710_v12 = vpop.f32.mrb[57].mxu1 }
 0x1ef   : > { %v11826_v13 = vadd.f32 %v9710_v12, %v9709_v10  ;;  %v9712_v14 = vpop.f32.mrb[58].mxu1  ;;  %v2097_v12 = vld [vmem:[#allocation2 + $0x54] sm:$0x1] }
 0x1f0   : > { %v9713_v17 = vpop.f32.mrb[59].mxu1  ;;  %v2246_v20 = vshll.u32 %v2097_v12, 16 }
 0x1f1   : > { %v11828_v19 = vadd.f32 %v9713_v17, %v9712_v14  ;;  %v2243_v17 = vor.u32 %v2242_v56, %v2239_v54  ;;  %v11933_v54 = vadd.f32 %v11805_v41, %v11839_v47  ;;  %v11941_v56 = vadd.f32 %v11809_v48, %v11839_v47 }
 0x1f2   : > { %v11913_v39 = vrot.slane %v2246_v20, 5 }
 0x1f3   : > { %v12010_v45 = vadd.f32 %v11828_v19, %v11839_v47 }
 0x1f5   : > { %v9715_v23 = vpop.f32.mrb[60].mxu1 }
 0x1f6   : > { %v9716_v27 = vpop.f32.mrb[61].mxu1 }
 0x1f7   : > { %v11830_v34 = vadd.f32 %v9716_v27, %v9715_v23  ;;  %v9718_v36 = vpop.f32.mrb[62].mxu1  ;;  %v11876_v23 = vadd.f32 %v11780_v60, %v11839_v47  ;;  %v11881_v27 = vadd.f32 %v11783_v1, %v11839_v47  ;;  %v11901_v1 = vadd.f32 %v11791_v15, %v11839_v47 }
 0x1f8   : > { %v9719_v38 = vpop.f32.mrb[63].mxu1  ;;  %v11921_v15 = vadd.f32 %v11799_v28, %v11839_v47 }
 0x1f9   : > { %v11832_v43 = vadd.f32 %v9719_v38, %v9718_v36  ;;  %v11905_v36 = vadd.f32 %v11793_v18, %v11839_v47  ;;  %v11911_v38 = vrot.slane %v2243_v17, 4  ;;  %v1846_v17 = vld [vmem:[#allocation2 + $0x8] sm:$0xf] }
 0x1fd   : > { %v9737_v58 = vpop.f32.mrb[64].mxu1 }
 0x1fe   : > { %v9738_v2 = vpop.f32.mrb[65].mxu1 }
 0x1ff   : > { %v9739_v7 = vadd.f32 %v9738_v2, %v9737_v58  ;;  %v9740_v10 = vpop.f32.mrb[66].mxu1  ;;  %v3167_v2 = vld [vmem:[#allocation2] sm:$0xe] }
 0x200   : > { %v9741_v14 = vpop.f32.mrb[67].mxu1 }
 0x201   : > { %v1188_v46 = vadd.f32 %v9739_v7, %v1027_v59  ;;  %v9742_v22 = vadd.f32 %v9741_v14, %v9740_v10 }
 0x203   : > { %v1314_v32 = vmax.f32 %v1188_v46, 0.0  ;;  %v1191_v5 = vadd.f32 %v9742_v22, %v1030_v62  ;;  %v1852_v46 = vld [vmem:[#allocation2 + $0xc] sm:$0x1] }
 0x205   : > { %v9511_v42 = vpack.c.bf16 %v1314_v32, %v1314_v32  ;;  %v1315_v49 = vmax.f32 %v1191_v5, 0.0  ;;  %v9743_v18 = vpop.f32.mrb[68].mxu1  ;;  %v9142_v5 = vrot.slane %v3167_v2, 9 }
 0x206   : > { %v9744_v28 = vpop.f32.mrb[69].mxu1 }
 0x207   : > { %v1523_v58 = vshrl.u32 %v9511_v42, 16  ;;  %v9512_v33 = vpack.c.bf16 %v1315_v49, %v1315_v49  ;;  %v9745_v59 = vadd.f32 %v9744_v28, %v9743_v18  ;;  %v9746_v62 = vpop.f32.mrb[70].mxu1  ;;  %v1526_v48 = vshll.u32 %v9511_v42, 16 }
 0x208   : > { %v9747_v41 = vpop.f32.mrb[71].mxu1 }
 0x209   : > { %v1525_v7 = vrot.slane %v1523_v58, 7  ;;  %v1531_v12 = vshrl.u32 %v9512_v33, 16  ;;  %v1196_v14 = vadd.f32 %v9745_v59, %v1035_v63  ;;  %v1534_v22 = vshll.u32 %v9512_v33, 16  ;;  %v1855_v59 = vld [vmem:[#allocation2 + $0x10] sm:$0xf] }
 0x20a   : > { %v9748_v32 = vadd.f32 %v9747_v41, %v9746_v62  ;;  %v11975_v63 = vadd.f32 %v11818_v61, %v11839_v47  ;;  %v11979_v58 = vadd.f32 %v11820_v0, %v11839_v47  ;;  %v11983_v33 = vadd.f32 %v11822_v4, %v11839_v47  ;;  %v1858_v62 = vld [vmem:[#allocation2 + $0x14] sm:$0x1]  ;;  %v2057_v41 = vld [vmem:[#allocation2 + $0xa0] sm:$0xf] }
 0x20b   : > { %v1528_v42 = vor.u32 %v1526_v48, %v1525_v7  ;;  %v1529_v49 = vrot.slane %v1525_v7, 4  ;;  %v1533_v18 = vrot.slane %v1531_v12, 7  ;;  %v1316_v28 = vmax.f32 %v1196_v14, 0.0 }
 0x20c   : > { %v1199_v2 = vadd.f32 %v9748_v32, %v11854_v26  ;;  %v11992_v0 = vadd.f32 %v11824_v9, %v11839_v47  ;;  %v11998_v26 = vsel %vm11969_vm11, %v9142_v5, %v3268_v25  ;;  %v2349_v32 = vshrl.u32 %v2057_v41, 16 }
 0x20d   : > { %v1847_v7 = vsel %vm11953_vm9, %v1528_v42, %v1846_v17  ;;  %v1853_v61 = vsel %vm11963_vm10, %v1529_v49, %v1852_v46  ;;  %v1536_v48 = vor.u32 %v1534_v22, %v1533_v18  ;;  %v1537_v12 = vrot.slane %v1533_v18, 4  ;;  %v9749_v14 = vpop.f32.mrb[72].mxu1  ;;  %14059 = vst [vmem:[#allocation18_spill] sm:$0xff] %v11998_v26  ;;  %v2105_v18 = vld [vmem:[#allocation2 + $0xa4] sm:$0x1] }
 0x20e   : > { %1848 = vst [vmem:[#allocation2 + $0x8] sm:$0xf] %v1847_v7  ;;  %1854 = vst [vmem:[#allocation2 + $0xc] sm:$0x1] %v1853_v61  ;;  %v9513_v4 = vpack.c.bf16 %v1316_v28, %v1316_v28  ;;  %v1317_v31 = vmax.f32 %v1199_v2, 0.0  ;;  %v9750_v44 = vpop.f32.mrb[73].mxu1  ;;  %v12006_v42 = vadd.f32 %v11826_v13, %v11839_v47  ;;  %v12015_v2 = vadd.f32 %v11830_v34, %v11839_v47 }
 0x20f   : > { %v1856_v17 = vsel %vm11953_vm9, %v1536_v48, %v1855_v59  ;;  %v1859_v46 = vsel %vm11963_vm10, %v1537_v12, %v1858_v62  ;;  %v9751_v22 = vadd.f32 %v9750_v44, %v9749_v14  ;;  %v9752_v9 = vpop.f32.mrb[74].mxu1  ;;  %v2352_v44 = vshll.u32 %v2057_v41, 16  ;;  %v1861_v61 = vld [vmem:[#allocation2 + $0x18] sm:$0xf]  ;;  %v1867_v12 = vld [vmem:[#allocation2 + $0x20] sm:$0xf] }
 0x210   : > { %1857 = vst [vmem:[#allocation2 + $0x10] sm:$0xf] %v1856_v17  ;;  %1860 = vst [vmem:[#allocation2 + $0x14] sm:$0x1] %v1859_v46  ;;  %v1539_v25 = vshrl.u32 %v9513_v4, 16  ;;  %v9514_v5 = vpack.c.bf16 %v1317_v31, %v1317_v31  ;;  %v9753_v49 = vpop.f32.mrb[75].mxu1  ;;  %v12019_v48 = vadd.f32 %v11832_v43, %v11839_v47 }
 0x211   : > { %v1204_v28 = vadd.f32 %v9751_v22, %v11858_v30  ;;  %v9754_v59 = vadd.f32 %v9753_v49, %v9752_v9  ;;  %v2358_v62 = vshll.u32 %v2105_v18, 16  ;;  %v1542_v7 = vshll.u32 %v9513_v4, 16  ;;  %v1864_v31 = vld [vmem:[#allocation2 + $0x1c] sm:$0x1]  ;;  %v1870_v9 = vld [vmem:[#allocation2 + $0x24] sm:$0x1] }
 0x212   : > { %v1541_v13 = vrot.slane %v1539_v25, 7  ;;  %v1547_v19 = vshrl.u32 %v9514_v5, 16  ;;  %14060 = vst [vmem:[#allocation19_spill] sm:$0xff] %v12019_v48  ;;  %v12022_v17 = vrot.slane %v2349_v32, 4  ;;  %v1550_v34 = vshll.u32 %v9514_v5, 16 }
 0x213   : > { %v1318_v14 = vmax.f32 %v1204_v28, 0.0  ;;  %v1207_v30 = vadd.f32 %v9754_v59, %v11868_v16  ;;  %v12024_v60 = vrot.slane %v2352_v44, 5  ;;  %v12026_v43 = vrot.slane %v2358_v62, 5  ;;  %v1879_v48 = vld [vmem:[#allocation2 + $0x30] sm:$0xf] }
 0x214   : > { %v1544_v41 = vor.u32 %v1542_v7, %v1541_v13  ;;  %v1545_v46 = vrot.slane %v1541_v13, 4  ;;  %v1549_v22 = vrot.slane %v1547_v19, 7 }
 0x215   : > { %v9515_v25 = vpack.c.bf16 %v1318_v14, %v1318_v14  ;;  %v1319_v4 = vmax.f32 %v1207_v30, 0.0  ;;  %v9755_v49 = vpop.f32.mrb[76].mxu1  ;;  %v2042_v18 = vld [vmem:[#allocation2 + $0x8] sm:$0xf]  ;;  %v2090_v44 = vld [vmem:[#allocation2 + $0xc] sm:$0x1] }
 0x216   : > { %v1862_v47 = vsel %vm11953_vm9, %v1544_v41, %v1861_v61  ;;  %v1865_v16 = vsel %vm11963_vm10, %v1545_v46, %v1864_v31  ;;  %v1552_v32 = vor.u32 %v1550_v34, %v1549_v22  ;;  %v1553_v28 = vrot.slane %v1549_v22, 4  ;;  %v9756_v59 = vpop.f32.mrb[77].mxu1  ;;  %v1873_v22 = vld [vmem:[#allocation2 + $0x28] sm:$0xf] }
 0x217   : > { %1863 = vst [vmem:[#allocation2 + $0x18] sm:$0xf] %v1862_v47  ;;  %1866 = vst [vmem:[#allocation2 + $0x1c] sm:$0x1] %v1865_v16  ;;  %v1555_v5 = vshrl.u32 %v9515_v25, 16  ;;  %v1558_v13 = vshll.u32 %v9515_v25, 16  ;;  %v9516_v7 = vpack.c.bf16 %v1319_v4, %v1319_v4  ;;  %v9757_v19 = vadd.f32 %v9756_v59, %v9755_v49 }
 0x218   : > { %v9758_v14 = vpop.f32.mrb[78].mxu1  ;;  %v1868_v62 = vsel %vm11953_vm9, %v1552_v32, %v1867_v12  ;;  %v1871_v61 = vsel %vm11963_vm10, %v1553_v28, %v1870_v9  ;;  %v2139_v41 = vshrl.u32 %v2042_v18, 16  ;;  %v2142_v31 = vshll.u32 %v2042_v18, 16  ;;  %v1876_v4 = vld [vmem:[#allocation2 + $0x2c] sm:$0x1] }
 0x219   : > { %v9759_v30 = vpop.f32.mrb[79].mxu1  ;;  %1869 = vst [vmem:[#allocation2 + $0x20] sm:$0xf] %v1868_v62  ;;  %1872 = vst [vmem:[#allocation2 + $0x24] sm:$0x1] %v1871_v61  ;;  %v1557_v46 = vrot.slane %v1555_v5, 7  ;;  %v1212_v25 = vadd.f32 %v9757_v19, %v11872_v40 }
 0x21a   : > { %v1563_v34 = vshrl.u32 %v9516_v7, 16  ;;  %v1566_v47 = vshll.u32 %v9516_v7, 16  ;;  %v9760_v49 = vadd.f32 %v9759_v30, %v9758_v14  ;;  %v2141_v16 = vrot.slane %v2139_v41, 4  ;;  %v2043_v28 = vld [vmem:[#allocation2 + $0x10] sm:$0xf] }
 0x21b   : > { %v2144_v59 = vrot.slane %v2142_v31, 5  ;;  %v2148_v26 = vshll.u32 %v2090_v44, 16  ;;  %v1560_v12 = vor.u32 %v1558_v13, %v1557_v46  ;;  %v1561_v32 = vrot.slane %v1557_v46, 4  ;;  %v1882_v18 = vld [vmem:[#allocation2 + $0x34] sm:$0x1] }
 0x21c   : > { %v1565_v57 = vrot.slane %v1563_v34, 7  ;;  %v1320_v9 = vmax.f32 %v1212_v25, 0.0  ;;  %v1215_v62 = vadd.f32 %v9760_v49, %v11876_v23  ;;  %v2355_v7 = vor.u32 %v12024_v60, %v12022_v17  ;;  %v2091_v34 = vld [vmem:[#allocation2 + $0x14] sm:$0x1] }
 0x21d   : > { %v2145_v5 = vor.u32 %v2144_v59, %v2141_v16  ;;  %v2150_v61 = vrot.slane %v2148_v26, 5  ;;  %v1874_v40 = vsel %vm11953_vm9, %v1560_v12, %v1873_v22  ;;  %v1877_v19 = vsel %vm11963_vm10, %v1561_v32, %v1876_v4  ;;  %v9761_v44 = vpop.f32.mrb[80].mxu1  ;;  %v1885_v12 = vld [vmem:[#allocation2 + $0x38] sm:$0xf]  ;;  %v1888_v32 = vld [vmem:[#allocation2 + $0x3c] sm:$0x1] }
 0x21e   : > { %v1568_v13 = vor.u32 %v1566_v47, %v1565_v57  ;;  %v1569_v14 = vrot.slane %v1565_v57, 4  ;;  %1875 = vst [vmem:[#allocation2 + $0x28] sm:$0xf] %v1874_v40  ;;  %1878 = vst [vmem:[#allocation2 + $0x2c] sm:$0x1] %v1877_v19  ;;  %v9517_v30 = vpack.c.bf16 %v1320_v9, %v1320_v9  ;;  %v1321_v41 = vmax.f32 %v1215_v62, 0.0 }
 0x21f   : > { %v9762_v31 = vpop.f32.mrb[81].mxu1  ;;  %v2146_v23 = vrot.slane %v2145_v5, 4  ;;  %v2153_v46 = vshrl.u32 %v2043_v28, 16  ;;  %v2156_v25 = vshll.u32 %v2043_v28, 16  ;;  %v2044_v59 = vld [vmem:[#allocation2 + $0x18] sm:$0xf]  ;;  %v14061_v28 = vsel %vm11862_vm6, %v11848_v3, %v11850_v6 }
 0x220   : > { %v1880_v26 = vsel %vm11953_vm9, %v1568_v13, %v1879_v48  ;;  %v1883_v60 = vsel %vm11963_vm10, %v1569_v14, %v1882_v18  ;;  %v9763_v17 = vadd.f32 %v9762_v31, %v9761_v44  ;;  %v9764_v22 = vpop.f32.mrb[82].mxu1  ;;  %v1571_v57 = vshrl.u32 %v9517_v30, 16  ;;  %v1891_v14 = vld [vmem:[#allocation2 + $0x40] sm:$0xf] }
 0x221   : > { %1881 = vst [vmem:[#allocation2 + $0x30] sm:$0xf] %v1880_v26  ;;  %1884 = vst [vmem:[#allocation2 + $0x34] sm:$0x1] %v1883_v60  ;;  %v1574_v47 = vshll.u32 %v9517_v30, 16  ;;  %v9518_v4 = vpack.c.bf16 %v1321_v41, %v1321_v41  ;;  %v9765_v49 = vpop.f32.mrb[83].mxu1  ;;  %v2151_v16 = vsel %vm11862_vm6, %v2146_v23, %v2150_v61 }
 0x222   : > { %v1220_v48 = vadd.f32 %v9763_v17, %v11881_v27  ;;  %v9766_v9 = vadd.f32 %v9765_v49, %v9764_v22  ;;  %v9094_v18 = vcombine.low %v14061_v28, %v2151_v16  ;;  %v2155_v62 = vrot.slane %v2153_v46, 4  ;;  %v1894_v60 = vld [vmem:[#allocation2 + $0x44] sm:$0x1] }
 0x223   : > { %v1573_v5 = vrot.slane %v1571_v57, 7  ;;  %v1579_v40 = vshrl.u32 %v9518_v4, 16  ;;  %v1582_v19 = vshll.u32 %v9518_v4, 16  ;;  %v2158_v13 = vrot.slane %v2156_v25, 5 }
 0x224   : > { %v1322_v44 = vmax.f32 %v1220_v48, 0.0  ;;  %v1223_v61 = vadd.f32 %v9766_v9, %v11885_v50  ;;  %10065 = vmatprep.mubr.bf16.mxu0 %v9094_v18  ;;  %v2162_v30 = vshll.u32 %v2091_v34, 16  ;;  %v2167_v41 = vshrl.u32 %v2044_v59, 16  ;;  %v2092_v9 = vld [vmem:[#allocation2 + $0x1c] sm:$0x1] }
 0x225   : > { %v1576_v27 = vor.u32 %v1574_v47, %v1573_v5  ;;  %v1577_v31 = vrot.slane %v1573_v5, 4  ;;  %v1581_v23 = vrot.slane %v1579_v40, 7  ;;  %v2159_v26 = vor.u32 %v2158_v13, %v2155_v62  ;;  %v9767_v6 = vpop.f32.mrb[84].mxu1  ;;  %v1897_v18 = vld [vmem:[#allocation2 + $0x58] sm:$0xf] }
 0x226   : > { %v9519_v17 = vpack.c.bf16 %v1322_v44, %v1322_v44  ;;  %v1323_v3 = vmax.f32 %v1223_v61, 0.0  ;;  %v12057_v46 = vrot.slane %v2162_v30, 5  ;;  %v12059_v22 = vrot.slane %v2355_v7, 4  ;;  %v9768_v47 = vpop.f32.mrb[85].mxu1  ;;  %v1900_v62 = vld [vmem:[#allocation2 + $0x5c] sm:$0x1] }
 0x227   : > { %v1886_v25 = vsel %vm11953_vm9, %v1576_v27, %v1885_v12  ;;  %v1889_v50 = vsel %vm11963_vm10, %v1577_v31, %v1888_v32  ;;  %v1584_v34 = vor.u32 %v1582_v19, %v1581_v23  ;;  %v1585_v57 = vrot.slane %v1581_v23, 4  ;;  %v9770_v48 = vpop.f32.mrb[86].mxu1 }
 0x228   : > { %1887 = vst [vmem:[#allocation2 + $0x38] sm:$0xf] %v1886_v25  ;;  %1890 = vst [vmem:[#allocation2 + $0x3c] sm:$0x1] %v1889_v50  ;;  %v1587_v4 = vshrl.u32 %v9519_v17, 16  ;;  %v9520_v49 = vpack.c.bf16 %v1323_v3, %v1323_v3  ;;  %v9769_v16 = vadd.f32 %v9768_v47, %v9767_v6  ;;  %v2169_v28 = vrot.slane %v2167_v41, 4 }
 0x229   : > { %v1892_v7 = vsel %vm11953_vm9, %v1584_v34, %v1891_v14  ;;  %v1895_v12 = vsel %vm11963_vm10, %v1585_v57, %v1894_v60  ;;  %v9771_v32 = vpop.f32.mrb[87].mxu1  ;;  %v2160_v5 = vrot.slane %v2159_v26, 4  ;;  %v2170_v40 = vshll.u32 %v2044_v59, 16  ;;  %v1903_v6 = vld [vmem:[#allocation2 + $0x60] sm:$0xf] }
 0x22a   : > { %1893 = vst [vmem:[#allocation2 + $0x40] sm:$0xf] %v1892_v7  ;;  %1896 = vst [vmem:[#allocation2 + $0x44] sm:$0x1] %v1895_v12  ;;  %v1589_v19 = vrot.slane %v1587_v4, 7  ;;  %v1590_v13 = vshll.u32 %v9519_v17, 16  ;;  %v1228_v61 = vadd.f32 %v9769_v16, %v11889_v55  ;;  %v9772_v41 = vadd.f32 %v9771_v32, %v9770_v48 }
 0x22b   : > { %v1595_v44 = vshrl.u32 %v9520_v49, 16  ;;  %v1598_v30 = vshll.u32 %v9520_v49, 16  ;;  %v2172_v27 = vrot.slane %v2170_v40, 5  ;;  %v2176_v31 = vshll.u32 %v2092_v9, 16  ;;  %v1906_v25 = vld [vmem:[#allocation2 + $0x64] sm:$0x1] }
 0x22c   : > { %v1592_v14 = vor.u32 %v1590_v13, %v1589_v19  ;;  %v1593_v23 = vrot.slane %v1589_v19, 4  ;;  %v1324_v60 = vmax.f32 %v1228_v61, 0.0  ;;  %v1231_v26 = vadd.f32 %v9772_v41, %v11897_v29  ;;  %v12074_v50 = vld [vmem:[#allocation2 + $0x20] sm:$0xf]  ;;  %v1912_v41 = vld [vmem:[#allocation2 + $0x6c] sm:$0x1] }
 0x22d   : > { %v1597_v3 = vrot.slane %v1595_v44, 7  ;;  %v2165_v59 = vsel %vm11862_vm6, %v2160_v5, %v12057_v46  ;;  %v2173_v17 = vor.u32 %v2172_v27, %v2169_v28  ;;  %v2361_v55 = vsel %vm11862_vm6, %v12059_v22, %v12026_v43  ;;  %v9773_v4 = vpop.f32.mrb[88].mxu1  ;;  %v2093_v28 = vld [vmem:[#allocation2 + $0x24] sm:$0x1] }
 0x22e   : > { %v1898_v34 = vsel %vm11953_vm9, %v1592_v14, %v1897_v18  ;;  %v1901_v57 = vsel %vm11963_vm10, %v1593_v23, %v1900_v62  ;;  %v9521_v46 = vpack.c.bf16 %v1324_v60, %v1324_v60  ;;  %v1325_v49 = vmax.f32 %v1231_v26, 0.0  ;;  %v9774_v9 = vpop.f32.mrb[89].mxu1  ;;  %v12088_v62 = vld [vmem:[#allocation2 + $0x28] sm:$0xf] }
 0x22f   : > { %v1600_v47 = vor.u32 %v1598_v30, %v1597_v3  ;;  %v1601_v29 = vrot.slane %v1597_v3, 4  ;;  %1899 = vst [vmem:[#allocation2 + $0x58] sm:$0xf] %v1898_v34  ;;  %1902 = vst [vmem:[#allocation2 + $0x5c] sm:$0x1] %v1901_v57  ;;  %v2174_v16 = vrot.slane %v2173_v17, 4  ;;  %v9775_v18 = vadd.f32 %v9774_v9, %v9773_v4 }
 0x230   : > { %v2178_v48 = vrot.slane %v2176_v31, 5  ;;  %v9776_v32 = vpop.f32.mrb[90].mxu1  ;;  %v2181_v5 = vshrl.u32 %v12074_v50, 16  ;;  %v1603_v40 = vshrl.u32 %v9521_v46, 16  ;;  %v1606_v19 = vshll.u32 %v9521_v46, 16  ;;  %v10974_v3 = vld [vmem:[#allocation8 + $0x8] sm:$0xff]  }
 0x231   : > { %v1904_v7 = vsel %vm11953_vm9, %v1600_v47, %v1903_v6  ;;  %v1907_v12 = vsel %vm11963_vm10, %v1601_v29, %v1906_v25  ;;  %v9522_v13 = vpack.c.bf16 %v1325_v49, %v1325_v49  ;;  %v9777_v61 = vpop.f32.mrb[91].mxu1  ;;  %v1909_v30 = vld [vmem:[#allocation2 + $0x68] sm:$0xf]  ;;  %v1236_v31 = vadd.f32 %v9775_v18, %v11901_v1  ;;  %v1915_v17 = vld [vmem:[#allocation2 + $0x70] sm:$0xf] }
 0x232   : > { %1905 = vst [vmem:[#allocation2 + $0x60] sm:$0xf] %v1904_v7  ;;  %1908 = vst [vmem:[#allocation2 + $0x64] sm:$0x1] %v1907_v12  ;;  %v2179_v44 = vsel %vm11862_vm6, %v2174_v16, %v2178_v48  ;;  %v9778_v14 = vadd.f32 %v9777_v61, %v9776_v32  ;;  %v2183_v23 = vrot.slane %v2181_v5, 4  ;;  %v1605_v60 = vrot.slane %v1603_v40, 7 }
 0x233   : > { %v9095_v27 = vcombine.low %v2165_v59, %v2179_v44  ;;  %v1611_v6 = vshrl.u32 %v9522_v13, 16  ;;  %v1614_v25 = vshll.u32 %v9522_v13, 16  ;;  %v2184_v26 = vshll.u32 %v12074_v50, 16  ;;  %v1918_v1 = vld [vmem:[#allocation2 + $0x74] sm:$0x1] }
 0x234   : > { %v1326_v34 = vmax.f32 %v1236_v31, 0.0  ;;  %v1239_v57 = vadd.f32 %v9778_v14, %v11905_v36  ;;  %v2190_v47 = vshll.u32 %v2093_v28, 16  ;;  %v2195_v29 = vshrl.u32 %v12088_v62, 16  ;;  %v10975_v16 = vld [vmem:[#allocation8 + $0x10] sm:$0xff]   ;;  %v2094_v7 = vld [vmem:[#allocation2 + $0x2c] sm:$0x1] }
 0x235   : > { %10066 = vmatmul.mubr.bf16.vlgmr.msra.gmra.mrb[0].mxu0 %v9095_v27  ;;  %v1608_v4 = vor.u32 %v1606_v19, %v1605_v60  ;;  %v1609_v59 = vrot.slane %v1605_v60, 4  ;;  %v1613_v46 = vrot.slane %v1611_v6, 7  ;;  %v2186_v49 = vrot.slane %v2184_v26, 5  ;;  %v9779_v32 = vpop.f32.mrb[92].mxu1  ;;  %v1924_v60 = vld [vmem:[#allocation2 + $0x7c] sm:$0x1] }
 0x236   : > { %10098 = vmatpush3.bf16.msra.mxu0 %v11811_v52  ;;  %v9523_v48 = vpack.c.bf16 %v1326_v34, %v1326_v34  ;;  %v1327_v9 = vmax.f32 %v1239_v57, 0.0  ;;  %v12098_v12 = vrot.slane %v2190_v47, 5  ;;  %v2197_v18 = vrot.slane %v2195_v29, 4  ;;  %v9780_v19 = vpop.f32.mrb[93].mxu1  ;;  %v10976_v26 = vld [vmem:[#allocation8 + $0x18] sm:$0xff]  }
 0x237   : > { %10099 = vmatprep.subr.bf16.mxu0 %v10974_v3  ;;  %v1910_v36 = vsel %vm11953_vm9, %v1608_v4, %v1909_v30  ;;  %v1913_v28 = vsel %vm11963_vm10, %v1609_v59, %v1912_v41  ;;  %v1616_v5 = vor.u32 %v1614_v25, %v1613_v46  ;;  %v1617_v40 = vrot.slane %v1613_v46, 4  ;;  %v9782_v27 = vpop.f32.mrb[94].mxu1  ;;  %v1921_v30 = vld [vmem:[#allocation2 + $0x78] sm:$0xf]  ;;  %v12109_v29 = vld [vmem:[#allocation2 + $0x30] sm:$0xf] }
 0x238   : > { %1911 = vst [vmem:[#allocation2 + $0x68] sm:$0xf] %v1910_v36  ;;  %1914 = vst [vmem:[#allocation2 + $0x6c] sm:$0x1] %v1913_v28  ;;  %v1619_v52 = vshrl.u32 %v9523_v48, 16  ;;  %v1622_v13 = vshll.u32 %v9523_v48, 16  ;;  %v9524_v44 = vpack.c.bf16 %v1327_v9, %v1327_v9  ;;  %v2187_v61 = vor.u32 %v2186_v49, %v2183_v23 }
 0x239   : > { %v1916_v31 = vsel %vm11953_vm9, %v1616_v5, %v1915_v17  ;;  %v1919_v14 = vsel %vm11963_vm10, %v1617_v40, %v1918_v1  ;;  %v2198_v41 = vshll.u32 %v12088_v62, 16  ;;  %v2204_v6 = vshll.u32 %v2094_v7, 16  ;;  %v9783_v25 = vpop.f32.mrb[95].mxu1  ;;  %v1927_v17 = vld [vmem:[#allocation2 + $0x80] sm:$0xf] }
 0x23a   : > { %10100 = vmatpush3.bf16.msra.mxu0 %v10974_v3  ;;  %1917 = vst [vmem:[#allocation2 + $0x70] sm:$0xf] %v1916_v31  ;;  %1920 = vst [vmem:[#allocation2 + $0x74] sm:$0x1] %v1919_v14  ;;  %v1621_v34 = vrot.slane %v1619_v52, 7  ;;  %v1627_v57 = vshrl.u32 %v9524_v44, 16  ;;  %v9781_v46 = vadd.f32 %v9780_v19, %v9779_v32  ;;  %v9784_v1 = vadd.f32 %v9783_v25, %v9782_v27 }
 0x23b   : > { %v1630_v23 = vshll.u32 %v9524_v44, 16  ;;  %v2188_v47 = vrot.slane %v2187_v61, 4  ;;  %10101 = vmatprep.subr.bf16.mxu0 %v10975_v16  ;;  %v2200_v4 = vrot.slane %v2198_v41, 5  ;;  %v2206_v59 = vrot.slane %v2204_v6, 5  ;;  %v1930_v7 = vld [vmem:[#allocation2 + $0x84] sm:$0x1] }
 0x23c   : > { %v1624_v49 = vor.u32 %v1622_v13, %v1621_v34  ;;  %v1625_v48 = vrot.slane %v1621_v34, 4  ;;  %v1629_v9 = vrot.slane %v1627_v57, 7  ;;  %v2095_v36 = vld [vmem:[#allocation2 + $0x34] sm:$0x1]  ;;  %v1244_v5 = vadd.f32 %v9781_v46, %v11909_v8  ;;  %v10977_v44 = vld [vmem:[#allocation8 + $0x20] sm:$0xff]  }
 0x23d   : > { %v2193_v3 = vsel %vm11862_vm6, %v2188_v47, %v12098_v12  ;;  %v2201_v28 = vor.u32 %v2200_v4, %v2197_v18  ;;  %v1247_v40 = vadd.f32 %v9784_v1, %v11917_v11  ;;  %v2209_v52 = vshrl.u32 %v12109_v29, 16  ;;  %v12121_v27 = vld [vmem:[#allocation2 + $0x38] sm:$0xf]  ;;  %v9785_v12 = vpop.f32.mrb[96].mxu1 }
 0x23e   : > { %10102 = vmatpush3.bf16.msra.mxu0 %v10975_v16  ;;  %v1922_v32 = vsel %vm11953_vm9, %v1624_v49, %v1921_v30  ;;  %v1925_v19 = vsel %vm11963_vm10, %v1625_v48, %v1924_v60  ;;  %v1632_v13 = vor.u32 %v1630_v23, %v1629_v9  ;;  %v1633_v61 = vrot.slane %v1629_v9, 4  ;;  %v9786_v16 = vpop.f32.mrb[97].mxu1  ;;  %v2096_v23 = vld [vmem:[#allocation2 + $0x3c] sm:$0x1]  ;;  %v12132_v48 = vld [vmem:[#allocation2 + $0x58] sm:$0xf] }
 0x23f   : > { %10103 = vmatprep.subr.bf16.mxu0 %v10976_v26  ;;  %1923 = vst [vmem:[#allocation2 + $0x78] sm:$0xf] %v1922_v32  ;;  %1926 = vst [vmem:[#allocation2 + $0x7c] sm:$0x1] %v1925_v19  ;;  %v2202_v8 = vrot.slane %v2201_v28, 4  ;;  %v1328_v11 = vmax.f32 %v1244_v5, 0.0 }
 0x240   : > { %v1329_v18 = vmax.f32 %v1247_v40, 0.0  ;;  %v2211_v31 = vrot.slane %v2209_v52, 4  ;;  %v1928_v14 = vsel %vm11953_vm9, %v1632_v13, %v1927_v17  ;;  %v1931_v30 = vsel %vm11963_vm10, %v1633_v61, %v1930_v7  ;;  %v9788_v6 = vpop.f32.mrb[98].mxu1  ;;  %v10978_v9 = vld [vmem:[#allocation8 + $0x28] sm:$0xff]   ;;  %v1939_v61 = vld [vmem:[#allocation2 + $0x90] sm:$0xf] }
 0x241   : > { %v2212_v60 = vshll.u32 %v12109_v29, 16  ;;  %v2218_v41 = vshll.u32 %v2095_v36, 16  ;;  %1929 = vst [vmem:[#allocation2 + $0x80] sm:$0xf] %v1928_v14  ;;  %1932 = vst [vmem:[#allocation2 + $0x84] sm:$0x1] %v1931_v30  ;;  %v2207_v25 = vsel %vm11862_vm6, %v2202_v8, %v2206_v59  ;;  %v9525_v34 = vpack.c.bf16 %v1328_v11, %v1328_v11 }
 0x242   : > { %v9526_v57 = vpack.c.bf16 %v1329_v18, %v1329_v18  ;;  %v2223_v47 = vshrl.u32 %v12121_v27, 16  ;;  %v9789_v4 = vpop.f32.mrb[99].mxu1  ;;  %10104 = vmatpush3.bf16.msra.mxu0 %v10976_v26  ;;  %v9096_v17 = vcombine.low %v2193_v3, %v2207_v25  ;;  %v2226_v49 = vshll.u32 %v12121_v27, 16  ;;  %v1933_v5 = vld [vmem:[#allocation2 + $0x88] sm:$0xf] }
 0x243   : > { %v2214_v46 = vrot.slane %v2212_v60, 5  ;;  %v2220_v1 = vrot.slane %v2218_v41, 5  ;;  %10105 = vmatprep.subr.bf16.mxu0 %v10977_v44  ;;  %v1635_v7 = vshrl.u32 %v9525_v34, 16  ;;  %v1638_v36 = vshll.u32 %v9525_v34, 16  ;;  %v1936_v40 = vld [vmem:[#allocation2 + $0x8c] sm:$0x1] }
 0x244   : > { %v1643_v28 = vshrl.u32 %v9526_v57, 16  ;;  %v1646_v59 = vshll.u32 %v9526_v57, 16  ;;  %10069 = vmatprep.mubr.bf16.mxu0 %v9096_v17  ;;  %v2225_v32 = vrot.slane %v2223_v47, 4  ;;  %v2228_v19 = vrot.slane %v2226_v49, 5  ;;  %v1942_v8 = vld [vmem:[#allocation2 + $0x94] sm:$0x1] }
 0x245   : > { %v2215_v52 = vor.u32 %v2214_v46, %v2211_v31  ;;  %v2232_v26 = vshll.u32 %v2096_v23, 16  ;;  %v1637_v3 = vrot.slane %v1635_v7, 7  ;;  %v9787_v11 = vadd.f32 %v9786_v16, %v9785_v12  ;;  %v9791_v25 = vpop.f32.mrb[100].mxu1  ;;  %v10979_v34 = vld [vmem:[#allocation8 + $0x30] sm:$0xff]   ;;  %v2098_v16 = vld [vmem:[#allocation2 + $0x5c] sm:$0x1] }
 0x246   : > { %v1645_v13 = vrot.slane %v1643_v28, 7  ;;  %v9790_v18 = vadd.f32 %v9789_v4, %v9788_v6  ;;  %10106 = vmatpush3.bf16.msra.mxu0 %v10977_v44  ;;  %v2229_v30 = vor.u32 %v2228_v19, %v2225_v32  ;;  %v2251_v41 = vshrl.u32 %v12132_v48, 16  ;;  %v9792_v23 = vpop.f32.mrb[101].mxu1 }
 0x247   : > { %v2216_v14 = vrot.slane %v2215_v52, 4  ;;  %v2234_v60 = vrot.slane %v2232_v26, 5  ;;  %10107 = vmatprep.subr.bf16.mxu0 %v10978_v9  ;;  %v1640_v57 = vor.u32 %v1638_v36, %v1637_v3  ;;  %v1641_v31 = vrot.slane %v1637_v3, 4  ;;  %v9794_v6 = vpop.f32.mrb[102].mxu1  ;;  %v10981_v52 = vld [vmem:[#allocation8 + $0x38] sm:$0xff]  }
 0x248   : > { %v1648_v47 = vor.u32 %v1646_v59, %v1645_v13  ;;  %v1649_v17 = vrot.slane %v1645_v13, 4  ;;  %v2230_v49 = vrot.slane %v2229_v30, 4  ;;  %v1252_v12 = vadd.f32 %v9787_v11, %v11921_v15  ;;  %v12147_v59 = vld [vmem:[#allocation2 + $0x60] sm:$0xf] }
 0x249   : > { %v2221_v46 = vsel %vm11862_vm6, %v2216_v14, %v2220_v1  ;;  %v1255_v44 = vadd.f32 %v9790_v18, %v11925_v51  ;;  %v1934_v4 = vsel %vm11953_vm9, %v1640_v57, %v1933_v5  ;;  %v1937_v7 = vsel %vm11963_vm10, %v1641_v31, %v1936_v40  ;;  %v9795_v1 = vpop.f32.mrb[103].mxu1 }
 0x24a   : > { %v1940_v36 = vsel %vm11953_vm9, %v1648_v47, %v1939_v61  ;;  %v1943_v28 = vsel %vm11963_vm10, %v1649_v17, %v1942_v8  ;;  %10108 = vmatpush3.bf16.msra.mxu0 %v10978_v9  ;;  %1935 = vst [vmem:[#allocation2 + $0x88] sm:$0xf] %v1934_v4  ;;  %1938 = vst [vmem:[#allocation2 + $0x8c] sm:$0x1] %v1937_v7  ;;  %v2235_v15 = vsel %vm11862_vm6, %v2230_v49, %v2234_v60  ;;  %v2099_v8 = vld [vmem:[#allocation2 + $0x64] sm:$0x1] }
 0x24b   : > { %1941 = vst [vmem:[#allocation2 + $0x90] sm:$0xf] %v1940_v36  ;;  %1944 = vst [vmem:[#allocation2 + $0x94] sm:$0x1] %v1943_v28  ;;  %v1330_v51 = vmax.f32 %v1252_v12, 0.0  ;;  %v1331_v5 = vmax.f32 %v1255_v44, 0.0  ;;  %10109 = vmatprep.subr.bf16.mxu0 %v10979_v34  ;;  %v9097_v32 = vcombine.low %v2221_v46, %v2235_v15  ;;  %v9793_v3 = vadd.f32 %v9792_v23, %v9791_v25 }
 0x24c   : > { %v2253_v40 = vrot.slane %v2251_v41, 4  ;;  %v2254_v19 = vshll.u32 %v12132_v48, 16  ;;  %v2260_v26 = vshll.u32 %v2098_v16, 16  ;;  %v9796_v9 = vadd.f32 %v9795_v1, %v9794_v6  ;;  %v12154_v60 = vld [vmem:[#allocation2 + $0x68] sm:$0xf]  ;;  %v12160_v4 = vld [vmem:[#allocation8 + $0x80] sm:$0xff]  }
 0x24d   : > { %v9527_v13 = vpack.c.bf16 %v1330_v51, %v1330_v51  ;;  %v9528_v61 = vpack.c.bf16 %v1331_v5, %v1331_v5  ;;  %v2265_v11 = vshrl.u32 %v12147_v59, 16  ;;  %10070 = vmatmul.mubr.bf16.gmra.mrb[4].mxu0 %v9097_v32  ;;  %v1260_v30 = vadd.f32 %v9793_v3, %v11929_v21  ;;  %v12157_v25 = vpop.f32.mrb[104].mxu1  ;;  %v1945_v23 = vld [vmem:[#allocation2 + $0xa8] sm:$0xf]  ;;  %v1948_v46 = vld [vmem:[#allocation2 + $0xac] sm:$0x1] }
 0x24e   : > { %v2256_v18 = vrot.slane %v2254_v19, 5  ;;  %v2262_v14 = vrot.slane %v2260_v26, 5  ;;  %v2268_v41 = vshll.u32 %v12147_v59, 16  ;;  %10110 = vmatpush3.bf16.msra.mxu0 %v10979_v34  ;;  %v1951_v49 = vld [vmem:[#allocation2 + $0xb0] sm:$0xf]  ;;  %v1263_v16 = vadd.f32 %v9796_v9, %v11933_v54  ;;  %v9798_v21 = vpop.f32.mrb[105].mxu1 }
 0x24f   : > { %v1651_v57 = vshrl.u32 %v9527_v13, 16  ;;  %v1654_v31 = vshll.u32 %v9527_v13, 16  ;;  %v1659_v47 = vshrl.u32 %v9528_v61, 16  ;;  %v1662_v17 = vshll.u32 %v9528_v61, 16  ;;  %10111 = vmatprep.subr.bf16.mxu0 %v10981_v52  ;;  %v9800_v15 = vpop.f32.mrb[106].mxu1 }
 0x250   : > { %v2257_v12 = vor.u32 %v2256_v18, %v2253_v40  ;;  %v1332_v44 = vmax.f32 %v1260_v30, 0.0  ;;  %v2267_v6 = vrot.slane %v2265_v11, 4  ;;  %v2270_v28 = vrot.slane %v2268_v41, 5  ;;  %v1954_v51 = vld [vmem:[#allocation2 + $0xb4] sm:$0x1]  ;;  %v9801_v40 = vpop.f32.mrb[107].mxu1 }
 0x251   : > { %v1653_v7 = vrot.slane %v1651_v57, 7  ;;  %v1661_v36 = vrot.slane %v1659_v47, 7  ;;  %v2274_v1 = vshll.u32 %v2099_v8, 16  ;;  %v1333_v32 = vmax.f32 %v1263_v16, 0.0  ;;  %v1957_v57 = vld [vmem:[#allocation2 + $0xb8] sm:$0xf] }
 0x252   : > { %v2258_v5 = vrot.slane %v2257_v12, 4  ;;  %v9529_v34 = vpack.c.bf16 %v1332_v44, %v1332_v44  ;;  %v2279_v19 = vshrl.u32 %v12154_v60, 16  ;;  %10112 = vmatpush3.bf16.msra.mxu0 %v10981_v52  ;;  %v2271_v44 = vor.u32 %v2270_v28, %v2267_v6 }
 0x253   : > { %v1656_v26 = vor.u32 %v1654_v31, %v1653_v7  ;;  %v1657_v3 = vrot.slane %v1653_v7, 4  ;;  %v1664_v54 = vor.u32 %v1662_v17, %v1661_v36  ;;  %v1665_v13 = vrot.slane %v1661_v36, 4  ;;  %10145 = vmatprep.subr.bf16.mxu0 %v12160_v4  ;;  %v2100_v31 = vld [vmem:[#allocation2 + $0x6c] sm:$0x1] }
 0x254   : > { %v2263_v61 = vsel %vm11862_vm6, %v2258_v5, %v2262_v14  ;;  %v1667_v9 = vshrl.u32 %v9529_v34, 16  ;;  %v1670_v11 = vshll.u32 %v9529_v34, 16  ;;  %v9530_v18 = vpack.c.bf16 %v1333_v32, %v1333_v32 }
 0x255   : > { %v1946_v8 = vsel %vm11953_vm9, %v1656_v26, %v1945_v23  ;;  %v1949_v30 = vsel %vm11963_vm10, %v1657_v3, %v1948_v46  ;;  %v1952_v41 = vsel %vm11953_vm9, %v1664_v54, %v1951_v49  ;;  %v1955_v52 = vsel %vm11963_vm10, %v1665_v13, %v1954_v51  ;;  %v1960_v23 = vld [vmem:[#allocation2 + $0xbc] sm:$0x1]  ;;  %v1963_v49 = vld [vmem:[#allocation2 + $0xc0] sm:$0xf]  ;;  %v9803_v51 = vpop.f32.mrb[108].mxu1 }
 0x256   : > { %1947 = vst [vmem:[#allocation2 + $0xa8] sm:$0xf] %v1946_v8  ;;  %1950 = vst [vmem:[#allocation2 + $0xac] sm:$0x1] %v1949_v30  ;;  %v14062_v14 = vsel %vm11862_vm6, %v11911_v38, %v11913_v39  ;;  %v1669_v17 = vrot.slane %v1667_v9, 7  ;;  %v1675_v46 = vshrl.u32 %v9530_v18, 16  ;;  %v9799_v13 = vadd.f32 %v9798_v21, %v12157_v25 }
 0x257   : > { %1953 = vst [vmem:[#allocation2 + $0xb0] sm:$0xf] %v1952_v41  ;;  %1956 = vst [vmem:[#allocation2 + $0xb4] sm:$0x1] %v1955_v52  ;;  %v9098_v47 = vcombine.low %v14062_v14, %v2263_v61  ;;  %v1678_v12 = vshll.u32 %v9530_v18, 16  ;;  %v2276_v16 = vrot.slane %v2274_v1, 5  ;;  %v9802_v61 = vadd.f32 %v9801_v40, %v9800_v15 }
 0x258   : > { %v2281_v7 = vrot.slane %v2279_v19, 4  ;;  %v2282_v36 = vshll.u32 %v12154_v60, 16  ;;  %v1672_v5 = vor.u32 %v1670_v11, %v1669_v17  ;;  %v1673_v34 = vrot.slane %v1669_v17, 4  ;;  %v1966_v26 = vld [vmem:[#allocation2 + $0xc4] sm:$0x1]  ;;  %v9804_v54 = vpop.f32.mrb[109].mxu1 }
 0x259   : > { %10073 = vmatprep.mubr.bf16.mxu0 %v9098_v47  ;;  %v1677_v32 = vrot.slane %v1675_v46, 7  ;;  %v2288_v3 = vshll.u32 %v2100_v31, 16  ;;  %v2272_v38 = vrot.slane %v2271_v44, 4  ;;  %v12181_v9 = vld [vmem:[#allocation2 + $0x70] sm:$0xf]  ;;  %v9806_v6 = vpop.f32.mrb[110].mxu1  ;;  %v1268_v15 = vadd.f32 %v9799_v13, %v11937_v24 }
 0x25a   : > { %v2284_v39 = vrot.slane %v2282_v36, 5  ;;  %v1958_v28 = vsel %vm11953_vm9, %v1672_v5, %v1957_v57  ;;  %v1961_v1 = vsel %vm11963_vm10, %v1673_v34, %v1960_v23  ;;  %v2101_v18 = vld [vmem:[#allocation2 + $0x74] sm:$0x1]  ;;  %v9807_v8 = vpop.f32.mrb[111].mxu1  ;;  %v12190_v40 = vld [vmem:[#allocation2 + $0x78] sm:$0xf]  ;;  %v1271_v57 = vadd.f32 %v9802_v61, %v11941_v56 }
 0x25b   : > { %v1680_v19 = vor.u32 %v1678_v12, %v1677_v32  ;;  %v1681_v11 = vrot.slane %v1677_v32, 4  ;;  %1959 = vst [vmem:[#allocation2 + $0xb8] sm:$0xf] %v1958_v28  ;;  %1962 = vst [vmem:[#allocation2 + $0xbc] sm:$0x1] %v1961_v1  ;;  %v2277_v30 = vsel %vm11862_vm6, %v2272_v38, %v2276_v16  ;;  %v2290_v21 = vrot.slane %v2288_v3, 5 }
 0x25c   : > { %v2285_v25 = vor.u32 %v2284_v39, %v2281_v7  ;;  %v2293_v31 = vshrl.u32 %v12181_v9, 16  ;;  %v1334_v47 = vmax.f32 %v1268_v15, 0.0  ;;  %v2296_v17 = vshll.u32 %v12181_v9, 16  ;;  %v2102_v46 = vld [vmem:[#allocation2 + $0x7c] sm:$0x1] }
 0x25d   : > { %v1964_v41 = vsel %vm11953_vm9, %v1680_v19, %v1963_v49  ;;  %v1967_v52 = vsel %vm11963_vm10, %v1681_v11, %v1966_v26  ;;  %v2302_v23 = vshll.u32 %v2101_v18, 16  ;;  %v1335_v24 = vmax.f32 %v1271_v57, 0.0  ;;  %v12203_v5 = vpop.f32.mrb[112].mxu1  ;;  %v12207_v1 = vld [vmem:[#allocation2 + $0x80] sm:$0xf] }
 0x25e   : > { %1965 = vst [vmem:[#allocation2 + $0xc0] sm:$0xf] %v1964_v41  ;;  %1968 = vst [vmem:[#allocation2 + $0xc4] sm:$0x1] %v1967_v52  ;;  %v2286_v14 = vrot.slane %v2285_v25, 4  ;;  %v2295_v12 = vrot.slane %v2293_v31, 4  ;;  %v9531_v56 = vpack.c.bf16 %v1334_v47, %v1334_v47  ;;  %v9808_v31 = vadd.f32 %v9807_v8, %v9806_v6 }
 0x25f   : > { %v2307_v44 = vshrl.u32 %v12190_v40, 16  ;;  %v2310_v49 = vshll.u32 %v12190_v40, 16  ;;  %v2298_v7 = vrot.slane %v2296_v17, 5  ;;  %v2304_v36 = vrot.slane %v2302_v23, 5  ;;  %v12205_v38 = vpop.f32.mrb[113].mxu1 }
 0x260   : > { %v2291_v16 = vsel %vm11862_vm6, %v2286_v14, %v2290_v21  ;;  %v9532_v32 = vpack.c.bf16 %v1335_v24, %v1335_v24  ;;  %v1683_v39 = vshrl.u32 %v9531_v56, 16  ;;  %v1686_v13 = vshll.u32 %v9531_v56, 16  ;;  %v12209_v19 = vpop.f32.mrb[114].mxu1  ;;  %v1969_v41 = vld [vmem:[#allocation2 + $0xc8] sm:$0xf] }
 0x261   : > { %v9099_v34 = vcombine.low %v2277_v30, %v2291_v16  ;;  %v2309_v26 = vrot.slane %v2307_v44, 4  ;;  %v2312_v3 = vrot.slane %v2310_v49, 5  ;;  %v2299_v61 = vor.u32 %v2298_v7, %v2295_v12  ;;  %v12211_v15 = vpop.f32.mrb[115].mxu1  ;;  %v1972_v14 = vld [vmem:[#allocation2 + $0xcc] sm:$0x1] }
 0x262   : > { %v2316_v28 = vshll.u32 %v2102_v46, 16  ;;  %v1691_v11 = vshrl.u32 %v9532_v32, 16  ;;  %v1694_v18 = vshll.u32 %v9532_v32, 16  ;;  %v9805_v21 = vadd.f32 %v9804_v54, %v9803_v51  ;;  %v1975_v44 = vld [vmem:[#allocation2 + $0xd0] sm:$0xf] }
 0x263   : > { %10074 = vmatmul.mubr.bf16.gmra.mrb[8].mxu0 %v9099_v34  ;;  %v2313_v25 = vor.u32 %v2312_v3, %v2309_v26  ;;  %v1685_v30 = vrot.slane %v1683_v39, 7  ;;  %v2300_v52 = vrot.slane %v2299_v61, 4  ;;  %v2321_v24 = vshrl.u32 %v12207_v1, 16  ;;  %v1978_v49 = vld [vmem:[#allocation2 + $0xd4] sm:$0x1] }
 0x264   : > { %v2318_v57 = vrot.slane %v2316_v28, 5  ;;  %v1693_v47 = vrot.slane %v1691_v11, 7  ;;  %v1276_v23 = vadd.f32 %v9805_v21, %v11945_v37  ;;  %v1279_v54 = vadd.f32 %v9808_v31, %v11959_v53  ;;  %v12220_v7 = vld [vmem:[#allocation2 + $0x88] sm:$0xf]  ;;  %v2103_v37 = vld [vmem:[#allocation2 + $0x84] sm:$0x1] }
 0x265   : > { %v2314_v17 = vrot.slane %v2313_v25, 4  ;;  %v1688_v46 = vor.u32 %v1686_v13, %v1685_v30  ;;  %v1689_v12 = vrot.slane %v1685_v30, 4  ;;  %v2305_v51 = vsel %vm11862_vm6, %v2300_v52, %v2304_v36  ;;  %v2104_v36 = vld [vmem:[#allocation2 + $0x8c] sm:$0x1]  ;;  %v12226_v39 = vpop.f32.mrb[116].mxu1 }
 0x266   : > { %v1696_v16 = vor.u32 %v1694_v18, %v1693_v47  ;;  %v1697_v56 = vrot.slane %v1693_v47, 4  ;;  %v1336_v8 = vmax.f32 %v1276_v23, 0.0  ;;  %v1337_v3 = vmax.f32 %v1279_v54, 0.0  ;;  %v12232_v11 = vpop.f32.mrb[117].mxu1 }
 0x267   : > { %v2319_v6 = vsel %vm11862_vm6, %v2314_v17, %v2318_v57  ;;  %v1970_v34 = vsel %vm11953_vm9, %v1688_v46, %v1969_v41  ;;  %v1973_v32 = vsel %vm11963_vm10, %v1689_v12, %v1972_v14  ;;  %v2323_v28 = vrot.slane %v2321_v24, 4  ;;  %v12236_v41 = vpop.f32.mrb[118].mxu1  ;;  %v1981_v17 = vld [vmem:[#allocation2 + $0xd8] sm:$0xf] }
 0x268   : > { %v9100_v26 = vcombine.low %v2305_v51, %v2319_v6  ;;  %1971 = vst [vmem:[#allocation2 + $0xc8] sm:$0xf] %v1970_v34  ;;  %1974 = vst [vmem:[#allocation2 + $0xcc] sm:$0x1] %v1973_v32  ;;  %v1976_v53 = vsel %vm11953_vm9, %v1696_v16, %v1975_v44  ;;  %v1979_v13 = vsel %vm11963_vm10, %v1697_v56, %v1978_v49  ;;  %v2324_v25 = vshll.u32 %v12207_v1, 16  ;;  %v12239_v47 = vpop.f32.mrb[119].mxu1 }
 0x269   : > { %v9533_v61 = vpack.c.bf16 %v1336_v8, %v1336_v8  ;;  %1977 = vst [vmem:[#allocation2 + $0xd0] sm:$0xf] %v1976_v53  ;;  %1980 = vst [vmem:[#allocation2 + $0xd4] sm:$0x1] %v1979_v13  ;;  %v9534_v18 = vpack.c.bf16 %v1337_v3, %v1337_v3  ;;  %v2330_v21 = vshll.u32 %v2103_v37, 16  ;;  %v2335_v30 = vshrl.u32 %v12220_v7, 16 }
 0x26a   : > { %10077 = vmatprep.mubr.bf16.mxu0 %v9100_v26  ;;  %v2338_v31 = vshll.u32 %v12220_v7, 16  ;;  %v2344_v14 = vshll.u32 %v2104_v36, 16  ;;  %v2326_v46 = vrot.slane %v2324_v25, 5  ;;  %v1984_v16 = vld [vmem:[#allocation2 + $0xdc] sm:$0x1]  ;;  %v9811_v32 = vadd.f32 %v12205_v38, %v12203_v5 }
 0x26b   : > { %v1699_v52 = vshrl.u32 %v9533_v61, 16  ;;  %v1702_v57 = vshll.u32 %v9533_v61, 16  ;;  %v1707_v23 = vshrl.u32 %v9534_v18, 16  ;;  %v1710_v24 = vshll.u32 %v9534_v18, 16  ;;  %v11133_v8 = vld [vmem:[#allocation2] sm:$0xf] }
 0x26c   : > { %v2332_v12 = vrot.slane %v2330_v21, 5  ;;  %v2337_v49 = vrot.slane %v2335_v30, 4  ;;  %v2340_v51 = vrot.slane %v2338_v31, 5  ;;  %v2346_v54 = vrot.slane %v2344_v14, 5  ;;  %v11134_v37 = vld [vmem:[#allocation2 + $0x8] sm:$0xf] }
 0x26d   : > { %v1701_v44 = vrot.slane %v1699_v52, 7  ;;  %v1709_v56 = vrot.slane %v1707_v23, 7  ;;  %v2327_v6 = vor.u32 %v2326_v46, %v2323_v28  ;;  %v9118_v34 = vcombine.low %v11133_v8, %v11134_v37  ;;  %v1987_v36 = vld [vmem:[#allocation2 + $0xe0] sm:$0xf]  ;;  %v1990_v53 = vld [vmem:[#allocation2 + $0xe4] sm:$0x1] }
 0x26e   : > { %v2341_v13 = vor.u32 %v2340_v51, %v2337_v49  ;;  %v9814_v61 = vadd.f32 %v12211_v15, %v12209_v19  ;;  %v1284_v30 = vadd.f32 %v9811_v32, %v11975_v63  ;;  %v12246_v28 = vld [vmem:[#allocation2 + $0xa8] sm:$0xf]  ;;  %v12248_v52 = vpop.f32.mrb[120].mxu1  ;;  %v2106_v14 = vld [vmem:[#allocation2 + $0xac] sm:$0x1] }
 0x26f   : > { %v1704_v26 = vor.u32 %v1702_v57, %v1701_v44  ;;  %v1705_v3 = vrot.slane %v1701_v44, 4  ;;  %v1712_v18 = vor.u32 %v1710_v24, %v1709_v56  ;;  %v1713_v25 = vrot.slane %v1709_v56, 4  ;;  %v12255_v19 = vpop.f32.mrb[121].mxu1  ;;  %v11135_v8 = vld [vmem:[#allocation2 + $0x10] sm:$0xf] }
 0x270   : > { %v2328_v21 = vrot.slane %v2327_v6, 4  ;;  %v2342_v57 = vrot.slane %v2341_v13, 4  ;;  %v1287_v31 = vadd.f32 %v9814_v61, %v11979_v58  ;;  %v1338_v23 = vmax.f32 %v1284_v30, 0.0  ;;  %v12263_v24 = vpop.f32.mrb[122].mxu1 }
 0x271   : > { %v1982_v5 = vsel %vm11953_vm9, %v1704_v26, %v1981_v17  ;;  %v1985_v38 = vsel %vm11963_vm10, %v1705_v3, %v1984_v16  ;;  %v1988_v63 = vsel %vm11953_vm9, %v1712_v18, %v1987_v36  ;;  %v1991_v15 = vsel %vm11963_vm10, %v1713_v25, %v1990_v53  ;;  %v12269_v51 = vpop.f32.mrb[123].mxu1  ;;  %v2107_v25 = vld [vmem:[#allocation2 + $0xb4] sm:$0x1] }
 0x272   : > { %1983 = vst [vmem:[#allocation2 + $0xd8] sm:$0xf] %v1982_v5  ;;  %1986 = vst [vmem:[#allocation2 + $0xdc] sm:$0x1] %v1985_v38  ;;  %v2333_v17 = vsel %vm11862_vm6, %v2328_v21, %v2332_v12  ;;  %v2347_v58 = vsel %vm11862_vm6, %v2342_v57, %v2346_v54  ;;  %v1339_v46 = vmax.f32 %v1287_v31, 0.0  ;;  %v2363_v44 = vshrl.u32 %v12246_v28, 16 }
 0x273   : > { %1989 = vst [vmem:[#allocation2 + $0xe0] sm:$0xf] %v1988_v63  ;;  %1992 = vst [vmem:[#allocation2 + $0xe4] sm:$0x1] %v1991_v15  ;;  %v2366_v49 = vshll.u32 %v12246_v28, 16  ;;  %v9101_v16 = vcombine.low %v2333_v17, %v2347_v58  ;;  %v9535_v56 = vpack.c.bf16 %v1338_v23, %v1338_v23  ;;  %v2372_v6 = vshll.u32 %v2106_v14, 16 }
 0x274   : > { %v11136_v12 = vld [vmem:[#allocation2 + $0x18] sm:$0xf]  ;;  %v9536_v32 = vpack.c.bf16 %v1339_v46, %v1339_v46  ;;  %v2365_v26 = vrot.slane %v2363_v44, 4  ;;  %v9120_v36 = vcombine.low %v12074_v50, %v12088_v62  ;;  %v12273_v54 = vld [vmem:[#allocation2 + $0xb0] sm:$0xf]  ;;  %v9817_v18 = vadd.f32 %v12232_v11, %v12226_v39 }
 0x275   : > { %v9119_v37 = vcombine.low %v11135_v8, %v11136_v12  ;;  %v2368_v3 = vrot.slane %v2366_v49, 5  ;;  %10078 = vmatmul.mubr.bf16.gmra.mrb[12].mxu0 %v9101_v16  ;;  %v1715_v53 = vshrl.u32 %v9535_v56, 16  ;;  %v1718_v13 = vshll.u32 %v9535_v56, 16  ;;  %v1993_v21 = vld [vmem:[#allocation2 + $0xf8] sm:$0xf]  ;;  %v12282_v15 = vpop.f32.mrb[124].mxu1 }
 0x276   : > { %v2374_v61 = vrot.slane %v2372_v6, 5  ;;  %10113 = vmatprep.mubr.bf16.mxu0 %v9118_v34  ;;  %v1723_v30 = vshrl.u32 %v9536_v32, 16  ;;  %v1726_v5 = vshll.u32 %v9536_v32, 16  ;;  %v9820_v57 = vadd.f32 %v12239_v47, %v12236_v41  ;;  %v1996_v50 = vld [vmem:[#allocation2 + $0xfc] sm:$0x1]  ;;  %v12285_v58 = vpop.f32.mrb[125].mxu1 }
 0x277   : > { %v2369_v38 = vor.u32 %v2368_v3, %v2365_v26  ;;  %v1717_v31 = vrot.slane %v1715_v53, 7  ;;  %v1292_v62 = vadd.f32 %v9817_v18, %v11983_v33  ;;  %v2377_v14 = vshrl.u32 %v12273_v54, 16  ;;  %v1999_v11 = vld [vmem:[#allocation2 + $0x100] sm:$0xf]  ;;  %v2002_v47 = vld [vmem:[#allocation2 + $0x104] sm:$0x1] }
 0x278   : > { %v2380_v63 = vshll.u32 %v12273_v54, 16  ;;  %v1725_v39 = vrot.slane %v1723_v30, 7  ;;  %v1295_v17 = vadd.f32 %v9820_v57, %v11992_v0  ;;  %v2386_v23 = vshll.u32 %v2107_v25, 16  ;;  %v12287_v33 = vpop.f32.mrb[126].mxu1  ;;  %v12291_v12 = vld [vmem:[#allocation2 + $0xb8] sm:$0xf] }
 0x279   : > { %v2370_v34 = vrot.slane %v2369_v38, 4  ;;  %v1720_v46 = vor.u32 %v1718_v13, %v1717_v31  ;;  %v1721_v41 = vrot.slane %v1717_v31, 4  ;;  %v1340_v44 = vmax.f32 %v1292_v62, 0.0  ;;  %v12293_v32 = vpop.f32.mrb[127].mxu1  ;;  %v10986_v13 = vld [vmem:[#allocation8 + $0x88] sm:$0xff]  }
 0x27a   : > { %v2379_v49 = vrot.slane %v2377_v14, 4  ;;  %v1728_v16 = vor.u32 %v1726_v5, %v1725_v39  ;;  %v1729_v56 = vrot.slane %v1725_v39, 4  ;;  %v1341_v8 = vmax.f32 %v1295_v17, 0.0  ;;  %v2005_v38 = vld [vmem:[#allocation2 + $0x108] sm:$0xf] }
 0x27b   : > { %v2375_v6 = vsel %vm11862_vm6, %v2370_v34, %v2374_v61  ;;  %v1994_v0 = vsel %vm11953_vm9, %v1720_v46, %v1993_v21  ;;  %v1997_v26 = vsel %vm11963_vm10, %v1721_v41, %v1996_v50  ;;  %v9537_v53 = vpack.c.bf16 %v1340_v44, %v1340_v44  ;;  %v12308_v21 = vld [vmem:[#allocation2 + $0xbc] sm:$0x1]  ;;  %v10989_v34 = vld [vmem:[#allocation8 + $0x90] sm:$0xff]  }
 0x27c   : > { %v9102_v3 = vcombine.low %v2361_v55, %v2375_v6  ;;  %1995 = vst [vmem:[#allocation2 + $0xf8] sm:$0xf] %v1994_v0  ;;  %1998 = vst [vmem:[#allocation2 + $0xfc] sm:$0x1] %v1997_v26  ;;  %v2000_v61 = vsel %vm11953_vm9, %v1728_v16, %v1999_v11  ;;  %v2003_v18 = vsel %vm11963_vm10, %v1729_v56, %v2002_v47  ;;  %v2382_v30 = vrot.slane %v2380_v63, 5 }
 0x27d   : > { %v9538_v25 = vpack.c.bf16 %v1341_v8, %v1341_v8  ;;  %2001 = vst [vmem:[#allocation2 + $0x100] sm:$0xf] %v2000_v61  ;;  %2004 = vst [vmem:[#allocation2 + $0x104] sm:$0x1] %v2003_v18  ;;  %10114 = vmatmul.mubr.bf16.vlgmr.msra.gmra.mrb[0].mxu0 %v9119_v37  ;;  %v1731_v43 = vshrl.u32 %v9537_v53, 16  ;;  %v1734_v22 = vshll.u32 %v9537_v53, 16  ;;  %v9121_v11 = vcombine.low %v12109_v29, %v12121_v27 }
 0x27e   : > { %10081 = vmatprep.mubr.bf16.mxu1 %v9102_v3  ;;  %v12310_v55 = vrot.slane %v2386_v23, 5  ;;  %v2391_v5 = vshrl.u32 %v12291_v12, 16  ;;  %10117 = vmatprep.mubr.bf16.mxu0 %v9120_v36  ;;  %v2383_v50 = vor.u32 %v2382_v30, %v2379_v49  ;;  %v2394_v62 = vshll.u32 %v12291_v12, 16  ;;  %v2008_v63 = vld [vmem:[#allocation2 + $0x10c] sm:$0x1]  ;;  %v10992_v61 = vld [vmem:[#allocation8 + $0x98] sm:$0xff]  }
 0x27f   : > { %10146 = vmatpush3.bf16.msra.mxu0 %v12160_v4  ;;  %v1739_v57 = vshrl.u32 %v9538_v25, 16  ;;  %v1742_v31 = vshll.u32 %v9538_v25, 16  ;;  %v1733_v14 = vrot.slane %v1731_v43, 7  ;;  %v2400_v37 = vshll.u32 %v12308_v21, 16  ;;  %v2011_v36 = vld [vmem:[#allocation2 + $0x110] sm:$0xf] }
 0x280   : > { %v2393_v39 = vrot.slane %v2391_v5, 4  ;;  %10147 = vmatprep.subr.bf16.mxu0 %v10986_v13  ;;  %v2384_v23 = vrot.slane %v2383_v50, 4  ;;  %v2396_v4 = vrot.slane %v2394_v62, 5  ;;  %v11137_v46 = vld [vmem:[#allocation2 + $0x50] sm:$0xf]  ;;  %v9823_v56 = vadd.f32 %v12255_v19, %v12248_v52 }
 0x281   : > { %v1741_v17 = vrot.slane %v1739_v57, 7  ;;  %v9122_v41 = vcombine.low %v11137_v46, %v12132_v48  ;;  %v1736_v47 = vor.u32 %v1734_v22, %v1733_v14  ;;  %v1737_v44 = vrot.slane %v1733_v14, 4  ;;  %v2014_v49 = vld [vmem:[#allocation2 + $0x114] sm:$0x1]  ;;  %v12321_v6 = vld [vmem:[#allocation2 + $0xc0] sm:$0xf] }
 0x282   : > { %v2402_v16 = vrot.slane %v2400_v37, 5  ;;  %v2389_v27 = vsel %vm11862_vm6, %v2384_v23, %v12310_v55  ;;  %v2397_v0 = vor.u32 %v2396_v4, %v2393_v39  ;;  %v12326_v26 = vld [vmem:[#allocation2 + $0xc4] sm:$0x1]  ;;  %v1300_v52 = vadd.f32 %v9823_v56, %v12006_v42  ;;  %v12335_v53 = vld [vmem:[#allocation2 + $0xc8] sm:$0xf] }
 0x283   : > { %v1744_v8 = vor.u32 %v1742_v31, %v1741_v17  ;;  %v1745_v29 = vrot.slane %v1741_v17, 4  ;;  %10148 = vmatpush3.bf16.msra.mxu0 %v10986_v13  ;;  %v2006_v48 = vsel %vm11953_vm9, %v1736_v47, %v2005_v38  ;;  %v2009_v3 = vsel %vm11963_vm10, %v1737_v44, %v2008_v63  ;;  %v10995_v31 = vld [vmem:[#allocation8 + $0xa0] sm:$0xff]   ;;  %v12352_v46 = vld [vmem:[#allocation2 + $0xd0] sm:$0xf] }
 0x284   : > { %v9826_v19 = vadd.f32 %v12269_v51, %v12263_v24  ;;  %10149 = vmatprep.subr.bf16.mxu0 %v10989_v34  ;;  %2007 = vst [vmem:[#allocation2 + $0x108] sm:$0xf] %v2006_v48  ;;  %2010 = vst [vmem:[#allocation2 + $0x10c] sm:$0x1] %v2009_v3  ;;  %v2398_v25 = vrot.slane %v2397_v0, 4  ;;  %v2405_v30 = vshrl.u32 %v12321_v6, 16  ;;  %v9123_v47 = vcombine.low %v12147_v59, %v12154_v60 }
 0x285   : > { %v2012_v13 = vsel %vm11953_vm9, %v1744_v8, %v2011_v36  ;;  %v2015_v18 = vsel %vm11963_vm10, %v1745_v29, %v2014_v49  ;;  %10118 = vmatmul.mubr.bf16.gmra.mrb[4].mxu0 %v9121_v11  ;;  %v1342_v42 = vmax.f32 %v1300_v52, 0.0  ;;  %v12343_v51 = vld [vmem:[#allocation2 + $0xcc] sm:$0x1]  ;;  %v2408_v43 = vshll.u32 %v12321_v6, 16  ;;  %v2020_v0 = vld [vmem:[#allocation2 + $0x11c] sm:$0x1] }
 0x286   : > { %2013 = vst [vmem:[#allocation2 + $0x110] sm:$0xf] %v2012_v13  ;;  %2016 = vst [vmem:[#allocation2 + $0x114] sm:$0x1] %v2015_v18  ;;  %v1303_v24 = vadd.f32 %v9826_v19, %v12010_v45  ;;  %v2414_v22 = vshll.u32 %v12326_v26, 16  ;;  %v2403_v55 = vsel %vm11862_vm6, %v2398_v25, %v2402_v16  ;;  %10121 = vmatprep.mubr.bf16.mxu0 %v9122_v41  ;;  %v2407_v5 = vrot.slane %v2405_v30, 4 }
 0x287   : > { %v2419_v38 = vshrl.u32 %v12335_v53, 16  ;;  %v2422_v57 = vshll.u32 %v12335_v53, 16  ;;  %10150 = vmatpush3.bf16.msra.mxu0 %v10989_v34  ;;  %v9103_v50 = vcombine.low %v2389_v27, %v2403_v55  ;;  %v9539_v62 = vpack.c.bf16 %v1342_v42, %v1342_v42  ;;  %v10998_v29 = vld [vmem:[#allocation8 + $0xa8] sm:$0xff]   ;;  %v2017_v27 = vld [vmem:[#allocation2 + $0x118] sm:$0xf]  ;;  %v11001_v55 = vld [vmem:[#allocation8 + $0xb0] sm:$0xff]  }
 0x288   : > { %v1343_v45 = vmax.f32 %v1303_v24, 0.0  ;;  %v2410_v14 = vrot.slane %v2408_v43, 5  ;;  %10151 = vmatprep.subr.bf16.mxu0 %v10992_v61  ;;  %v2416_v63 = vrot.slane %v2414_v22, 5  ;;  %v2428_v11 = vshll.u32 %v12343_v51, 16  ;;  %v2023_v19 = vld [vmem:[#allocation2 + $0x120] sm:$0xf] }
 0x289   : > { %v2421_v39 = vrot.slane %v2419_v38, 4  ;;  %v2424_v37 = vrot.slane %v2422_v57, 5  ;;  %10082 = vmatmul.mubr.bf16.vlgmr.msra.gmra.mrb[128].mxu1 %v9103_v50  ;;  %v1747_v17 = vshrl.u32 %v9539_v62, 16  ;;  %v1750_v36 = vshll.u32 %v9539_v62, 16  ;;  %v12377_v57 = vld [vmem:[#allocation2 + $0xdc] sm:$0x1] }
 0x28a   : > { %v9540_v23 = vpack.c.bf16 %v1343_v45, %v1343_v45  ;;  %v2411_v4 = vor.u32 %v2410_v14, %v2407_v5  ;;  %v2430_v34 = vrot.slane %v2428_v11, 5  ;;  %v9124_v44 = vcombine.low %v12181_v9, %v12190_v40 }
 0x28b   : > { %v2425_v41 = vor.u32 %v2424_v37, %v2421_v39  ;;  %10152 = vmatpush3.bf16.msra.mxu0 %v10992_v61  ;;  %v1749_v49 = vrot.slane %v1747_v17, 7  ;;  %v9829_v3 = vadd.f32 %v12285_v58, %v12282_v15  ;;  %v9832_v52 = vadd.f32 %v12293_v32, %v12287_v33  ;;  %v2026_v61 = vld [vmem:[#allocation2 + $0x124] sm:$0x1]  ;;  %v14063_v58 = vld [vmem:[#allocation19_spill] sm:$0xff]  ;;  %v12369_v33 = vld [vmem:[#allocation2 + $0xd8] sm:$0xf] }
 0x28c   : > { %v1755_v16 = vshrl.u32 %v9540_v23, 16  ;;  %v1758_v56 = vshll.u32 %v9540_v23, 16  ;;  %v2412_v8 = vrot.slane %v2411_v4, 4  ;;  %10153 = vmatprep.subr.bf16.mxu0 %v10995_v31  ;;  %v2433_v59 = vshrl.u32 %v12352_v46, 16  ;;  %v12371_v32 = vld [vmem:[#allocation2 + $0xd4] sm:$0x1] }
 0x28d   : > { %v2426_v48 = vrot.slane %v2425_v41, 4  ;;  %v1752_v60 = vor.u32 %v1750_v36, %v1749_v49  ;;  %v1753_v9 = vrot.slane %v1749_v49, 4  ;;  %10122 = vmatmul.mubr.bf16.gmra.mrb[8].mxu0 %v9123_v47  ;;  %v1308_v15 = vadd.f32 %v9829_v3, %v12015_v2  ;;  %v12390_v41 = vld [vmem:[#allocation2 + $0xf0] sm:$0xf]  ;;  %v12421_v10 = vld [vmem:[#allocation2 + $0x108] sm:$0xf] }
 0x28e   : > { %v1757_v40 = vrot.slane %v1755_v16, 7  ;;  %v2417_v13 = vsel %vm11862_vm6, %v2412_v8, %v2416_v63  ;;  %10125 = vmatprep.mubr.bf16.mxu0 %v9124_v44  ;;  %v1311_v25 = vadd.f32 %v9832_v52, %v14063_v58  ;;  %v2435_v30 = vrot.slane %v2433_v59, 4  ;;  %v2029_v8 = vld [vmem:[#allocation2 + $0x128] sm:$0xf]  ;;  %v11138_v52 = vld [vmem:[#allocation2 + $0xa0] sm:$0xf] }
 0x28f   : > { %v2431_v18 = vsel %vm11862_vm6, %v2426_v48, %v2430_v34  ;;  %10154 = vmatpush3.bf16.msra.mxu0 %v10995_v31  ;;  %v2018_v42 = vsel %vm11953_vm9, %v1752_v60, %v2017_v27  ;;  %v2021_v24 = vsel %vm11963_vm10, %v1753_v9, %v2020_v0  ;;  %v1344_v5 = vmax.f32 %v1308_v15, 0.0  ;;  %v11004_v34 = vld [vmem:[#allocation8 + $0xb8] sm:$0xff]   ;;  %v2032_v27 = vld [vmem:[#allocation2 + $0x12c] sm:$0x1]  ;;  %v12395_v60 = vld [vmem:[#allocation2 + $0xf4] sm:$0x1] }
 0x290   : > { %v1760_v43 = vor.u32 %v1758_v56, %v1757_v40  ;;  %v1761_v22 = vrot.slane %v1757_v40, 4  ;;  %10155 = vmatprep.subr.bf16.mxu0 %v10998_v29  ;;  %2019 = vst [vmem:[#allocation2 + $0x118] sm:$0xf] %v2018_v42  ;;  %2022 = vst [vmem:[#allocation2 + $0x11c] sm:$0x1] %v2021_v24  ;;  %v9104_v2 = vcombine.low %v2417_v13, %v2431_v18  ;;  %v1345_v38 = vmax.f32 %v1311_v25, 0.0 }
 0x291   : > { %v2436_v50 = vshll.u32 %v12352_v46, 16  ;;  %v2442_v45 = vshll.u32 %v12371_v32, 16  ;;  %v2447_v14 = vshrl.u32 %v12369_v33, 16  ;;  %v9541_v63 = vpack.c.bf16 %v1344_v5, %v1344_v5  ;;  %v12392_v56 = vld [vmem:[#allocation2 + $0xf8] sm:$0xf]  ;;  %v12401_v58 = vld [vmem:[#allocation8 + $0xc0] sm:$0xff]  }
 0x292   : > { %v2024_v31 = vsel %vm11953_vm9, %v1760_v43, %v2023_v19  ;;  %v2027_v62 = vsel %vm11963_vm10, %v1761_v22, %v2026_v61  ;;  %10085 = vmatprep.mubr.bf16.mxu1 %v9104_v2  ;;  %v9542_v39 = vpack.c.bf16 %v1345_v38, %v1345_v38  ;;  %v2450_v11 = vshll.u32 %v12369_v33, 16  ;;  %v2038_v19 = vld [vmem:[#allocation2 + $0x134] sm:$0x1]  ;;  %v12405_v22 = vld [vmem:[#allocation2 + $0xfc] sm:$0x1] }
 0x293   : > { %2025 = vst [vmem:[#allocation2 + $0x120] sm:$0xf] %v2024_v31  ;;  %2028 = vst [vmem:[#allocation2 + $0x124] sm:$0x1] %v2027_v62  ;;  %v2438_v37 = vrot.slane %v2436_v50, 5  ;;  %10156 = vmatpush3.bf16.msra.mxu0 %v10998_v29  ;;  %v2444_v17 = vrot.slane %v2442_v45, 5  ;;  %v9125_v4 = vcombine.low %v12207_v1, %v12220_v7  ;;  %v9126_v1 = vcombine.low %v11138_v52, %v12246_v28 }
 0x294   : > { %v2449_v36 = vrot.slane %v2447_v14, 4  ;;  %v2456_v23 = vshll.u32 %v12377_v57, 16  ;;  %10157 = vmatprep.subr.bf16.mxu0 %v11001_v55  ;;  %v1763_v47 = vshrl.u32 %v9541_v63, 16  ;;  %v1766_v44 = vshll.u32 %v9541_v63, 16  ;;  %v2035_v29 = vld [vmem:[#allocation2 + $0x130] sm:$0xf] }
 0x295   : > { %v1771_v49 = vshrl.u32 %v9542_v39, 16  ;;  %v1774_v16 = vshll.u32 %v9542_v39, 16  ;;  %v2439_v0 = vor.u32 %v2438_v37, %v2435_v30  ;;  %v2452_v48 = vrot.slane %v2450_v11, 5  ;;  %10126 = vmatmul.mubr.bf16.gmra.mrb[12].mxu0 %v9125_v4  ;;  %v12415_v62 = vld [vmem:[#allocation2 + $0x100] sm:$0xf] }
 0x296   : > { %v2458_v3 = vrot.slane %v2456_v23, 5  ;;  %v1765_v7 = vrot.slane %v1763_v47, 7  ;;  %v2461_v9 = vshrl.u32 %v12390_v41, 16  ;;  %v2464_v40 = vshll.u32 %v12390_v41, 16  ;;  %10129 = vmatprep.mubr.bf16.mxu0 %v9126_v1  ;;  %v12417_v45 = vld [vmem:[#allocation2 + $0x104] sm:$0x1] }
 0x297   : > { %v1773_v59 = vrot.slane %v1771_v49, 7  ;;  %10158 = vmatpush3.bf16.msra.mxu0 %v11001_v55  ;;  %v2440_v61 = vrot.slane %v2439_v0, 4  ;;  %v2453_v13 = vor.u32 %v2452_v48, %v2449_v36  ;;  %v2470_v18 = vshll.u32 %v12395_v60, 16  ;;  %v12443_v48 = vld [vmem:[#allocation2 + $0x110] sm:$0xf] }
 0x298   : > { %v2475_v15 = vshrl.u32 %v12392_v56, 16  ;;  %10159 = vmatprep.subr.bf16.mxu0 %v11004_v34  ;;  %v1768_v28 = vor.u32 %v1766_v44, %v1765_v7  ;;  %v1769_v25 = vrot.slane %v1765_v7, 4  ;;  %v2463_v55 = vrot.slane %v2461_v9, 4  ;;  %v12432_v44 = vld [vmem:[#allocation2 + $0xc] sm:$0x1] }
 0x299   : > { %v1776_v30 = vor.u32 %v1774_v16, %v1773_v59  ;;  %v1777_v42 = vrot.slane %v1773_v59, 4  ;;  %v2445_v24 = vsel %vm11862_vm6, %v2440_v61, %v2444_v17  ;;  %v2454_v43 = vrot.slane %v2453_v13, 4  ;;  %v12447_v59 = vld [vmem:[#allocation2 + $0x118] sm:$0xf]  ;;  %v12449_v9 = vld [vmem:[#allocation2 + $0x114] sm:$0x1] }
 0x29a   : > { %v2466_v2 = vrot.slane %v2464_v40, 5  ;;  %v2030_v5 = vsel %vm11953_vm9, %v1768_v28, %v2029_v8  ;;  %v2033_v38 = vsel %vm11963_vm10, %v1769_v25, %v2032_v27  ;;  %v2472_v39 = vrot.slane %v2470_v18, 5  ;;  %v12435_v8 = vld [vmem:[#allocation2 + $0x10c] sm:$0x1] }
 0x29b   : > { %v2036_v50 = vsel %vm11953_vm9, %v1776_v30, %v2035_v29  ;;  %v2039_v31 = vsel %vm11963_vm10, %v1777_v42, %v2038_v19  ;;  %10160 = vmatpush3.bf16.msra.mxu0 %v11004_v34  ;;  %2031 = vst [vmem:[#allocation2 + $0x128] sm:$0xf] %v2030_v5  ;;  %2034 = vst [vmem:[#allocation2 + $0x12c] sm:$0x1] %v2033_v38  ;;  %v2459_v14 = vsel %vm11862_vm6, %v2454_v43, %v2458_v3 }
 0x29c   : > { %2037 = vst [vmem:[#allocation2 + $0x130] sm:$0xf] %v2036_v50  ;;  %2040 = vst [vmem:[#allocation2 + $0x134] sm:$0x1] %v2039_v31  ;;  %v2467_v63 = vor.u32 %v2466_v2, %v2463_v55  ;;  %v2477_v37 = vrot.slane %v2475_v15, 4  ;;  %10193 = vmatprep.subr.bf16.mxu0 %v12401_v58  ;;  %v9105_v20 = vcombine.low %v2445_v24, %v2459_v14  ;;  %v2478_v11 = vshll.u32 %v12392_v56, 16 }
 0x29d   : > { %v2484_v17 = vshll.u32 %v12405_v22, 16  ;;  %v9127_v36 = vcombine.low %v12273_v54, %v12291_v12  ;;  %v9128_v4 = vcombine.low %v12321_v6, %v12335_v53  ;;  %v2489_v34 = vshrl.u32 %v12415_v62, 16  ;;  %v12439_v12 = vld [vmem:[#allocation2 + $0x14] sm:$0x1]  ;;  %v12456_v24 = vld [vmem:[#allocation2 + $0x11c] sm:$0x1] }
 0x29e   : > { %v2468_v23 = vrot.slane %v2467_v63, 4  ;;  %v2492_v47 = vshll.u32 %v12415_v62, 16  ;;  %v3272_v49 = vrot.slane %v12432_v44, 5  ;;  %10086 = vmatmul.mubr.bf16.gmra.mrb[132].mxu1 %v9105_v20  ;;  %v2480_v16 = vrot.slane %v2478_v11, 5 }
 0x29f   : > { %10130 = vmatmul.mubr.bf16.gmra.mrb[16].mxu0 %v9127_v36  ;;  %v2498_v27 = vshll.u32 %v12417_v45, 16  ;;  %v2503_v54 = vshrl.u32 %v12421_v10, 16  ;;  %v3276_v6 = vrot.slane %v12439_v12, 5  ;;  %v2491_v53 = vrot.slane %v2489_v34, 4  ;;  %v11141_v36 = vld [vmem:[#allocation2 + $0x1c] sm:$0x1] }
 0x2a0   : > { %10133 = vmatprep.mubr.bf16.mxu0 %v9128_v4  ;;  %v2494_v29 = vrot.slane %v2492_v47, 5  ;;  %v2506_v0 = vshll.u32 %v12421_v10, 16  ;;  %v2473_v3 = vsel %vm11862_vm6, %v2468_v23, %v2472_v39  ;;  %v2481_v52 = vor.u32 %v2480_v16, %v2477_v37 }
 0x2a1   : > { %v2486_v1 = vrot.slane %v2484_v17, 5  ;;  %v2505_v7 = vrot.slane %v2503_v54, 4  ;;  %v2500_v19 = vrot.slane %v2498_v27, 5  ;;  %v2512_v13 = vshll.u32 %v12435_v8, 16 }
 0x2a2   : > { %v2495_v40 = vor.u32 %v2494_v29, %v2491_v53  ;;  %v2508_v61 = vrot.slane %v2506_v0, 5  ;;  %v2482_v18 = vrot.slane %v2481_v52, 4  ;;  %v9129_v15 = vcombine.low %v12352_v46, %v12369_v33  ;;  %v12463_v46 = vld [vmem:[#allocation2 + $0x120] sm:$0xf]  ;;  %v12468_v17 = vld [vmem:[#allocation2 + $0x128] sm:$0xf] }
 0x2a3   : > { %v2517_v28 = vshrl.u32 %v12443_v48, 16  ;;  %v2520_v25 = vshll.u32 %v12443_v48, 16  ;;  %v2526_v43 = vshll.u32 %v12449_v9, 16  ;;  %v2531_v55 = vshrl.u32 %v12447_v59, 16  ;;  %v12475_v53 = vld [vmem:[#allocation2 + $0x124] sm:$0x1] }
 0x2a4   : > { %v2496_v30 = vrot.slane %v2495_v40, 4  ;;  %v2509_v42 = vor.u32 %v2508_v61, %v2505_v7  ;;  %v2487_v2 = vsel %vm11862_vm6, %v2482_v18, %v2486_v1  ;;  %v2534_v50 = vshll.u32 %v12447_v59, 16  ;;  %v3169_v29 = vld [vmem:[#allocation2 + $0x10] sm:$0xe]  ;;  %v3170_v18 = vld [vmem:[#allocation2 + $0x18] sm:$0xe] }
 0x2a5   : > { %v2519_v5 = vrot.slane %v2517_v28, 4  ;;  %v2522_v38 = vrot.slane %v2520_v25, 5  ;;  %v9106_v33 = vcombine.low %v2473_v3, %v2487_v2  ;;  %v2514_v14 = vrot.slane %v2512_v13, 5  ;;  %v12479_v3 = vld [vmem:[#allocation2 + $0x12c] sm:$0x1] }
 0x2a6   : > { %v2510_v31 = vrot.slane %v2509_v42, 4  ;;  %v9130_v63 = vcombine.low %v12390_v41, %v12392_v56  ;;  %v2533_v37 = vrot.slane %v2531_v55, 4  ;;  %v2536_v20 = vrot.slane %v2534_v50, 5  ;;  %v3168_v56 = vld [vmem:[#allocation2 + $0x8] sm:$0xe] }
 0x2a7   : > { %10134 = vmatmul.mubr.bf16.gmra.mrb[20].mxu0 %v9129_v15  ;;  %v2523_v39 = vor.u32 %v2522_v38, %v2519_v5  ;;  %v2540_v11 = vshll.u32 %v12456_v24, 16  ;;  %v3280_v23 = vrot.slane %v11141_v36, 5  ;;  %10089 = vmatprep.mubr.bf16.mxu1 %v9106_v33  ;;  %v2501_v4 = vsel %vm11862_vm6, %v2496_v30, %v2500_v19  ;;  %v3171_v36 = vld [vmem:[#allocation2 + $0x20] sm:$0xe] }
 0x2a8   : > { %v2515_v34 = vsel %vm11862_vm6, %v2510_v31, %v2514_v14  ;;  %10137 = vmatprep.mubr.bf16.mxu0 %v9130_v63  ;;  %v2545_v41 = vshrl.u32 %v12463_v46, 16  ;;  %v2528_v27 = vrot.slane %v2526_v43, 5  ;;  %v2537_v54 = vor.u32 %v2536_v20, %v2533_v37  ;;  %v14065_v31 = vld [vmem:[#allocation18_spill] sm:$0xff] }
 0x2a9   : > { %v9107_v47 = vcombine.low %v2501_v4, %v2515_v34  ;;  %v2524_v16 = vrot.slane %v2523_v39, 4  ;;  %v9131_v0 = vcombine.low %v12415_v62, %v12421_v10  ;;  %v2548_v1 = vshll.u32 %v12463_v46, 16  ;;  %v3172_v4 = vld [vmem:[#allocation2 + $0x28] sm:$0xe] }
 0x2aa   : > { %v2547_v52 = vrot.slane %v2545_v41, 4  ;;  %v2559_v7 = vshrl.u32 %v12468_v17, 16  ;;  %v2538_v40 = vrot.slane %v2537_v54, 4  ;;  %v2542_v19 = vrot.slane %v2540_v11, 5  ;;  %v3174_v41 = vld [vmem:[#allocation2 + $0x38] sm:$0xe] }
 0x2ab   : > { %10090 = vmatmul.mubr.bf16.gmra.mrb[136].mxu1 %v9107_v47  ;;  %v9132_v61 = vcombine.low %v12443_v48, %v12447_v59  ;;  %v2562_v13 = vshll.u32 %v12468_v17, 16  ;;  %v2529_v15 = vsel %vm11862_vm6, %v2524_v16, %v2528_v27  ;;  %v2550_v62 = vrot.slane %v2548_v1, 5  ;;  %v3175_v47 = vld [vmem:[#allocation2 + $0x50] sm:$0xe]  ;;  %v11142_v16 = vld [vmem:[#allocation2 + $0x24] sm:$0x1] }
 0x2ac   : > { %v2554_v10 = vshll.u32 %v12475_v53, 16  ;;  %v2561_v28 = vrot.slane %v2559_v7, 4  ;;  %v2543_v25 = vsel %vm11862_vm6, %v2538_v40, %v2542_v19  ;;  %v2568_v42 = vshll.u32 %v12479_v3, 16  ;;  %v11144_v7 = vld [vmem:[#allocation2 + $0x3c] sm:$0x1] }
 0x2ad   : > { %v2564_v30 = vrot.slane %v2562_v13, 5  ;;  %v9143_v43 = vrot.slane %v3168_v56, 9  ;;  %v9108_v55 = vcombine.low %v2529_v15, %v2543_v25  ;;  %v2551_v2 = vor.u32 %v2550_v62, %v2547_v52  ;;  %v3173_v56 = vld [vmem:[#allocation2 + $0x30] sm:$0xe]  ;;  %v3176_v52 = vld [vmem:[#allocation2 + $0x58] sm:$0xe] }
 0x2ae   : > { %v9144_v48 = vrot.slane %v3169_v29, 9  ;;  %v9145_v59 = vrot.slane %v3170_v18, 9  ;;  %v2556_v37 = vrot.slane %v2554_v10, 5  ;;  %v2570_v11 = vrot.slane %v2568_v42, 5  ;;  %v11143_v29 = vld [vmem:[#allocation2 + $0x2c] sm:$0x1] }
 0x2af   : > { %10138 = vmatmul.mubr.bf16.gmra.mrb[24].mxu0 %v9131_v0  ;;  %v2565_v5 = vor.u32 %v2564_v30, %v2561_v28  ;;  %v3273_v50 = vsel %vm11969_vm11, %v9143_v43, %v3272_v49  ;;  %10093 = vmatprep.mubr.bf16.mxu1 %v9108_v55  ;;  %v2552_v33 = vrot.slane %v2551_v2, 4  ;;  %v3284_v27 = vrot.slane %v11142_v16, 5  ;;  %v11146_v15 = vld [vmem:[#allocation2 + $0x54] sm:$0x1]  ;;  %v11147_v10 = vld [vmem:[#allocation2 + $0x5c] sm:$0x1] }
 0x2b0   : > { %10141 = vmatprep.mubr.bf16.mxu0 %v9132_v61  ;;  %v9174_v14 = vcombine.low %v14065_v31, %v3273_v50  ;;  %v3277_v63 = vsel %vm11969_vm11, %v9144_v48, %v3276_v6  ;;  %v3281_v39 = vsel %vm11969_vm11, %v9145_v59, %v3280_v23  ;;  %v9133_v6 = vcombine.low %v12463_v46, %v12468_v17  ;;  %v11145_v61 = vld [vmem:[#allocation2 + $0x34] sm:$0x1]  ;;  %v11006_v42 = vld [vmem:[#allocation8 + $0xc8] sm:$0xff]   ;;  %v12516_v43 = vld [vmem:[#allocation2 + $0x60] sm:$0xe] }
 0x2b1   : > { %v2566_v20 = vrot.slane %v2565_v5, 4  ;;  %v9175_v44 = vcombine.low %v3277_v63, %v3281_v39  ;;  %v2557_v49 = vsel %vm11862_vm6, %v2552_v33, %v2556_v37  ;;  %v9146_v23 = vrot.slane %v3171_v36, 9  ;;  %v12518_v55 = vld [vmem:[#allocation2 + $0x68] sm:$0xe]  ;;  %v3187_v2 = vld [vmem:[#allocation2 + $0xc0] sm:$0xe] }
 0x2b2   : > { %v9147_v54 = vrot.slane %v3172_v4, 9  ;;  %v3288_v0 = vrot.slane %v11143_v29, 5  ;;  %v9149_v1 = vrot.slane %v3174_v41, 9  ;;  %v3296_v40 = vrot.slane %v11144_v7, 5  ;;  %v12534_v33 = vld [vmem:[#allocation2 + $0x78] sm:$0xe] }
 0x2b3   : > { %v2571_v34 = vsel %vm11862_vm6, %v2566_v20, %v2570_v11  ;;  %v9148_v19 = vrot.slane %v3173_v56, 9  ;;  %v3292_v13 = vrot.slane %v11145_v61, 5  ;;  %v9150_v18 = vrot.slane %v3175_v47, 9  ;;  %v3188_v31 = vld [vmem:[#allocation2 + $0xc8] sm:$0xe]  ;;  %v11007_v29 = vld [vmem:[#allocation8 + $0xd0] sm:$0xff]  }
 0x2b4   : > { %v9109_v12 = vcombine.low %v2557_v49, %v2571_v34  ;;  %v3300_v46 = vrot.slane %v11146_v15, 5  ;;  %v14066_v17 = vmov 0   ;;  %v9151_v62 = vrot.slane %v3176_v52, 9  ;;  %v3190_v37 = vld [vmem:[#allocation2 + $0xd8] sm:$0xe] }
 0x2b5   : > { %v3304_v28 = vrot.slane %v11147_v10, 5  ;;  %v3289_v25 = vsel %vm11969_vm11, %v9147_v54, %v3288_v0  ;;  %v12514_v30 = vsel %vm11969_vm11, %v9149_v1, %v3296_v40  ;;  %v3285_v48 = vsel %vm11969_vm11, %v9146_v23, %v3284_v27  ;;  %v3191_v20 = vld [vmem:[#allocation2 + $0xf0] sm:$0xe]  ;;  %v12539_v36 = vld [vmem:[#allocation2 + $0x64] sm:$0x1] }
 0x2b6   : > { %10094 = vmatmul.mubr.bf16.gmra.mrb[140].mxu1 %v9109_v12  ;;  %v12524_v59 = vsel %vm11969_vm11, %v9148_v19, %v3292_v13  ;;  %v12528_v5 = vsel %vm11969_vm11, %v9150_v18, %v3300_v46  ;;  %v9176_v63 = vcombine.low %v3285_v48, %v3289_v25  ;;  %v9152_v11 = vrot.slane %v12516_v43, 9  ;;  %v3192_v41 = vld [vmem:[#allocation2 + $0xf8] sm:$0xe]  ;;  %v11150_v0 = vld [vmem:[#allocation2 + $0x7c] sm:$0x1] }
 0x2b7   : > { %10142 = vmatmul.mubr.bf16.gmra.mrb[28].mxu0 %v9133_v6  ;;  %7774 = vmatprep.mubr.bf16.mxu1 %v14066_v17  ;;  %v12532_v50 = vsel %vm11969_vm11, %v9151_v62, %v3304_v28  ;;  %v9177_v39 = vcombine.low %v12524_v59, %v12514_v30  ;;  %v3308_v4 = vrot.slane %v12539_v36, 5  ;;  %v9153_v49 = vrot.slane %v12518_v55, 9  ;;  %v12545_v6 = vld [vmem:[#allocation2 + $0x6c] sm:$0x1]  ;;  %v3193_v40 = vld [vmem:[#allocation2 + $0x100] sm:$0xe] }
 0x2b8   : > { %10161 = vmatprep.mubr.bf16.mxu0 %v9174_v14  ;;  %v3189_v14 = vld [vmem:[#allocation2 + $0xd0] sm:$0xe]  ;;  %v9162_v34 = vrot.slane %v3187_v2, 9  ;;  %v9178_v12 = vcombine.low %v12528_v5, %v12532_v50  ;;  %v3312_v56 = vrot.slane %v12545_v6, 5  ;;  %v3348_v47 = vrot.slane %v12326_v26, 5  ;;  %v11008_v59 = vld [vmem:[#allocation8 + $0xd8] sm:$0xff]  }
 0x2b9   : > { %v9163_v23 = vrot.slane %v3188_v31, 9  ;;  %v9155_v16 = vrot.slane %v12534_v33, 9  ;;  %v3352_v27 = vrot.slane %v12343_v51, 5  ;;  %v9164_v54 = vrot.slane %v3189_v14, 9  ;;  %v3194_v61 = vld [vmem:[#allocation2 + $0x108] sm:$0xe] }
 0x2ba   : > { %v3320_v52 = vrot.slane %v11150_v0, 5  ;;  %v12555_v1 = vsel %vm11969_vm11, %v9162_v34, %v3348_v47  ;;  %v9165_v26 = vrot.slane %v3190_v37, 9  ;;  %v3360_v7 = vrot.slane %v12377_v57, 5  ;;  %v3195_v13 = vld [vmem:[#allocation2 + $0x110] sm:$0xe]  ;;  %v11009_v37 = vld [vmem:[#allocation8 + $0xe0] sm:$0xff]  }
 0x2bb   : > { %v3364_v19 = vrot.slane %v12395_v60, 5  ;;  %v9167_v15 = vrot.slane %v3192_v41, 9  ;;  %v3368_v46 = vrot.slane %v12405_v22, 5  ;;  %v3196_v62 = vld [vmem:[#allocation2 + $0x118] sm:$0xe]  ;;  %v9168_v30 = vrot.slane %v3193_v40, 9 }
 0x2bc   : > { %v12571_v57 = vsel %vm11969_vm11, %v9165_v26, %v3360_v7  ;;  %v3197_v10 = vld [vmem:[#allocation2 + $0x120] sm:$0xe]  ;;  %v3179_v28 = vld [vmem:[#allocation2 + $0x70] sm:$0xe]  ;;  %v3372_v2 = vrot.slane %v12417_v45, 5  ;;  %v9169_v5 = vrot.slane %v3194_v61, 9  ;;  %v3321_v6 = vsel %vm11969_vm11, %v9155_v16, %v3320_v52 }
 0x2bd   : > { %v3198_v48 = vld [vmem:[#allocation2 + $0x128] sm:$0xe]  ;;  %v12583_v22 = vsel %vm11969_vm11, %v9167_v15, %v3368_v46  ;;  %v9170_v50 = vrot.slane %v3195_v13, 9  ;;  %v3380_v45 = vrot.slane %v12449_v9, 5  ;;  %v3384_v34 = vrot.slane %v12456_v24, 5 }
 0x2be   : > { %v12590_v14 = vsel %vm11969_vm11, %v9168_v30, %v3372_v2  ;;  %v3388_v41 = vrot.slane %v12475_v53, 5  ;;  %v3392_v9 = vrot.slane %v12479_v3, 5  ;;  %v3313_v53 = vsel %vm11969_vm11, %v9153_v49, %v3312_v56  ;;  %v3182_v55 = vld [vmem:[#allocation2 + $0x88] sm:$0xe]  ;;  %v3183_v0 = vld [vmem:[#allocation2 + $0xa0] sm:$0xe] }
 0x2bf   : > { %10162 = vmatmul.mubr.bf16.vlgmr.msra.gmra.mrb[0].mxu0 %v9175_v44  ;;  %v3356_v44 = vrot.slane %v12371_v32, 5  ;;  %v9166_v32 = vrot.slane %v3191_v20, 9  ;;  %v3309_v56 = vsel %vm11969_vm11, %v9152_v11, %v3308_v4  ;;  %v3184_v26 = vld [vmem:[#allocation2 + $0xa8] sm:$0xe]  ;;  %v3181_v40 = vld [vmem:[#allocation2 + $0x80] sm:$0xe] }
 0x2c0   : > { %10165 = vmatprep.mubr.bf16.mxu0 %v9176_v63  ;;  %10194 = vmatpush3.bf16.msra.mxu0 %v12401_v58  ;;  %v12560_v58 = vsel %vm11969_vm11, %v9163_v23, %v3352_v27  ;;  %v9171_v63 = vrot.slane %v3196_v62, 9  ;;  %v9173_v23 = vrot.slane %v3198_v48, 9  ;;  %v9154_v27 = vrot.slane %v3179_v28, 9  ;;  %v11010_v16 = vld [vmem:[#allocation8 + $0xe8] sm:$0xff]   ;;  %v11153_v43 = vld [vmem:[#allocation2 + $0xa4] sm:$0x1] }
 0x2c1   : > { %10195 = vmatprep.subr.bf16.mxu0 %v11006_v42  ;;  %v12564_v51 = vsel %vm11969_vm11, %v9164_v54, %v3356_v44  ;;  %v9184_v18 = vcombine.low %v12555_v1, %v12560_v58  ;;  %v12578_v60 = vsel %vm11969_vm11, %v9166_v32, %v3364_v19  ;;  %v12604_v44 = vsel %vm11969_vm11, %v9170_v50, %v3380_v45  ;;  %v11152_v19 = vld [vmem:[#allocation2 + $0x8c] sm:$0x1]  ;;  %v11155_v62 = vld [vmem:[#allocation2 + $0x84] sm:$0x1]  ;;  %v11011_v28 = vld [vmem:[#allocation8 + $0xf0] sm:$0xff]  }
 0x2c2   : > { %v9185_v25 = vcombine.low %v12564_v51, %v12571_v57  ;;  %v9186_v31 = vcombine.low %v12578_v60, %v12583_v22  ;;  %v12608_v24 = vsel %vm11969_vm11, %v9171_v63, %v3384_v34  ;;  %v9179_v7 = vcombine.low %v3309_v56, %v3313_v53  ;;  %v11154_v11 = vld [vmem:[#allocation2 + $0xac] sm:$0x1]  ;;  %v3185_v50 = vld [vmem:[#allocation2 + $0xb0] sm:$0xe]  ;;  %v11012_v45 = vld [vmem:[#allocation8 + $0xf8] sm:$0xff]  }
 0x2c3   : > { %v9188_v3 = vcombine.low %v12604_v44, %v12608_v24  ;;  %v9157_v32 = vrot.slane %v3182_v55, 9  ;;  %v3328_v61 = vrot.slane %v11152_v19, 5  ;;  %v9158_v36 = vrot.slane %v3183_v0, 9  ;;  %v11014_v1 = vld [vmem:[#allocation2 + $0x18] ss:$8 sps:$4 sm:$0xff]   ;;  %v11018_v58 = vld [vmem:[#allocation8 + $0x108] sm:$0xff]  }
 0x2c4   : > { %10196 = vmatpush3.bf16.msra.mxu0 %v11006_v42  ;;  %v3376_v42 = vrot.slane %v12435_v8, 5  ;;  %v9172_v8 = vrot.slane %v3197_v10, 9  ;;  %v3332_v13 = vrot.slane %v11153_v43, 5  ;;  %v9159_v15 = vrot.slane %v3184_v26, 9  ;;  %v11021_v51 = vld [vmem:[#allocation8 + $0x110] sm:$0xff]   ;;  %v11024_v60 = vld [vmem:[#allocation8 + $0x118] sm:$0xff]  }
 0x2c5   : > { %10197 = vmatprep.subr.bf16.mxu0 %v11007_v29  ;;  %v3336_v4 = vrot.slane %v11154_v11, 5  ;;  %v9156_v46 = vrot.slane %v3181_v40, 9  ;;  %v3324_v10 = vrot.slane %v11155_v62, 5  ;;  %v3329_v30 = vsel %vm11969_vm11, %v9157_v32, %v3328_v61  ;;  %v4104_v57 = vld [vmem:[#allocation2 + $0x10] sm:$0xf]  ;;  %v11027_v53 = vld [vmem:[#allocation8 + $0x120] sm:$0xff]  }
 0x2c6   : > { %v12595_v20 = vsel %vm11969_vm11, %v9169_v5, %v3376_v42  ;;  %v3333_v2 = vsel %vm11969_vm11, %v9158_v36, %v3332_v13  ;;  %v3344_v34 = vrot.slane %v12308_v21, 5  ;;  %v11013_v21 = vld [vmem:[#allocation2 + $0x8] ss:$8 sps:$4 sm:$0xff]   ;;  %v4105_v55 = vld [vmem:[#allocation2 + $0x14] sm:$0x1] }
 0x2c7   : > { %10166 = vmatmul.mubr.bf16.gmra.mrb[4].mxu0 %v9177_v39  ;;  %v9187_v47 = vcombine.low %v12590_v14, %v12595_v20  ;;  %v11151_v39 = vld [vmem:[#allocation2 + $0x74] sm:$0x1]  ;;  %v3337_v48 = vsel %vm11969_vm11, %v9159_v15, %v3336_v4  ;;  %v3325_v5 = vsel %vm11969_vm11, %v9156_v46, %v3324_v10  ;;  %v4102_v22 = vld [vmem:[#allocation2 + $0x8] sm:$0xf]  ;;  %v4181_v14 = vshrl.u32 %v4104_v57, 16 }
 0x2c8   : > { %10169 = vmatprep.mubr.bf16.mxu0 %v9178_v12  ;;  %10198 = vmatpush3.bf16.msra.mxu0 %v11007_v29  ;;  %v3316_v54 = vrot.slane %v11151_v39, 5  ;;  %v12620_v12 = vsel %vm11969_vm11, %v9172_v8, %v3388_v41  ;;  %v12624_v29 = vsel %vm11969_vm11, %v9173_v23, %v3392_v9  ;;  %v9181_v42 = vcombine.low %v3325_v5, %v3329_v30  ;;  %v11156_v41 = vld [vmem:[#allocation2 + $0xb4] sm:$0x1]  ;;  %v11015_v9 = vld [vmem:[#allocation8 + $0x100] sm:$0xff]   ;;  %v11020_v26 = vld [vmem:[#allocation2 + $0x68] ss:$8 sps:$4 sm:$0xff]  }
 0x2c9   : > { %10199 = vmatprep.subr.bf16.mxu0 %v11008_v59  ;;  %v9189_v49 = vcombine.low %v12620_v12, %v12624_v29  ;;  %v9182_v63 = vcombine.low %v3333_v2, %v3337_v48  ;;  %v9160_v8 = vrot.slane %v3185_v50, 9  ;;  %v3340_v23 = vrot.slane %v11156_v41, 5  ;;  %v4108_v0 = vld [vmem:[#allocation2 + $0x20] sm:$0xf]  ;;  %v4110_v40 = vld [vmem:[#allocation2 + $0x28] sm:$0xf] }
 0x2ca   : > { %v3317_v33 = vsel %vm11969_vm11, %v9154_v27, %v3316_v54  ;;  %v4184_v20 = vshll.u32 %v4104_v57, 16  ;;  %v4167_v44 = vshrl.u32 %v4102_v22, 16  ;;  %v4170_v24 = vshll.u32 %v4102_v22, 16  ;;  %v4112_v32 = vld [vmem:[#allocation2 + $0x30] sm:$0xf] }
 0x2cb   : > { %v9180_v52 = vcombine.low %v3317_v33, %v3321_v6  ;;  %v3341_v39 = vsel %vm11969_vm11, %v9160_v8, %v3340_v23  ;;  %v4183_v12 = vrot.slane %v4181_v14, 4  ;;  %v4103_v33 = vld [vmem:[#allocation2 + $0xc] sm:$0x1]  ;;  %v4107_v61 = vld [vmem:[#allocation2 + $0x1c] sm:$0x1]  ;;  %v4209_v43 = vshrl.u32 %v4108_v0, 16 }
 0x2cc   : > { %10200 = vmatpush3.bf16.msra.mxu0 %v11008_v59  ;;  %v3186_v59 = vld [vmem:[#allocation2 + $0xb8] sm:$0xe]  ;;  %v4186_v29 = vrot.slane %v4184_v20, 5  ;;  %v4172_v56 = vrot.slane %v4170_v24, 5  ;;  %v4212_v13 = vshll.u32 %v4108_v0, 16  ;;  %v4190_v11 = vshll.u32 %v4105_v55, 16 }
 0x2cd   : > { %10201 = vmatprep.subr.bf16.mxu0 %v11009_v37  ;;  %v4223_v4 = vshrl.u32 %v4110_v40, 16  ;;  %v4226_v46 = vshll.u32 %v4110_v40, 16  ;;  %v11033_v62 = vld [vmem:[#allocation8 + $0x130] sm:$0xff]   ;;  %v4237_v10 = vshrl.u32 %v4112_v32, 16  ;;  %v4176_v30 = vshll.u32 %v4103_v33, 16 }
 0x2ce   : > { %v4187_v19 = vor.u32 %v4186_v29, %v4183_v12  ;;  %v4109_v2 = vld [vmem:[#allocation2 + $0x24] sm:$0x1]  ;;  %v4204_v48 = vshll.u32 %v4107_v61, 16  ;;  %v4211_v50 = vrot.slane %v4209_v43, 4  ;;  %v4192_v8 = vrot.slane %v4190_v11, 5 }
 0x2cf   : > { %10170 = vmatmul.mubr.bf16.gmra.mrb[8].mxu0 %v9179_v7  ;;  %v11030_v7 = vld [vmem:[#allocation8 + $0x128] sm:$0xff]   ;;  %v4225_v41 = vrot.slane %v4223_v4, 4  ;;  %v4228_v23 = vrot.slane %v4226_v46, 5  ;;  %v12672_v22 = vld [vmem:[#allocation2 + $0x34] sm:$0x1] }
 0x2d0   : > { %10173 = vmatprep.mubr.bf16.mxu0 %v9180_v52  ;;  %10202 = vmatpush3.bf16.msra.mxu0 %v11009_v37  ;;  %v9161_v37 = vrot.slane %v3186_v59, 9  ;;  %v4114_v59 = vld [vmem:[#allocation2 + $0x38] sm:$0xf]  ;;  %v4188_v5 = vrot.slane %v4187_v19, 4  ;;  %v12674_v14 = vld [vmem:[#allocation2 + $0x3c] sm:$0x1] }
 0x2d1   : > { %10203 = vmatprep.subr.bf16.mxu0 %v11010_v16  ;;  %v12680_v24 = vld [vmem:[#allocation2 + $0x44] sm:$0x1]  ;;  %v12698_v33 = vld [vmem:[#allocation2 + $0x74] sm:$0x1]  ;;  %v4946_v40 = vld [vmem:[#allocation2 + $0x68] sm:$0xe] }
 0x2d2   : > { %v3345_v27 = vsel %vm11969_vm11, %v9161_v37, %v3344_v34  ;;  %v11023_v37 = vld [vmem:[#allocation2 + $0x88] ss:$8 sps:$4 sm:$0xff]   ;;  %v4193_v57 = vsel %vm11862_vm6, %v4188_v5, %v4192_v8  ;;  %v9256_v5 = vrot.slane %v4946_v40, 9  ;;  %v12758_v40 = vld [vmem:[#allocation2 + $0xcc] sm:$0x1] }
 0x2d3   : > { %v9183_v54 = vcombine.low %v3341_v39, %v3345_v27  ;;  %v4239_v27 = vrot.slane %v4237_v10, 4  ;;  %v4947_v43 = vld [vmem:[#allocation2 + $0x70] sm:$0xe]  ;;  %v4948_v10 = vld [vmem:[#allocation2 + $0x78] sm:$0xe] }
 0x2d4   : > { %10204 = vmatpush3.bf16.msra.mxu0 %v11010_v16  ;;  %v11022_v16 = vld [vmem:[#allocation2 + $0x78] ss:$8 sps:$4 sm:$0xff]   ;;  %v4950_v8 = vld [vmem:[#allocation2 + $0x88] sm:$0xe] }
 0x2d5   : > { %10205 = vmatprep.subr.bf16.mxu0 %v11011_v28 }
 0x2d7   : > { %10174 = vmatmul.mubr.bf16.gmra.mrb[12].mxu0 %v9181_v42 }
 0x2d8   : > { %10177 = vmatprep.mubr.bf16.mxu0 %v9182_v63  ;;  %10206 = vmatpush3.bf16.msra.mxu0 %v11011_v28  ;;  %v4240_v28 = vshll.u32 %v4112_v32, 16  ;;  %v4111_v63 = vld [vmem:[#allocation2 + $0x2c] sm:$0x1] }
 0x2d9   : > { %10207 = vmatprep.subr.bf16.mxu0 %v11012_v45 }
 0x2da   : > { %v4242_v39 = vrot.slane %v4240_v28, 5 }
 0x2dc   : > { %10208 = vmatpush3.bf16.msra.mxu0 %v11012_v45  ;;  %v4214_v45 = vrot.slane %v4212_v13, 5  ;;  %v4243_v12 = vor.u32 %v4242_v39, %v4239_v27  ;;  %v11028_v13 = vld [vmem:[#allocation2 + $0xc8] ss:$8 sps:$4 sm:$0xff]   ;;  %v12739_v27 = vld [vmem:[#allocation2 + $0xb4] sm:$0x1]  ;;  %v9258_v39 = vrot.slane %v4948_v10, 9 }
 0x2dd   : > { %10241 = vmatprep.subr.bf16.mxu0 %v11015_v9  ;;  %v4955_v10 = vld [vmem:[#allocation2 + $0xc0] sm:$0xe] }
 0x2de   : > { %v12719_v28 = vrot.slane %v4243_v12, 4 }
 0x2df   : > { %10178 = vmatmul.mubr.bf16.gmra.mrb[16].mxu0 %v9183_v54  ;;  %v4251_v54 = vshrl.u32 %v4114_v59, 16 }
 0x2e0   : > { %10181 = vmatprep.mubr.bf16.mxu0 %v9184_v18  ;;  %v11016_v18 = vld [vmem:[#allocation2 + $0x28] ss:$8 sps:$4 sm:$0xff]  }
 0x2e1   : > { %v12686_v29 = vrot.slane %v4251_v54, 4  ;;  %v4951_v54 = vld [vmem:[#allocation2 + $0x90] sm:$0xe] }
 0x2e7   : > { %10182 = vmatmul.mubr.bf16.gmra.mrb[20].mxu0 %v9185_v25  ;;  %v11017_v25 = vld [vmem:[#allocation2 + $0x38] ss:$8 sps:$4 sm:$0xff]  }
 0x2e8   : > { %10185 = vmatprep.mubr.bf16.mxu0 %v9186_v31  ;;  %v11019_v31 = vld [vmem:[#allocation2 + $0x58] ss:$8 sps:$4 sm:$0xff]  }
 0x2ef   : > { %10186 = vmatmul.mubr.bf16.gmra.mrb[24].mxu0 %v9187_v47  ;;  %v4106_v47 = vld [vmem:[#allocation2 + $0x18] sm:$0xf] }
 0x2f0   : > { %10189 = vmatprep.mubr.bf16.mxu0 %v9188_v3  ;;  %v4195_v3 = vshrl.u32 %v4106_v47, 16  ;;  %v4198_v6 = vshll.u32 %v4106_v47, 16  ;;  %v12678_v47 = vrot.slane %v4204_v48, 5  ;;  %v12725_v48 = vld [vmem:[#allocation2 + $0x8c] sm:$0x1] }
 0x2f2   : > { %v4197_v52 = vrot.slane %v4195_v3, 4  ;;  %v4200_v36 = vrot.slane %v4198_v6, 5  ;;  %v12684_v3 = vld [vmem:[#allocation8 + $0x140] sm:$0xff]  }
 0x2f4   : > { %v4201_v42 = vor.u32 %v4200_v36, %v4197_v52  ;;  %v12709_v36 = vld [vmem:[#allocation2 + $0x7c] sm:$0x1]  ;;  %v12775_v52 = vld [vmem:[#allocation2 + $0xe4] sm:$0x1] }
 0x2f7   : > { %10190 = vmatmul.mubr.bf16.gmra.mrb[28].mxu0 %v9189_v49  ;;  %v4169_v49 = vrot.slane %v4167_v44, 4  ;;  %v4229_v44 = vor.u32 %v4228_v23, %v4225_v41  ;;  %v4959_v23 = vld [vmem:[#allocation2 + $0xe0] sm:$0xe] }
 0x2f8   : > { %10209 = vmatprep.mubr.bf16.mxu0 %v11013_v21  ;;  %v4254_v21 = vshll.u32 %v4114_v59, 16  ;;  %v12727_v59 = vld [vmem:[#allocation2 + $0x94] sm:$0x1] }
 0x2f9   : > { %v4173_v15 = vor.u32 %v4172_v56, %v4169_v49  ;;  %v12690_v49 = vld [vmem:[#allocation2 + $0x6c] sm:$0x1] }
 0x2fa   : > { %v12688_v6 = vrot.slane %v4254_v21, 5  ;;  %v12797_v21 = vld [vmem:[#allocation2 + $0x104] sm:$0x1] }
 0x2fb   : > { %v4174_v34 = vrot.slane %v4173_v15, 4  ;;  %v12711_v15 = vrot.slane %v4229_v44, 4  ;;  %14075 = vst [vmem:[#allocation25_spill] sm:$0xff] %v12797_v21 }
 0x2ff   : > { %10210 = vmatmul.mubr.bf16.vlgmr.msra.gmra.mrb[0].mxu0 %v11014_v1  ;;  %v11025_v1 = vld [vmem:[#allocation2 + $0xa8] ss:$8 sps:$4 sm:$0xff]  }
 0x300   : > { %10213 = vmatprep.mubr.bf16.mxu0 %v11016_v18  ;;  %10242 = vmatpush3.bf16.msra.mxu0 %v11015_v9  ;;  %v11036_v9 = vld [vmem:[#allocation8 + $0x138] sm:$0xff]   ;;  %v4218_v18 = vshll.u32 %v4109_v2, 16 }
 0x301   : > { %10243 = vmatprep.subr.bf16.mxu0 %v11018_v58 }
 0x302   : > { %v12694_v0 = vrot.slane %v4218_v18, 5 }
 0x304   : > { %10244 = vmatpush3.bf16.msra.mxu0 %v11018_v58  ;;  %v4178_v58 = vrot.slane %v4176_v30, 5 }
 0x305   : > { %10245 = vmatprep.subr.bf16.mxu0 %v11021_v51 }
 0x306   : > { %v4179_v20 = vsel %vm11862_vm6, %v4174_v34, %v4178_v58  ;;  %v5078_v34 = vrot.slane %v12698_v33, 5 }
 0x307   : > { %10214 = vmatmul.mubr.bf16.gmra.mrb[4].mxu0 %v11017_v25  ;;  %v12670_v25 = vrot.slane %v4201_v42, 4  ;;  %v12692_v56 = vcombine.low %v4179_v20, %v4193_v57  ;;  %v4949_v42 = vld [vmem:[#allocation2 + $0x80] sm:$0xe]  ;;  %v4952_v57 = vld [vmem:[#allocation2 + $0xa8] sm:$0xe] }
 0x308   : > { %10217 = vmatprep.mubr.bf16.mxu0 %v11019_v31  ;;  %10246 = vmatpush3.bf16.msra.mxu0 %v11021_v51  ;;  %v4116_v51 = vld [vmem:[#allocation2 + $0x40] sm:$0xf]  ;;  %v4232_v31 = vshll.u32 %v4111_v63, 16  ;;  %v5074_v63 = vrot.slane %v12690_v49, 5  ;;  %v9259_v44 = vrot.slane %v4949_v42, 9 }
 0x309   : > { %10247 = vmatprep.subr.bf16.mxu0 %v11024_v60  ;;  %v4265_v55 = vshrl.u32 %v4116_v51, 16  ;;  %v12768_v42 = vld [vmem:[#allocation2 + $0xdc] sm:$0x1]  ;;  %v11031_v20 = vld [vmem:[#allocation2 + $0xf8] ss:$8 sps:$4 sm:$0xff]  }
 0x30a   : > { %v12706_v19 = vrot.slane %v4232_v31, 5  ;;  %v12746_v58 = vsel %vm11969_vm11, %v9256_v5, %v5074_v63  ;;  %v12753_v31 = vld [vmem:[#allocation2 + $0xc4] sm:$0x1]  ;;  %v11029_v5 = vld [vmem:[#allocation2 + $0xd8] ss:$8 sps:$4 sm:$0xff]  }
 0x30b   : > { %v12723_v2 = vrot.slane %v4265_v55, 4  ;;  %14067 = vst [vmem:[#allocation19_spill] sm:$0xff] %v12746_v58  ;;  %v9260_v55 = vrot.slane %v4950_v8, 9  ;;  %v12766_v63 = vld [vmem:[#allocation2 + $0xd4] sm:$0x1] }
 0x30c   : > { %10248 = vmatpush3.bf16.msra.mxu0 %v11024_v60  ;;  %v4215_v60 = vor.u32 %v4214_v45, %v4211_v50  ;;  %v12731_v45 = vld [vmem:[#allocation2 + $0xac] sm:$0x1]  ;;  %v4967_v58 = vld [vmem:[#allocation2 + $0x130] sm:$0xe] }
 0x30d   : > { %10249 = vmatprep.subr.bf16.mxu0 %v11027_v53  ;;  %v5098_v8 = vrot.slane %v12731_v45, 5 }
 0x30e   : > { %v12704_v32 = vrot.slane %v4215_v60, 4  ;;  %v4953_v60 = vld [vmem:[#allocation2 + $0xb0] sm:$0xe] }
 0x30f   : > { %10218 = vmatmul.mubr.bf16.gmra.mrb[8].mxu0 %v11020_v26  ;;  %v4268_v26 = vshll.u32 %v4116_v51, 16  ;;  %v5082_v51 = vrot.slane %v12709_v36, 5 }
 0x310   : > { %10221 = vmatprep.mubr.bf16.mxu0 %v11022_v16  ;;  %10250 = vmatpush3.bf16.msra.mxu0 %v11027_v53  ;;  %v12682_v53 = vld [vmem:[#allocation2 + $0x58] sm:$0xf] }
 0x311   : > { %10251 = vmatprep.subr.bf16.mxu0 %v11030_v7  ;;  %v11026_v16 = vld [vmem:[#allocation2 + $0xb8] ss:$8 sps:$4 sm:$0xff]   ;;  %v4279_v61 = vshrl.u32 %v12682_v53, 16  ;;  %v12729_v50 = vrot.slane %v4268_v26, 5 }
 0x312   : > { %v4954_v26 = vld [vmem:[#allocation2 + $0xb8] sm:$0xe] }
 0x313   : > { %v12735_v41 = vrot.slane %v4279_v61, 4  ;;  %v5090_v61 = vrot.slane %v12725_v48, 5 }
 0x314   : > { %10252 = vmatpush3.bf16.msra.mxu0 %v11030_v7  ;;  %v12696_v7 = vld [vmem:[#allocation2 + $0x60] sm:$0xf] }
 0x315   : > { %10253 = vmatprep.subr.bf16.mxu0 %v11033_v62  ;;  %v12781_v46 = vsel %vm11969_vm11, %v9260_v55, %v5090_v61  ;;  %v4958_v61 = vld [vmem:[#allocation2 + $0xd8] sm:$0xe] }
 0x316   : > { %14071 = vst [vmem:[#allocation21_spill] sm:$0xff] %v12781_v46 }
 0x317   : > { %10222 = vmatmul.mubr.bf16.gmra.mrb[12].mxu0 %v11023_v37  ;;  %v9257_v37 = vrot.slane %v4947_v43, 9  ;;  %v9261_v43 = vrot.slane %v4951_v54, 9  ;;  %v9264_v54 = vrot.slane %v4954_v26, 9  ;;  %v5122_v26 = vrot.slane %v12768_v42, 5 }
 0x318   : > { %10225 = vmatprep.mubr.bf16.mxu0 %v11025_v1  ;;  %10254 = vmatpush3.bf16.msra.mxu0 %v11033_v62  ;;  %v12716_v62 = vld [vmem:[#allocation2 + $0x84] sm:$0x1]  ;;  %v12742_v1 = vld [vmem:[#allocation2 + $0xbc] sm:$0x1] }
 0x319   : > { %10255 = vmatprep.subr.bf16.mxu0 %v11036_v9  ;;  %v12750_v18 = vsel %vm11969_vm11, %v9257_v37, %v5078_v34  ;;  %v5086_v12 = vrot.slane %v12716_v62, 5  ;;  %v9262_v34 = vrot.slane %v4952_v57, 9  ;;  %v5102_v57 = vrot.slane %v12739_v27, 5 }
 0x31a   : > { %14068 = vst [vmem:[#allocation17_spill] sm:$0xff] %v12750_v18  ;;  %v5106_v55 = vrot.slane %v12742_v1, 5 }
 0x31b   : > { %v12772_v37 = vsel %vm11969_vm11, %v9259_v44, %v5086_v12  ;;  %v4957_v44 = vld [vmem:[#allocation2 + $0xd0] sm:$0xe]  ;;  %v12788_v12 = vld [vmem:[#allocation2 + $0xfc] sm:$0x1]  ;;  %v12794_v4 = vsel %vm11969_vm11, %v9262_v34, %v5098_v8  ;;  %v5114_v8 = vrot.slane %v12758_v40, 5 }
 0x31c   : > { %10256 = vmatpush3.bf16.msra.mxu0 %v11036_v9  ;;  %14070 = vst [vmem:[#allocation20_spill] sm:$0xff] %v12772_v37  ;;  %14073 = vst [vmem:[#allocation23_spill] sm:$0xff] %v12788_v12  ;;  %v5110_v9 = vrot.slane %v12753_v31, 5  ;;  %v12810_v34 = vsel %vm11969_vm11, %v9264_v54, %v5106_v55  ;;  %v9267_v17 = vrot.slane %v4957_v44, 9  ;;  %v9269_v44 = vrot.slane %v4959_v23, 9 }
 0x31d   : > { %10289 = vmatprep.subr.bf16.mxu0 %v12684_v3  ;;  %14074 = vst [vmem:[#allocation24_spill] sm:$0xff] %v12794_v4  ;;  %14077 = vst [vmem:[#allocation27_spill] sm:$0xff] %v12810_v34  ;;  %v12821_v4 = vld [vmem:[#allocation2 + $0x11c] sm:$0x1]  ;;  %v5126_v55 = vrot.slane %v12775_v52, 5  ;;  %v5130_v54 = vrot.slane %v12788_v12, 5 }
 0x31e   : > { %v12841_v23 = vld [vmem:[#allocation2 + $0x12c] sm:$0x1]  ;;  %v4122_v12 = vld [vmem:[#allocation2 + $0x68] sm:$0xf] }
 0x31f   : > { %10226 = vmatmul.mubr.bf16.gmra.mrb[16].mxu0 %v11026_v16  ;;  %v12762_v16 = vsel %vm11969_vm11, %v9258_v39, %v5082_v51  ;;  %v9263_v39 = vrot.slane %v4953_v60, 9  ;;  %v4956_v51 = vld [vmem:[#allocation2 + $0xc8] sm:$0xe]  ;;  %v12804_v60 = vld [vmem:[#allocation2 + $0x10c] sm:$0x1]  ;;  %v12847_v37 = vsel %vm11969_vm11, %v9269_v44, %v5126_v55 }
 0x320   : > { %10229 = vmatprep.mubr.bf16.mxu0 %v11028_v13  ;;  %14069 = vst [vmem:[#allocation18_spill] sm:$0xff] %v12762_v16  ;;  %v5094_v13 = vrot.slane %v12727_v59, 5  ;;  %v9266_v11 = vrot.slane %v4956_v51, 9  ;;  %v5138_v34 = vrot.slane %v12804_v60, 5 }
 0x322   : > { %v12785_v30 = vsel %vm11969_vm11, %v9261_v43, %v5094_v13  ;;  %v12801_v43 = vsel %vm11969_vm11, %v9263_v39, %v5102_v57  ;;  %v9265_v13 = vrot.slane %v4955_v10, 9  ;;  %v4960_v39 = vld [vmem:[#allocation2 + $0xf8] sm:$0xe]  ;;  %v12813_v10 = vld [vmem:[#allocation2 + $0x114] sm:$0x1]  ;;  %v9268_v57 = vrot.slane %v4958_v61, 9 }
 0x323   : > { %14072 = vst [vmem:[#allocation22_spill] sm:$0xff] %v12785_v30  ;;  %14076 = vst [vmem:[#allocation26_spill] sm:$0xff] %v12801_v43  ;;  %v4961_v43 = vld [vmem:[#allocation2 + $0x100] sm:$0xe]  ;;  %v9270_v46 = vrot.slane %v4960_v39, 9  ;;  %v5142_v55 = vrot.slane %v12813_v10, 5  ;;  %v4271_v39 = vor.u32 %v12729_v50, %v12723_v2  ;;  %v14093_v50 = vor.u32 %v12688_v6, %v12686_v29 }
 0x324   : > { %v12817_v51 = vsel %vm11969_vm11, %v9265_v13, %v5110_v9  ;;  %v4962_v9 = vld [vmem:[#allocation2 + $0x108] sm:$0xe]  ;;  %v12830_v13 = vld [vmem:[#allocation2 + $0x124] sm:$0x1]  ;;  %v12838_v30 = vsel %vm11969_vm11, %v9268_v57, %v5122_v26  ;;  %v4965_v26 = vld [vmem:[#allocation2 + $0x120] sm:$0xe]  ;;  %v14095_v29 = vsel %vm11862_vm6, %v12670_v25, %v12678_v47 }
 0x325   : > { %14078 = vst [vmem:[#allocation28_spill] sm:$0xff] %v12817_v51  ;;  %v4963_v51 = vld [vmem:[#allocation2 + $0x110] sm:$0xe]  ;;  %v12850_v57 = vld [vmem:[#allocation2 + $0x134] sm:$0x1]  ;;  %v12856_v16 = vsel %vm11969_vm11, %v9270_v46, %v5130_v54  ;;  %v9272_v18 = vrot.slane %v4962_v9, 9 }
 0x326   : > { %v5146_v54 = vrot.slane %v12821_v4, 5  ;;  %v9275_v9 = vrot.slane %v4965_v26, 9  ;;  %v5158_v26 = vrot.slane %v12850_v57, 5  ;;  %v4310_v2 = vshll.u32 %v4122_v12, 16  ;;  %v4132_v25 = vld [vmem:[#allocation2 + $0x90] sm:$0xf] }
 0x327   : > { %10230 = vmatmul.mubr.bf16.gmra.mrb[20].mxu0 %v11029_v5  ;;  %v5118_v5 = vrot.slane %v12766_v63, 5  ;;  %v12868_v46 = vsel %vm11969_vm11, %v9272_v18, %v5138_v34  ;;  %v9277_v34 = vrot.slane %v4967_v58, 9 }
 0x328   : > { %10233 = vmatprep.mubr.bf16.mxu0 %v11031_v20  ;;  %v12827_v20 = vsel %vm11969_vm11, %v9266_v11, %v5114_v8  ;;  %v4964_v11 = vld [vmem:[#allocation2 + $0x118] sm:$0xe]  ;;  %v11032_v8 = vld [vmem:[#allocation2 + $0x108] ss:$8 sps:$4 sm:$0xff]   ;;  %14082 = vst [vmem:[#allocation32_spill] sm:$0xff] %v12868_v46 }
 0x329   : > { %14079 = vst [vmem:[#allocation29_spill] sm:$0xff] %v12827_v20  ;;  %v12834_v61 = vsel %vm11969_vm11, %v9267_v17, %v5118_v5  ;;  %v9271_v17 = vrot.slane %v4961_v43, 9  ;;  %v5134_v5 = vrot.slane %v12797_v21, 5  ;;  %v9273_v43 = vrot.slane %v4963_v51, 9  ;;  %v11034_v21 = vld [vmem:[#allocation2 + $0x118] ss:$8 sps:$4 sm:$0xff]  }
 0x32a   : > { %14080 = vst [vmem:[#allocation30_spill] sm:$0xff] %v12834_v61  ;;  %v4966_v61 = vld [vmem:[#allocation2 + $0x128] sm:$0xe]  ;;  %v9274_v20 = vrot.slane %v4964_v11, 9  ;;  %v5150_v11 = vrot.slane %v12830_v13, 5 }
 0x32b   : > { %v12861_v44 = vsel %vm11969_vm11, %v9271_v17, %v5134_v5  ;;  %v12873_v51 = vsel %vm11969_vm11, %v9273_v43, %v5142_v55  ;;  %v9276_v17 = vrot.slane %v4966_v61, 9  ;;  %v5154_v5 = vrot.slane %v12841_v23, 5  ;;  %v4128_v46 = vld [vmem:[#allocation2 + $0x80] sm:$0xf] }
 0x32c   : > { %14081 = vst [vmem:[#allocation31_spill] sm:$0xff] %v12861_v44  ;;  %14083 = vst [vmem:[#allocation33_spill] sm:$0xff] %v12873_v51  ;;  %v14084_v43 = vshll.u32 %v12682_v53, 16  ;;  %v4307_v44 = vshrl.u32 %v4122_v12, 16  ;;  %v12888_v61 = vsel %vm11969_vm11, %v9274_v20, %v5146_v54  ;;  %v12902_v53 = vsel %vm11969_vm11, %v9277_v34, %v5158_v26 }
 0x32d   : > { %14085 = vst [vmem:[#allocation34_spill] sm:$0xff] %v12888_v61  ;;  %v12898_v58 = vsel %vm11969_vm11, %v9276_v17, %v5154_v5  ;;  %14088 = vst [vmem:[#allocation37_spill] sm:$0xff] %v12902_v53  ;;  %v14090_v54 = vshrl.u32 %v12696_v7, 16  ;;  %v4221_v17 = vsel %vm11862_vm6, %v12704_v32, %v12694_v0  ;;  %v4235_v5 = vsel %vm11862_vm6, %v12711_v15, %v12706_v19  ;;  %v12929_v53 = vld [vmem:[#allocation2 + $0x64] sm:$0x1] }
 0x32e   : > { %v4284_v55 = vrot.slane %v14084_v43, 5  ;;  %14087 = vst [vmem:[#allocation36_spill] sm:$0xff] %v12898_v58  ;;  %v14089_v43 = vshll.u32 %v12672_v22, 16  ;;  %v14092_v34 = vshll.u32 %v12674_v14, 16  ;;  %v4258_v0 = vrot.slane %v14093_v50, 4 }
 0x32f   : > { %10234 = vmatmul.mubr.bf16.gmra.mrb[24].mxu0 %v11032_v8  ;;  %v12882_v8 = vld [vmem:[#allocation2 + $0x5c] sm:$0x1]  ;;  %v4295_v18 = vrot.slane %v14090_v54, 4  ;;  %v11035_v54 = vld [vmem:[#allocation2 + $0x128] ss:$8 sps:$4 sm:$0xff]   ;;  %v4272_v32 = vrot.slane %v4271_v39, 4  ;;  %v9223_v6 = vcombine.low %v14095_v29, %v4221_v17 }
 0x330   : > { %10237 = vmatprep.mubr.bf16.mxu0 %v11034_v21  ;;  %v12892_v21 = vsel %vm11969_vm11, %v9275_v9, %v5150_v11  ;;  %v4248_v20 = vrot.slane %v14089_v43, 5  ;;  %v14091_v9 = vshll.u32 %v12696_v7, 16  ;;  %v4124_v11 = vld [vmem:[#allocation2 + $0x70] sm:$0xf]  ;;  %v4262_v26 = vrot.slane %v14092_v34, 5 }
 0x331   : > { %14086 = vst [vmem:[#allocation35_spill] sm:$0xff] %v12892_v21  ;;  %v4288_v7 = vshll.u32 %v12882_v8, 16  ;;  %v4126_v43 = vld [vmem:[#allocation2 + $0x78] sm:$0xf]  ;;  %v4285_v19 = vor.u32 %v4284_v55, %v12735_v41  ;;  %v14094_v14 = vshll.u32 %v12680_v24, 16  ;;  %v4309_v34 = vrot.slane %v4307_v44, 4 }
 0x332   : > { %v4298_v12 = vrot.slane %v14091_v9, 5  ;;  %v4249_v9 = vsel %vm11862_vm6, %v12719_v28, %v4248_v20  ;;  %v4312_v58 = vrot.slane %v4310_v2, 5  ;;  %v4321_v21 = vshrl.u32 %v4124_v11, 16 }
 0x333   : > { %v4276_v15 = vrot.slane %v14094_v14, 5  ;;  %v4324_v51 = vshll.u32 %v4124_v11, 16  ;;  %v4335_v28 = vshrl.u32 %v4126_v43, 16  ;;  %v4338_v20 = vshll.u32 %v4126_v43, 16 }
 0x334   : > { %v4299_v61 = vor.u32 %v4298_v12, %v4295_v18  ;;  %v9224_v41 = vcombine.low %v4235_v5, %v4249_v9  ;;  %v4290_v39 = vrot.slane %v4288_v7, 5  ;;  %v4302_v44 = vshll.u32 %v12929_v53, 16 }
 0x335   : > { %v4263_v55 = vsel %vm11862_vm6, %v4258_v0, %v4262_v26  ;;  %v4277_v18 = vsel %vm11862_vm6, %v4272_v32, %v4276_v15  ;;  %v4286_v2 = vrot.slane %v4285_v19, 4  ;;  %v4316_v50 = vshll.u32 %v12690_v49, 16  ;;  %v11038_v0 = vld [vmem:[#allocation8 + $0x148] sm:$0xff]  }
 0x336   : > { %v4313_v12 = vor.u32 %v4312_v58, %v4309_v34  ;;  %v4323_v11 = vrot.slane %v4321_v21, 4  ;;  %v4349_v43 = vshrl.u32 %v4128_v46, 16  ;;  %v4300_v47 = vrot.slane %v4299_v61, 4  ;;  %v4134_v21 = vld [vmem:[#allocation2 + $0xa8] sm:$0xf] }
 0x337   : > { %10238 = vmatmul.mubr.bf16.gmra.mrb[28].mxu0 %v11035_v54  ;;  %v4352_v54 = vshll.u32 %v4128_v46, 16  ;;  %v4326_v17 = vrot.slane %v4324_v51, 5  ;;  %v4337_v5 = vrot.slane %v4335_v28, 4  ;;  %v4340_v7 = vrot.slane %v4338_v20, 5  ;;  %v4136_v34 = vld [vmem:[#allocation2 + $0xb0] sm:$0xf] }
 0x338   : > { %10257 = vmatprep.mubr.bf16.mxu0 %v12692_v56  ;;  %v4130_v56 = vld [vmem:[#allocation2 + $0x88] sm:$0xf]  ;;  %v9225_v9 = vcombine.low %v4263_v55, %v4277_v18  ;;  %v4304_v14 = vrot.slane %v4302_v44, 5  ;;  %v4291_v32 = vsel %vm11862_vm6, %v4286_v2, %v4290_v39  ;;  %v12948_v19 = vrot.slane %v4316_v50, 5 }
 0x339   : > { %v4363_v29 = vshrl.u32 %v4130_v56, 16  ;;  %v4366_v26 = vshll.u32 %v4130_v56, 16  ;;  %v4377_v49 = vshrl.u32 %v4132_v25, 16  ;;  %v4380_v58 = vshll.u32 %v4132_v25, 16 }
 0x33a   : > { %v4330_v46 = vshll.u32 %v12698_v33, 16  ;;  %v4344_v61 = vshll.u32 %v12709_v36, 16  ;;  %v4351_v51 = vrot.slane %v4349_v43, 4  ;;  %v4354_v15 = vrot.slane %v4352_v54, 5  ;;  %v11039_v36 = vld [vmem:[#allocation8 + $0x150] sm:$0xff]  }
 0x33b   : > { %v4305_v28 = vsel %vm11862_vm6, %v4300_v47, %v4304_v14  ;;  %v12954_v20 = vrot.slane %v4313_v12, 4  ;;  %v4327_v44 = vor.u32 %v4326_v17, %v4323_v11  ;;  %v4341_v39 = vor.u32 %v4340_v7, %v4337_v5  ;;  %v4140_v5 = vld [vmem:[#allocation2 + $0xc0] sm:$0xf] }
 0x33c   : > { %v4365_v55 = vrot.slane %v4363_v29, 4  ;;  %v4368_v18 = vrot.slane %v4366_v26, 5  ;;  %v4391_v2 = vshrl.u32 %v4134_v21, 16  ;;  %v4394_v33 = vshll.u32 %v4134_v21, 16 }
 0x33d   : > { %v4379_v50 = vrot.slane %v4377_v49, 4  ;;  %v4382_v56 = vrot.slane %v4380_v58, 5  ;;  %v4405_v43 = vshrl.u32 %v4136_v34, 16  ;;  %v4332_v54 = vrot.slane %v4330_v46, 5  ;;  %v4138_v49 = vld [vmem:[#allocation2 + $0xb8] sm:$0xf] }
 0x33e   : > { %v12957_v25 = vrot.slane %v4344_v61, 5  ;;  %v4355_v12 = vor.u32 %v4354_v15, %v4351_v51  ;;  %v4358_v11 = vshll.u32 %v12716_v62, 16  ;;  %v9226_v47 = vcombine.low %v4291_v32, %v4305_v28  ;;  %v11040_v32 = vld [vmem:[#allocation8 + $0x158] sm:$0xff]  }
 0x33f   : > { %10258 = vmatmul.mubr.bf16.vlgmr.msra.gmra.mrb[0].mxu0 %v9223_v6  ;;  %v4408_v6 = vshll.u32 %v4136_v34, 16  ;;  %v4372_v17 = vshll.u32 %v12725_v48, 16  ;;  %v4369_v7 = vor.u32 %v4368_v18, %v4365_v55  ;;  %v4386_v14 = vshll.u32 %v12727_v59, 16  ;;  %v4142_v34 = vld [vmem:[#allocation2 + $0xc8] sm:$0xf] }
 0x340   : > { %10261 = vmatprep.mubr.bf16.mxu0 %v9224_v41  ;;  %10290 = vmatpush3.bf16.msra.mxu0 %v12684_v3  ;;  %v4319_v3 = vsel %vm11862_vm6, %v12954_v20, %v12948_v19  ;;  %v4328_v41 = vrot.slane %v4327_v44, 4  ;;  %v4393_v29 = vrot.slane %v4391_v2, 4  ;;  %v4396_v26 = vrot.slane %v4394_v33, 5  ;;  %v4144_v18 = vld [vmem:[#allocation2 + $0xd0] sm:$0xf] }
 0x341   : > { %10291 = vmatprep.subr.bf16.mxu0 %v11038_v0  ;;  %v4342_v58 = vrot.slane %v4341_v39, 4  ;;  %v4383_v62 = vor.u32 %v4382_v56, %v4379_v50  ;;  %v4407_v21 = vrot.slane %v4405_v43, 4  ;;  %v4410_v46 = vrot.slane %v4408_v6, 5  ;;  %v11041_v50 = vld [vmem:[#allocation8 + $0x160] sm:$0xff]  }
 0x342   : > { %v4356_v61 = vrot.slane %v4355_v12, 4  ;;  %v4360_v51 = vrot.slane %v4358_v11, 5  ;;  %v4433_v19 = vshrl.u32 %v4140_v5, 16  ;;  %v4436_v15 = vshll.u32 %v4140_v5, 16 }
 0x343   : > { %v4333_v48 = vsel %vm11862_vm6, %v4328_v41, %v4332_v54  ;;  %v4419_v59 = vshrl.u32 %v4138_v49, 16  ;;  %v4422_v28 = vshll.u32 %v4138_v49, 16  ;;  %v4370_v20 = vrot.slane %v4369_v7, 4  ;;  %v11042_v49 = vld [vmem:[#allocation8 + $0x168] sm:$0xff]  }
 0x344   : > { %10292 = vmatpush3.bf16.msra.mxu0 %v11038_v0  ;;  %v4374_v0 = vrot.slane %v4372_v17, 5  ;;  %v4388_v44 = vrot.slane %v4386_v14, 5  ;;  %v4397_v39 = vor.u32 %v4396_v26, %v4393_v29  ;;  %v4400_v55 = vshll.u32 %v12731_v45, 16 }
 0x345   : > { %10293 = vmatprep.subr.bf16.mxu0 %v11039_v36  ;;  %v4384_v2 = vrot.slane %v4383_v62, 4  ;;  %v4411_v33 = vor.u32 %v4410_v46, %v4407_v21  ;;  %v4447_v56 = vshrl.u32 %v4142_v34, 16  ;;  %v4361_v43 = vsel %vm11862_vm6, %v4356_v61, %v4360_v51  ;;  %v4146_v61 = vld [vmem:[#allocation2 + $0xd8] sm:$0xf]  ;;  %v4148_v51 = vld [vmem:[#allocation2 + $0xe0] sm:$0xf] }
 0x346   : > { %v4414_v6 = vshll.u32 %v12739_v27, 16  ;;  %v4435_v54 = vrot.slane %v4433_v19, 4  ;;  %v4438_v12 = vrot.slane %v4436_v15, 5  ;;  %v4424_v11 = vrot.slane %v4422_v28, 5 }
 0x347   : > { %10262 = vmatmul.mubr.bf16.gmra.mrb[4].mxu0 %v9225_v9  ;;  %v4450_v9 = vshll.u32 %v4142_v34, 16  ;;  %v4464_v41 = vshll.u32 %v4144_v18, 16  ;;  %v9227_v17 = vcombine.low %v4319_v3, %v4333_v48  ;;  %v4347_v45 = vsel %vm11862_vm6, %v4342_v58, %v12957_v25 }
 0x348   : > { %10265 = vmatprep.mubr.bf16.mxu0 %v9226_v47  ;;  %10294 = vmatpush3.bf16.msra.mxu0 %v11039_v36  ;;  %v4421_v36 = vrot.slane %v4419_v59, 4  ;;  %v4461_v47 = vshrl.u32 %v4144_v18, 16  ;;  %v4398_v5 = vrot.slane %v4397_v39, 4  ;;  %v4428_v7 = vshll.u32 %v12742_v1, 16  ;;  %v4152_v59 = vld [vmem:[#allocation2 + $0x100] sm:$0xf] }
 0x349   : > { %10295 = vmatprep.subr.bf16.mxu0 %v11040_v32  ;;  %v4389_v14 = vsel %vm11862_vm6, %v4384_v2, %v4388_v44  ;;  %v4412_v29 = vrot.slane %v4411_v33, 4  ;;  %v4449_v27 = vrot.slane %v4447_v56, 4  ;;  %v4452_v26 = vrot.slane %v4450_v9, 5  ;;  %v11043_v39 = vld [vmem:[#allocation8 + $0x170] sm:$0xff]   ;;  %v4150_v56 = vld [vmem:[#allocation2 + $0xf8] sm:$0xf] }
 0x34a   : > { %v9228_v62 = vcombine.low %v4347_v45, %v4361_v43  ;;  %v4375_v3 = vsel %vm11862_vm6, %v4370_v20, %v4374_v0  ;;  %v4402_v21 = vrot.slane %v4400_v55, 5  ;;  %v4439_v46 = vor.u32 %v4438_v12, %v4435_v54 }
 0x34b   : > { %v4416_v25 = vrot.slane %v4414_v6, 5  ;;  %v4425_v58 = vor.u32 %v4424_v11, %v4421_v36  ;;  %v4466_v1 = vrot.slane %v4464_v41, 5  ;;  %v9229_v19 = vcombine.low %v4375_v3, %v4389_v14 }
 0x34c   : > { %10296 = vmatpush3.bf16.msra.mxu0 %v11040_v32  ;;  %v4463_v32 = vrot.slane %v4461_v47, 4  ;;  %v4403_v15 = vsel %vm11862_vm6, %v4398_v5, %v4402_v21  ;;  %v4430_v34 = vrot.slane %v4428_v7, 5  ;;  %v4442_v48 = vshll.u32 %v12753_v31, 16  ;;  %v4160_v21 = vld [vmem:[#allocation2 + $0x120] sm:$0xf] }
 0x34d   : > { %10297 = vmatprep.subr.bf16.mxu0 %v11041_v50  ;;  %v4417_v0 = vsel %vm11862_vm6, %v4412_v29, %v4416_v25  ;;  %v4453_v28 = vor.u32 %v4452_v26, %v4449_v27  ;;  %v4456_v20 = vshll.u32 %v12758_v40, 16  ;;  %v4475_v44 = vshrl.u32 %v4146_v61, 16 }
 0x34e   : > { %v4440_v55 = vrot.slane %v4439_v46, 4  ;;  %v4478_v18 = vshll.u32 %v4146_v61, 16  ;;  %v4489_v2 = vshrl.u32 %v4148_v51, 16  ;;  %v4492_v33 = vshll.u32 %v4148_v51, 16 }
 0x34f   : > { %10266 = vmatmul.mubr.bf16.gmra.mrb[8].mxu0 %v9227_v17  ;;  %v4426_v9 = vrot.slane %v4425_v58, 4  ;;  %v4467_v43 = vor.u32 %v4466_v1, %v4463_v32  ;;  %v4517_v6 = vshrl.u32 %v4152_v59, 16  ;;  %v4520_v31 = vshll.u32 %v4152_v59, 16  ;;  %v11044_v17 = vld [vmem:[#allocation8 + $0x178] sm:$0xff]   ;;  %v4154_v32 = vld [vmem:[#allocation2 + $0x108] sm:$0xf] }
 0x350   : > { %10269 = vmatprep.mubr.bf16.mxu0 %v9228_v62  ;;  %10298 = vmatpush3.bf16.msra.mxu0 %v11041_v50  ;;  %v9230_v50 = vcombine.low %v4403_v15, %v4417_v0  ;;  %v4444_v54 = vrot.slane %v4442_v48, 5  ;;  %v4470_v12 = vshll.u32 %v12766_v63, 16  ;;  %v4484_v36 = vshll.u32 %v12768_v42, 16  ;;  %v4156_v62 = vld [vmem:[#allocation2 + $0x110] sm:$0xf]  ;;  %v12996_v1 = vld [vmem:[#allocation8 + $0x180] sm:$0xff]  }
 0x351   : > { %10299 = vmatprep.subr.bf16.mxu0 %v11042_v49  ;;  %v4454_v40 = vrot.slane %v4453_v28, 4  ;;  %v4477_v11 = vrot.slane %v4475_v44, 4  ;;  %v4503_v47 = vshrl.u32 %v4150_v56, 16  ;;  %v4506_v41 = vshll.u32 %v4150_v56, 16 }
 0x352   : > { %v4445_v45 = vsel %vm11862_vm6, %v4440_v55, %v4444_v54  ;;  %v4480_v5 = vrot.slane %v4478_v18, 5  ;;  %v4491_v7 = vrot.slane %v4489_v2, 4  ;;  %v4494_v14 = vrot.slane %v4492_v33, 5 }
 0x353   : > { %v4458_v29 = vrot.slane %v4456_v20, 5  ;;  %v4468_v27 = vrot.slane %v4467_v43, 4  ;;  %v4519_v26 = vrot.slane %v4517_v6, 4  ;;  %v4522_v63 = vrot.slane %v4520_v31, 5 }
 0x354   : > { %10300 = vmatpush3.bf16.msra.mxu0 %v11042_v49  ;;  %v4431_v42 = vsel %vm11862_vm6, %v4426_v9, %v4430_v34  ;;  %v4472_v49 = vrot.slane %v4470_v12, 5  ;;  %v12992_v3 = vrot.slane %v4484_v36, 5  ;;  %v4505_v25 = vrot.slane %v4503_v47, 4  ;;  %v4158_v34 = vld [vmem:[#allocation2 + $0x118] sm:$0xf]  ;;  %v14098_v9 = vld [vmem:[#allocation25_spill] sm:$0xff] }
 0x355   : > { %10301 = vmatprep.subr.bf16.mxu0 %v11043_v39  ;;  %v9231_v46 = vcombine.low %v4431_v42, %v4445_v45  ;;  %v4459_v61 = vsel %vm11862_vm6, %v4454_v40, %v4458_v29  ;;  %v4508_v58 = vrot.slane %v4506_v41, 5  ;;  %v4481_v51 = vor.u32 %v4480_v5, %v4477_v11  ;;  %v4164_v40 = vld [vmem:[#allocation2 + $0x130] sm:$0xf] }
 0x356   : > { %v4545_v15 = vshrl.u32 %v4156_v62, 16  ;;  %v4548_v48 = vshll.u32 %v4156_v62, 16  ;;  %v4473_v59 = vsel %vm11862_vm6, %v4468_v27, %v4472_v49  ;;  %v4523_v0 = vor.u32 %v4522_v63, %v4519_v26  ;;  %v4162_v49 = vld [vmem:[#allocation2 + $0x128] sm:$0xf] }
 0x357   : > { %10270 = vmatmul.mubr.bf16.gmra.mrb[12].mxu0 %v9229_v19  ;;  %v4495_v19 = vor.u32 %v4494_v14, %v4491_v7  ;;  %v4573_v28 = vshrl.u32 %v4160_v21, 16  ;;  %v4576_v20 = vshll.u32 %v4160_v21, 16  ;;  %v4498_v44 = vshll.u32 %v12775_v52, 16 }
 0x358   : > { %10273 = vmatprep.mubr.bf16.mxu0 %v9230_v50  ;;  %10302 = vmatpush3.bf16.msra.mxu0 %v11043_v39  ;;  %v14096_v39 = vld [vmem:[#allocation23_spill] sm:$0xff]  ;;  %v4531_v18 = vshrl.u32 %v4154_v32, 16  ;;  %v4534_v2 = vshll.u32 %v4154_v32, 16  ;;  %v4509_v56 = vor.u32 %v4508_v58, %v4505_v25  ;;  %v4526_v43 = vshll.u32 %v14098_v9, 16 }
 0x359   : > { %10303 = vmatprep.subr.bf16.mxu0 %v11044_v17  ;;  %v4512_v55 = vshll.u32 %v14096_v39, 16  ;;  %v4559_v6 = vshrl.u32 %v4158_v34, 16  ;;  %v4562_v31 = vshll.u32 %v4158_v34, 16  ;;  %v9232_v54 = vcombine.low %v4459_v61, %v4473_v59 }
 0x35a   : > { %v4496_v12 = vrot.slane %v4495_v19, 4  ;;  %v4547_v36 = vrot.slane %v4545_v15, 4  ;;  %v4550_v52 = vrot.slane %v4548_v48, 5  ;;  %v4482_v47 = vrot.slane %v4481_v51, 4 }
 0x35b   : > { %v4524_v41 = vrot.slane %v4523_v0, 4  ;;  %v4578_v45 = vrot.slane %v4576_v20, 5  ;;  %v4500_v7 = vrot.slane %v4498_v44, 5  ;;  %v4514_v14 = vrot.slane %v4512_v55, 5 }
 0x35c   : > { %10304 = vmatpush3.bf16.msra.mxu0 %v11044_v17  ;;  %v13002_v33 = vpop.f32.mrb[128].mxu1  ;;  %v4575_v17 = vrot.slane %v4573_v28, 4  ;;  %v4533_v29 = vrot.slane %v4531_v18, 4  ;;  %v4536_v27 = vrot.slane %v4534_v2, 5  ;;  %v4510_v26 = vrot.slane %v4509_v56, 4 }
 0x35d   : > { %14097 = vst [vmem:[#allocation23_spill] sm:$0xff] %v13002_v33  ;;  %10337 = vmatprep.subr.bf16.mxu0 %v12996_v1  ;;  %v13006_v50 = vpop.f32.mrb[129].mxu1  ;;  %v4528_v63 = vrot.slane %v4526_v43, 5  ;;  %v4561_v62 = vrot.slane %v4559_v6, 4  ;;  %v4564_v42 = vrot.slane %v4562_v31, 5  ;;  %v4501_v21 = vsel %vm11862_vm6, %v4496_v12, %v4500_v7 }
 0x35e   : > { %14099 = vst [vmem:[#allocation25_spill] sm:$0xff] %v13006_v50  ;;  %v13008_v11 = vpop.f32.mrb[130].mxu1  ;;  %v4601_v61 = vshrl.u32 %v4164_v40, 16  ;;  %v4604_v25 = vshll.u32 %v4164_v40, 16  ;;  %v4487_v58 = vsel %vm11862_vm6, %v4482_v47, %v12992_v3  ;;  %v4540_v51 = vshll.u32 %v12804_v60, 16  ;;  %v14138_v50 = vld [vmem:[#allocation22_spill] sm:$0xff] }
 0x35f   : > { %14100 = vst [vmem:[#allocation38_spill] sm:$0xff] %v13008_v11  ;;  %10274 = vmatmul.mubr.bf16.gmra.mrb[16].mxu0 %v9231_v46  ;;  %v13010_v5 = vpop.f32.mrb[131].mxu1  ;;  %v4551_v46 = vor.u32 %v4550_v52, %v4547_v36  ;;  %v4529_v32 = vsel %vm11862_vm6, %v4524_v41, %v4528_v63  ;;  %v4579_v19 = vor.u32 %v4578_v45, %v4575_v17  ;;  %v4554_v48 = vshll.u32 %v12813_v10, 16  ;;  %v4937_v41 = vld [vmem:[#allocation2 + $0x10] sm:$0xe]  ;;  %v14137_v11 = vld [vmem:[#allocation21_spill] sm:$0xff] }
 0x360   : > { %14101 = vst [vmem:[#allocation39_spill] sm:$0xff] %v13010_v5  ;;  %10277 = vmatprep.mubr.bf16.mxu0 %v9232_v54  ;;  %v4537_v15 = vor.u32 %v4536_v27, %v4533_v29  ;;  %v4587_v34 = vshrl.u32 %v4162_v49, 16  ;;  %v4590_v59 = vshll.u32 %v4162_v49, 16  ;;  %v9233_v0 = vcombine.low %v4487_v58, %v4501_v21  ;;  %v4936_v27 = vld [vmem:[#allocation2 + $0x8] sm:$0xe] }
 0x361   : > { %v4515_v28 = vsel %vm11862_vm6, %v4510_v26, %v4514_v14  ;;  %v4565_v20 = vor.u32 %v4564_v42, %v4561_v62  ;;  %v4582_v44 = vshll.u32 %v12830_v13, 16  ;;  %v4552_v3 = vrot.slane %v4551_v46, 4  ;;  %v11157_v63 = vld [vmem:[#allocation2 + $0x14] sm:$0x1]  ;;  %v11158_v46 = vld [vmem:[#allocation2 + $0xc] sm:$0x1] }
 0x362   : > { %v9234_v39 = vcombine.low %v4515_v28, %v4529_v32  ;;  %v4603_v55 = vrot.slane %v4601_v61, 4  ;;  %v4606_v18 = vrot.slane %v4604_v25, 5  ;;  %v4568_v60 = vshll.u32 %v12821_v4, 16  ;;  %v4938_v28 = vld [vmem:[#allocation2 + $0x18] sm:$0xe] }
 0x363   : > { %v4580_v2 = vrot.slane %v4579_v19, 4  ;;  %v4538_v56 = vrot.slane %v4537_v15, 4  ;;  %v4556_v10 = vrot.slane %v4554_v48, 5  ;;  %v4589_v9 = vrot.slane %v4587_v34, 4  ;;  %v4941_v48 = vld [vmem:[#allocation2 + $0x30] sm:$0xe] }
 0x364   : > { %v4592_v43 = vrot.slane %v4590_v59, 5  ;;  %v4566_v6 = vrot.slane %v4565_v20, 4  ;;  %v4584_v31 = vrot.slane %v4582_v44, 5  ;;  %v4542_v54 = vrot.slane %v4540_v51, 5  ;;  %v4939_v51 = vld [vmem:[#allocation2 + $0x20] sm:$0xe] }
 0x365   : > { %v4557_v12 = vsel %vm11862_vm6, %v4552_v3, %v4556_v10  ;;  %v4607_v13 = vor.u32 %v4606_v18, %v4603_v55  ;;  %v4570_v36 = vrot.slane %v4568_v60, 5  ;;  %v4610_v47 = vshll.u32 %v12850_v57, 16  ;;  %v4940_v55 = vld [vmem:[#allocation2 + $0x28] sm:$0xe]  ;;  %v6734_v5 = vld [vmem:[#allocation2 + $0x138] sm:$0xe] }
 0x366   : > { %v4585_v52 = vsel %vm11862_vm6, %v4580_v2, %v4584_v31  ;;  %v4543_v4 = vsel %vm11862_vm6, %v4538_v56, %v4542_v54  ;;  %v4593_v40 = vor.u32 %v4592_v43, %v4589_v9  ;;  %v4596_v14 = vshll.u32 %v12841_v23, 16  ;;  %v11160_v56 = vld [vmem:[#allocation2 + $0x1c] sm:$0x1]  ;;  %v11161_v43 = vld [vmem:[#allocation2 + $0x2c] sm:$0x1] }
 0x367   : > { %10278 = vmatmul.mubr.bf16.gmra.mrb[20].mxu0 %v9233_v0  ;;  %v9235_v17 = vcombine.low %v4543_v4, %v4557_v12  ;;  %v4571_v45 = vsel %vm11862_vm6, %v4566_v6, %v4570_v36  ;;  %v4608_v29 = vrot.slane %v4607_v13, 4  ;;  %v9247_v26 = vrot.slane %v4937_v41, 9  ;;  %v4943_v12 = vld [vmem:[#allocation2 + $0x40] sm:$0xe]  ;;  %v4942_v4 = vld [vmem:[#allocation2 + $0x38] sm:$0xe] }
 0x368   : > { %10281 = vmatprep.mubr.bf16.mxu0 %v9234_v39  ;;  %v9236_v7 = vcombine.low %v4571_v45, %v4585_v52  ;;  %v5038_v62 = vrot.slane %v11157_v63, 5  ;;  %v4594_v42 = vrot.slane %v4593_v40, 4  ;;  %v4612_v49 = vrot.slane %v4610_v47, 5  ;;  %v11159_v39 = vld [vmem:[#allocation2 + $0x24] sm:$0x1]  ;;  %v11046_v40 = vld [vmem:[#allocation8 + $0x188] sm:$0xff]  }
 0x369   : > { %v9246_v21 = vrot.slane %v4936_v27, 9  ;;  %v5034_v57 = vrot.slane %v11158_v46, 5  ;;  %v4598_v25 = vrot.slane %v4596_v14, 5  ;;  %v9249_v44 = vrot.slane %v4939_v51, 9  ;;  %v4945_v36 = vld [vmem:[#allocation2 + $0x60] sm:$0xe] }
 0x36a   : > { %v4613_v58 = vsel %vm11862_vm6, %v4608_v29, %v4612_v49  ;;  %v5039_v23 = vsel %vm11969_vm11, %v9247_v26, %v5038_v62  ;;  %v5046_v3 = vrot.slane %v11159_v39, 5  ;;  %v9251_v18 = vrot.slane %v4941_v48, 9  ;;  %v11162_v62 = vld [vmem:[#allocation2 + $0x3c] sm:$0x1]  ;;  %v11047_v46 = vld [vmem:[#allocation8 + $0x190] sm:$0xff]  }
 0x36b   : > { %v4599_v15 = vsel %vm11862_vm6, %v4594_v42, %v4598_v25  ;;  %v5035_v0 = vsel %vm11969_vm11, %v9246_v21, %v5034_v57  ;;  %v5054_v60 = vrot.slane %v12672_v22, 5  ;;  %v9248_v2 = vrot.slane %v4938_v28, 9  ;;  %v6713_v25 = vld [vmem:[#allocation2 + $0x70] sm:$0xe]  ;;  %v6715_v48 = vld [vmem:[#allocation2 + $0x80] sm:$0xe] }
 0x36c   : > { %v9237_v59 = vcombine.low %v4599_v15, %v4613_v58  ;;  %v9278_v20 = vcombine.low %v5035_v0, %v5039_v23  ;;  %v5042_v10 = vrot.slane %v11160_v56, 5  ;;  %v9250_v9 = vrot.slane %v4940_v55, 9  ;;  %v13076_v58 = vld [vmem:[#allocation2 + $0x74] sm:$0x1]  ;;  %v6714_v23 = vld [vmem:[#allocation2 + $0x78] sm:$0xe] }
 0x36d   : > { %v5050_v6 = vrot.slane %v11161_v43, 5  ;;  %v5047_v31 = vsel %vm11969_vm11, %v9249_v44, %v5046_v3  ;;  %v5055_v54 = vsel %vm11969_vm11, %v9251_v18, %v5054_v60  ;;  %v5062_v45 = vrot.slane %v12680_v24, 5  ;;  %v13082_v15 = vld [vmem:[#allocation2 + $0x84] sm:$0x1]  ;;  %v11048_v28 = vld [vmem:[#allocation8 + $0x198] sm:$0xff]  }
 0x36e   : > { %v5043_v13 = vsel %vm11969_vm11, %v9248_v2, %v5042_v10  ;;  %v9255_v29 = vrot.slane %v4945_v36, 9  ;;  %v5070_v27 = vrot.slane %v12929_v53, 5  ;;  %v9252_v63 = vrot.slane %v4942_v4, 9  ;;  %v13090_v44 = vld [vmem:[#allocation2 + $0x9c] sm:$0x1] }
 0x36f   : > { %10282 = vmatmul.mubr.bf16.gmra.mrb[24].mxu0 %v9235_v17  ;;  %v9279_v52 = vcombine.low %v5043_v13, %v5047_v31  ;;  %v5051_v22 = vsel %vm11969_vm11, %v9250_v9, %v5050_v6  ;;  %v9253_v17 = vrot.slane %v4943_v12, 9  ;;  %v5058_v42 = vrot.slane %v11162_v62, 5  ;;  %v6716_v3 = vld [vmem:[#allocation2 + $0x88] sm:$0xe]  ;;  %v13092_v18 = vld [vmem:[#allocation2 + $0xb4] sm:$0x1] }
 0x370   : > { %10285 = vmatprep.mubr.bf16.mxu0 %v9236_v7  ;;  %v9280_v41 = vcombine.low %v5051_v22, %v5055_v54  ;;  %v4944_v7 = vld [vmem:[#allocation2 + $0x58] sm:$0xe]  ;;  %v5066_v24 = vrot.slane %v12882_v8, 5  ;;  %v5071_v53 = vsel %vm11969_vm11, %v9255_v29, %v5070_v27  ;;  %v13084_v8 = vld [vmem:[#allocation2 + $0x8c] sm:$0x1]  ;;  %v9360_v39 = vrot.slane %v6713_v25, 9 }
 0x371   : > { %v13035_v61 = vpop.f32.mrb[132].mxu1  ;;  %v9254_v21 = vrot.slane %v4944_v7, 9  ;;  %v5063_v57 = vsel %vm11969_vm11, %v9253_v17, %v5062_v45  ;;  %v5059_v51 = vsel %vm11969_vm11, %v9252_v63, %v5058_v42  ;;  %v6841_v60 = vrot.slane %v13076_v58, 5  ;;  %v6717_v10 = vld [vmem:[#allocation2 + $0x90] sm:$0xe]  ;;  %v11049_v31 = vld [vmem:[#allocation8 + $0x1a0] sm:$0xff]  }
 0x372   : > { %14102 = vst [vmem:[#allocation40_spill] sm:$0xff] %v13035_v61  ;;  %v13039_v32 = vpop.f32.mrb[133].mxu1  ;;  %v9361_v2 = vrot.slane %v6714_v23, 9  ;;  %v13096_v9 = vld [vmem:[#allocation2 + $0xbc] sm:$0x1]  ;;  %v9362_v43 = vrot.slane %v6715_v48, 9  ;;  %v14139_v33 = vcombine.low %v14137_v11, %v14138_v50 }
 0x373   : > { %14103 = vst [vmem:[#allocation41_spill] sm:$0xff] %v13039_v32  ;;  %v13043_v19 = vpop.f32.mrb[134].mxu1  ;;  %v5067_v0 = vsel %vm11969_vm11, %v9254_v21, %v5066_v24  ;;  %v6718_v6 = vld [vmem:[#allocation2 + $0x98] sm:$0xe]  ;;  %v13098_v54 = vld [vmem:[#allocation2 + $0xc4] sm:$0x1]  ;;  %v13102_v12 = vsel %vm11969_vm11, %v9360_v39, %v6841_v60 }
 0x374   : > { %14104 = vst [vmem:[#allocation42_spill] sm:$0xff] %v13043_v19  ;;  %v13047_v34 = vpop.f32.mrb[135].mxu1  ;;  %v9282_v55 = vcombine.low %v5067_v0, %v5071_v53  ;;  %14110 = vst [vmem:[#allocation48_spill] sm:$0xff] %v13102_v12  ;;  %v6849_v36 = vrot.slane %v13082_v15, 5  ;;  %v6720_v22 = vld [vmem:[#allocation2 + $0xb8] sm:$0xe] }
 0x375   : > { %14105 = vst [vmem:[#allocation43_spill] sm:$0xff] %v13047_v34  ;;  %v9363_v17 = vrot.slane %v6716_v3, 9  ;;  %v6853_v45 = vrot.slane %v13084_v8, 5  ;;  %v9364_v7 = vrot.slane %v6717_v10, 9  ;;  %v6721_v29 = vld [vmem:[#allocation2 + $0xc0] sm:$0xe] }
 0x376   : > { %v13118_v63 = vld [vmem:[#allocation2 + $0xd4] sm:$0x1]  ;;  %v13122_v62 = vsel %vm11969_vm11, %v9362_v43, %v6849_v36  ;;  %v9365_v21 = vrot.slane %v6718_v6, 9  ;;  %v6861_v24 = vrot.slane %v13090_v44, 5  ;;  %v13128_v25 = vld [vmem:[#allocation2 + $0xdc] sm:$0x1] }
 0x377   : > { %10286 = vmatmul.mubr.bf16.gmra.mrb[28].mxu0 %v9237_v59  ;;  %v9281_v59 = vcombine.low %v5059_v51, %v5063_v57  ;;  %14114 = vst [vmem:[#allocation52_spill] sm:$0xff] %v13122_v62  ;;  %v13130_v53 = vld [vmem:[#allocation2 + $0xe4] sm:$0x1]  ;;  %v13134_v23 = vsel %vm11969_vm11, %v9363_v17, %v6853_v45  ;;  %v6865_v48 = vrot.slane %v13092_v18, 5  ;;  %v6723_v0 = vld [vmem:[#allocation2 + $0xd0] sm:$0xe] }
 0x378   : > { %10305 = vmatprep.mubr.bf16.mxu0 %v9278_v20  ;;  %v13088_v20 = vld [vmem:[#allocation2 + $0x94] sm:$0x1]  ;;  %14116 = vst [vmem:[#allocation54_spill] sm:$0xff] %v13134_v23  ;;  %v13139_v3 = vld [vmem:[#allocation2 + $0xec] sm:$0x1]  ;;  %v11055_v50 = vld [vmem:[#allocation8 + $0x1c0] sm:$0xff]  }
 0x379   : > { %v6857_v42 = vrot.slane %v13088_v20, 5  ;;  %v6724_v10 = vld [vmem:[#allocation2 + $0xd8] sm:$0xe]  ;;  %v11050_v43 = vld [vmem:[#allocation8 + $0x1a8] sm:$0xff]   ;;  %v13152_v6 = vld [vmem:[#allocation2 + $0x104] sm:$0x1] }
 0x37a   : > { %v6725_v17 = vld [vmem:[#allocation2 + $0xe0] sm:$0xe]  ;;  %v13161_v45 = vld [vmem:[#allocation2 + $0x10c] sm:$0x1]  ;;  %v6732_v34 = vld [vmem:[#allocation2 + $0x128] sm:$0xe] }
 0x37b   : > { %v13145_v60 = vsel %vm11969_vm11, %v9364_v7, %v6857_v42  ;;  %v6733_v32 = vld [vmem:[#allocation2 + $0x130] sm:$0xe]  ;;  %v11074_v12 = vld [vmem:[#allocation2 + $0x120] ss:$8 sps:$4 sm:$0xff]  }
 0x37c   : > { %14118 = vst [vmem:[#allocation56_spill] sm:$0xff] %v13145_v60  ;;  %v5885_v60 = vld [vmem:[#allocation2 + $0x60] sm:$0xf] }
 0x37e   : > { %v13060_v47 = vpop.f32.mrb[136].mxu1 }
 0x37f   : > { %14106 = vst [vmem:[#allocation44_spill] sm:$0xff] %v13060_v47  ;;  %v13063_v14 = vpop.f32.mrb[137].mxu1  ;;  %10306 = vmatmul.mubr.bf16.vlgmr.msra.gmra.mrb[0].mxu0 %v9279_v52  ;;  %v6719_v52 = vld [vmem:[#allocation2 + $0xb0] sm:$0xe] }
 0x380   : > { %14107 = vst [vmem:[#allocation45_spill] sm:$0xff] %v13063_v14  ;;  %v13066_v26 = vpop.f32.mrb[138].mxu1  ;;  %10309 = vmatprep.mubr.bf16.mxu0 %v9280_v41  ;;  %10338 = vmatpush3.bf16.msra.mxu0 %v12996_v1  ;;  %v13078_v1 = vld [vmem:[#allocation2 + $0x7c] sm:$0x1]  ;;  %v9366_v51 = vrot.slane %v6719_v52, 9  ;;  %v9368_v52 = vrot.slane %v6721_v29, 9 }
 0x381   : > { %14108 = vst [vmem:[#allocation46_spill] sm:$0xff] %v13066_v26  ;;  %v13069_v49 = vpop.f32.mrb[139].mxu1  ;;  %10339 = vmatprep.subr.bf16.mxu0 %v11046_v40  ;;  %v6845_v56 = vrot.slane %v13078_v1, 5  ;;  %v14123_v41 = vld [vmem:[#allocation17_spill] sm:$0xff]  ;;  %v9372_v29 = vrot.slane %v6725_v17, 9 }
 0x382   : > { %14109 = vst [vmem:[#allocation47_spill] sm:$0xff] %v13069_v49  ;;  %v13158_v36 = vsel %vm11969_vm11, %v9366_v51, %v6865_v48  ;;  %v13171_v51 = vld [vmem:[#allocation2 + $0x114] sm:$0x1]  ;;  %v6730_v14 = vld [vmem:[#allocation2 + $0x118] sm:$0xe] }
 0x383   : > { %v13106_v13 = vsel %vm11969_vm11, %v9361_v2, %v6845_v56  ;;  %v13149_v2 = vsel %vm11969_vm11, %v9365_v21, %v6861_v24  ;;  %v6869_v56 = vrot.slane %v13096_v9, 5  ;;  %14120 = vst [vmem:[#allocation58_spill] sm:$0xff] %v13158_v36  ;;  %v9370_v24 = vrot.slane %v6723_v0, 9  ;;  %v14127_v0 = vld [vmem:[#allocation20_spill] sm:$0xff] }
 0x384   : > { %10340 = vmatpush3.bf16.msra.mxu0 %v11046_v40  ;;  %14111 = vst [vmem:[#allocation49_spill] sm:$0xff] %v13106_v13  ;;  %v13111_v40 = vld [vmem:[#allocation2 + $0xcc] sm:$0x1]  ;;  %14119 = vst [vmem:[#allocation57_spill] sm:$0xff] %v13149_v2 }
 0x385   : > { %10341 = vmatprep.subr.bf16.mxu0 %v11047_v46  ;;  %v6877_v21 = vrot.slane %v13111_v40, 5 }
 0x387   : > { %10310 = vmatmul.mubr.bf16.gmra.mrb[4].mxu0 %v9281_v59  ;;  %v9367_v59 = vrot.slane %v6720_v22, 9  ;;  %v6873_v22 = vrot.slane %v13098_v54, 5 }
 0x388   : > { %10313 = vmatprep.mubr.bf16.mxu0 %v9282_v55  ;;  %10342 = vmatpush3.bf16.msra.mxu0 %v11047_v46  ;;  %v6722_v46 = vld [vmem:[#allocation2 + $0xc8] sm:$0xe] }
 0x389   : > { %v13109_v4 = vpop.f32.mrb[140].mxu1  ;;  %10343 = vmatprep.subr.bf16.mxu0 %v11048_v28  ;;  %v13165_v7 = vsel %vm11969_vm11, %v9367_v59, %v6869_v56  ;;  %v9369_v42 = vrot.slane %v6722_v46, 9  ;;  %v6726_v55 = vld [vmem:[#allocation2 + $0xe8] sm:$0xe]  ;;  %v13177_v48 = vsel %vm11969_vm11, %v9368_v52, %v6873_v22  ;;  %v6881_v59 = vrot.slane %v13118_v63, 5 }
 0x38a   : > { %14112 = vst [vmem:[#allocation50_spill] sm:$0xff] %v13109_v4  ;;  %v13116_v27 = vpop.f32.mrb[141].mxu1  ;;  %14121 = vst [vmem:[#allocation59_spill] sm:$0xff] %v13165_v7  ;;  %v9371_v46 = vrot.slane %v6724_v10, 9  ;;  %v6727_v56 = vld [vmem:[#allocation2 + $0x100] sm:$0xe] }
 0x38b   : > { %14113 = vst [vmem:[#allocation51_spill] sm:$0xff] %v13116_v27  ;;  %v13126_v57 = vpop.f32.mrb[142].mxu1  ;;  %v6889_v52 = vrot.slane %v13130_v53, 5  ;;  %v6728_v22 = vld [vmem:[#allocation2 + $0x108] sm:$0xe]  ;;  %v11051_v10 = vld [vmem:[#allocation8 + $0x1b0] sm:$0xff]  }
 0x38c   : > { %14115 = vst [vmem:[#allocation53_spill] sm:$0xff] %v13126_v57  ;;  %v13137_v39 = vpop.f32.mrb[143].mxu1  ;;  %10344 = vmatpush3.bf16.msra.mxu0 %v11048_v28  ;;  %v14122_v28 = vld [vmem:[#allocation19_spill] sm:$0xff]  ;;  %v14126_v57 = vld [vmem:[#allocation18_spill] sm:$0xff]  ;;  %v13191_v4 = vld [vmem:[#allocation2 + $0x124] sm:$0x1] }
 0x38d   : > { %14117 = vst [vmem:[#allocation55_spill] sm:$0xff] %v13137_v39  ;;  %10345 = vmatprep.subr.bf16.mxu0 %v11049_v31  ;;  %v14124_v39 = vcombine.low %v14122_v28, %v14123_v41  ;;  %14125 = vst [vmem:[#allocation19_spill] sm:$0xff] %v13177_v48  ;;  %v14128_v27 = vcombine.low %v14126_v57, %v14127_v0  ;;  %v13183_v41 = vld [vmem:[#allocation2 + $0x11c] sm:$0x1]  ;;  %v6885_v28 = vrot.slane %v13128_v25, 5  ;;  %v9373_v57 = vrot.slane %v6726_v55, 9 }
 0x38e   : > { %v13200_v0 = vld [vmem:[#allocation2 + $0x12c] sm:$0x1]  ;;  %v13208_v49 = vsel %vm11969_vm11, %v9372_v29, %v6889_v52  ;;  %v9374_v26 = vrot.slane %v6727_v56, 9  ;;  %v13220_v29 = vld [vmem:[#allocation2 + $0x13c] sm:$0x1]  ;;  %v6905_v55 = vrot.slane %v13171_v51, 5 }
 0x38f   : > { %10314 = vmatmul.mubr.bf16.gmra.mrb[8].mxu0 %v14124_v39  ;;  %v13187_v39 = vsel %vm11969_vm11, %v9369_v42, %v6877_v21  ;;  %v6893_v42 = vrot.slane %v13139_v3, 5  ;;  %v6729_v21 = vld [vmem:[#allocation2 + $0x110] sm:$0xe]  ;;  %v13204_v17 = vsel %vm11969_vm11, %v9371_v46, %v6885_v28  ;;  %14132 = vst [vmem:[#allocation60_spill] sm:$0xff] %v13208_v49  ;;  %v9375_v46 = vrot.slane %v6728_v22, 9  ;;  %v14141_v56 = vld [vmem:[#allocation24_spill] sm:$0xff] }
 0x390   : > { %10317 = vmatprep.mubr.bf16.mxu0 %v14128_v27  ;;  %10346 = vmatpush3.bf16.msra.mxu0 %v11049_v31  ;;  %14129 = vst [vmem:[#allocation17_spill] sm:$0xff] %v13187_v39  ;;  %v13197_v31 = vsel %vm11969_vm11, %v9370_v24, %v6881_v59  ;;  %14131 = vst [vmem:[#allocation20_spill] sm:$0xff] %v13204_v17  ;;  %v6897_v27 = vrot.slane %v13152_v6, 5  ;;  %v6731_v24 = vld [vmem:[#allocation2 + $0x120] sm:$0xe]  ;;  %v6901_v28 = vrot.slane %v13161_v45, 5 }
 0x391   : > { %10347 = vmatprep.subr.bf16.mxu0 %v11050_v43  ;;  %14130 = vst [vmem:[#allocation18_spill] sm:$0xff] %v13197_v31  ;;  %v13211_v59 = vld [vmem:[#allocation2 + $0x134] sm:$0x1]  ;;  %v13217_v47 = vsel %vm11969_vm11, %v9373_v57, %v6893_v42  ;;  %v9376_v19 = vrot.slane %v6729_v21, 9  ;;  %v11052_v57 = vld [vmem:[#allocation8 + $0x1b8] sm:$0xff]   ;;  %v6909_v42 = vrot.slane %v13183_v41, 5 }
 0x392   : > { %14133 = vst [vmem:[#allocation61_spill] sm:$0xff] %v13217_v47  ;;  %v13226_v52 = vsel %vm11969_vm11, %v9374_v26, %v6897_v27  ;;  %v13231_v22 = vsel %vm11969_vm11, %v9375_v46, %v6901_v28  ;;  %v9378_v61 = vrot.slane %v6731_v24, 9  ;;  %v6913_v27 = vrot.slane %v13191_v4, 5 }
 0x393   : > { %14134 = vst [vmem:[#allocation62_spill] sm:$0xff] %v13226_v52  ;;  %14135 = vst [vmem:[#allocation63_spill] sm:$0xff] %v13231_v22  ;;  %v13238_v26 = vsel %vm11969_vm11, %v9376_v19, %v6905_v55  ;;  %v9379_v21 = vrot.slane %v6732_v34, 9  ;;  %v6917_v24 = vrot.slane %v13200_v0, 5  ;;  %v9380_v46 = vrot.slane %v6733_v32, 9  ;;  %v14142_v22 = vld [vmem:[#allocation26_spill] sm:$0xff] }
 0x394   : > { %10348 = vmatpush3.bf16.msra.mxu0 %v11050_v43  ;;  %v9377_v43 = vrot.slane %v6730_v14, 9  ;;  %14136 = vst [vmem:[#allocation64_spill] sm:$0xff] %v13238_v26  ;;  %v6921_v28 = vrot.slane %v13211_v59, 5  ;;  %v14143_v19 = vcombine.low %v14141_v56, %v14142_v22  ;;  %v9381_v55 = vrot.slane %v6734_v5, 9  ;;  %v14160_v22 = vld [vmem:[#allocation34_spill] sm:$0xff]  ;;  %v14190_v38 = vld [vmem:[#allocation19_spill] sm:$0xff] }
 0x395   : > { %10349 = vmatprep.subr.bf16.mxu0 %v11051_v10  ;;  %v13258_v11 = vsel %vm11969_vm11, %v9378_v61, %v6913_v27  ;;  %v13262_v32 = vsel %vm11969_vm11, %v9379_v21, %v6917_v24  ;;  %v14148_v61 = vld [vmem:[#allocation27_spill] sm:$0xff]  ;;  %v14151_v27 = vld [vmem:[#allocation29_spill] sm:$0xff]  ;;  %v14152_v21 = vld [vmem:[#allocation30_spill] sm:$0xff] }
 0x396   : > { %v13246_v14 = vsel %vm11969_vm11, %v9377_v43, %v6909_v42  ;;  %14144 = vst [vmem:[#allocation22_spill] sm:$0xff] %v13258_v11  ;;  %14145 = vst [vmem:[#allocation24_spill] sm:$0xff] %v13262_v32  ;;  %v13266_v56 = vsel %vm11969_vm11, %v9380_v46, %v6921_v28  ;;  %v14149_v43 = vld [vmem:[#allocation28_spill] sm:$0xff]  ;;  %v14153_v24 = vcombine.low %v14151_v27, %v14152_v21  ;;  %v14155_v28 = vld [vmem:[#allocation31_spill] sm:$0xff] }
 0x397   : > { %10318 = vmatmul.mubr.bf16.gmra.mrb[12].mxu0 %v14139_v33  ;;  %14140 = vst [vmem:[#allocation21_spill] sm:$0xff] %v13246_v14  ;;  %v6925_v33 = vrot.slane %v13220_v29, 5  ;;  %14146 = vst [vmem:[#allocation26_spill] sm:$0xff] %v13266_v56  ;;  %v14150_v42 = vcombine.low %v14148_v61, %v14149_v43  ;;  %v14154_v46 = vcombine.low %v12838_v30, %v12847_v37  ;;  %v11053_v43 = vld [vmem:[#allocation2 + $0x10] ss:$8 sps:$4 sm:$0xff]   ;;  %v14164_v27 = vld [vmem:[#allocation37_spill] sm:$0xff] }
 0x398   : > { %10321 = vmatprep.mubr.bf16.mxu0 %v14143_v19  ;;  %10350 = vmatpush3.bf16.msra.mxu0 %v11051_v10  ;;  %v14156_v19 = vcombine.low %v12856_v16, %v14155_v28  ;;  %v14161_v10 = vld [vmem:[#allocation35_spill] sm:$0xff]  ;;  %v11054_v30 = vld [vmem:[#allocation2 + $0x20] ss:$8 sps:$4 sm:$0xff]   ;;  %v11064_v28 = vld [vmem:[#allocation8 + $0x1d8] sm:$0xff]  }
 0x399   : > { %10351 = vmatprep.subr.bf16.mxu0 %v11052_v57  ;;  %v13272_v5 = vsel %vm11969_vm11, %v9381_v55, %v6925_v33  ;;  %v14157_v55 = vld [vmem:[#allocation32_spill] sm:$0xff]  ;;  %v14158_v33 = vld [vmem:[#allocation33_spill] sm:$0xff]  ;;  %v14162_v61 = vcombine.low %v14160_v22, %v14161_v10  ;;  %v11058_v37 = vld [vmem:[#allocation8 + $0x1c8] sm:$0xff]  }
 0x39a   : > { %14147 = vst [vmem:[#allocation65_spill] sm:$0xff] %v13272_v5  ;;  %v11061_v16 = vld [vmem:[#allocation8 + $0x1d0] sm:$0xff]   ;;  %v11059_v10 = vld [vmem:[#allocation2 + $0x60] ss:$8 sps:$4 sm:$0xff]   ;;  %v13302_v5 = vld [vmem:[#allocation2 + $0x1c] sm:$0x1] }
 0x39b   : > { %v11067_v22 = vld [vmem:[#allocation8 + $0x1e0] sm:$0xff]   ;;  %v13300_v34 = vld [vmem:[#allocation2 + $0x14] sm:$0x1]  ;;  %v5877_v11 = vld [vmem:[#allocation2 + $0x30] sm:$0xf] }
 0x39c   : > { %10352 = vmatpush3.bf16.msra.mxu0 %v11052_v57  ;;  %v14159_v57 = vcombine.low %v14157_v55, %v14158_v33  ;;  %v11070_v55 = vld [vmem:[#allocation8 + $0x1e8] sm:$0xff]   ;;  %v13306_v52 = vld [vmem:[#allocation2 + $0x24] sm:$0x1]  ;;  %v5990_v17 = vshrl.u32 %v5877_v11, 16 }
 0x39d   : > { %10385 = vmatprep.subr.bf16.mxu0 %v11055_v50  ;;  %v11062_v33 = vld [vmem:[#allocation2 + $0x80] ss:$8 sps:$4 sm:$0xff]   ;;  %14166 = vst [vmem:[#allocation27_spill] sm:$0xff] %v13306_v52 }
 0x39f   : > { %10322 = vmatmul.mubr.bf16.gmra.mrb[16].mxu0 %v14150_v42  ;;  %v14163_v42 = vld [vmem:[#allocation36_spill] sm:$0xff] }
 0x3a0   : > { %10325 = vmatprep.mubr.bf16.mxu0 %v14153_v24  ;;  %v14165_v21 = vcombine.low %v14163_v42, %v14164_v27  ;;  %v11056_v24 = vld [vmem:[#allocation2 + $0x30] ss:$8 sps:$4 sm:$0xff]  }
 0x3a1   : > { %v5869_v42 = vld [vmem:[#allocation2 + $0x10] sm:$0xf]  ;;  %v5871_v27 = vld [vmem:[#allocation2 + $0x18] sm:$0xf] }
 0x3a7   : > { %10326 = vmatmul.mubr.bf16.gmra.mrb[20].mxu0 %v14154_v46  ;;  %v11057_v46 = vld [vmem:[#allocation2 + $0x40] ss:$8 sps:$4 sm:$0xff]  }
 0x3a8   : > { %10329 = vmatprep.mubr.bf16.mxu0 %v14156_v19  ;;  %v11060_v19 = vld [vmem:[#allocation2 + $0x70] ss:$8 sps:$4 sm:$0xff]  }
 0x3af   : > { %10330 = vmatmul.mubr.bf16.gmra.mrb[24].mxu0 %v14159_v57  ;;  %v11063_v57 = vld [vmem:[#allocation2 + $0x90] ss:$8 sps:$4 sm:$0xff]  }
 0x3b0   : > { %10333 = vmatprep.mubr.bf16.mxu0 %v14162_v61  ;;  %v11076_v61 = vld [vmem:[#allocation8 + $0x1f8] sm:$0xff]  }
 0x3b7   : > { %10334 = vmatmul.mubr.bf16.gmra.mrb[28].mxu0 %v14165_v21  ;;  %v5934_v21 = vshrl.u32 %v5869_v42, 16 }
 0x3b8   : > { %10353 = vmatprep.mubr.bf16.mxu0 %v11053_v43  ;;  %v11065_v43 = vld [vmem:[#allocation2 + $0xb0] ss:$8 sps:$4 sm:$0xff]  }
 0x3bf   : > { %10354 = vmatmul.mubr.bf16.vlgmr.msra.gmra.mrb[0].mxu0 %v11054_v30  ;;  %v5937_v30 = vshll.u32 %v5869_v42, 16  ;;  %v5879_v42 = vld [vmem:[#allocation2 + $0x38] sm:$0xf] }
 0x3c0   : > { %10357 = vmatprep.mubr.bf16.mxu0 %v11056_v24  ;;  %10386 = vmatpush3.bf16.msra.mxu0 %v11055_v50  ;;  %v11073_v50 = vld [vmem:[#allocation8 + $0x1f0] sm:$0xff]   ;;  %v5948_v24 = vshrl.u32 %v5871_v27, 16  ;;  %v6004_v14 = vshrl.u32 %v5879_v42, 16  ;;  %v6007_v26 = vshll.u32 %v5879_v42, 16 }
 0x3c1   : > { %10387 = vmatprep.subr.bf16.mxu0 %v11058_v37 }
 0x3c2   : > { %v6006_v42 = vrot.slane %v6004_v14, 4  ;;  %v6009_v31 = vrot.slane %v6007_v26, 5  ;;  %v5971_v26 = vshll.u32 %v13306_v52, 16  ;;  %v5891_v52 = vld [vmem:[#allocation2 + $0x78] sm:$0xf] }
 0x3c4   : > { %10388 = vmatpush3.bf16.msra.mxu0 %v11058_v37  ;;  %v13297_v37 = vld [vmem:[#allocation8 + $0x200] sm:$0xff]  }
 0x3c5   : > { %10389 = vmatprep.subr.bf16.mxu0 %v11061_v16 }
 0x3c7   : > { %10358 = vmatmul.mubr.bf16.gmra.mrb[4].mxu0 %v11057_v46  ;;  %v5875_v46 = vld [vmem:[#allocation2 + $0x28] sm:$0xf] }
 0x3c8   : > { %10361 = vmatprep.mubr.bf16.mxu0 %v11059_v10  ;;  %10390 = vmatpush3.bf16.msra.mxu0 %v11061_v16  ;;  %v5951_v16 = vshll.u32 %v5871_v27, 16  ;;  %v5936_v10 = vrot.slane %v5934_v21, 4 }
 0x3c9   : > { %10391 = vmatprep.subr.bf16.mxu0 %v11064_v28 }
 0x3cc   : > { %10392 = vmatpush3.bf16.msra.mxu0 %v11064_v28  ;;  %v11066_v28 = vld [vmem:[#allocation2 + $0xc0] ss:$8 sps:$4 sm:$0xff]  }
 0x3cd   : > { %10393 = vmatprep.subr.bf16.mxu0 %v11067_v22 }
 0x3cf   : > { %10362 = vmatmul.mubr.bf16.gmra.mrb[8].mxu0 %v11060_v19  ;;  %v5873_v19 = vld [vmem:[#allocation2 + $0x20] sm:$0xf] }
 0x3d0   : > { %10365 = vmatprep.mubr.bf16.mxu0 %v11062_v33  ;;  %10394 = vmatpush3.bf16.msra.mxu0 %v11067_v22  ;;  %v5939_v22 = vrot.slane %v5937_v30, 5  ;;  %v5950_v33 = vrot.slane %v5948_v24, 4  ;;  %v5962_v27 = vshrl.u32 %v5873_v19, 16  ;;  %v5943_v24 = vshll.u32 %v13300_v34, 16 }
 0x3d1   : > { %10395 = vmatprep.subr.bf16.mxu0 %v11070_v55 }
 0x3d2   : > { %v5940_v56 = vor.u32 %v5939_v22, %v5936_v10  ;;  %v5964_v47 = vrot.slane %v5962_v27, 4  ;;  %v11071_v10 = vld [vmem:[#allocation2 + $0x100] ss:$8 sps:$4 sm:$0xff]   ;;  %v5945_v7 = vrot.slane %v5943_v24, 5 }
 0x3d4   : > { %10396 = vmatpush3.bf16.msra.mxu0 %v11070_v55  ;;  %v11068_v55 = vld [vmem:[#allocation2 + $0xd0] ss:$8 sps:$4 sm:$0xff]   ;;  %v5941_v22 = vrot.slane %v5940_v56, 4  ;;  %v5992_v56 = vrot.slane %v5990_v17, 4  ;;  %v13321_v17 = vld [vmem:[#allocation2 + $0x44] sm:$0x1] }
 0x3d5   : > { %10397 = vmatprep.subr.bf16.mxu0 %v11073_v50  ;;  %14168 = vst [vmem:[#allocation29_spill] sm:$0xff] %v13321_v17 }
 0x3d7   : > { %10366 = vmatmul.mubr.bf16.gmra.mrb[12].mxu0 %v11063_v57  ;;  %v5953_v57 = vrot.slane %v5951_v16, 5  ;;  %v5957_v16 = vshll.u32 %v13302_v5, 16 }
 0x3d8   : > { %10369 = vmatprep.mubr.bf16.mxu0 %v11065_v43  ;;  %10398 = vmatpush3.bf16.msra.mxu0 %v11073_v50  ;;  %v5976_v43 = vshrl.u32 %v5875_v46, 16  ;;  %v5979_v50 = vshll.u32 %v5875_v46, 16  ;;  %v5881_v46 = vld [vmem:[#allocation2 + $0x40] sm:$0xf] }
 0x3d9   : > { %10399 = vmatprep.subr.bf16.mxu0 %v11076_v61  ;;  %v5954_v21 = vor.u32 %v5953_v57, %v5950_v33  ;;  %v13308_v57 = vld [vmem:[#allocation2 + $0x2c] sm:$0x1]  ;;  %v6018_v39 = vshrl.u32 %v5881_v46, 16  ;;  %v6021_v48 = vshll.u32 %v5881_v46, 16  ;;  %v5959_v36 = vrot.slane %v5957_v16, 5 }
 0x3da   : > { %v5978_v30 = vrot.slane %v5976_v43, 4  ;;  %v5981_v32 = vrot.slane %v5979_v50, 5  ;;  %v13310_v50 = vld [vmem:[#allocation2 + $0x34] sm:$0x1]  ;;  %v6010_v46 = vor.u32 %v6009_v31, %v6006_v42  ;;  %v5973_v31 = vrot.slane %v5971_v26, 5 }
 0x3db   : > { %v5955_v33 = vrot.slane %v5954_v21, 4  ;;  %14167 = vst [vmem:[#allocation28_spill] sm:$0xff] %v13310_v50  ;;  %v5999_v24 = vshll.u32 %v13310_v50, 16 }
 0x3dc   : > { %10400 = vmatpush3.bf16.msra.mxu0 %v11076_v61  ;;  %v5965_v61 = vshll.u32 %v5873_v19, 16  ;;  %v5993_v19 = vshll.u32 %v5877_v11, 16  ;;  %v5982_v43 = vor.u32 %v5981_v32, %v5978_v30  ;;  %v5985_v11 = vshll.u32 %v13308_v57, 16  ;;  %v13318_v30 = vld [vmem:[#allocation2 + $0x3c] sm:$0x1] }
 0x3dd   : > { %10433 = vmatprep.subr.bf16.mxu0 %v13297_v37  ;;  %v5946_v32 = vsel %vm11862_vm6, %v5941_v22, %v5945_v7  ;;  %v5960_v14 = vsel %vm11862_vm6, %v5955_v33, %v5959_v36  ;;  %v6049_v22 = vshll.u32 %v5885_v60, 16  ;;  %v11072_v36 = vld [vmem:[#allocation2 + $0x110] ss:$8 sps:$4 sm:$0xff]   ;;  %v6013_v13 = vshll.u32 %v13318_v30, 16 }
 0x3de   : > { %v5967_v49 = vrot.slane %v5965_v61, 5  ;;  %v5995_v21 = vrot.slane %v5993_v19, 5  ;;  %v5983_v16 = vrot.slane %v5982_v43, 4  ;;  %v5987_v23 = vrot.slane %v5985_v11, 5 }
 0x3df   : > { %10370 = vmatmul.mubr.bf16.gmra.mrb[16].mxu0 %v11066_v28  ;;  %v5883_v28 = vld [vmem:[#allocation2 + $0x48] sm:$0xf]  ;;  %v9326_v43 = vcombine.low %v5946_v32, %v5960_v14  ;;  %v6001_v50 = vrot.slane %v5999_v24, 5  ;;  %v6015_v26 = vrot.slane %v6013_v13, 5  ;;  %v6821_v35 = vrot.slane %v13318_v30, 5 }
 0x3e0   : > { %10373 = vmatprep.mubr.bf16.mxu0 %v11068_v55  ;;  %v11069_v55 = vld [vmem:[#allocation2 + $0xe0] ss:$8 sps:$4 sm:$0xff]   ;;  %v6032_v27 = vshrl.u32 %v5883_v28, 16  ;;  %v6035_v61 = vshll.u32 %v5883_v28, 16  ;;  %v5968_v2 = vor.u32 %v5967_v49, %v5964_v47  ;;  %v6020_v47 = vrot.slane %v6018_v39, 4 }
 0x3e1   : > { %v6023_v49 = vrot.slane %v6021_v48, 5  ;;  %v5887_v28 = vld [vmem:[#allocation2 + $0x68] sm:$0xf]  ;;  %v5996_v62 = vor.u32 %v5995_v21, %v5992_v56  ;;  %v5988_v42 = vsel %vm11862_vm6, %v5983_v16, %v5987_v23  ;;  %v6051_v21 = vrot.slane %v6049_v22, 5  ;;  %v13334_v23 = vld [vmem:[#allocation2 + $0x6c] sm:$0x1] }
 0x3e2   : > { %v6034_v19 = vrot.slane %v6032_v27, 4  ;;  %v6037_v7 = vrot.slane %v6035_v61, 5  ;;  %v5969_v33 = vrot.slane %v5968_v2, 4  ;;  %v6060_v39 = vshrl.u32 %v5887_v28, 16  ;;  %14171 = vst [vmem:[#allocation32_spill] sm:$0xff] %v13334_v23 }
 0x3e3   : > { %v6063_v48 = vshll.u32 %v5887_v28, 16  ;;  %v6024_v27 = vor.u32 %v6023_v49, %v6020_v47  ;;  %v6011_v2 = vrot.slane %v6010_v46, 4  ;;  %v5997_v14 = vrot.slane %v5996_v62, 4 }
 0x3e4   : > { %v6038_v11 = vor.u32 %v6037_v7, %v6034_v19  ;;  %v5974_v32 = vsel %vm11862_vm6, %v5969_v33, %v5973_v31  ;;  %v6027_v28 = vshll.u32 %v13321_v17, 16  ;;  %v6062_v24 = vrot.slane %v6060_v39, 4  ;;  %v5893_v33 = vld [vmem:[#allocation2 + $0x80] sm:$0xf]  ;;  %v5895_v31 = vld [vmem:[#allocation2 + $0x88] sm:$0xf] }
 0x3e5   : > { %v6065_v16 = vrot.slane %v6063_v48, 5  ;;  %v13336_v46 = vcombine.low %v5974_v32, %v5988_v42  ;;  %v6025_v49 = vrot.slane %v6024_v27, 4  ;;  %v6088_v19 = vshrl.u32 %v5891_v52, 16  ;;  %v5897_v27 = vld [vmem:[#allocation2 + $0x90] sm:$0xf] }
 0x3e6   : > { %v6091_v7 = vshll.u32 %v5891_v52, 16  ;;  %v6039_v62 = vrot.slane %v6038_v11, 4  ;;  %v6002_v39 = vsel %vm11862_vm6, %v5997_v14, %v6001_v50  ;;  %v6029_v48 = vrot.slane %v6027_v28, 5  ;;  %v5899_v11 = vld [vmem:[#allocation2 + $0x98] sm:$0xf] }
 0x3e7   : > { %10374 = vmatmul.mubr.bf16.gmra.mrb[20].mxu0 %v11069_v55  ;;  %v13323_v55 = vld [vmem:[#allocation2 + $0x4c] sm:$0x1]  ;;  %v6069_v42 = vshll.u32 %v13334_v23, 16  ;;  %v6066_v32 = vor.u32 %v6065_v16, %v6062_v24  ;;  %v11085_v50 = vld [vmem:[#allocation9] ss:$16 sps:$4 sm:$0xff]   ;;  %v6116_v24 = vshrl.u32 %v5895_v31, 16 }
 0x3e8   : > { %10377 = vmatprep.mubr.bf16.mxu0 %v11071_v10  ;;  %14169 = vst [vmem:[#allocation30_spill] sm:$0xff] %v13323_v55  ;;  %v6046_v10 = vshrl.u32 %v5885_v60, 16  ;;  %v6041_v61 = vshll.u32 %v13323_v55, 16  ;;  %v5889_v60 = vld [vmem:[#allocation2 + $0x70] sm:$0xf]  ;;  %v6119_v16 = vshll.u32 %v5895_v31, 16 }
 0x3e9   : > { %v6074_v47 = vshrl.u32 %v5889_v60, 16  ;;  %v11075_v55 = vld [vmem:[#allocation2 + $0x130] ss:$8 sps:$4 sm:$0xff]   ;;  %v11087_v14 = vld [vmem:[#allocation9 + $0x4] ss:$16 sps:$4 sm:$0xff]   ;;  %v6102_v23 = vshrl.u32 %v5893_v33, 16 }
 0x3ea   : > { %v6048_v56 = vrot.slane %v6046_v10, 4  ;;  %v6016_v10 = vsel %vm11862_vm6, %v6011_v2, %v6015_v26  ;;  %v6043_v13 = vrot.slane %v6041_v61, 5  ;;  %v6083_v2 = vshll.u32 %v13076_v58, 16  ;;  %7742 = vmatprep.subr.bf16.mxu1 %v11087_v14  ;;  %v11093_v31 = vld [vmem:[#allocation9 + $0x44] ss:$16 sps:$4 sm:$0xff]  }
 0x3eb   : > { %v6076_v52 = vrot.slane %v6074_v47, 4  ;;  %v9328_v61 = vcombine.low %v6002_v39, %v6016_v10  ;;  %v6093_v26 = vrot.slane %v6091_v7, 5  ;;  %v11090_v47 = vld [vmem:[#allocation9 + $0x24] ss:$16 sps:$4 sm:$0xff]   ;;  %v6071_v58 = vrot.slane %v6069_v42, 5  ;;  %7743 = vmatpush1.bf16.msra.mxu1 %v11085_v50 }
 0x3ec   : > { %v6052_v22 = vor.u32 %v6051_v21, %v6048_v56  ;;  %v6030_v56 = vsel %vm11862_vm6, %v6025_v49, %v6029_v48  ;;  %v6090_v21 = vrot.slane %v6088_v19, 4  ;;  %v6044_v28 = vsel %vm11862_vm6, %v6039_v62, %v6043_v13  ;;  %v11088_v7 = vld [vmem:[#allocation9 + $0x20] ss:$16 sps:$4 sm:$0xff]   ;;  %7744 = vmatprep.subr.bf16.mxu1 %v11090_v47 }
 0x3ed   : > { %v6067_v10 = vrot.slane %v6066_v32, 4  ;;  %v6130_v49 = vshrl.u32 %v5897_v27, 16  ;;  %v6133_v19 = vshll.u32 %v5897_v27, 16  ;;  %v13349_v48 = vcombine.low %v6030_v56, %v6044_v28  ;;  %v11091_v47 = vld [vmem:[#allocation9 + $0x40] ss:$16 sps:$4 sm:$0xff]  }
 0x3ee   : > { %v6094_v62 = vor.u32 %v6093_v26, %v6090_v21  ;;  %v6144_v13 = vshrl.u32 %v5899_v11, 16  ;;  %v6121_v42 = vrot.slane %v6119_v16, 5  ;;  %v6147_v32 = vshll.u32 %v5899_v11, 16 }
 0x3ef   : > { %10378 = vmatmul.mubr.bf16.gmra.mrb[24].mxu0 %v11072_v36  ;;  %v13332_v36 = vld [vmem:[#allocation2 + $0x64] sm:$0x1]  ;;  %v6097_v27 = vshll.u32 %v13078_v1, 16  ;;  %v6104_v50 = vrot.slane %v6102_v23, 4  ;;  %v6072_v21 = vsel %vm11862_vm6, %v6067_v10, %v6071_v58  ;;  %v6132_v14 = vrot.slane %v6130_v49, 4  ;;  %7745 = vmatpush1.bf16.msra.mxu1 %v11088_v7  ;;  %v11079_v10 = vld [vmem:[#allocation8 + $0x210] sm:$0xff]  }
 0x3f0   : > { %10381 = vmatprep.mubr.bf16.mxu0 %v11074_v12  ;;  %14170 = vst [vmem:[#allocation31_spill] sm:$0xff] %v13332_v36  ;;  %v6077_v12 = vshll.u32 %v5889_v60, 16  ;;  %v6055_v60 = vshll.u32 %v13332_v36, 16  ;;  %v6053_v36 = vrot.slane %v6052_v22, 4  ;;  %v5901_v22 = vld [vmem:[#allocation2 + $0xb0] sm:$0xf]  ;;  %7746 = vmatprep.subr.bf16.mxu1 %v11093_v31 }
 0x3f1   : > { %v6135_v28 = vrot.slane %v6133_v19, 5  ;;  %v6146_v11 = vrot.slane %v6144_v13, 4  ;;  %v6161_v16 = vshll.u32 %v5901_v22, 16  ;;  %v11096_v1 = vld [vmem:[#allocation9 + $0x64] ss:$16 sps:$4 sm:$0xff]   ;;  %v6149_v23 = vrot.slane %v6147_v32, 5 }
 0x3f2   : > { %v6079_v17 = vrot.slane %v6077_v12, 5  ;;  %v6057_v12 = vrot.slane %v6055_v60, 5  ;;  %v5907_v13 = vld [vmem:[#allocation2 + $0xc8] sm:$0xf] }
 0x3f3   : > { %7747 = vmatpush1.bf16.msra.mxu1 %v11091_v47  ;;  %v6163_v32 = vrot.slane %v6161_v16, 5 }
 0x3f4   : > { %v6080_v39 = vor.u32 %v6079_v17, %v6076_v52  ;;  %v6058_v60 = vsel %vm11862_vm6, %v6053_v36, %v6057_v12  ;;  %v5903_v17 = vld [vmem:[#allocation2 + $0xb8] sm:$0xf]  ;;  %v11078_v52 = vld [vmem:[#allocation8 + $0x208] sm:$0xff]   ;;  %v6095_v36 = vrot.slane %v6094_v62, 4  ;;  %v6136_v62 = vor.u32 %v6135_v28, %v6132_v14  ;;  %7748 = vmatprep.subr.bf16.mxu1 %v11096_v1 }
 0x3f5   : > { %v6172_v12 = vshrl.u32 %v5903_v17, 16  ;;  %v6175_v58 = vshll.u32 %v5903_v17, 16  ;;  %v9330_v19 = vcombine.low %v6058_v60, %v6072_v21  ;;  %v6150_v17 = vor.u32 %v6149_v23, %v6146_v11  ;;  %v5911_v14 = vld [vmem:[#allocation2 + $0xd8] sm:$0xf] }
 0x3f6   : > { %v6081_v26 = vrot.slane %v6080_v39, 4  ;;  %v6200_v21 = vshrl.u32 %v5907_v13, 16  ;;  %v6137_v47 = vrot.slane %v6136_v62, 4 }
 0x3f7   : > { %10382 = vmatmul.mubr.bf16.gmra.mrb[28].mxu0 %v11075_v55  ;;  %v6105_v55 = vshll.u32 %v5893_v33, 16  ;;  %v6118_v33 = vrot.slane %v6116_v24, 4  ;;  %v6158_v24 = vshrl.u32 %v5901_v22, 16  ;;  %v11094_v22 = vld [vmem:[#allocation9 + $0x60] ss:$16 sps:$4 sm:$0xff]  }
 0x3f8   : > { %10401 = vmatprep.mubr.bf16.mxu0 %v9326_v43  ;;  %v13351_v43 = vrot.slane %v6083_v2, 5  ;;  %v6111_v2 = vshll.u32 %v13082_v15, 16  ;;  %7749 = vmatpush1.bf16.msra.mxu1 %v11094_v22 }
 0x3f9   : > { %v6107_v56 = vrot.slane %v6105_v55, 5  ;;  %v6122_v15 = vor.u32 %v6121_v42, %v6118_v33  ;;  %v6099_v55 = vrot.slane %v6097_v27, 5  ;;  %v6153_v33 = vshll.u32 %v13090_v44, 16 }
 0x3fa   : > { %v6113_v49 = vrot.slane %v6111_v2, 5  ;;  %v6086_v7 = vsel %vm11862_vm6, %v6081_v26, %v13351_v43  ;;  %v6160_v42 = vrot.slane %v6158_v24, 4  ;;  %v6174_v43 = vrot.slane %v6172_v12, 4  ;;  %v11080_v2 = vld [vmem:[#allocation8 + $0x218] sm:$0xff]   ;;  %v11097_v24 = vld [vmem:[#allocation9 + $0x80] ss:$16 sps:$4 sm:$0xff]  }
 0x3fb   : > { %v6108_v39 = vor.u32 %v6107_v56, %v6104_v50  ;;  %v6100_v31 = vsel %vm11862_vm6, %v6095_v36, %v6099_v55  ;;  %v6123_v60 = vrot.slane %v6122_v15, 4  ;;  %v6177_v27 = vrot.slane %v6175_v58, 5  ;;  %v5909_v50 = vld [vmem:[#allocation2 + $0xd0] sm:$0xf]  ;;  %v11102_v15 = vld [vmem:[#allocation9 + $0xa4] ss:$16 sps:$4 sm:$0xff]  }
 0x3fc   : > { %v6203_v26 = vshll.u32 %v5907_v13, 16  ;;  %v9331_v28 = vcombine.low %v6086_v7, %v6100_v31  ;;  %v6167_v36 = vshll.u32 %v13092_v18, 16  ;;  %v6164_v11 = vor.u32 %v6163_v32, %v6160_v42  ;;  %v11100_v13 = vld [vmem:[#allocation9 + $0xa0] ss:$16 sps:$4 sm:$0xff]  }
 0x3fd   : > { %v6151_v12 = vrot.slane %v6150_v17, 4  ;;  %v6178_v58 = vor.u32 %v6177_v27, %v6174_v43  ;;  %v6181_v55 = vshll.u32 %v13096_v9, 16  ;;  %v6202_v18 = vrot.slane %v6200_v21, 4  ;;  %v5913_v42 = vld [vmem:[#allocation2 + $0xe0] sm:$0xf] }
 0x3fe   : > { %v6217_v7 = vshll.u32 %v5909_v50, 16 }
 0x3ff   : > { %10402 = vmatmul.mubr.bf16.vlgmr.msra.gmra.mrb[0].mxu0 %v13336_v46  ;;  %v6125_v46 = vshll.u32 %v13084_v8, 16  ;;  %v11099_v8 = vld [vmem:[#allocation9 + $0x84] ss:$16 sps:$4 sm:$0xff]  }
 0x400   : > { %10405 = vmatprep.mubr.bf16.mxu0 %v9328_v61  ;;  %10434 = vmatpush3.bf16.msra.mxu0 %v13297_v37  ;;  %v6139_v61 = vshll.u32 %v13088_v20, 16  ;;  %v5905_v37 = vld [vmem:[#allocation2 + $0xc0] sm:$0xf]  ;;  %v6109_v20 = vrot.slane %v6108_v39, 4  ;;  %v6205_v39 = vrot.slane %v6203_v26, 5  ;;  %v6219_v27 = vrot.slane %v6217_v7, 5 }
 0x401   : > { %10435 = vmatprep.subr.bf16.mxu0 %v11078_v52  ;;  %v6127_v56 = vrot.slane %v6125_v46, 5  ;;  %v6186_v16 = vshrl.u32 %v5905_v37, 16  ;;  %v6189_v1 = vshll.u32 %v5905_v37, 16  ;;  %7750 = vmatprep.subr.bf16.mxu1 %v11099_v8  ;;  %v11081_v46 = vld [vmem:[#allocation8 + $0x220] sm:$0xff]   ;;  %v6228_v37 = vshrl.u32 %v5911_v14, 16 }
 0x402   : > { %v6141_v44 = vrot.slane %v6139_v61, 5  ;;  %v6114_v62 = vsel %vm11862_vm6, %v6109_v20, %v6113_v49  ;;  %v6169_v61 = vrot.slane %v6167_v36, 5  ;;  %7751 = vmatpush1.bf16.msra.mxu1 %v11097_v24  ;;  %v6183_v8 = vrot.slane %v6181_v55, 5  ;;  %v11082_v20 = vld [vmem:[#allocation8 + $0x228] sm:$0xff]  }
 0x403   : > { %v6128_v23 = vsel %vm11862_vm6, %v6123_v60, %v6127_v56  ;;  %v6188_v31 = vrot.slane %v6186_v16, 4  ;;  %7752 = vmatprep.subr.bf16.mxu1 %v11102_v15  ;;  %v6195_v49 = vshll.u32 %v13098_v54, 16  ;;  %v6179_v60 = vrot.slane %v6178_v58, 4  ;;  %v5919_v36 = vld [vmem:[#allocation2 + $0x108] sm:$0xf]  ;;  %v11083_v58 = vld [vmem:[#allocation8 + $0x230] sm:$0xff]  }
 0x404   : > { %10436 = vmatpush3.bf16.msra.mxu0 %v11078_v52  ;;  %v6155_v52 = vrot.slane %v6153_v33, 5  ;;  %v9332_v22 = vcombine.low %v6114_v62, %v6128_v23  ;;  %v6191_v33 = vrot.slane %v6189_v1, 5  ;;  %v6142_v9 = vsel %vm11862_vm6, %v6137_v47, %v6141_v44  ;;  %v5917_v1 = vld [vmem:[#allocation2 + $0x100] sm:$0xf] }
 0x405   : > { %10437 = vmatprep.subr.bf16.mxu0 %v11079_v10  ;;  %v6206_v17 = vor.u32 %v6205_v39, %v6202_v18  ;;  %v6230_v56 = vrot.slane %v6228_v37, 4  ;;  %v6242_v26 = vshrl.u32 %v5913_v42, 16  ;;  %v6209_v54 = vshll.u32 %v13111_v40, 16 }
 0x406   : > { %v6156_v32 = vsel %vm11862_vm6, %v6151_v12, %v6155_v52  ;;  %7753 = vmatpush1.bf16.msra.mxu1 %v11100_v13  ;;  %v6192_v44 = vor.u32 %v6191_v33, %v6188_v31  ;;  %v6197_v24 = vrot.slane %v6195_v49, 5  ;;  %v6223_v52 = vshll.u32 %v13118_v63, 16  ;;  %v5923_v33 = vld [vmem:[#allocation2 + $0x118] sm:$0xf] }
 0x407   : > { %10406 = vmatmul.mubr.bf16.gmra.mrb[4].mxu0 %v13349_v48  ;;  %v6214_v48 = vshrl.u32 %v5909_v50, 16  ;;  %v5915_v50 = vld [vmem:[#allocation2 + $0xe8] sm:$0xf]  ;;  %v9333_v47 = vcombine.low %v6142_v9, %v6156_v32  ;;  %v6184_v15 = vsel %vm11862_vm6, %v6179_v60, %v6183_v8  ;;  %v6287_v12 = vshll.u32 %v5919_v36, 16 }
 0x408   : > { %10409 = vmatprep.mubr.bf16.mxu0 %v9330_v19  ;;  %10438 = vmatpush3.bf16.msra.mxu0 %v11079_v10  ;;  %v6231_v19 = vshll.u32 %v5911_v14, 16  ;;  %v6165_v10 = vrot.slane %v6164_v11, 4  ;;  %v6245_v14 = vshll.u32 %v5913_v42, 16  ;;  %v6256_v11 = vshrl.u32 %v5915_v50, 16  ;;  %v11084_v42 = vld [vmem:[#allocation8 + $0x238] sm:$0xff]  }
 0x409   : > { %10439 = vmatprep.subr.bf16.mxu0 %v11080_v2  ;;  %v6216_v43 = vrot.slane %v6214_v48, 4  ;;  %v6259_v16 = vshll.u32 %v5915_v50, 16  ;;  %v6207_v55 = vrot.slane %v6206_v17, 4  ;;  %v6244_v39 = vrot.slane %v6242_v26, 4 }
 0x40a   : > { %v6233_v21 = vrot.slane %v6231_v19, 5  ;;  %v6247_v40 = vrot.slane %v6245_v14, 5  ;;  %v6193_v48 = vrot.slane %v6192_v44, 4  ;;  %v6211_v7 = vrot.slane %v6209_v54, 5 }
 0x40b   : > { %v6220_v23 = vor.u32 %v6219_v27, %v6216_v43  ;;  %v6270_v62 = vshrl.u32 %v5917_v1, 16  ;;  %v6273_v63 = vshll.u32 %v5917_v1, 16  ;;  %v6258_v37 = vrot.slane %v6256_v11, 4 }
 0x40c   : > { %10440 = vmatpush3.bf16.msra.mxu0 %v11080_v2  ;;  %v6170_v2 = vsel %vm11862_vm6, %v6165_v10, %v6169_v61  ;;  %v6234_v18 = vor.u32 %v6233_v21, %v6230_v56  ;;  %v6251_v61 = vshll.u32 %v13130_v53, 16  ;;  %v6261_v19 = vrot.slane %v6259_v16, 5  ;;  %v5927_v56 = vld [vmem:[#allocation2 + $0x128] sm:$0xf] }
 0x40d   : > { %10441 = vmatprep.subr.bf16.mxu0 %v11081_v46  ;;  %v9334_v13 = vcombine.low %v6170_v2, %v6184_v15  ;;  %v6289_v31 = vrot.slane %v6287_v12, 5  ;;  %v6212_v9 = vsel %vm11862_vm6, %v6207_v55, %v6211_v7  ;;  %v6248_v8 = vor.u32 %v6247_v40, %v6244_v39  ;;  %v5929_v7 = vld [vmem:[#allocation2 + $0x130] sm:$0xf] }
 0x40e   : > { %v6235_v32 = vrot.slane %v6234_v18, 4  ;;  %v6265_v49 = vshll.u32 %v13139_v3, 16  ;;  %v6225_v53 = vrot.slane %v6223_v52, 5  ;;  %v6272_v60 = vrot.slane %v6270_v62, 4  ;;  %v5921_v3 = vld [vmem:[#allocation2 + $0x110] sm:$0xf] }
 0x40f   : > { %10410 = vmatmul.mubr.bf16.gmra.mrb[8].mxu0 %v9331_v28  ;;  %v6284_v28 = vshrl.u32 %v5919_v36, 16  ;;  %v6275_v17 = vrot.slane %v6273_v63, 5  ;;  %v6253_v27 = vrot.slane %v6251_v61, 5  ;;  %v6262_v50 = vor.u32 %v6261_v19, %v6258_v37 }
 0x410   : > { %10413 = vmatprep.mubr.bf16.mxu0 %v9332_v22  ;;  %10442 = vmatpush3.bf16.msra.mxu0 %v11081_v46  ;;  %v6237_v46 = vshll.u32 %v13128_v25, 16  ;;  %v6221_v22 = vrot.slane %v6220_v23, 4  ;;  %v6198_v25 = vsel %vm11862_vm6, %v6193_v48, %v6197_v24  ;;  %v6315_v36 = vshll.u32 %v5923_v33, 16  ;;  %v5925_v24 = vld [vmem:[#allocation2 + $0x120] sm:$0xf] }
 0x411   : > { %10443 = vmatprep.subr.bf16.mxu0 %v11082_v20  ;;  %v6286_v10 = vrot.slane %v6284_v28, 4  ;;  %v9335_v21 = vcombine.low %v6198_v25, %v6212_v9  ;;  %v6249_v2 = vrot.slane %v6248_v8, 4  ;;  %v6267_v44 = vrot.slane %v6265_v49, 5 }
 0x412   : > { %v6239_v43 = vrot.slane %v6237_v46, 5  ;;  %v6226_v26 = vsel %vm11862_vm6, %v6221_v22, %v6225_v53  ;;  %v6279_v54 = vshll.u32 %v13152_v6, 16  ;;  %v6276_v52 = vor.u32 %v6275_v17, %v6272_v60  ;;  %v5931_v46 = vld [vmem:[#allocation2 + $0x138] sm:$0xf] }
 0x413   : > { %v6290_v14 = vor.u32 %v6289_v31, %v6286_v10  ;;  %v6293_v11 = vshll.u32 %v13161_v45, 16  ;;  %v6340_v16 = vshrl.u32 %v5927_v56, 16  ;;  %v6343_v1 = vshll.u32 %v5927_v56, 16 }
 0x414   : > { %10444 = vmatpush3.bf16.msra.mxu0 %v11082_v20  ;;  %v6312_v20 = vshrl.u32 %v5923_v33, 16  ;;  %v6263_v15 = vrot.slane %v6262_v50, 4  ;;  %v6298_v23 = vshrl.u32 %v5921_v3, 16  ;;  %v6301_v28 = vshll.u32 %v5921_v3, 16 }
 0x415   : > { %10445 = vmatprep.subr.bf16.mxu0 %v11083_v58  ;;  %v6317_v55 = vrot.slane %v6315_v36, 5  ;;  %v6326_v18 = vshrl.u32 %v5925_v24, 16  ;;  %v6329_v39 = vshll.u32 %v5925_v24, 16  ;;  %v6281_v48 = vrot.slane %v6279_v54, 5 }
 0x416   : > { %v6314_v12 = vrot.slane %v6312_v20, 4  ;;  %v6254_v6 = vsel %vm11862_vm6, %v6249_v2, %v6253_v27  ;;  %v6295_v62 = vrot.slane %v6293_v11, 5  ;;  %v6342_v45 = vrot.slane %v6340_v16, 4 }
 0x417   : > { %10414 = vmatmul.mubr.bf16.gmra.mrb[12].mxu0 %v9333_v47  ;;  %v6240_v47 = vsel %vm11862_vm6, %v6235_v32, %v6239_v43  ;;  %v6345_v63 = vrot.slane %v6343_v1, 5  ;;  %v6268_v61 = vsel %vm11862_vm6, %v6263_v15, %v6267_v44  ;;  %v6277_v37 = vrot.slane %v6276_v52, 4 }
 0x418   : > { %10417 = vmatprep.mubr.bf16.mxu0 %v9334_v13  ;;  %10446 = vmatpush3.bf16.msra.mxu0 %v11083_v58  ;;  %v6291_v58 = vrot.slane %v6290_v14, 4  ;;  %v9336_v40 = vcombine.low %v6226_v26, %v6240_v47  ;;  %v6300_v19 = vrot.slane %v6298_v23, 4  ;;  %v6303_v13 = vrot.slane %v6301_v28, 5  ;;  %v6704_v23 = vld [vmem:[#allocation2 + $0x18] sm:$0xe] }
 0x419   : > { %10447 = vmatprep.subr.bf16.mxu0 %v11084_v42  ;;  %v6318_v10 = vor.u32 %v6317_v55, %v6314_v12  ;;  %v6328_v31 = vrot.slane %v6326_v18, 4  ;;  %v6331_v33 = vrot.slane %v6329_v39, 5  ;;  %v6357_v9 = vshll.u32 %v5929_v7, 16 }
 0x41a   : > { %v6296_v22 = vsel %vm11862_vm6, %v6291_v58, %v6295_v62  ;;  %v6368_v32 = vshrl.u32 %v5931_v46, 16  ;;  %v6371_v8 = vshll.u32 %v5931_v46, 16  ;;  %v6307_v49 = vshll.u32 %v13171_v51, 16  ;;  %v6706_v46 = vld [vmem:[#allocation2 + $0x28] sm:$0xe] }
 0x41b   : > { %v6346_v25 = vor.u32 %v6345_v63, %v6342_v45  ;;  %v9337_v53 = vcombine.low %v6254_v6, %v6268_v61  ;;  %v6282_v60 = vsel %vm11862_vm6, %v6277_v37, %v6281_v48  ;;  %v6304_v17 = vor.u32 %v6303_v13, %v6300_v19  ;;  %v6708_v61 = vld [vmem:[#allocation2 + $0x38] sm:$0xe]  ;;  %v6705_v19 = vld [vmem:[#allocation2 + $0x20] sm:$0xe] }
 0x41c   : > { %10448 = vmatpush3.bf16.msra.mxu0 %v11084_v42  ;;  %v6354_v42 = vshrl.u32 %v5929_v7, 16  ;;  %v6321_v43 = vshll.u32 %v13183_v41, 16  ;;  %v9338_v27 = vcombine.low %v6282_v60, %v6296_v22  ;;  %v6319_v50 = vrot.slane %v6318_v10, 4  ;;  %v6707_v10 = vld [vmem:[#allocation2 + $0x30] sm:$0xe] }
 0x41d   : > { %v6332_v20 = vor.u32 %v6331_v33, %v6328_v31  ;;  %v6349_v56 = vshll.u32 %v13200_v0, 16  ;;  %v6359_v26 = vrot.slane %v6357_v9, 5  ;;  %v6370_v14 = vrot.slane %v6368_v32, 4 }
 0x41e   : > { %v6373_v3 = vrot.slane %v6371_v8, 5  ;;  %v6335_v51 = vshll.u32 %v13191_v4, 16  ;;  %v6347_v36 = vrot.slane %v6346_v25, 4  ;;  %v6305_v47 = vrot.slane %v6304_v17, 4  ;;  %v14173_v8 = vld [vmem:[#allocation28_spill] sm:$0xff] }
 0x41f   : > { %10418 = vmatmul.mubr.bf16.gmra.mrb[16].mxu0 %v9335_v21  ;;  %v6356_v21 = vrot.slane %v6354_v42, 4  ;;  %v6323_v2 = vrot.slane %v6321_v43, 5  ;;  %v6309_v44 = vrot.slane %v6307_v49, 5  ;;  %v6333_v54 = vrot.slane %v6332_v20, 4  ;;  %v14172_v42 = vld [vmem:[#allocation27_spill] sm:$0xff] }
 0x420   : > { %10421 = vmatprep.mubr.bf16.mxu0 %v9336_v40  ;;  %v6351_v24 = vrot.slane %v6349_v56, 5  ;;  %v6374_v11 = vor.u32 %v6373_v3, %v6370_v14  ;;  %v6377_v0 = vshll.u32 %v13220_v29, 16  ;;  %v6337_v16 = vrot.slane %v6335_v51, 5  ;;  %v6703_v40 = vld [vmem:[#allocation2 + $0x10] sm:$0xe]  ;;  %v14174_v56 = vld [vmem:[#allocation29_spill] sm:$0xff] }
 0x421   : > { %v6324_v41 = vsel %vm11862_vm6, %v6319_v50, %v6323_v2  ;;  %v6360_v52 = vor.u32 %v6359_v26, %v6356_v21  ;;  %v6310_v4 = vsel %vm11862_vm6, %v6305_v47, %v6309_v44  ;;  %v6363_v15 = vshll.u32 %v13211_v59, 16  ;;  %v6712_v43 = vld [vmem:[#allocation2 + $0x68] sm:$0xe]  ;;  %v6711_v51 = vld [vmem:[#allocation2 + $0x60] sm:$0xe]  ;;  %v14176_v47 = vld [vmem:[#allocation32_spill] sm:$0xff] }
 0x422   : > { %v6352_v1 = vsel %vm11862_vm6, %v6347_v36, %v6351_v24  ;;  %v9339_v28 = vcombine.low %v6310_v4, %v6324_v41  ;;  %v6338_v12 = vsel %vm11862_vm6, %v6333_v54, %v6337_v16  ;;  %v6375_v18 = vrot.slane %v6374_v11, 4  ;;  %v14175_v14 = vld [vmem:[#allocation30_spill] sm:$0xff]  ;;  %v14177_v54 = vld [vmem:[#allocation31_spill] sm:$0xff]  ;;  %v14178_v4 = vld [vmem:[#allocation48_spill] sm:$0xff] }
 0x423   : > { %v9340_v58 = vcombine.low %v6338_v12, %v6352_v1  ;;  %v6361_v55 = vrot.slane %v6360_v52, 4  ;;  %v6379_v39 = vrot.slane %v6377_v0, 5  ;;  %v9351_v29 = vrot.slane %v6704_v23, 9  ;;  %v14182_v12 = vld [vmem:[#allocation54_spill] sm:$0xff] }
 0x424   : > { %v6805_v48 = vrot.slane %v13302_v5, 5  ;;  %v6365_v7 = vrot.slane %v6363_v15, 5  ;;  %v9350_v6 = vrot.slane %v6703_v40, 9  ;;  %v6801_v62 = vrot.slane %v13300_v34, 5  ;;  %v14179_v15 = vld [vmem:[#allocation49_spill] sm:$0xff]  ;;  %v14187_v40 = vld [vmem:[#allocation58_spill] sm:$0xff] }
 0x425   : > { %v6380_v45 = vsel %vm11862_vm6, %v6375_v18, %v6379_v39  ;;  %v9353_v22 = vrot.slane %v6706_v46, 9  ;;  %v6813_v34 = vrot.slane %v13308_v57, 5  ;;  %v9355_v31 = vrot.slane %v6708_v61, 9  ;;  %v6710_v57 = vld [vmem:[#allocation2 + $0x48] sm:$0xe]  ;;  %v14185_v18 = vld [vmem:[#allocation57_spill] sm:$0xff] }
 0x426   : > { %v6366_v59 = vsel %vm11862_vm6, %v6361_v55, %v6365_v7  ;;  %v6806_v63 = vsel %vm11969_vm11, %v9351_v29, %v6805_v48  ;;  %v6802_v5 = vsel %vm11969_vm11, %v9350_v6, %v6801_v62  ;;  %v9352_v33 = vrot.slane %v6705_v19, 9  ;;  %v14184_v55 = vld [vmem:[#allocation56_spill] sm:$0xff]  ;;  %v14188_v29 = vld [vmem:[#allocation59_spill] sm:$0xff]  ;;  %v14191_v7 = vld [vmem:[#allocation17_spill] sm:$0xff] }
 0x427   : > { %10422 = vmatmul.mubr.bf16.gmra.mrb[20].mxu0 %v9337_v53  ;;  %v9341_v37 = vcombine.low %v6366_v59, %v6380_v45  ;;  %v9382_v13 = vcombine.low %v6802_v5, %v6806_v63  ;;  %v6809_v9 = vrot.slane %v14172_v42, 5  ;;  %v9354_v32 = vrot.slane %v6707_v10, 9  ;;  %v6709_v53 = vld [vmem:[#allocation2 + $0x40] sm:$0xe]  ;;  %v14193_v62 = vld [vmem:[#allocation18_spill] sm:$0xff]  ;;  %v14194_v59 = vld [vmem:[#allocation20_spill] sm:$0xff] }
 0x428   : > { %10425 = vmatprep.mubr.bf16.mxu0 %v9338_v27  ;;  %v6817_v49 = vrot.slane %v14173_v8, 5  ;;  %v6814_v25 = vsel %vm11969_vm11, %v9353_v22, %v6813_v34  ;;  %v6822_v60 = vsel %vm11969_vm11, %v9355_v31, %v6821_v35  ;;  %v9356_v50 = vrot.slane %v6709_v53, 9  ;;  %v14196_v63 = vld [vmem:[#allocation60_spill] sm:$0xff]  ;;  %v14197_v46 = vld [vmem:[#allocation61_spill] sm:$0xff]  ;;  %v14200_v5 = vld [vmem:[#allocation63_spill] sm:$0xff] }
 0x429   : > { %v6810_v17 = vsel %vm11969_vm11, %v9352_v33, %v6809_v9  ;;  %v6825_v21 = vrot.slane %v14174_v56, 5  ;;  %v9357_v26 = vrot.slane %v6710_v57, 9  ;;  %v6829_v3 = vrot.slane %v14175_v14, 5  ;;  %v14203_v22 = vld [vmem:[#allocation21_spill] sm:$0xff]  ;;  %v14205_v10 = vld [vmem:[#allocation22_spill] sm:$0xff]  ;;  %v14206_v31 = vld [vmem:[#allocation24_spill] sm:$0xff] }
 0x42a   : > { %v9383_v30 = vcombine.low %v6810_v17, %v6814_v25  ;;  %v6818_v27 = vsel %vm11969_vm11, %v9354_v32, %v6817_v49  ;;  %v9359_v36 = vrot.slane %v6712_v43, 9  ;;  %v6837_v2 = vrot.slane %v14176_v47, 5  ;;  %v14208_v33 = vld [vmem:[#allocation26_spill] sm:$0xff]  ;;  %v14209_v42 = vld [vmem:[#allocation65_spill] sm:$0xff] }
 0x42b   : > { %v9384_v20 = vcombine.low %v6818_v27, %v6822_v60  ;;  %v9358_v44 = vrot.slane %v6711_v51, 9  ;;  %v6833_v24 = vrot.slane %v14177_v54, 5  ;;  %v6826_v41 = vsel %vm11969_vm11, %v9356_v50, %v6825_v21  ;;  %v11103_v32 = vld [vmem:[#allocation9 + $0xc0] ss:$16 sps:$4 sm:$0xff]   ;;  %v11105_v8 = vld [vmem:[#allocation9 + $0xc4] ss:$16 sps:$4 sm:$0xff]  }
 0x42c   : > { %v6830_v52 = vsel %vm11969_vm11, %v9357_v26, %v6829_v3  ;;  %v6838_v11 = vsel %vm11969_vm11, %v9359_v36, %v6837_v2  ;;  %v14180_v23 = vcombine.low %v14178_v4, %v14179_v15  ;;  %v14186_v39 = vcombine.low %v14184_v55, %v14185_v18  ;;  %v11108_v49 = vld [vmem:[#allocation9 + $0xe4] ss:$16 sps:$4 sm:$0xff]   ;;  %7754 = vmatprep.subr.bf16.mxu1 %v11105_v8  ;;  %v11106_v25 = vld [vmem:[#allocation9 + $0xe0] ss:$16 sps:$4 sm:$0xff]   ;;  %v11111_v53 = vld [vmem:[#allocation9 + $0xc] ss:$16 sps:$4 sm:$0xff]  }
 0x42d   : > { %v9385_v0 = vcombine.low %v6826_v41, %v6830_v52  ;;  %v6834_v16 = vsel %vm11969_vm11, %v9358_v44, %v6833_v24  ;;  %v14189_v48 = vcombine.low %v14187_v40, %v14188_v29  ;;  %v14192_v6 = vcombine.low %v14190_v38, %v14191_v7  ;;  %7755 = vmatpush1.bf16.msra.mxu1 %v11103_v32  ;;  %v13492_v60 = vld [vmem:[%s13974_s4] ss:$0 sm:$0xff]  ;;  %v11109_v36 = vld [vmem:[#allocation9 + $0x8] ss:$16 sps:$4 sm:$0xff]   ;;  %v11114_v44 = vld [vmem:[#allocation9 + $0x2c] ss:$16 sps:$4 sm:$0xff]  }
 0x42e   : > { %v9386_v1 = vcombine.low %v6834_v16, %v6838_v11  ;;  %v14195_v45 = vcombine.low %v14193_v62, %v14194_v59  ;;  %v14198_v61 = vcombine.low %v14196_v63, %v14197_v46  ;;  %v14207_v35 = vcombine.low %v14205_v10, %v14206_v31  ;;  %7756 = vmatprep.subr.bf16.mxu1 %v11108_v49  ;;  %v11117_v15 = vld [vmem:[#allocation9 + $0x4c] ss:$16 sps:$4 sm:$0xff]   ;;  %v11115_v18 = vld [vmem:[#allocation9 + $0x48] ss:$16 sps:$4 sm:$0xff]  }
 0x42f   : > { %10426 = vmatmul.mubr.bf16.gmra.mrb[24].mxu0 %v9339_v28  ;;  %v14181_v28 = vld [vmem:[#allocation52_spill] sm:$0xff]  ;;  %v14210_v9 = vcombine.low %v14208_v33, %v14209_v42  ;;  %v14211_v16 = vmov 0  }
 0x430   : > { %10429 = vmatprep.mubr.bf16.mxu0 %v9340_v58  ;;  %v14183_v58 = vcombine.low %v14181_v28, %v14182_v12  ;;  %v11120_v29 = vld [vmem:[#allocation9 + $0x6c] ss:$16 sps:$4 sm:$0xff]   ;;  %v11124_v49 = vld [vmem:[#allocation9 + $0xa8] ss:$16 sps:$4 sm:$0xff]  }
 0x431   : > { %7757 = vmatpush1.bf16.msra.mxu1 %v11106_v25  ;;  %v11123_v46 = vld [vmem:[#allocation9 + $0x8c] ss:$16 sps:$4 sm:$0xff]  }
 0x432   : > { %7935 = vmatprep.subr.bf16.mxu1 %v11111_v53  ;;  %v11126_v31 = vld [vmem:[#allocation9 + $0xac] ss:$16 sps:$4 sm:$0xff]  }
 0x433   : > { %v11129_v53 = vld [vmem:[#allocation9 + $0xcc] ss:$16 sps:$4 sm:$0xff]  }
 0x437   : > { %10430 = vmatmul.mubr.bf16.gmra.mrb[28].mxu0 %v9341_v37  ;;  %v14199_v37 = vld [vmem:[#allocation62_spill] sm:$0xff] }
 0x438   : > { %10449 = vmatprep.mubr.bf16.mxu0 %v9382_v13  ;;  %v14201_v19 = vcombine.low %v14199_v37, %v14200_v5  ;;  %v14202_v13 = vld [vmem:[#allocation64_spill] sm:$0xff] }
 0x439   : > { %v14204_v34 = vcombine.low %v14202_v13, %v14203_v22  ;;  %v11121_v22 = vld [vmem:[#allocation9 + $0x88] ss:$16 sps:$4 sm:$0xff]  }
 0x43f   : > { %10450 = vmatmul.mubr.bf16.vlgmr.msra.gmra.mrb[0].mxu0 %v9383_v30 }
 0x440   : > { %10453 = vmatprep.mubr.bf16.mxu0 %v9384_v20 }
 0x447   : > { %10454 = vmatmul.mubr.bf16.gmra.mrb[4].mxu0 %v9385_v0 }
 0x448   : > { %10457 = vmatprep.mubr.bf16.mxu0 %v9386_v1  ;;  %v11112_v1 = vld [vmem:[#allocation9 + $0x28] ss:$16 sps:$4 sm:$0xff]  }
 0x44f   : > { %10458 = vmatmul.mubr.bf16.gmra.mrb[8].mxu0 %v14180_v23 }
 0x450   : > { %10461 = vmatprep.mubr.bf16.mxu0 %v14183_v58 }
 0x457   : > { %10462 = vmatmul.mubr.bf16.gmra.mrb[12].mxu0 %v14186_v39 }
 0x458   : > { %10465 = vmatprep.mubr.bf16.mxu0 %v14189_v48 }
 0x45f   : > { %10466 = vmatmul.mubr.bf16.gmra.mrb[16].mxu0 %v14192_v6 }
 0x460   : > { %10469 = vmatprep.mubr.bf16.mxu0 %v14195_v45  ;;  %v11118_v45 = vld [vmem:[#allocation9 + $0x68] ss:$16 sps:$4 sm:$0xff]  }
 0x467   : > { %10470 = vmatmul.mubr.bf16.gmra.mrb[20].mxu0 %v14198_v61 }
 0x468   : > { %10473 = vmatprep.mubr.bf16.mxu0 %v14201_v19 }
 0x46f   : > { %10474 = vmatmul.mubr.bf16.gmra.mrb[24].mxu0 %v14204_v34 }
 0x470   : > { %10477 = vmatprep.mubr.bf16.mxu0 %v14207_v35 }
 0x477   : > { %10478 = vmatmul.mubr.bf16.gmra.mrb[28].mxu0 %v14210_v9 }
 0x512   : > { %v10451_v57 = vpop.f32.mrb[0].mxu0 }
 0x513   : > { %v7258_v17 = vadd.f32 %v10451_v57, %v13492_v60  ;;  %v7090_v43 = vpop.f32.mrb[1].mxu0 }
 0x514   : > { %v7256_v30 = vadd.f32 %v13492_v60, %v7090_v43  ;;  %v10452_v27 = vpop.f32.mrb[2].mxu0 }
 0x515   : > { %v7259_v50 = vadd.f32 %v10452_v27, %v13492_v60  ;;  %v7093_v20 = vpop.f32.mrb[3].mxu0  ;;  %v7290_v21 = vmax.f32 %v7258_v17, 0.0 }
 0x516   : > { %v7257_v56 = vadd.f32 %v13492_v60, %v7093_v20  ;;  %v7288_v14 = vmax.f32 %v7256_v30, 0.0 }
 0x517   : > { %v7291_v26 = vmax.f32 %v7259_v50, 0.0  ;;  %v11127_v50 = vld [vmem:[#allocation9 + $0xc8] ss:$16 sps:$4 sm:$0xff]  }
 0x518   : > { %v7289_v3 = vmax.f32 %v7257_v56, 0.0 }
 0x519   : > { %v13498_v51 = vpack.c.bf16 %v7291_v26, %v7290_v21  ;;  %v11132_v21 = vld [vmem:[#allocation9 + $0xec] ss:$16 sps:$4 sm:$0xff]   ;;  %v14212_v26 = vld [vmem:[#allocation23_spill] sm:$0xff] }
 0x51a   : > { %v13500_v47 = vpack.c.bf16 %v7289_v3, %v7288_v14  ;;  %v10455_v2 = vpop.f32.mrb[4].mxu0 }
 0x51b   : > { %v7262_v54 = vadd.f32 %v10455_v2, %v13492_v60  ;;  %v7106_v24 = vpop.f32.mrb[5].mxu0 }
 0x51c   : > { %v7260_v41 = vadd.f32 %v13492_v60, %v7106_v24  ;;  %v10456_v52 = vpop.f32.mrb[6].mxu0  ;;  %7775 = vmatmul.mubr.bf16.vlgmr.msra.gmra.mrb[144].mxu1 %v13500_v47  ;;  %v14214_v24 = vld [vmem:[#allocation38_spill] sm:$0xff] }
 0x51d   : > { %v7263_v11 = vadd.f32 %v10456_v52, %v13492_v60  ;;  %v7109_v0 = vpop.f32.mrb[7].mxu0  ;;  %7936 = vmatpush1.bf16.msra.mxu1 %v11109_v36  ;;  %7784 = vmatprep.mubr.bf16.mxu1 %v14211_v16  ;;  %v7294_v23 = vmax.f32 %v7262_v54, 0.0  ;;  %v14213_v36 = vld [vmem:[#allocation25_spill] sm:$0xff] }
 0x51e   : > { %v7261_v4 = vadd.f32 %v13492_v60, %v7109_v0  ;;  %7937 = vmatprep.subr.bf16.mxu1 %v11114_v44  ;;  %v7292_v12 = vmax.f32 %v7260_v41, 0.0 }
 0x51f   : > { %v7295_v28 = vmax.f32 %v7263_v11, 0.0  ;;  %v11130_v11 = vld [vmem:[#allocation9 + $0xe8] ss:$16 sps:$4 sm:$0xff]  }
 0x520   : > { %v7293_v58 = vmax.f32 %v7261_v4, 0.0 }
 0x521   : > { %v13508_v55 = vpack.c.bf16 %v7295_v28, %v7294_v23  ;;  %7938 = vmatpush1.bf16.msra.mxu1 %v11112_v1  ;;  %v14215_v1 = vld [vmem:[#allocation39_spill] sm:$0xff] }
 0x522   : > { %v13510_v39 = vpack.c.bf16 %v7293_v58, %v7292_v12  ;;  %v10459_v40 = vpop.f32.mrb[8].mxu0  ;;  %7939 = vmatprep.subr.bf16.mxu1 %v11117_v15 }
 0x523   : > { %v7266_v48 = vadd.f32 %v10459_v40, %v13492_v60  ;;  %v7122_v38 = vpop.f32.mrb[9].mxu0 }
 0x524   : > { %v7264_v7 = vadd.f32 %v13492_v60, %v7122_v38  ;;  %v10460_v6 = vpop.f32.mrb[10].mxu0  ;;  %7785 = vmatmul.mubr.bf16.gmra.mrb[148].mxu1 %v13498_v51 }
 0x525   : > { %v7267_v62 = vadd.f32 %v10460_v6, %v13492_v60  ;;  %v7125_v59 = vpop.f32.mrb[11].mxu0  ;;  %7794 = vmatprep.mubr.bf16.mxu1 %v14211_v16  ;;  %7940 = vmatpush1.bf16.msra.mxu1 %v11115_v18  ;;  %v7298_v61 = vmax.f32 %v7266_v48, 0.0  ;;  %v14217_v6 = vld [vmem:[#allocation41_spill] sm:$0xff] }
 0x526   : > { %v7265_v63 = vadd.f32 %v13492_v60, %v7125_v59  ;;  %7941 = vmatprep.subr.bf16.mxu1 %v11120_v29  ;;  %v7296_v5 = vmax.f32 %v7264_v7, 0.0  ;;  %v14216_v29 = vld [vmem:[#allocation40_spill] sm:$0xff] }
 0x527   : > { %v7299_v37 = vmax.f32 %v7267_v62, 0.0 }
 0x528   : > { %v7297_v19 = vmax.f32 %v7265_v63, 0.0 }
 0x529   : > { %v13518_v13 = vpack.c.bf16 %v7299_v37, %v7298_v61  ;;  %7942 = vmatpush1.bf16.msra.mxu1 %v11118_v45 }
 0x52a   : > { %v13520_v34 = vpack.c.bf16 %v7297_v19, %v7296_v5  ;;  %v10463_v10 = vpop.f32.mrb[12].mxu0  ;;  %7943 = vmatprep.subr.bf16.mxu1 %v11123_v46  ;;  %v14218_v46 = vld [vmem:[#allocation42_spill] sm:$0xff]  ;;  %v14219_v19 = vld [vmem:[#allocation43_spill] sm:$0xff] }
 0x52b   : > { %v7270_v35 = vadd.f32 %v10463_v10, %v13492_v60  ;;  %v7138_v33 = vpop.f32.mrb[13].mxu0 }
 0x52c   : > { %v7268_v42 = vadd.f32 %v13492_v60, %v7138_v33  ;;  %v10464_v9 = vpop.f32.mrb[14].mxu0  ;;  %7795 = vmatmul.mubr.bf16.gmra.mrb[152].mxu1 %v13510_v39 }
 0x52d   : > { %v7271_v32 = vadd.f32 %v10464_v9, %v13492_v60  ;;  %v7141_v8 = vpop.f32.mrb[15].mxu0  ;;  %7804 = vmatprep.mubr.bf16.mxu1 %v14211_v16  ;;  %7944 = vmatpush1.bf16.msra.mxu1 %v11121_v22  ;;  %v7302_v57 = vmax.f32 %v7270_v35, 0.0 }
 0x52e   : > { %v7269_v25 = vadd.f32 %v13492_v60, %v7141_v8  ;;  %7945 = vmatprep.subr.bf16.mxu1 %v11126_v31  ;;  %v7300_v43 = vmax.f32 %v7268_v42, 0.0  ;;  %v14220_v8 = vld [vmem:[#allocation44_spill] sm:$0xff] }
 0x52f   : > { %v7303_v17 = vmax.f32 %v7271_v32, 0.0 }
 0x530   : > { %v7301_v30 = vmax.f32 %v7269_v25, 0.0 }
 0x531   : > { %v13528_v27 = vpack.c.bf16 %v7303_v17, %v7302_v57  ;;  %7946 = vmatpush1.bf16.msra.mxu1 %v11124_v49  ;;  %v14221_v57 = vld [vmem:[#allocation45_spill] sm:$0xff] }
 0x532   : > { %v13530_v20 = vpack.c.bf16 %v7301_v30, %v7300_v43  ;;  %v10467_v56 = vpop.f32.mrb[16].mxu0  ;;  %7947 = vmatprep.subr.bf16.mxu1 %v11129_v53 }
 0x533   : > { %v10497_v14 = vadd.f32 %v10467_v56, %v14212_v26  ;;  %v7154_v3 = vpop.f32.mrb[17].mxu0  ;;  %v14222_v56 = vld [vmem:[#allocation46_spill] sm:$0xff] }
 0x534   : > { %v10498_v2 = vadd.f32 %v7154_v3, %v14213_v36  ;;  %v10468_v44 = vpop.f32.mrb[18].mxu0  ;;  %7805 = vmatmul.mubr.bf16.gmra.mrb[156].mxu1 %v13508_v55  ;;  %v14223_v3 = vld [vmem:[#allocation47_spill] sm:$0xff] }
 0x535   : > { %v7274_v54 = vadd.f32 %v10497_v14, %v13492_v60  ;;  %v10499_v41 = vadd.f32 %v10468_v44, %v14214_v24  ;;  %v7157_v52 = vpop.f32.mrb[19].mxu0  ;;  %7814 = vmatprep.mubr.bf16.mxu1 %v14211_v16  ;;  %7948 = vmatpush1.bf16.msra.mxu1 %v11127_v50 }
 0x536   : > { %v7272_v0 = vadd.f32 %v10498_v2, %v13492_v60  ;;  %v10500_v4 = vadd.f32 %v7157_v52, %v14215_v1  ;;  %7949 = vmatprep.subr.bf16.mxu1 %v11132_v21 }
 0x537   : > { %v7275_v15 = vadd.f32 %v10499_v41, %v13492_v60  ;;  %v7306_v28 = vmax.f32 %v7274_v54, 0.0 }
 0x538   : > { %v7273_v23 = vadd.f32 %v10500_v4, %v13492_v60  ;;  %v7304_v58 = vmax.f32 %v7272_v0, 0.0  ;;  %v14224_v0 = vld [vmem:[#allocation50_spill] sm:$0xff] }
 0x539   : > { %v7307_v12 = vmax.f32 %v7275_v15, 0.0  ;;  %7950 = vmatpush1.bf16.msra.mxu1 %v11130_v11 }
 0x53a   : > { %v7305_v18 = vmax.f32 %v7273_v23, 0.0  ;;  %v10471_v40 = vpop.f32.mrb[20].mxu0  ;;  %v14225_v23 = vld [vmem:[#allocation51_spill] sm:$0xff] }
 0x53b   : > { %v10501_v48 = vadd.f32 %v10471_v40, %v14216_v29  ;;  %v7170_v38 = vpop.f32.mrb[21].mxu0  ;;  %v13543_v7 = vpack.c.bf16 %v7307_v12, %v7306_v28  ;;  %v14226_v40 = vld [vmem:[#allocation53_spill] sm:$0xff] }
 0x53c   : > { %v10502_v62 = vadd.f32 %v7170_v38, %v14217_v6  ;;  %v10472_v59 = vpop.f32.mrb[22].mxu0  ;;  %7815 = vmatmul.mubr.bf16.gmra.mrb[160].mxu1 %v13520_v34  ;;  %v13547_v45 = vpack.c.bf16 %v7305_v18, %v7304_v58  ;;  %v14227_v6 = vld [vmem:[#allocation55_spill] sm:$0xff] }
 0x53d   : > { %v7278_v63 = vadd.f32 %v10501_v48, %v13492_v60  ;;  %v10503_v61 = vadd.f32 %v10472_v59, %v14218_v46  ;;  %v7173_v37 = vpop.f32.mrb[23].mxu0  ;;  %7824 = vmatprep.mubr.bf16.mxu1 %v14211_v16 }
 0x53e   : > { %v7276_v5 = vadd.f32 %v10502_v62, %v13492_v60  ;;  %v10504_v22 = vadd.f32 %v7173_v37, %v14219_v19 }
 0x53f   : > { %v7279_v10 = vadd.f32 %v10503_v61, %v13492_v60  ;;  %v7310_v35 = vmax.f32 %v7278_v63, 0.0 }
 0x540   : > { %v7277_v31 = vadd.f32 %v10504_v22, %v13492_v60  ;;  %v7308_v42 = vmax.f32 %v7276_v5, 0.0 }
 0x541   : > { %v7311_v33 = vmax.f32 %v7279_v10, 0.0 }
 0x542   : > { %v7309_v9 = vmax.f32 %v7277_v31, 0.0  ;;  %v10475_v32 = vpop.f32.mrb[24].mxu0 }
 0x543   : > { %v10505_v49 = vadd.f32 %v10475_v32, %v14220_v8  ;;  %v7186_v25 = vpop.f32.mrb[25].mxu0  ;;  %v13557_v53 = vpack.c.bf16 %v7311_v33, %v7310_v35 }
 0x544   : > { %v10506_v17 = vadd.f32 %v7186_v25, %v14221_v57  ;;  %v10476_v43 = vpop.f32.mrb[26].mxu0  ;;  %7825 = vmatmul.mubr.bf16.gmra.mrb[164].mxu1 %v13518_v13  ;;  %v13561_v30 = vpack.c.bf16 %v7309_v9, %v7308_v42 }
 0x545   : > { %v7282_v50 = vadd.f32 %v10505_v49, %v13492_v60  ;;  %v10507_v21 = vadd.f32 %v10476_v43, %v14222_v56  ;;  %v7189_v26 = vpop.f32.mrb[27].mxu0  ;;  %7834 = vmatprep.mubr.bf16.mxu1 %v14211_v16  ;;  %v7372_v43 = vld [vmem:[%s11609_s15 + $0x20] sm:$0xff] }
 0x546   : > { %v7280_v14 = vadd.f32 %v10506_v17, %v13492_v60  ;;  %v10508_v36 = vadd.f32 %v7189_v26, %v14223_v3  ;;  %v7374_v26 = vld [vmem:[%s11609_s15 + $0x30] sm:$0xff]  ;;  %v7440_v3 = vunpack.c.l.bf16 %v7372_v43 }
 0x547   : > { %v7283_v2 = vadd.f32 %v10507_v21, %v13492_v60  ;;  %v7314_v54 = vmax.f32 %v7282_v50, 0.0 }
 0x548   : > { %v7281_v44 = vadd.f32 %v10508_v36, %v13492_v60  ;;  %v7312_v41 = vmax.f32 %v7280_v14, 0.0 }
 0x549   : > { %v7315_v24 = vmax.f32 %v7283_v2, 0.0 }
 0x54a   : > { %v7313_v52 = vmax.f32 %v7281_v44, 0.0  ;;  %v10479_v11 = vpop.f32.mrb[28].mxu0 }
 0x54b   : > { %v10509_v1 = vadd.f32 %v10479_v11, %v14224_v0  ;;  %v7202_v4 = vpop.f32.mrb[29].mxu0  ;;  %v13571_v15 = vpack.c.bf16 %v7315_v24, %v7314_v54  ;;  %v7441_v54 = vunpack.c.h.bf16 %v7372_v43 }
 0x54c   : > { %v10510_v28 = vadd.f32 %v7202_v4, %v14225_v23  ;;  %v10480_v12 = vpop.f32.mrb[30].mxu0  ;;  %7835 = vmatmul.mubr.bf16.gmra.mrb[168].mxu1 %v13530_v20  ;;  %v13575_v58 = vpack.c.bf16 %v7313_v52, %v7312_v41  ;;  %v7444_v52 = vunpack.c.l.bf16 %v7374_v26 }
 0x54d   : > { %v7286_v18 = vadd.f32 %v10509_v1, %v13492_v60  ;;  %v10511_v29 = vadd.f32 %v10480_v12, %v14226_v40  ;;  %v7205_v48 = vpop.f32.mrb[31].mxu0  ;;  %7844 = vmatprep.mubr.bf16.mxu1 %v14211_v16  ;;  %v7445_v1 = vunpack.c.h.bf16 %v7374_v26  ;;  %v7376_v40 = vld [vmem:[%s11609_s15 + $0x40] sm:$0xff] }
 0x54e   : > { %v7284_v38 = vadd.f32 %v10510_v28, %v13492_v60  ;;  %v10512_v62 = vadd.f32 %v7205_v48, %v14227_v6 }
 0x54f   : > { %v7287_v59 = vadd.f32 %v10511_v29, %v13492_v60  ;;  %v7318_v46 = vmax.f32 %v7286_v18, 0.0 }
 0x550   : > { %v7285_v63 = vadd.f32 %v10512_v62, %v13492_v60  ;;  %v7316_v37 = vmax.f32 %v7284_v38, 0.0  ;;  %v7562_v60 = vlaneseq  ;;  %v7378_v62 = vld [vmem:[%s11609_s15 + $0x50] sm:$0xff] }
 0x551   : > { %v7319_v61 = vmax.f32 %v7287_v59, 0.0 }
 0x552   : > { %v7317_v5 = vmax.f32 %v7285_v63, 0.0  ;;  %v7448_v63 = vunpack.c.l.bf16 %v7376_v40 }
 0x553   : > { %v13584_v19 = vpack.c.bf16 %v7319_v61, %v7318_v46 }
 0x554   : > { %7845 = vmatmul.mubr.bf16.gmra.mrb[172].mxu1 %v13528_v27  ;;  %v13587_v22 = vpack.c.bf16 %v7317_v5, %v7316_v37  ;;  %v7449_v5 = vunpack.c.h.bf16 %v7376_v40 }
 0x555   : > { %7854 = vmatprep.mubr.bf16.mxu1 %v14211_v16 }
 0x55c   : > { %7855 = vmatmul.mubr.bf16.gmra.mrb[176].mxu1 %v13547_v45 }
 0x55d   : > { %7864 = vmatprep.mubr.bf16.mxu1 %v14211_v16 }
 0x564   : > { %7865 = vmatmul.mubr.bf16.gmra.mrb[180].mxu1 %v13543_v7 }
 0x565   : > { %7874 = vmatprep.mubr.bf16.mxu1 %v14211_v16 }
 0x56c   : > { %7875 = vmatmul.mubr.bf16.gmra.mrb[184].mxu1 %v13561_v30 }
 0x56d   : > { %7884 = vmatprep.mubr.bf16.mxu1 %v14211_v16 }
 0x574   : > { %7885 = vmatmul.mubr.bf16.gmra.mrb[188].mxu1 %v13557_v53 }
 0x575   : > { %7894 = vmatprep.mubr.bf16.mxu1 %v14211_v16 }
 0x57c   : > { %7895 = vmatmul.mubr.bf16.gmra.mrb[192].mxu1 %v13575_v58 }
 0x57d   : > { %7904 = vmatprep.mubr.bf16.mxu1 %v14211_v16 }
 0x584   : > { %7905 = vmatmul.mubr.bf16.gmra.mrb[196].mxu1 %v13571_v15 }
 0x585   : > { %7914 = vmatprep.mubr.bf16.mxu1 %v14211_v16 }
 0x58c   : > { %7915 = vmatmul.mubr.bf16.gmra.mrb[200].mxu1 %v13587_v22 }
 0x58d   : > { %7924 = vmatprep.mubr.bf16.mxu1 %v14211_v16 }
 0x594   : > { %7925 = vmatmul.mubr.bf16.gmra.mrb[204].mxu1 %v13584_v19 }
 0x595   : > { %7967 = vmatprep.mubr.bf16.mxu1 %v14211_v16 }
 0x59c   : > { %7968 = vmatmul.mubr.bf16.vlgmr.msra.gmra.mrb[208].mxu1 %v13500_v47 }
 0x59d   : > { %7977 = vmatprep.mubr.bf16.mxu1 %v14211_v16 }
 0x5a4   : > { %7978 = vmatmul.mubr.bf16.gmra.mrb[212].mxu1 %v13498_v51  ;;  %v13625_v51 = vshrl.u32 %v7562_v60, 7 }
 0x5a5   : > { %7987 = vmatprep.mubr.bf16.mxu1 %v14211_v16 }
 0x5a6   : > { %v7564_v47 = vsub.s32 0, %v13625_v51 }
 0x5ac   : > { %7988 = vmatmul.mubr.bf16.gmra.mrb[216].mxu1 %v13510_v39  ;;  %v7568_v39 = vsub.s32 1, %v13625_v51 }
 0x5ad   : > { %7997 = vmatprep.mubr.bf16.mxu1 %v14211_v16 }
 0x5b4   : > { %7998 = vmatmul.mubr.bf16.gmra.mrb[220].mxu1 %v13508_v55  ;;  %v13632_v55 = vld [vmem:[%s13976_s6] sm:$0xf] }
 0x5b5   : > { %8007 = vmatprep.mubr.bf16.mxu1 %v14211_v16 }
 0x5bc   : > { %8008 = vmatmul.mubr.bf16.gmra.mrb[224].mxu1 %v13520_v34  ;;  %v13638_v34 = vrot.slane %v13632_v55, %v7564_v47 }
 0x5bd   : > { %8017 = vmatprep.mubr.bf16.mxu1 %v14211_v16 }
 0x5c4   : > { %8018 = vmatmul.mubr.bf16.gmra.mrb[228].mxu1 %v13518_v13  ;;  %v7368_v13 = vld [vmem:[%s11609_s15] sm:$0xff] }
 0x5c5   : > { %8027 = vmatprep.mubr.bf16.mxu1 %v14211_v16  ;;  %v7433_v10 = vunpack.c.h.bf16 %v7368_v13 }
 0x5cc   : > { %8028 = vmatmul.mubr.bf16.gmra.mrb[232].mxu1 %v13530_v20  ;;  %v7370_v20 = vld [vmem:[%s11609_s15 + $0x10] sm:$0xff] }
 0x5cd   : > { %8037 = vmatprep.mubr.bf16.mxu1 %v14211_v16  ;;  %v7436_v33 = vunpack.c.l.bf16 %v7370_v20  ;;  %v7437_v32 = vunpack.c.h.bf16 %v7370_v20 }
 0x5d4   : > { %8038 = vmatmul.mubr.bf16.gmra.mrb[236].mxu1 %v13528_v27  ;;  %v13641_v27 = vrot.slane %v13632_v55, %v7568_v39  ;;  %v7452_v39 = vunpack.c.l.bf16 %v7378_v62 }
 0x5d5   : > { %8047 = vmatprep.mubr.bf16.mxu1 %v14211_v16 }
 0x5dc   : > { %8048 = vmatmul.mubr.bf16.gmra.mrb[240].mxu1 %v13547_v45 }
 0x5dd   : > { %8057 = vmatprep.mubr.bf16.mxu1 %v14211_v16 }
 0x5e4   : > { %8058 = vmatmul.mubr.bf16.gmra.mrb[244].mxu1 %v13543_v7  ;;  %v7432_v7 = vunpack.c.l.bf16 %v7368_v13 }
 0x5e5   : > { %8067 = vmatprep.mubr.bf16.mxu1 %v14211_v16 }
 0x5ec   : > { %8068 = vmatmul.mubr.bf16.gmra.mrb[248].mxu1 %v13561_v30 }
 0x5ed   : > { %8077 = vmatprep.mubr.bf16.mxu1 %v14211_v16 }
 0x5ef   : > { %v7776_v45 = vpop.f32.mrb[144].mxu1 }
 0x5f0   : > { %v7777_v31 = vadd.f32 %v7776_v45, %v13638_v34  ;;  %v7778_v35 = vpop.f32.mrb[145].mxu1 }
 0x5f1   : > { %v7779_v42 = vadd.f32 %v7778_v35, %v13641_v27  ;;  %v7780_v9 = vpop.f32.mrb[146].mxu1 }
 0x5f2   : > { %v8128_v8 = vadd.f32 %v7777_v31, %v7432_v7  ;;  %v7781_v49 = vadd.f32 %v7780_v9, %v13638_v34  ;;  %v7782_v25 = vpop.f32.mrb[147].mxu1  ;;  %v7453_v7 = vunpack.c.h.bf16 %v7378_v62 }
 0x5f3   : > { %v8129_v57 = vadd.f32 %v7779_v42, %v7433_v10  ;;  %v7783_v17 = vadd.f32 %v7782_v25, %v13641_v27  ;;  %v7380_v42 = vld [vmem:[%s11609_s15 + $0x60] sm:$0xff]  ;;  %v7382_v25 = vld [vmem:[%s11609_s15 + $0x70] sm:$0xff] }
 0x5f4   : > { %v8256_v30 = vmax.f32 %v8128_v8, 0.0  ;;  %v8132_v50 = vadd.f32 %v7781_v49, %v7436_v33  ;;  %8078 = vmatmul.mubr.bf16.gmra.mrb[252].mxu1 %v13557_v53 }
 0x5f5   : > { %v8257_v56 = vmax.f32 %v8129_v57, 0.0  ;;  %v8133_v21 = vadd.f32 %v7783_v17, %v7437_v32  ;;  %8087 = vmatprep.mubr.bf16.mxu1 %v14211_v16  ;;  %v7456_v17 = vunpack.c.l.bf16 %v7380_v42 }
 0x5f6   : > { %v8260_v14 = vmax.f32 %v8132_v50, 0.0 }
 0x5f7   : > { %v9543_v36 = vpack.c.bf16 %v8257_v56, %v8256_v30  ;;  %v8261_v2 = vmax.f32 %v8133_v21, 0.0  ;;  %v7786_v44 = vpop.f32.mrb[148].mxu1  ;;  %v7457_v56 = vunpack.c.h.bf16 %v7380_v42 }
 0x5f8   : > { %v7787_v24 = vadd.f32 %v7786_v44, %v13638_v34  ;;  %v7788_v41 = vpop.f32.mrb[149].mxu1 }
 0x5f9   : > { %8768 = vst [vmem:[%s13656_s17] sm:$0xff] %v9543_v36  ;;  %v9545_v53 = vpack.c.bf16 %v8261_v2, %v8260_v14  ;;  %v7789_v11 = vadd.f32 %v7788_v41, %v13641_v27  ;;  %v7790_v0 = vpop.f32.mrb[150].mxu1  ;;  %v7460_v14 = vunpack.c.l.bf16 %v7382_v25  ;;  %v7461_v2 = vunpack.c.h.bf16 %v7382_v25 }
 0x5fa   : > { %v8136_v4 = vadd.f32 %v7787_v24, %v7440_v3  ;;  %v7791_v23 = vadd.f32 %v7790_v0, %v13638_v34  ;;  %v7792_v28 = vpop.f32.mrb[151].mxu1 }
 0x5fb   : > { %8770 = vst [vmem:[%s13656_s17 + $0x10] sm:$0xff] %v9545_v53  ;;  %v8137_v12 = vadd.f32 %v7789_v11, %v7441_v54  ;;  %v7793_v18 = vadd.f32 %v7792_v28, %v13641_v27  ;;  %v7384_v53 = vld [vmem:[%s11609_s15 + $0x80] sm:$0xff] }
 0x5fc   : > { %v8264_v29 = vmax.f32 %v8136_v4, 0.0  ;;  %v8140_v48 = vadd.f32 %v7791_v23, %v7444_v52  ;;  %8088 = vmatmul.mubr.bf16.gmra.mrb[0].mxu1 %v13575_v58  ;;  %v7386_v23 = vld [vmem:[%s11609_s15 + $0x90] sm:$0xff] }
 0x5fd   : > { %v8265_v38 = vmax.f32 %v8137_v12, 0.0  ;;  %v8141_v6 = vadd.f32 %v7793_v18, %v7445_v1  ;;  %8097 = vmatprep.mubr.bf16.mxu1 %v14211_v16  ;;  %v7464_v12 = vunpack.c.l.bf16 %v7384_v53  ;;  %v7468_v62 = vunpack.c.l.bf16 %v7386_v23 }
 0x5fe   : > { %v8268_v59 = vmax.f32 %v8140_v48, 0.0  ;;  %v7465_v48 = vunpack.c.h.bf16 %v7384_v53 }
 0x5ff   : > { %v9547_v46 = vpack.c.bf16 %v8265_v38, %v8264_v29  ;;  %v8269_v61 = vmax.f32 %v8141_v6, 0.0  ;;  %v7796_v37 = vpop.f32.mrb[152].mxu1 }
 0x600   : > { %v7797_v60 = vadd.f32 %v7796_v37, %v13638_v34  ;;  %v7798_v47 = vpop.f32.mrb[153].mxu1 }
 0x601   : > { %8772 = vst [vmem:[%s13656_s17 + $0x20] sm:$0xff] %v9547_v46  ;;  %v9549_v13 = vpack.c.bf16 %v8269_v61, %v8268_v59  ;;  %v7799_v58 = vadd.f32 %v7798_v47, %v13641_v27  ;;  %v7800_v20 = vpop.f32.mrb[154].mxu1  ;;  %v7469_v46 = vunpack.c.h.bf16 %v7386_v23  ;;  %v7388_v47 = vld [vmem:[%s11609_s15 + $0xa0] sm:$0xff] }
 0x602   : > { %v8144_v45 = vadd.f32 %v7797_v60, %v7448_v63  ;;  %v7801_v10 = vadd.f32 %v7800_v20, %v13638_v34  ;;  %v7802_v31 = vpop.f32.mrb[155].mxu1  ;;  %v7473_v42 = vunpack.c.h.bf16 %v7388_v47 }
 0x603   : > { %8774 = vst [vmem:[%s13656_s17 + $0x30] sm:$0xff] %v9549_v13  ;;  %v8145_v35 = vadd.f32 %v7799_v58, %v7449_v5  ;;  %v7803_v33 = vadd.f32 %v7802_v31, %v13641_v27 }
 0x604   : > { %v8272_v9 = vmax.f32 %v8144_v45, 0.0  ;;  %v8148_v32 = vadd.f32 %v7801_v10, %v7452_v39  ;;  %8098 = vmatmul.mubr.bf16.gmra.mrb[4].mxu1 %v13571_v15  ;;  %v7472_v10 = vunpack.c.l.bf16 %v7388_v47 }
 0x605   : > { %v8273_v8 = vmax.f32 %v8145_v35, 0.0  ;;  %v8149_v49 = vadd.f32 %v7803_v33, %v7453_v7  ;;  %8107 = vmatprep.mubr.bf16.mxu1 %v14211_v16  ;;  %v7390_v7 = vld [vmem:[%s11609_s15 + $0xb0] sm:$0xff] }
 0x606   : > { %v8276_v57 = vmax.f32 %v8148_v32, 0.0 }
 0x607   : > { %v9551_v43 = vpack.c.bf16 %v8273_v8, %v8272_v9  ;;  %v8277_v30 = vmax.f32 %v8149_v49, 0.0  ;;  %v7806_v50 = vpop.f32.mrb[156].mxu1  ;;  %v7476_v8 = vunpack.c.l.bf16 %v7390_v7 }
 0x608   : > { %v7807_v21 = vadd.f32 %v7806_v50, %v13638_v34  ;;  %v7808_v26 = vpop.f32.mrb[157].mxu1 }
 0x609   : > { %8776 = vst [vmem:[%s13656_s17 + $0x40] sm:$0xff] %v9551_v43  ;;  %v9553_v3 = vpack.c.bf16 %v8277_v30, %v8276_v57  ;;  %v7809_v15 = vadd.f32 %v7808_v26, %v13641_v27  ;;  %v7810_v36 = vpop.f32.mrb[158].mxu1  ;;  %v7477_v57 = vunpack.c.h.bf16 %v7390_v7 }
 0x60a   : > { %v8152_v44 = vadd.f32 %v7807_v21, %v7456_v17  ;;  %v7811_v54 = vadd.f32 %v7810_v36, %v13638_v34  ;;  %v7812_v24 = vpop.f32.mrb[159].mxu1  ;;  %v7392_v21 = vld [vmem:[%s11609_s15 + $0xc0] sm:$0xff]  ;;  %v7394_v36 = vld [vmem:[%s11609_s15 + $0xd0] sm:$0xff] }
 0x60b   : > { %8778 = vst [vmem:[%s13656_s17 + $0x50] sm:$0xff] %v9553_v3  ;;  %v8153_v41 = vadd.f32 %v7809_v15, %v7457_v56  ;;  %v7813_v52 = vadd.f32 %v7812_v24, %v13641_v27 }
 0x60c   : > { %v8280_v11 = vmax.f32 %v8152_v44, 0.0  ;;  %v8156_v0 = vadd.f32 %v7811_v54, %v7460_v14  ;;  %8108 = vmatmul.mubr.bf16.gmra.mrb[8].mxu1 %v13587_v22  ;;  %v7480_v44 = vunpack.c.l.bf16 %v7392_v21 }
 0x60d   : > { %v8281_v1 = vmax.f32 %v8153_v41, 0.0  ;;  %v8157_v4 = vadd.f32 %v7813_v52, %v7461_v2  ;;  %8117 = vmatprep.mubr.bf16.mxu1 %v14211_v16  ;;  %v7481_v52 = vunpack.c.h.bf16 %v7392_v21 }
 0x60e   : > { %v8284_v28 = vmax.f32 %v8156_v0, 0.0  ;;  %v7484_v0 = vunpack.c.l.bf16 %v7394_v36 }
 0x60f   : > { %v9555_v18 = vpack.c.bf16 %v8281_v1, %v8280_v11  ;;  %v8285_v40 = vmax.f32 %v8157_v4, 0.0  ;;  %v7816_v29 = vpop.f32.mrb[160].mxu1 }
 0x610   : > { %v7817_v38 = vadd.f32 %v7816_v29, %v13638_v34  ;;  %v7818_v6 = vpop.f32.mrb[161].mxu1 }
 0x611   : > { %8780 = vst [vmem:[%s13656_s17 + $0x60] sm:$0xff] %v9555_v18  ;;  %v9557_v59 = vpack.c.bf16 %v8285_v40, %v8284_v28  ;;  %v7819_v22 = vadd.f32 %v7818_v6, %v13641_v27  ;;  %v7820_v63 = vpop.f32.mrb[162].mxu1  ;;  %v7485_v28 = vunpack.c.h.bf16 %v7394_v36 }
 0x612   : > { %v8160_v16 = vadd.f32 %v7817_v38, %v7464_v12  ;;  %v7821_v61 = vadd.f32 %v7820_v63, %v13638_v34  ;;  %v7822_v37 = vpop.f32.mrb[163].mxu1  ;;  %v7396_v38 = vld [vmem:[%s11609_s15 + $0xe0] sm:$0xff]  ;;  %v7398_v63 = vld [vmem:[%s11609_s15 + $0xf0] sm:$0xff] }
 0x613   : > { %8782 = vst [vmem:[%s13656_s17 + $0x70] sm:$0xff] %v9557_v59  ;;  %v8161_v5 = vadd.f32 %v7819_v22, %v7465_v48  ;;  %v7823_v60 = vadd.f32 %v7822_v37, %v13641_v27 }
 0x614   : > { %v8288_v39 = vmax.f32 %v8160_v16, 0.0  ;;  %v8164_v13 = vadd.f32 %v7821_v61, %v7468_v62  ;;  %8118 = vmatmul.mubr.bf16.gmra.mrb[12].mxu1 %v13584_v19  ;;  %v7488_v16 = vunpack.c.l.bf16 %v7396_v38 }
 0x615   : > { %v8289_v58 = vmax.f32 %v8161_v5, 0.0  ;;  %v8165_v20 = vadd.f32 %v7823_v60, %v7469_v46  ;;  %v7489_v60 = vunpack.c.h.bf16 %v7396_v38 }
 0x616   : > { %v8292_v45 = vmax.f32 %v8164_v13, 0.0  ;;  %v7492_v13 = vunpack.c.l.bf16 %v7398_v63 }
 0x617   : > { %v9559_v31 = vpack.c.bf16 %v8289_v58, %v8288_v39  ;;  %v8293_v35 = vmax.f32 %v8165_v20, 0.0  ;;  %v7826_v33 = vpop.f32.mrb[164].mxu1 }
 0x618   : > { %v7827_v9 = vadd.f32 %v7826_v33, %v13638_v34  ;;  %v7828_v32 = vpop.f32.mrb[165].mxu1 }
 0x619   : > { %8784 = vst [vmem:[%s13656_s17 + $0x80] sm:$0xff] %v9559_v31  ;;  %v9561_v49 = vpack.c.bf16 %v8293_v35, %v8292_v45  ;;  %v7829_v19 = vadd.f32 %v7828_v32, %v13641_v27  ;;  %v7830_v25 = vpop.f32.mrb[166].mxu1  ;;  %v7493_v45 = vunpack.c.h.bf16 %v7398_v63 }
 0x61a   : > { %v8168_v17 = vadd.f32 %v7827_v9, %v7472_v10  ;;  %v7831_v43 = vadd.f32 %v7830_v25, %v13638_v34  ;;  %v7832_v30 = vpop.f32.mrb[167].mxu1  ;;  %v7400_v9 = vld [vmem:[%s11609_s15 + $0x100] sm:$0xff]  ;;  %v7402_v25 = vld [vmem:[%s11609_s15 + $0x110] sm:$0xff] }
 0x61b   : > { %8786 = vst [vmem:[%s13656_s17 + $0x90] sm:$0xff] %v9561_v49  ;;  %v8169_v50 = vadd.f32 %v7829_v19, %v7473_v42  ;;  %v7833_v56 = vadd.f32 %v7832_v30, %v13641_v27 }
 0x61c   : > { %v8296_v26 = vmax.f32 %v8168_v17, 0.0  ;;  %v8172_v14 = vadd.f32 %v7831_v43, %v7476_v8  ;;  %v7496_v17 = vunpack.c.l.bf16 %v7400_v9 }
 0x61d   : > { %v8297_v3 = vmax.f32 %v8169_v50, 0.0  ;;  %v8173_v15 = vadd.f32 %v7833_v56, %v7477_v57  ;;  %v7497_v56 = vunpack.c.h.bf16 %v7400_v9 }
 0x61e   : > { %v8300_v2 = vmax.f32 %v8172_v14, 0.0  ;;  %v7500_v14 = vunpack.c.l.bf16 %v7402_v25 }
 0x61f   : > { %v9563_v54 = vpack.c.bf16 %v8297_v3, %v8296_v26  ;;  %v8301_v24 = vmax.f32 %v8173_v15, 0.0  ;;  %v7836_v41 = vpop.f32.mrb[168].mxu1 }
 0x620   : > { %v7837_v53 = vadd.f32 %v7836_v41, %v13638_v34  ;;  %v7838_v11 = vpop.f32.mrb[169].mxu1 }
 0x621   : > { %8788 = vst [vmem:[%s13656_s17 + $0xa0] sm:$0xff] %v9563_v54  ;;  %v9565_v1 = vpack.c.bf16 %v8301_v24, %v8300_v2  ;;  %v7839_v4 = vadd.f32 %v7838_v11, %v13641_v27  ;;  %v7840_v23 = vpop.f32.mrb[170].mxu1  ;;  %v7501_v2 = vunpack.c.h.bf16 %v7402_v25 }
 0x622   : > { %v8176_v12 = vadd.f32 %v7837_v53, %v7480_v44  ;;  %v7841_v18 = vadd.f32 %v7840_v23, %v13638_v34  ;;  %v7842_v40 = vpop.f32.mrb[171].mxu1  ;;  %v7404_v53 = vld [vmem:[%s11609_s15 + $0x120] sm:$0xff]  ;;  %v7406_v23 = vld [vmem:[%s11609_s15 + $0x130] sm:$0xff] }
 0x623   : > { %8790 = vst [vmem:[%s13656_s17 + $0xb0] sm:$0xff] %v9565_v1  ;;  %v8177_v29 = vadd.f32 %v7839_v4, %v7481_v52  ;;  %v7843_v48 = vadd.f32 %v7842_v40, %v13641_v27 }
 0x624   : > { %v8304_v6 = vmax.f32 %v8176_v12, 0.0  ;;  %v8180_v62 = vadd.f32 %v7841_v18, %v7484_v0  ;;  %v7504_v12 = vunpack.c.l.bf16 %v7404_v53 }
 0x625   : > { %v8305_v59 = vmax.f32 %v8177_v29, 0.0  ;;  %v8181_v22 = vadd.f32 %v7843_v48, %v7485_v28  ;;  %v7505_v48 = vunpack.c.h.bf16 %v7404_v53 }
 0x626   : > { %v8308_v46 = vmax.f32 %v8180_v62, 0.0  ;;  %v7508_v62 = vunpack.c.l.bf16 %v7406_v23 }
 0x627   : > { %v9567_v61 = vpack.c.bf16 %v8305_v59, %v8304_v6  ;;  %v8309_v37 = vmax.f32 %v8181_v22, 0.0  ;;  %v7846_v5 = vpop.f32.mrb[172].mxu1 }
 0x628   : > { %v7847_v47 = vadd.f32 %v7846_v5, %v13638_v34  ;;  %v7848_v39 = vpop.f32.mrb[173].mxu1 }
 0x629   : > { %8792 = vst [vmem:[%s13656_s17 + $0xc0] sm:$0xff] %v9567_v61  ;;  %v9569_v58 = vpack.c.bf16 %v8309_v37, %v8308_v46  ;;  %v7849_v20 = vadd.f32 %v7848_v39, %v13641_v27  ;;  %v7850_v7 = vpop.f32.mrb[174].mxu1  ;;  %v7509_v46 = vunpack.c.h.bf16 %v7406_v23 }
 0x62a   : > { %v8184_v10 = vadd.f32 %v7847_v47, %v7488_v16  ;;  %v7851_v31 = vadd.f32 %v7850_v7, %v13638_v34  ;;  %v7852_v35 = vpop.f32.mrb[175].mxu1  ;;  %v7408_v47 = vld [vmem:[%s11609_s15 + $0x140] sm:$0xff]  ;;  %v7410_v7 = vld [vmem:[%s11609_s15 + $0x150] sm:$0xff] }
 0x62b   : > { %8794 = vst [vmem:[%s13656_s17 + $0xd0] sm:$0xff] %v9569_v58  ;;  %v8185_v33 = vadd.f32 %v7849_v20, %v7489_v60  ;;  %v7853_v42 = vadd.f32 %v7852_v35, %v13641_v27 }
 0x62c   : > { %v8312_v32 = vmax.f32 %v8184_v10, 0.0  ;;  %v8188_v8 = vadd.f32 %v7851_v31, %v7492_v13  ;;  %v7512_v10 = vunpack.c.l.bf16 %v7408_v47 }
 0x62d   : > { %v8313_v49 = vmax.f32 %v8185_v33, 0.0  ;;  %v8189_v19 = vadd.f32 %v7853_v42, %v7493_v45  ;;  %v7513_v42 = vunpack.c.h.bf16 %v7408_v47 }
 0x62e   : > { %v8316_v57 = vmax.f32 %v8188_v8, 0.0  ;;  %v7516_v8 = vunpack.c.l.bf16 %v7410_v7 }
 0x62f   : > { %v9571_v43 = vpack.c.bf16 %v8313_v49, %v8312_v32  ;;  %v8317_v30 = vmax.f32 %v8189_v19, 0.0  ;;  %v7856_v50 = vpop.f32.mrb[176].mxu1 }
 0x630   : > { %v7857_v21 = vadd.f32 %v7856_v50, %v13638_v34  ;;  %v7858_v26 = vpop.f32.mrb[177].mxu1 }
 0x631   : > { %8796 = vst [vmem:[%s13656_s17 + $0xe0] sm:$0xff] %v9571_v43  ;;  %v9573_v3 = vpack.c.bf16 %v8317_v30, %v8316_v57  ;;  %v7859_v15 = vadd.f32 %v7858_v26, %v13641_v27  ;;  %v7860_v36 = vpop.f32.mrb[178].mxu1  ;;  %v7517_v57 = vunpack.c.h.bf16 %v7410_v7 }
 0x632   : > { %v8192_v44 = vadd.f32 %v7857_v21, %v7496_v17  ;;  %v7861_v54 = vadd.f32 %v7860_v36, %v13638_v34  ;;  %v7862_v24 = vpop.f32.mrb[179].mxu1  ;;  %v7412_v21 = vld [vmem:[%s11609_s15 + $0x160] sm:$0xff]  ;;  %v7414_v36 = vld [vmem:[%s11609_s15 + $0x170] sm:$0xff] }
 0x633   : > { %8798 = vst [vmem:[%s13656_s17 + $0xf0] sm:$0xff] %v9573_v3  ;;  %v8193_v41 = vadd.f32 %v7859_v15, %v7497_v56  ;;  %v7863_v52 = vadd.f32 %v7862_v24, %v13641_v27 }
 0x634   : > { %v8320_v11 = vmax.f32 %v8192_v44, 0.0  ;;  %v8196_v0 = vadd.f32 %v7861_v54, %v7500_v14  ;;  %v7520_v44 = vunpack.c.l.bf16 %v7412_v21 }
 0x635   : > { %v8321_v1 = vmax.f32 %v8193_v41, 0.0  ;;  %v8197_v4 = vadd.f32 %v7863_v52, %v7501_v2  ;;  %v7521_v52 = vunpack.c.h.bf16 %v7412_v21 }
 0x636   : > { %v8324_v28 = vmax.f32 %v8196_v0, 0.0  ;;  %v7524_v0 = vunpack.c.l.bf16 %v7414_v36 }
 0x637   : > { %v9575_v18 = vpack.c.bf16 %v8321_v1, %v8320_v11  ;;  %v8325_v40 = vmax.f32 %v8197_v4, 0.0  ;;  %v7866_v29 = vpop.f32.mrb[180].mxu1 }
 0x638   : > { %v7867_v38 = vadd.f32 %v7866_v29, %v13638_v34  ;;  %v7868_v6 = vpop.f32.mrb[181].mxu1 }
 0x639   : > { %8800 = vst [vmem:[%s13656_s17 + $0x100] sm:$0xff] %v9575_v18  ;;  %v9577_v59 = vpack.c.bf16 %v8325_v40, %v8324_v28  ;;  %v7869_v22 = vadd.f32 %v7868_v6, %v13641_v27  ;;  %v7870_v63 = vpop.f32.mrb[182].mxu1  ;;  %v7525_v28 = vunpack.c.h.bf16 %v7414_v36 }
 0x63a   : > { %v8200_v16 = vadd.f32 %v7867_v38, %v7504_v12  ;;  %v7871_v61 = vadd.f32 %v7870_v63, %v13638_v34  ;;  %v7872_v37 = vpop.f32.mrb[183].mxu1  ;;  %v7416_v38 = vld [vmem:[%s11609_s15 + $0x180] sm:$0xff]  ;;  %v7418_v63 = vld [vmem:[%s11609_s15 + $0x190] sm:$0xff] }
 0x63b   : > { %8802 = vst [vmem:[%s13656_s17 + $0x110] sm:$0xff] %v9577_v59  ;;  %v8201_v5 = vadd.f32 %v7869_v22, %v7505_v48  ;;  %v7873_v60 = vadd.f32 %v7872_v37, %v13641_v27 }
 0x63c   : > { %v8328_v39 = vmax.f32 %v8200_v16, 0.0  ;;  %v8204_v13 = vadd.f32 %v7871_v61, %v7508_v62  ;;  %v7528_v16 = vunpack.c.l.bf16 %v7416_v38 }
 0x63d   : > { %v8329_v58 = vmax.f32 %v8201_v5, 0.0  ;;  %v8205_v20 = vadd.f32 %v7873_v60, %v7509_v46  ;;  %v7529_v60 = vunpack.c.h.bf16 %v7416_v38 }
 0x63e   : > { %v8332_v45 = vmax.f32 %v8204_v13, 0.0  ;;  %v7532_v13 = vunpack.c.l.bf16 %v7418_v63 }
 0x63f   : > { %v9579_v31 = vpack.c.bf16 %v8329_v58, %v8328_v39  ;;  %v8333_v35 = vmax.f32 %v8205_v20, 0.0  ;;  %v7876_v33 = vpop.f32.mrb[184].mxu1 }
 0x640   : > { %v7877_v9 = vadd.f32 %v7876_v33, %v13638_v34  ;;  %v7878_v32 = vpop.f32.mrb[185].mxu1 }
 0x641   : > { %8804 = vst [vmem:[%s13656_s17 + $0x120] sm:$0xff] %v9579_v31  ;;  %v9581_v49 = vpack.c.bf16 %v8333_v35, %v8332_v45  ;;  %v7879_v19 = vadd.f32 %v7878_v32, %v13641_v27  ;;  %v7880_v25 = vpop.f32.mrb[186].mxu1  ;;  %v7533_v45 = vunpack.c.h.bf16 %v7418_v63 }
 0x642   : > { %v8208_v17 = vadd.f32 %v7877_v9, %v7512_v10  ;;  %v7881_v43 = vadd.f32 %v7880_v25, %v13638_v34  ;;  %v7882_v30 = vpop.f32.mrb[187].mxu1  ;;  %v7420_v9 = vld [vmem:[%s11609_s15 + $0x1a0] sm:$0xff]  ;;  %v7422_v25 = vld [vmem:[%s11609_s15 + $0x1b0] sm:$0xff] }
 0x643   : > { %8806 = vst [vmem:[%s13656_s17 + $0x130] sm:$0xff] %v9581_v49  ;;  %v8209_v50 = vadd.f32 %v7879_v19, %v7513_v42  ;;  %v7883_v56 = vadd.f32 %v7882_v30, %v13641_v27 }
 0x644   : > { %v8336_v26 = vmax.f32 %v8208_v17, 0.0  ;;  %v8212_v14 = vadd.f32 %v7881_v43, %v7516_v8  ;;  %v7536_v17 = vunpack.c.l.bf16 %v7420_v9 }
 0x645   : > { %v8337_v3 = vmax.f32 %v8209_v50, 0.0  ;;  %v8213_v15 = vadd.f32 %v7883_v56, %v7517_v57  ;;  %v7537_v56 = vunpack.c.h.bf16 %v7420_v9 }
 0x646   : > { %v8340_v2 = vmax.f32 %v8212_v14, 0.0  ;;  %v7540_v14 = vunpack.c.l.bf16 %v7422_v25 }
 0x647   : > { %v9583_v54 = vpack.c.bf16 %v8337_v3, %v8336_v26  ;;  %v8341_v24 = vmax.f32 %v8213_v15, 0.0  ;;  %v7886_v41 = vpop.f32.mrb[188].mxu1 }
 0x648   : > { %v7887_v53 = vadd.f32 %v7886_v41, %v13638_v34  ;;  %v7888_v11 = vpop.f32.mrb[189].mxu1 }
 0x649   : > { %8808 = vst [vmem:[%s13656_s17 + $0x140] sm:$0xff] %v9583_v54  ;;  %v9585_v1 = vpack.c.bf16 %v8341_v24, %v8340_v2  ;;  %v7889_v4 = vadd.f32 %v7888_v11, %v13641_v27  ;;  %v7890_v23 = vpop.f32.mrb[190].mxu1  ;;  %v7541_v2 = vunpack.c.h.bf16 %v7422_v25 }
 0x64a   : > { %v8216_v12 = vadd.f32 %v7887_v53, %v7520_v44  ;;  %v7891_v18 = vadd.f32 %v7890_v23, %v13638_v34  ;;  %v7892_v40 = vpop.f32.mrb[191].mxu1  ;;  %v7424_v53 = vld [vmem:[%s11609_s15 + $0x1c0] sm:$0xff]  ;;  %v7426_v23 = vld [vmem:[%s11609_s15 + $0x1d0] sm:$0xff] }
 0x64b   : > { %8810 = vst [vmem:[%s13656_s17 + $0x150] sm:$0xff] %v9585_v1  ;;  %v8217_v29 = vadd.f32 %v7889_v4, %v7521_v52  ;;  %v7893_v48 = vadd.f32 %v7892_v40, %v13641_v27 }
 0x64c   : > { %v8344_v6 = vmax.f32 %v8216_v12, 0.0  ;;  %v8220_v62 = vadd.f32 %v7891_v18, %v7524_v0  ;;  %v7544_v12 = vunpack.c.l.bf16 %v7424_v53 }
 0x64d   : > { %v8345_v59 = vmax.f32 %v8217_v29, 0.0  ;;  %v8221_v22 = vadd.f32 %v7893_v48, %v7525_v28  ;;  %v7545_v48 = vunpack.c.h.bf16 %v7424_v53 }
 0x64e   : > { %v8348_v46 = vmax.f32 %v8220_v62, 0.0  ;;  %v7548_v62 = vunpack.c.l.bf16 %v7426_v23 }
 0x64f   : > { %v9587_v61 = vpack.c.bf16 %v8345_v59, %v8344_v6  ;;  %v8349_v37 = vmax.f32 %v8221_v22, 0.0  ;;  %v7896_v5 = vpop.f32.mrb[192].mxu1 }
 0x650   : > { %v7897_v47 = vadd.f32 %v7896_v5, %v13638_v34  ;;  %v7898_v39 = vpop.f32.mrb[193].mxu1 }
 0x651   : > { %8812 = vst [vmem:[%s13656_s17 + $0x160] sm:$0xff] %v9587_v61  ;;  %v9589_v58 = vpack.c.bf16 %v8349_v37, %v8348_v46  ;;  %v7899_v20 = vadd.f32 %v7898_v39, %v13641_v27  ;;  %v7900_v7 = vpop.f32.mrb[194].mxu1  ;;  %v7549_v46 = vunpack.c.h.bf16 %v7426_v23 }
 0x652   : > { %v8224_v10 = vadd.f32 %v7897_v47, %v7528_v16  ;;  %v7901_v31 = vadd.f32 %v7900_v7, %v13638_v34  ;;  %v7902_v35 = vpop.f32.mrb[195].mxu1  ;;  %v7428_v47 = vld [vmem:[%s11609_s15 + $0x1e0] sm:$0xff]  ;;  %v7430_v7 = vld [vmem:[%s11609_s15 + $0x1f0] sm:$0xff] }
 0x653   : > { %8814 = vst [vmem:[%s13656_s17 + $0x170] sm:$0xff] %v9589_v58  ;;  %v8225_v33 = vadd.f32 %v7899_v20, %v7529_v60  ;;  %v7903_v42 = vadd.f32 %v7902_v35, %v13641_v27 }
 0x654   : > { %v8352_v32 = vmax.f32 %v8224_v10, 0.0  ;;  %v8228_v8 = vadd.f32 %v7901_v31, %v7532_v13  ;;  %v7552_v10 = vunpack.c.l.bf16 %v7428_v47 }
 0x655   : > { %v8353_v49 = vmax.f32 %v8225_v33, 0.0  ;;  %v8229_v19 = vadd.f32 %v7903_v42, %v7533_v45  ;;  %v7553_v42 = vunpack.c.h.bf16 %v7428_v47 }
 0x656   : > { %v8356_v57 = vmax.f32 %v8228_v8, 0.0  ;;  %v7556_v8 = vunpack.c.l.bf16 %v7430_v7 }
 0x657   : > { %v9591_v43 = vpack.c.bf16 %v8353_v49, %v8352_v32  ;;  %v8357_v30 = vmax.f32 %v8229_v19, 0.0  ;;  %v7906_v50 = vpop.f32.mrb[196].mxu1  ;;  %v7572_v49 = vsub.s32 2, %v13625_v51 }
 0x658   : > { %v7907_v21 = vadd.f32 %v7906_v50, %v13638_v34  ;;  %v7908_v26 = vpop.f32.mrb[197].mxu1 }
 0x659   : > { %8816 = vst [vmem:[%s13656_s17 + $0x180] sm:$0xff] %v9591_v43  ;;  %v9593_v3 = vpack.c.bf16 %v8357_v30, %v8356_v57  ;;  %v7909_v15 = vadd.f32 %v7908_v26, %v13641_v27  ;;  %v7910_v36 = vpop.f32.mrb[198].mxu1  ;;  %v7576_v43 = vsub.s32 3, %v13625_v51  ;;  %v7371_v51 = vld [vmem:[%s11609_s15 + $0x18] sm:$0xff] }
 0x65a   : > { %v8232_v44 = vadd.f32 %v7907_v21, %v7536_v17  ;;  %v7911_v54 = vadd.f32 %v7910_v36, %v13638_v34  ;;  %v7912_v24 = vpop.f32.mrb[199].mxu1  ;;  %v7557_v17 = vunpack.c.h.bf16 %v7430_v7  ;;  %v13786_v36 = vrot.slane %v13632_v55, %v7572_v49 }
 0x65b   : > { %8818 = vst [vmem:[%s13656_s17 + $0x190] sm:$0xff] %v9593_v3  ;;  %v8233_v41 = vadd.f32 %v7909_v15, %v7537_v56  ;;  %v7913_v52 = vadd.f32 %v7912_v24, %v13641_v27 }
 0x65c   : > { %v8360_v11 = vmax.f32 %v8232_v44, 0.0  ;;  %v8236_v0 = vadd.f32 %v7911_v54, %v7540_v14  ;;  %v7369_v14 = vld [vmem:[%s11609_s15 + $0x8] sm:$0xff]  ;;  %v13789_v54 = vrot.slane %v13632_v55, %v7576_v43 }
 0x65d   : > { %v8361_v1 = vmax.f32 %v8233_v41, 0.0  ;;  %v8237_v4 = vadd.f32 %v7913_v52, %v7541_v2 }
 0x65e   : > { %v8364_v28 = vmax.f32 %v8236_v0, 0.0 }
 0x65f   : > { %v9595_v18 = vpack.c.bf16 %v8361_v1, %v8360_v11  ;;  %v8365_v40 = vmax.f32 %v8237_v4, 0.0  ;;  %v7916_v29 = vpop.f32.mrb[200].mxu1  ;;  %v7438_v1 = vunpack.c.l.bf16 %v7371_v51 }
 0x660   : > { %v7917_v38 = vadd.f32 %v7916_v29, %v13638_v34  ;;  %v7918_v6 = vpop.f32.mrb[201].mxu1 }
 0x661   : > { %8820 = vst [vmem:[%s13656_s17 + $0x1a0] sm:$0xff] %v9595_v18  ;;  %v9597_v59 = vpack.c.bf16 %v8365_v40, %v8364_v28  ;;  %v7919_v22 = vadd.f32 %v7918_v6, %v13641_v27  ;;  %v7920_v63 = vpop.f32.mrb[202].mxu1  ;;  %v7439_v28 = vunpack.c.h.bf16 %v7371_v51 }
 0x662   : > { %v8240_v16 = vadd.f32 %v7917_v38, %v7544_v12  ;;  %v7921_v61 = vadd.f32 %v7920_v63, %v13638_v34  ;;  %v7922_v37 = vpop.f32.mrb[203].mxu1  ;;  %v7373_v38 = vld [vmem:[%s11609_s15 + $0x28] sm:$0xff]  ;;  %v7375_v63 = vld [vmem:[%s11609_s15 + $0x38] sm:$0xff] }
 0x663   : > { %8822 = vst [vmem:[%s13656_s17 + $0x1b0] sm:$0xff] %v9597_v59  ;;  %v8241_v5 = vadd.f32 %v7919_v22, %v7545_v48  ;;  %v7923_v60 = vadd.f32 %v7922_v37, %v13641_v27 }
 0x664   : > { %v8368_v39 = vmax.f32 %v8240_v16, 0.0  ;;  %v8244_v13 = vadd.f32 %v7921_v61, %v7548_v62  ;;  %v7442_v16 = vunpack.c.l.bf16 %v7373_v38 }
 0x665   : > { %v8369_v58 = vmax.f32 %v8241_v5, 0.0  ;;  %v8245_v20 = vadd.f32 %v7923_v60, %v7549_v46  ;;  %v7443_v60 = vunpack.c.h.bf16 %v7373_v38 }
 0x666   : > { %v8372_v45 = vmax.f32 %v8244_v13, 0.0  ;;  %v7446_v13 = vunpack.c.l.bf16 %v7375_v63 }
 0x667   : > { %v9599_v31 = vpack.c.bf16 %v8369_v58, %v8368_v39  ;;  %v8373_v35 = vmax.f32 %v8245_v20, 0.0  ;;  %v7926_v33 = vpop.f32.mrb[204].mxu1 }
 0x668   : > { %v7927_v9 = vadd.f32 %v7926_v33, %v13638_v34  ;;  %v7928_v32 = vpop.f32.mrb[205].mxu1 }
 0x669   : > { %8824 = vst [vmem:[%s13656_s17 + $0x1c0] sm:$0xff] %v9599_v31  ;;  %v9601_v19 = vpack.c.bf16 %v8373_v35, %v8372_v45  ;;  %v7929_v25 = vadd.f32 %v7928_v32, %v13641_v27  ;;  %v7930_v57 = vpop.f32.mrb[206].mxu1  ;;  %v7447_v45 = vunpack.c.h.bf16 %v7375_v63 }
 0x66a   : > { %v8248_v30 = vadd.f32 %v7927_v9, %v7552_v10  ;;  %v7931_v50 = vadd.f32 %v7930_v57, %v13638_v34  ;;  %v7932_v56 = vpop.f32.mrb[207].mxu1  ;;  %v7434_v34 = vunpack.c.l.bf16 %v7369_v14  ;;  %v7377_v9 = vld [vmem:[%s11609_s15 + $0x48] sm:$0xff] }
 0x66b   : > { %8826 = vst [vmem:[%s13656_s17 + $0x1d0] sm:$0xff] %v9601_v19  ;;  %v8249_v21 = vadd.f32 %v7929_v25, %v7553_v42  ;;  %v7933_v26 = vadd.f32 %v7932_v56, %v13641_v27  ;;  %v7435_v27 = vunpack.c.h.bf16 %v7369_v14  ;;  %v7379_v25 = vld [vmem:[%s11609_s15 + $0x58] sm:$0xff]  ;;  %v7451_v56 = vunpack.c.h.bf16 %v7377_v9 }
 0x66c   : > { %v8376_v3 = vmax.f32 %v8248_v30, 0.0  ;;  %v8252_v15 = vadd.f32 %v7931_v50, %v7556_v8  ;;  %v7454_v14 = vunpack.c.l.bf16 %v7379_v25 }
 0x66d   : > { %v8377_v2 = vmax.f32 %v8249_v21, 0.0  ;;  %v8253_v44 = vadd.f32 %v7933_v26, %v7557_v17  ;;  %v7450_v17 = vunpack.c.l.bf16 %v7377_v9 }
 0x66e   : > { %v8380_v24 = vmax.f32 %v8252_v15, 0.0 }
 0x66f   : > { %v9603_v41 = vpack.c.bf16 %v8377_v2, %v8376_v3  ;;  %v8381_v52 = vmax.f32 %v8253_v44, 0.0  ;;  %v7969_v53 = vpop.f32.mrb[208].mxu1  ;;  %v7455_v44 = vunpack.c.h.bf16 %v7379_v25 }
 0x670   : > { %v7970_v11 = vadd.f32 %v7969_v53, %v13786_v36  ;;  %v7971_v0 = vpop.f32.mrb[209].mxu1  ;;  %v7381_v53 = vld [vmem:[%s11609_s15 + $0x68] sm:$0xff] }
 0x671   : > { %8828 = vst [vmem:[%s13656_s17 + $0x1e0] sm:$0xff] %v9603_v41  ;;  %v9605_v4 = vpack.c.bf16 %v8381_v52, %v8380_v24  ;;  %v7972_v23 = vadd.f32 %v7971_v0, %v13789_v54  ;;  %v7973_v55 = vpop.f32.mrb[210].mxu1 }
 0x672   : > { %v8130_v12 = vadd.f32 %v7970_v11, %v7434_v34  ;;  %v7974_v18 = vadd.f32 %v7973_v55, %v13786_v36  ;;  %v7975_v40 = vpop.f32.mrb[211].mxu1  ;;  %v7458_v55 = vunpack.c.l.bf16 %v7381_v53 }
 0x673   : > { %8830 = vst [vmem:[%s13656_s17 + $0x1f0] sm:$0xff] %v9605_v4  ;;  %v8131_v29 = vadd.f32 %v7972_v23, %v7435_v27  ;;  %v7976_v48 = vadd.f32 %v7975_v40, %v13789_v54  ;;  %v7383_v4 = vld [vmem:[%s11609_s15 + $0x78] sm:$0xff]  ;;  %v7459_v40 = vunpack.c.h.bf16 %v7381_v53 }
 0x674   : > { %v8258_v6 = vmax.f32 %v8130_v12, 0.0  ;;  %v8134_v62 = vadd.f32 %v7974_v18, %v7438_v1  ;;  %v7462_v38 = vunpack.c.l.bf16 %v7383_v4 }
 0x675   : > { %v8259_v59 = vmax.f32 %v8131_v29, 0.0  ;;  %v8135_v22 = vadd.f32 %v7976_v48, %v7439_v28 }
 0x676   : > { %v8262_v46 = vmax.f32 %v8134_v62, 0.0 }
 0x677   : > { %v9544_v61 = vpack.c.bf16 %v8259_v59, %v8258_v6  ;;  %v8263_v37 = vmax.f32 %v8135_v22, 0.0  ;;  %v7979_v5 = vpop.f32.mrb[212].mxu1  ;;  %v7463_v22 = vunpack.c.h.bf16 %v7383_v4 }
 0x678   : > { %v7980_v47 = vadd.f32 %v7979_v5, %v13786_v36  ;;  %v7981_v39 = vpop.f32.mrb[213].mxu1  ;;  %v7385_v5 = vld [vmem:[%s11609_s15 + $0x88] sm:$0xff] }
 0x679   : > { %8769 = vst [vmem:[%s13656_s17 + $0x8] sm:$0xff] %v9544_v61  ;;  %v9546_v58 = vpack.c.bf16 %v8263_v37, %v8262_v46  ;;  %v7982_v20 = vadd.f32 %v7981_v39, %v13789_v54  ;;  %v7983_v7 = vpop.f32.mrb[214].mxu1 }
 0x67a   : > { %v8138_v10 = vadd.f32 %v7980_v47, %v7442_v16  ;;  %v7984_v31 = vadd.f32 %v7983_v7, %v13786_v36  ;;  %v7985_v35 = vpop.f32.mrb[215].mxu1  ;;  %v7466_v7 = vunpack.c.l.bf16 %v7385_v5 }
 0x67b   : > { %8771 = vst [vmem:[%s13656_s17 + $0x18] sm:$0xff] %v9546_v58  ;;  %v8139_v33 = vadd.f32 %v7982_v20, %v7443_v60  ;;  %v7986_v42 = vadd.f32 %v7985_v35, %v13789_v54  ;;  %v7387_v58 = vld [vmem:[%s11609_s15 + $0x98] sm:$0xff]  ;;  %v7467_v35 = vunpack.c.h.bf16 %v7385_v5 }
 0x67c   : > { %v8266_v32 = vmax.f32 %v8138_v10, 0.0  ;;  %v8142_v8 = vadd.f32 %v7984_v31, %v7446_v13  ;;  %v7470_v9 = vunpack.c.l.bf16 %v7387_v58 }
 0x67d   : > { %v8267_v49 = vmax.f32 %v8139_v33, 0.0  ;;  %v8143_v19 = vadd.f32 %v7986_v42, %v7447_v45 }
 0x67e   : > { %v8270_v57 = vmax.f32 %v8142_v8, 0.0 }
 0x67f   : > { %v9548_v43 = vpack.c.bf16 %v8267_v49, %v8266_v32  ;;  %v8271_v30 = vmax.f32 %v8143_v19, 0.0  ;;  %v7989_v50 = vpop.f32.mrb[216].mxu1  ;;  %v7471_v19 = vunpack.c.h.bf16 %v7387_v58 }
 0x680   : > { %v7990_v21 = vadd.f32 %v7989_v50, %v13786_v36  ;;  %v7991_v26 = vpop.f32.mrb[217].mxu1  ;;  %v7389_v50 = vld [vmem:[%s11609_s15 + $0xa8] sm:$0xff] }
 0x681   : > { %8773 = vst [vmem:[%s13656_s17 + $0x28] sm:$0xff] %v9548_v43  ;;  %v9550_v3 = vpack.c.bf16 %v8271_v30, %v8270_v57  ;;  %v7992_v15 = vadd.f32 %v7991_v26, %v13789_v54  ;;  %v7993_v2 = vpop.f32.mrb[218].mxu1 }
 0x682   : > { %v8146_v51 = vadd.f32 %v7990_v21, %v7450_v17  ;;  %v7994_v24 = vadd.f32 %v7993_v2, %v13786_v36  ;;  %v7995_v34 = vpop.f32.mrb[219].mxu1  ;;  %v7474_v2 = vunpack.c.l.bf16 %v7389_v50 }
 0x683   : > { %8775 = vst [vmem:[%s13656_s17 + $0x38] sm:$0xff] %v9550_v3  ;;  %v8147_v41 = vadd.f32 %v7992_v15, %v7451_v56  ;;  %v7996_v52 = vadd.f32 %v7995_v34, %v13789_v54  ;;  %v7391_v3 = vld [vmem:[%s11609_s15 + $0xb8] sm:$0xff]  ;;  %v7475_v34 = vunpack.c.h.bf16 %v7389_v50 }
 0x684   : > { %v8274_v27 = vmax.f32 %v8146_v51, 0.0  ;;  %v8150_v11 = vadd.f32 %v7994_v24, %v7454_v14  ;;  %v7478_v53 = vunpack.c.l.bf16 %v7391_v3 }
 0x685   : > { %v8275_v0 = vmax.f32 %v8147_v41, 0.0  ;;  %v8151_v1 = vadd.f32 %v7996_v52, %v7455_v44 }
 0x686   : > { %v8278_v23 = vmax.f32 %v8150_v11, 0.0 }
 0x687   : > { %v9552_v28 = vpack.c.bf16 %v8275_v0, %v8274_v27  ;;  %v8279_v12 = vmax.f32 %v8151_v1, 0.0  ;;  %v7999_v18 = vpop.f32.mrb[220].mxu1  ;;  %v7479_v1 = vunpack.c.h.bf16 %v7391_v3 }
 0x688   : > { %v8000_v29 = vadd.f32 %v7999_v18, %v13786_v36  ;;  %v8001_v48 = vpop.f32.mrb[221].mxu1  ;;  %v7393_v18 = vld [vmem:[%s11609_s15 + $0xc8] sm:$0xff] }
 0x689   : > { %8777 = vst [vmem:[%s13656_s17 + $0x48] sm:$0xff] %v9552_v28  ;;  %v9554_v6 = vpack.c.bf16 %v8279_v12, %v8278_v23  ;;  %v8002_v62 = vadd.f32 %v8001_v48, %v13789_v54  ;;  %v8003_v59 = vpop.f32.mrb[222].mxu1 }
 0x68a   : > { %v8154_v63 = vadd.f32 %v8000_v29, %v7458_v55  ;;  %v8004_v46 = vadd.f32 %v8003_v59, %v13786_v36  ;;  %v8005_v16 = vpop.f32.mrb[223].mxu1  ;;  %v7482_v59 = vunpack.c.l.bf16 %v7393_v18 }
 0x68b   : > { %8779 = vst [vmem:[%s13656_s17 + $0x58] sm:$0xff] %v9554_v6  ;;  %v8155_v61 = vadd.f32 %v8002_v62, %v7459_v40  ;;  %v8006_v37 = vadd.f32 %v8005_v16, %v13789_v54  ;;  %v7395_v6 = vld [vmem:[%s11609_s15 + $0xd8] sm:$0xff]  ;;  %v7483_v16 = vunpack.c.h.bf16 %v7393_v18 }
 0x68c   : > { %v8282_v60 = vmax.f32 %v8154_v63, 0.0  ;;  %v8158_v47 = vadd.f32 %v8004_v46, %v7462_v38  ;;  %v7486_v5 = vunpack.c.l.bf16 %v7395_v6 }
 0x68d   : > { %v8283_v39 = vmax.f32 %v8155_v61, 0.0  ;;  %v8159_v13 = vadd.f32 %v8006_v37, %v7463_v22 }
 0x68e   : > { %v8286_v20 = vmax.f32 %v8158_v47, 0.0 }
 0x68f   : > { %v9556_v45 = vpack.c.bf16 %v8283_v39, %v8282_v60  ;;  %v8287_v10 = vmax.f32 %v8159_v13, 0.0  ;;  %v8009_v31 = vpop.f32.mrb[224].mxu1  ;;  %v7487_v13 = vunpack.c.h.bf16 %v7395_v6 }
 0x690   : > { %v8010_v33 = vadd.f32 %v8009_v31, %v13786_v36  ;;  %v8011_v42 = vpop.f32.mrb[225].mxu1  ;;  %v7397_v31 = vld [vmem:[%s11609_s15 + $0xe8] sm:$0xff] }
 0x691   : > { %8781 = vst [vmem:[%s13656_s17 + $0x68] sm:$0xff] %v9556_v45  ;;  %v9558_v32 = vpack.c.bf16 %v8287_v10, %v8286_v20  ;;  %v8012_v8 = vadd.f32 %v8011_v42, %v13789_v54  ;;  %v8013_v49 = vpop.f32.mrb[226].mxu1 }
 0x692   : > { %v8162_v25 = vadd.f32 %v8010_v33, %v7466_v7  ;;  %v8014_v57 = vadd.f32 %v8013_v49, %v13786_v36  ;;  %v8015_v17 = vpop.f32.mrb[227].mxu1  ;;  %v7490_v49 = vunpack.c.l.bf16 %v7397_v31 }
 0x693   : > { %8783 = vst [vmem:[%s13656_s17 + $0x78] sm:$0xff] %v9558_v32  ;;  %v8163_v43 = vadd.f32 %v8012_v8, %v7467_v35  ;;  %v8016_v30 = vadd.f32 %v8015_v17, %v13789_v54  ;;  %v7399_v32 = vld [vmem:[%s11609_s15 + $0xf8] sm:$0xff]  ;;  %v7491_v17 = vunpack.c.h.bf16 %v7397_v31 }
 0x694   : > { %v8290_v56 = vmax.f32 %v8162_v25, 0.0  ;;  %v8166_v21 = vadd.f32 %v8014_v57, %v7470_v9  ;;  %v7494_v50 = vunpack.c.l.bf16 %v7399_v32 }
 0x695   : > { %v8291_v26 = vmax.f32 %v8163_v43, 0.0  ;;  %v8167_v14 = vadd.f32 %v8016_v30, %v7471_v19 }
 0x696   : > { %v8294_v15 = vmax.f32 %v8166_v21, 0.0 }
 0x697   : > { %v9560_v44 = vpack.c.bf16 %v8291_v26, %v8290_v56  ;;  %v8295_v51 = vmax.f32 %v8167_v14, 0.0  ;;  %v8019_v24 = vpop.f32.mrb[228].mxu1  ;;  %v7495_v14 = vunpack.c.h.bf16 %v7399_v32 }
 0x698   : > { %v8020_v41 = vadd.f32 %v8019_v24, %v13786_v36  ;;  %v8021_v52 = vpop.f32.mrb[229].mxu1  ;;  %v7401_v24 = vld [vmem:[%s11609_s15 + $0x108] sm:$0xff] }
 0x699   : > { %8785 = vst [vmem:[%s13656_s17 + $0x88] sm:$0xff] %v9560_v44  ;;  %v9562_v27 = vpack.c.bf16 %v8295_v51, %v8294_v15  ;;  %v8022_v11 = vadd.f32 %v8021_v52, %v13789_v54  ;;  %v8023_v0 = vpop.f32.mrb[230].mxu1 }
 0x69a   : > { %v8170_v4 = vadd.f32 %v8020_v41, %v7474_v2  ;;  %v8024_v23 = vadd.f32 %v8023_v0, %v13786_v36  ;;  %v8025_v55 = vpop.f32.mrb[231].mxu1  ;;  %v7498_v0 = vunpack.c.l.bf16 %v7401_v24 }
 0x69b   : > { %8787 = vst [vmem:[%s13656_s17 + $0x98] sm:$0xff] %v9562_v27  ;;  %v8171_v28 = vadd.f32 %v8022_v11, %v7475_v34  ;;  %v8026_v12 = vadd.f32 %v8025_v55, %v13789_v54  ;;  %v7403_v27 = vld [vmem:[%s11609_s15 + $0x118] sm:$0xff]  ;;  %v7499_v55 = vunpack.c.h.bf16 %v7401_v24 }
 0x69c   : > { %v8298_v40 = vmax.f32 %v8170_v4, 0.0  ;;  %v8174_v29 = vadd.f32 %v8024_v23, %v7478_v53  ;;  %v7502_v18 = vunpack.c.l.bf16 %v7403_v27 }
 0x69d   : > { %v8299_v48 = vmax.f32 %v8171_v28, 0.0  ;;  %v8175_v38 = vadd.f32 %v8026_v12, %v7479_v1 }
 0x69e   : > { %v8302_v62 = vmax.f32 %v8174_v29, 0.0 }
 0x69f   : > { %v9564_v22 = vpack.c.bf16 %v8299_v48, %v8298_v40  ;;  %v8303_v63 = vmax.f32 %v8175_v38, 0.0  ;;  %v8029_v46 = vpop.f32.mrb[232].mxu1  ;;  %v7503_v38 = vunpack.c.h.bf16 %v7403_v27 }
 0x6a0   : > { %v8030_v61 = vadd.f32 %v8029_v46, %v13786_v36  ;;  %v8031_v37 = vpop.f32.mrb[233].mxu1  ;;  %v7405_v46 = vld [vmem:[%s11609_s15 + $0x128] sm:$0xff] }
 0x6a1   : > { %8789 = vst [vmem:[%s13656_s17 + $0xa8] sm:$0xff] %v9564_v22  ;;  %v9566_v60 = vpack.c.bf16 %v8303_v63, %v8302_v62  ;;  %v8032_v47 = vadd.f32 %v8031_v37, %v13789_v54  ;;  %v8033_v39 = vpop.f32.mrb[234].mxu1 }
 0x6a2   : > { %v8178_v58 = vadd.f32 %v8030_v61, %v7482_v59  ;;  %v8034_v20 = vadd.f32 %v8033_v39, %v13786_v36  ;;  %v8035_v7 = vpop.f32.mrb[235].mxu1  ;;  %v7506_v39 = vunpack.c.l.bf16 %v7405_v46 }
 0x6a3   : > { %8791 = vst [vmem:[%s13656_s17 + $0xb8] sm:$0xff] %v9566_v60  ;;  %v8179_v45 = vadd.f32 %v8032_v47, %v7483_v16  ;;  %v8036_v10 = vadd.f32 %v8035_v7, %v13789_v54  ;;  %v7407_v60 = vld [vmem:[%s11609_s15 + $0x138] sm:$0xff]  ;;  %v7507_v7 = vunpack.c.h.bf16 %v7405_v46 }
 0x6a4   : > { %v8306_v35 = vmax.f32 %v8178_v58, 0.0  ;;  %v8182_v33 = vadd.f32 %v8034_v20, %v7486_v5  ;;  %v7510_v31 = vunpack.c.l.bf16 %v7407_v60 }
 0x6a5   : > { %v8307_v42 = vmax.f32 %v8179_v45, 0.0  ;;  %v8183_v9 = vadd.f32 %v8036_v10, %v7487_v13 }
 0x6a6   : > { %v8310_v8 = vmax.f32 %v8182_v33, 0.0 }
 0x6a7   : > { %v9568_v19 = vpack.c.bf16 %v8307_v42, %v8306_v35  ;;  %v8311_v25 = vmax.f32 %v8183_v9, 0.0  ;;  %v8039_v57 = vpop.f32.mrb[236].mxu1  ;;  %v7511_v9 = vunpack.c.h.bf16 %v7407_v60 }
 0x6a8   : > { %v8040_v43 = vadd.f32 %v8039_v57, %v13786_v36  ;;  %v8041_v30 = vpop.f32.mrb[237].mxu1  ;;  %v7409_v57 = vld [vmem:[%s11609_s15 + $0x148] sm:$0xff] }
 0x6a9   : > { %8793 = vst [vmem:[%s13656_s17 + $0xc8] sm:$0xff] %v9568_v19  ;;  %v9570_v56 = vpack.c.bf16 %v8311_v25, %v8310_v8  ;;  %v8042_v21 = vadd.f32 %v8041_v30, %v13789_v54  ;;  %v8043_v26 = vpop.f32.mrb[238].mxu1 }
 0x6aa   : > { %v8186_v3 = vadd.f32 %v8040_v43, %v7490_v49  ;;  %v8044_v15 = vadd.f32 %v8043_v26, %v13786_v36  ;;  %v8045_v2 = vpop.f32.mrb[239].mxu1  ;;  %v7514_v26 = vunpack.c.l.bf16 %v7409_v57 }
 0x6ab   : > { %8795 = vst [vmem:[%s13656_s17 + $0xd8] sm:$0xff] %v9570_v56  ;;  %v8187_v44 = vadd.f32 %v8042_v21, %v7491_v17  ;;  %v8046_v51 = vadd.f32 %v8045_v2, %v13789_v54  ;;  %v7411_v56 = vld [vmem:[%s11609_s15 + $0x158] sm:$0xff]  ;;  %v7515_v2 = vunpack.c.h.bf16 %v7409_v57 }
 0x6ac   : > { %v8314_v34 = vmax.f32 %v8186_v3, 0.0  ;;  %v8190_v41 = vadd.f32 %v8044_v15, %v7494_v50  ;;  %v7518_v24 = vunpack.c.l.bf16 %v7411_v56 }
 0x6ad   : > { %v8315_v52 = vmax.f32 %v8187_v44, 0.0  ;;  %v8191_v53 = vadd.f32 %v8046_v51, %v7495_v14 }
 0x6ae   : > { %v8318_v11 = vmax.f32 %v8190_v41, 0.0 }
 0x6af   : > { %v9572_v1 = vpack.c.bf16 %v8315_v52, %v8314_v34  ;;  %v8319_v4 = vmax.f32 %v8191_v53, 0.0  ;;  %v8049_v23 = vpop.f32.mrb[240].mxu1  ;;  %v7519_v53 = vunpack.c.h.bf16 %v7411_v56 }
 0x6b0   : > { %v8050_v28 = vadd.f32 %v8049_v23, %v13786_v36  ;;  %v8051_v12 = vpop.f32.mrb[241].mxu1  ;;  %v7413_v23 = vld [vmem:[%s11609_s15 + $0x168] sm:$0xff] }
 0x6b1   : > { %8797 = vst [vmem:[%s13656_s17 + $0xe8] sm:$0xff] %v9572_v1  ;;  %v9574_v40 = vpack.c.bf16 %v8319_v4, %v8318_v11  ;;  %v8052_v29 = vadd.f32 %v8051_v12, %v13789_v54  ;;  %v8053_v48 = vpop.f32.mrb[242].mxu1 }
 0x6b2   : > { %v8194_v6 = vadd.f32 %v8050_v28, %v7498_v0  ;;  %v8054_v62 = vadd.f32 %v8053_v48, %v13786_v36  ;;  %v8055_v59 = vpop.f32.mrb[243].mxu1  ;;  %v7522_v48 = vunpack.c.l.bf16 %v7413_v23 }
 0x6b3   : > { %8799 = vst [vmem:[%s13656_s17 + $0xf8] sm:$0xff] %v9574_v40  ;;  %v8195_v22 = vadd.f32 %v8052_v29, %v7499_v55  ;;  %v8056_v63 = vadd.f32 %v8055_v59, %v13789_v54  ;;  %v7415_v40 = vld [vmem:[%s11609_s15 + $0x178] sm:$0xff]  ;;  %v7523_v59 = vunpack.c.h.bf16 %v7413_v23 }
 0x6b4   : > { %v8322_v16 = vmax.f32 %v8194_v6, 0.0  ;;  %v8198_v61 = vadd.f32 %v8054_v62, %v7502_v18  ;;  %v7526_v46 = vunpack.c.l.bf16 %v7415_v40 }
 0x6b5   : > { %v8323_v37 = vmax.f32 %v8195_v22, 0.0  ;;  %v8199_v5 = vadd.f32 %v8056_v63, %v7503_v38 }
 0x6b6   : > { %v8326_v47 = vmax.f32 %v8198_v61, 0.0 }
 0x6b7   : > { %v9576_v13 = vpack.c.bf16 %v8323_v37, %v8322_v16  ;;  %v8327_v58 = vmax.f32 %v8199_v5, 0.0  ;;  %v8059_v20 = vpop.f32.mrb[244].mxu1  ;;  %v7527_v5 = vunpack.c.h.bf16 %v7415_v40 }
 0x6b8   : > { %v8060_v45 = vadd.f32 %v8059_v20, %v13786_v36  ;;  %v8061_v10 = vpop.f32.mrb[245].mxu1  ;;  %v7417_v20 = vld [vmem:[%s11609_s15 + $0x188] sm:$0xff] }
 0x6b9   : > { %8801 = vst [vmem:[%s13656_s17 + $0x108] sm:$0xff] %v9576_v13  ;;  %v9578_v35 = vpack.c.bf16 %v8327_v58, %v8326_v47  ;;  %v8062_v33 = vadd.f32 %v8061_v10, %v13789_v54  ;;  %v8063_v42 = vpop.f32.mrb[246].mxu1 }
 0x6ba   : > { %v8202_v32 = vadd.f32 %v8060_v45, %v7506_v39  ;;  %v8064_v8 = vadd.f32 %v8063_v42, %v13786_v36  ;;  %v8065_v49 = vpop.f32.mrb[247].mxu1  ;;  %v7530_v42 = vunpack.c.l.bf16 %v7417_v20 }
 0x6bb   : > { %8803 = vst [vmem:[%s13656_s17 + $0x118] sm:$0xff] %v9578_v35  ;;  %v8203_v19 = vadd.f32 %v8062_v33, %v7507_v7  ;;  %v8066_v25 = vadd.f32 %v8065_v49, %v13789_v54  ;;  %v7419_v35 = vld [vmem:[%s11609_s15 + $0x198] sm:$0xff]  ;;  %v7531_v49 = vunpack.c.h.bf16 %v7417_v20 }
 0x6bc   : > { %v8330_v17 = vmax.f32 %v8202_v32, 0.0  ;;  %v8206_v43 = vadd.f32 %v8064_v8, %v7510_v31  ;;  %v7534_v57 = vunpack.c.l.bf16 %v7419_v35 }
 0x6bd   : > { %v8331_v30 = vmax.f32 %v8203_v19, 0.0  ;;  %v8207_v50 = vadd.f32 %v8066_v25, %v7511_v9 }
 0x6be   : > { %v8334_v21 = vmax.f32 %v8206_v43, 0.0 }
 0x6bf   : > { %v9580_v14 = vpack.c.bf16 %v8331_v30, %v8330_v17  ;;  %v8335_v3 = vmax.f32 %v8207_v50, 0.0  ;;  %v8069_v15 = vpop.f32.mrb[248].mxu1  ;;  %v7535_v50 = vunpack.c.h.bf16 %v7419_v35 }
 0x6c0   : > { %v8070_v44 = vadd.f32 %v8069_v15, %v13786_v36  ;;  %v8071_v51 = vpop.f32.mrb[249].mxu1  ;;  %v7421_v15 = vld [vmem:[%s11609_s15 + $0x1a8] sm:$0xff] }
 0x6c1   : > { %8805 = vst [vmem:[%s13656_s17 + $0x128] sm:$0xff] %v9580_v14  ;;  %v9582_v34 = vpack.c.bf16 %v8335_v3, %v8334_v21  ;;  %v8072_v41 = vadd.f32 %v8071_v51, %v13789_v54  ;;  %v8073_v52 = vpop.f32.mrb[250].mxu1 }
 0x6c2   : > { %v8210_v27 = vadd.f32 %v8070_v44, %v7514_v26  ;;  %v8074_v11 = vadd.f32 %v8073_v52, %v13786_v36  ;;  %v8075_v0 = vpop.f32.mrb[251].mxu1  ;;  %v7538_v52 = vunpack.c.l.bf16 %v7421_v15 }
 0x6c3   : > { %8807 = vst [vmem:[%s13656_s17 + $0x138] sm:$0xff] %v9582_v34  ;;  %v8211_v1 = vadd.f32 %v8072_v41, %v7515_v2  ;;  %v8076_v4 = vadd.f32 %v8075_v0, %v13789_v54  ;;  %v7423_v34 = vld [vmem:[%s11609_s15 + $0x1b8] sm:$0xff]  ;;  %v7539_v0 = vunpack.c.h.bf16 %v7421_v15 }
 0x6c4   : > { %v8338_v55 = vmax.f32 %v8210_v27, 0.0  ;;  %v8214_v28 = vadd.f32 %v8074_v11, %v7518_v24  ;;  %v7542_v23 = vunpack.c.l.bf16 %v7423_v34 }
 0x6c5   : > { %v8339_v12 = vmax.f32 %v8211_v1, 0.0  ;;  %v8215_v18 = vadd.f32 %v8076_v4, %v7519_v53 }
 0x6c6   : > { %v8342_v29 = vmax.f32 %v8214_v28, 0.0 }
 0x6c7   : > { %v9584_v38 = vpack.c.bf16 %v8339_v12, %v8338_v55  ;;  %v8343_v6 = vmax.f32 %v8215_v18, 0.0  ;;  %v8079_v62 = vpop.f32.mrb[252].mxu1  ;;  %v7543_v18 = vunpack.c.h.bf16 %v7423_v34 }
 0x6c8   : > { %v8080_v22 = vadd.f32 %v8079_v62, %v13786_v36  ;;  %v8081_v63 = vpop.f32.mrb[253].mxu1  ;;  %v7425_v62 = vld [vmem:[%s11609_s15 + $0x1c8] sm:$0xff] }
 0x6c9   : > { %8809 = vst [vmem:[%s13656_s17 + $0x148] sm:$0xff] %v9584_v38  ;;  %v9586_v16 = vpack.c.bf16 %v8343_v6, %v8342_v29  ;;  %v8082_v61 = vadd.f32 %v8081_v63, %v13789_v54  ;;  %v8083_v37 = vpop.f32.mrb[254].mxu1 }
 0x6ca   : > { %v8218_v60 = vadd.f32 %v8080_v22, %v7522_v48  ;;  %v8084_v47 = vadd.f32 %v8083_v37, %v13786_v36  ;;  %v8085_v39 = vpop.f32.mrb[255].mxu1  ;;  %v7546_v37 = vunpack.c.l.bf16 %v7425_v62 }
 0x6cb   : > { %8811 = vst [vmem:[%s13656_s17 + $0x158] sm:$0xff] %v9586_v16  ;;  %v8219_v13 = vadd.f32 %v8082_v61, %v7523_v59  ;;  %v8086_v58 = vadd.f32 %v8085_v39, %v13789_v54  ;;  %v7427_v16 = vld [vmem:[%s11609_s15 + $0x1d8] sm:$0xff]  ;;  %v7547_v39 = vunpack.c.h.bf16 %v7425_v62 }
 0x6cc   : > { %v8346_v7 = vmax.f32 %v8218_v60, 0.0  ;;  %v8222_v45 = vadd.f32 %v8084_v47, %v7526_v46  ;;  %v7550_v20 = vunpack.c.l.bf16 %v7427_v16 }
 0x6cd   : > { %v8347_v10 = vmax.f32 %v8219_v13, 0.0  ;;  %v8223_v31 = vadd.f32 %v8086_v58, %v7527_v5 }
 0x6ce   : > { %v8350_v33 = vmax.f32 %v8222_v45, 0.0 }
 0x6cf   : > { %v9588_v9 = vpack.c.bf16 %v8347_v10, %v8346_v7  ;;  %v8351_v32 = vmax.f32 %v8223_v31, 0.0  ;;  %v8089_v8 = vpop.f32.mrb[0].mxu1  ;;  %v7551_v31 = vunpack.c.h.bf16 %v7427_v16 }
 0x6d0   : > { %v8090_v19 = vadd.f32 %v8089_v8, %v13786_v36  ;;  %v8091_v25 = vpop.f32.mrb[1].mxu1  ;;  %v7429_v8 = vld [vmem:[%s11609_s15 + $0x1e8] sm:$0xff] }
 0x6d1   : > { %8813 = vst [vmem:[%s13656_s17 + $0x168] sm:$0xff] %v9588_v9  ;;  %v9590_v17 = vpack.c.bf16 %v8351_v32, %v8350_v33  ;;  %v8092_v43 = vadd.f32 %v8091_v25, %v13789_v54  ;;  %v8093_v30 = vpop.f32.mrb[2].mxu1 }
 0x6d2   : > { %v8226_v56 = vadd.f32 %v8090_v19, %v7530_v42  ;;  %v8094_v21 = vadd.f32 %v8093_v30, %v13786_v36  ;;  %v8095_v26 = vpop.f32.mrb[3].mxu1  ;;  %v7554_v30 = vunpack.c.l.bf16 %v7429_v8 }
 0x6d3   : > { %8815 = vst [vmem:[%s13656_s17 + $0x178] sm:$0xff] %v9590_v17  ;;  %v8227_v14 = vadd.f32 %v8092_v43, %v7531_v49  ;;  %v8096_v3 = vadd.f32 %v8095_v26, %v13789_v54  ;;  %v7431_v17 = vld [vmem:[%s11609_s15 + $0x1f8] sm:$0xff]  ;;  %v7555_v26 = vunpack.c.h.bf16 %v7429_v8  ;;  %s11277_s15 = scalar_lea.vmem %s13925_s21, 8192 }
 0x6d4   : > { %v8354_v2 = vmax.f32 %v8226_v56, 0.0  ;;  %v8230_v44 = vadd.f32 %v8094_v21, %v7534_v57  ;;  %v7558_v15 = vunpack.c.l.bf16 %v7431_v17  ;;  %p11278_p0 = scmp.ne.s32.totalorder %s13925_s21, %s11277_s15  ;;  %p11285_p2 = scmp.lt.s32.totalorder %s11283_s9, %s11277_s15 }
 0x6d5   : > { %v8355_v51 = vmax.f32 %v8227_v14, 0.0  ;;  %v8231_v24 = vadd.f32 %v8096_v3, %v7535_v50 }
 0x6d6   : > { %v8358_v41 = vmax.f32 %v8230_v44, 0.0  ;;  %p11279_p3 = pnand %p11278_p0, %p11552_p5  ;;  %p11286_p1 = por %p11285_p2, %p11284_p11 }
 0x6d7   : > { %v9592_v53 = vpack.c.bf16 %v8355_v51, %v8354_v2  ;;  %v8359_v27 = vmax.f32 %v8231_v24, 0.0  ;;  %v8099_v11 = vpop.f32.mrb[4].mxu1  ;;  %v7559_v24 = vunpack.c.h.bf16 %v7431_v17 }
 0x6d8   : > { %v8100_v1 = vadd.f32 %v8099_v11, %v13786_v36  ;;  %v8101_v4 = vpop.f32.mrb[5].mxu1  ;;  %p11280_p7 = pneg %p11279_p3 }
 0x6d9   : > { %8817 = vst [vmem:[%s13656_s17 + $0x188] sm:$0xff] %v9592_v53  ;;  %v9594_v55 = vpack.c.bf16 %v8359_v27, %v8358_v41  ;;  %v8102_v28 = vadd.f32 %v8101_v4, %v13789_v54  ;;  %v8103_v12 = vpop.f32.mrb[6].mxu1 }
 0x6da   : > { %v8234_v40 = vadd.f32 %v8100_v1, %v7538_v52  ;;  %v8104_v29 = vadd.f32 %v8103_v12, %v13786_v36  ;;  %v8105_v48 = vpop.f32.mrb[7].mxu1  ;;  %p11287_p4 = pnand %p11286_p1, %p11280_p7 }
 0x6db   : > { %8819 = vst [vmem:[%s13656_s17 + $0x198] sm:$0xff] %v9594_v55  ;;  %v8235_v38 = vadd.f32 %v8102_v28, %v7539_v0  ;;  %v8106_v6 = vadd.f32 %v8105_v48, %v13789_v54 }
 0x6dc   : > { %v8362_v59 = vmax.f32 %v8234_v40, 0.0  ;;  %v8238_v22 = vadd.f32 %v8104_v29, %v7542_v23 }
 0x6dd   : > { %v8363_v63 = vmax.f32 %v8235_v38, 0.0  ;;  %v8239_v46 = vadd.f32 %v8106_v6, %v7543_v18 }
 0x6de   : > { %v8366_v61 = vmax.f32 %v8238_v22, 0.0 }
 0x6df   : > { %v9596_v5 = vpack.c.bf16 %v8363_v63, %v8362_v59  ;;  %v8367_v60 = vmax.f32 %v8239_v46, 0.0  ;;  %v8109_v47 = vpop.f32.mrb[8].mxu1 }
 0x6e0   : > { %v8110_v13 = vadd.f32 %v8109_v47, %v13786_v36  ;;  %v8111_v58 = vpop.f32.mrb[9].mxu1 }
 0x6e1   : > { %8821 = vst [vmem:[%s13656_s17 + $0x1a8] sm:$0xff] %v9596_v5  ;;  %v9598_v7 = vpack.c.bf16 %v8367_v60, %v8366_v61  ;;  %v8112_v45 = vadd.f32 %v8111_v58, %v13789_v54  ;;  %v8113_v10 = vpop.f32.mrb[10].mxu1 }
 0x6e2   : > { %v8242_v35 = vadd.f32 %v8110_v13, %v7546_v37  ;;  %v8114_v33 = vadd.f32 %v8113_v10, %v13786_v36  ;;  %v8115_v42 = vpop.f32.mrb[11].mxu1 }
 0x6e3   : > { %8823 = vst [vmem:[%s13656_s17 + $0x1b8] sm:$0xff] %v9598_v7  ;;  %v8243_v9 = vadd.f32 %v8112_v45, %v7547_v39  ;;  %v8116_v32 = vadd.f32 %v8115_v42, %v13789_v54 }
 0x6e4   : > { %v8370_v49 = vmax.f32 %v8242_v35, 0.0  ;;  %v8246_v19 = vadd.f32 %v8114_v33, %v7550_v20 }
 0x6e5   : > { %v8371_v25 = vmax.f32 %v8243_v9, 0.0  ;;  %v8247_v57 = vadd.f32 %v8116_v32, %v7551_v31 }
 0x6e6   : > { %v8374_v43 = vmax.f32 %v8246_v19, 0.0 }
 0x6e7   : > { %v9600_v50 = vpack.c.bf16 %v8371_v25, %v8370_v49  ;;  %v8375_v56 = vmax.f32 %v8247_v57, 0.0  ;;  %v8119_v21 = vpop.f32.mrb[12].mxu1 }
 0x6e8   : > { %v8120_v14 = vadd.f32 %v8119_v21, %v13786_v36  ;;  %v8121_v3 = vpop.f32.mrb[13].mxu1 }
 0x6e9   : > { %8825 = vst [vmem:[%s13656_s17 + $0x1c8] sm:$0xff] %v9600_v50  ;;  %v9602_v2 = vpack.c.bf16 %v8375_v56, %v8374_v43  ;;  %v8122_v44 = vadd.f32 %v8121_v3, %v13789_v54  ;;  %v8123_v51 = vpop.f32.mrb[14].mxu1 }
 0x6ea   : > { %v8250_v34 = vadd.f32 %v8120_v14, %v7554_v30  ;;  %v8124_v41 = vadd.f32 %v8123_v51, %v13786_v36  ;;  %v8125_v52 = vpop.f32.mrb[15].mxu1 }
 0x6eb   : > { %8827 = vst [vmem:[%s13656_s17 + $0x1d8] sm:$0xff] %v9602_v2  ;;  %v8251_v53 = vadd.f32 %v8122_v44, %v7555_v26  ;;  %v8126_v27 = vadd.f32 %v8125_v52, %v13789_v54 }
 0x6ec   : > { %v8378_v11 = vmax.f32 %v8250_v34, 0.0  ;;  %v8254_v0 = vadd.f32 %v8124_v41, %v7558_v15 }
 0x6ed   : > { %v8379_v1 = vmax.f32 %v8251_v53, 0.0  ;;  %v8255_v4 = vadd.f32 %v8126_v27, %v7559_v24 }
 0x6ee   : > { %v8382_v23 = vmax.f32 %v8254_v0, 0.0 }
 0x6ef   : > { %v9604_v55 = vpack.c.bf16 %v8379_v1, %v8378_v11  ;;  %v8383_v28 = vmax.f32 %v8255_v4, 0.0 }
 0x6f1   : > { %8829 = vst [vmem:[%s13656_s17 + $0x1e8] sm:$0xff] %v9604_v55  ;;  %v9606_v36 = vpack.c.bf16 %v8383_v28, %v8382_v23 }
 0x6f3   : > { %8831 = vst [vmem:[%s13656_s17 + $0x1f8] sm:$0xff] %v9606_v36 }
 0x6f4   : > { %11290 = shalt.err (!%p11287_p4)
}
 0x6f5   : > { %s11291_s14 = scalar_lea.hbm %s13923_s23, 8192  ;;  %s11295_s13 = scalar_lea.hbm %s13977_s7, 32768 }
 0x6f6   : > { %p11292_p9 = scmp.ne.s32.totalorder %s13923_s23, %s11291_s14  ;;  %p11296_p8 = scmp.lt.u32.totalorder %s13923_s23, %s13977_s7 }
 0x6f7   : > { %p11297_p12 = scmp.lt.u32.totalorder %s11295_s13, %s11291_s14  ;;  %p11299_p0 = scmp.lt.u32.totalorder %s11291_s14, %s13923_s23 }
 0x6f8   : > { %p11293_p13 = pnand %p11292_p9, %p11552_p5 }
 0x6f9   : > { %p11298_p6 = por %p11297_p12, %p11296_p8 }
 0x6fa   : > { %p11294_p10 = pneg %p11293_p13 }
 0x6fb   : > { %p11300_p3 = por %p11299_p0, %p11298_p6 }
 0x6fd   : > { %p11301_p7 = pnand %p11300_p3, %p11294_p10 }
 0x6ff   : > { %11304 = shalt.err (!%p11301_p7)
}
 0x700   : > { %s11363_s16 = smov 256   ;;  %s11364_s29 = smov 16  }
 0x701   : > { %10767 = dma.vmem_to_hbm [thread:$0]  (%p11552_p5), %s13925_s21, 8192, %s13923_s23, %s8833_s11, %s11363_s16, %s11363_s16, %s11364_s29  }
 0x702 PF: > { %s14228_s15 = sld [smem:[#allocation16_spill]]  ;;  %p10794_p11 = scmp.ge.s32.totalorder %s11351_s27, 2 }
 0x703   : > { %s8862_s28 = sand.u32 1, %s11339_s24  }
 0x704   : > { %s8863_s30 = scalar_lea.sflag [#allocation5], %s8862_s28 }
 0x708   : > { %p14229_p2 = scmp.ne.s32.totalorder %s14228_s15, 0 }
 0x70a   : > { %p10784_p1 = pnand %p10794_p11, %p14229_p2 }
 0x70c   : > { %11334 = dma.done.wait (!%p10784_p1), %s8863_s30, 8192  }
 0x70d   : > { %11336 = vsyncadd (!%p10784_p1), %s8863_s30, 4294959104  ;;  %p22_p4 = scmp.ge.s32.totalorder %s11538_s8, 6   ;;  %s14230_s24 = smov %s11343_s25 }
 0x70e   : > { %s14231_s25 = smov %s11347_s26  ;;  %s14232_s26 = smov %s11548_s19 }
 0x70f   : > { %s14233_s27 = smov %s11538_s8  ;;  %24 = sbr.rel (!%p22_p4) target bundleno = 7 (0x7), region = 115 }
 0x716   :  { %8868 = vsyncpa [#allocation4], 1 }
 0x717   :  { %8870 = vsyncpa [#allocation4 + $0x1], 1 }
 0x718   :  { %8871 = vsyncpa [#allocation7], 1 }
 0x719   :  { %8872 = vsyncpa [#allocation10], 1 }
 0x71a   :  { %8873 = vsyncpa [#allocation5], 1 }
 0x71b   :  { %8875 = vsyncpa [#allocation5 + $0x1], 1 }

</bundles_post_ra>
